<compile_context>
chip_gen: v7x
topology: tpu7x:2x2x1
jax: 0.10.0
libtpu: 0.0.40
codegen_flags: <defaults>
</compile_context>

<pallas_src>
import functools

import jax
import jax.numpy as jnp
from jax.experimental import pallas as pl
from jax.experimental.pallas import tpu as pltpu

C_PAD = 128                     # padded channel width (lane-dense)
N_PAD = 128                     # padded num_classes width (lane-dense)
VMEM_LIMIT = 32 * 1024 * 1024   # actual working set is ~2 MB/image


# ----------------------------- fused Pallas kernel -----------------------------

def _fused_resnet_kernel(x_ref, w_stem_ref, s_stem_ref, b_stem_ref,
                         w1_ref, s1_ref, b1_ref,
                         w2_ref, s2_ref, b2_ref,
                         mask_ref, wfc_ref, bfc_ref,
                         o_ref,
                         stem_buf, y_buf,
                         *, H, W):
    """Whole forward for one image.

    x_ref:      [1, H+2, W+2, Cin]   spatially padded input image
    w_stem_ref: [9, Cin, C]          bf16 stem conv taps
    w1/w2_ref:  [9, C, C]            bf16 block conv taps
    s*/b*_ref:  [1, C]               folded-BN affine (f32)
    mask_ref:   [1, 1, C]            dropout keep-mask pre-scaled by 1/(1-p)
    wfc/bfc:    [C, N] / [1, N]      fc weight / bias (f32, lane-padded)
    o_ref:      [1, 1, N]
    stem_buf:   [1, H+2, W+2, C]     bf16 VMEM scratch (stem output, padded)
    y_buf:      [1, H+2, W+2, C]     bf16 VMEM scratch (conv1 output, padded)
    """
    Hp, Wp = H + 2, W + 2
    cin = w_stem_ref.shape[1]
    C = w1_ref.shape[-1]

    # --- zero only the 4 border slabs of the padded scratch buffers --------
    # (interior is fully overwritten below; done every step because each
    #  TensorCore owns its own scratch copy under megacore sharding)
    zrow = jnp.zeros((1, 1, Wp, C), jnp.bfloat16)
    zcol = jnp.zeros((1, Hp, 1, C), jnp.bfloat16)
    stem_buf[:, 0:1, :, :] = zrow
    stem_buf[:, Hp - 1:Hp, :, :] = zrow
    stem_buf[:, :, 0:1, :] = zcol
    stem_buf[:, :, Wp - 1:Wp, :] = zcol
    y_buf[:, 0:1, :, :] = zrow
    y_buf[:, Hp - 1:Hp, :, :] = zrow
    y_buf[:, :, 0:1, :] = zcol
    y_buf[:, :, Wp - 1:Wp, :] = zcol

    # --- stem: conv3x3 + BN + ReLU  (input cast to bf16 once, not per tap) --
    xb = x_ref[0].astype(jnp.bfloat16)                     # [Hp, Wp, Cin]
    s_stem = s_stem_ref[...]
    b_stem = b_stem_ref[...]
    acc = jnp.zeros((H * W, C), jnp.float32)
    for t in range(9):                                     # 9 MXU dots
        dh, dw = t // 3, t % 3
        patch = xb[dh:dh + H, dw:dw + W, :].reshape(H * W, cin)
        acc += jnp.dot(patch, w_stem_ref[t], preferred_element_type=jnp.float32)
    stem = jnp.maximum(acc * s_stem + b_stem, 0.0)
    stem_buf[:, 1:H + 1, 1:W + 1, :] = (
        stem.reshape(1, H, W, C).astype(jnp.bfloat16))

    # --- block conv1 + BN + ReLU  (reads bf16 scratch, no per-tap cast) -----
    s1 = s1_ref[...]
    b1 = b1_ref[...]
    acc1 = jnp.zeros((H * W, C), jnp.float32)
    for t in range(9):
        dh, dw = t // 3, t % 3
        patch = stem_buf[0, dh:dh + H, dw:dw + W, :].reshape(H * W, C)
        acc1 += jnp.dot(patch, w1_ref[t], preferred_element_type=jnp.float32)
    y1 = jnp.maximum(acc1 * s1 + b1, 0.0)
    y_buf[:, 1:H + 1, 1:W + 1, :] = (
        y1.reshape(1, H, W, C).astype(jnp.bfloat16))

    # --- block conv2 + BN + residual + ReLU + GAP + dropout + fc ------------
    s2 = s2_ref[...]
    b2 = b2_ref[...]
    acc2 = jnp.zeros((H * W, C), jnp.float32)
    for t in range(9):
        dh, dw = t // 3, t % 3
        patch = y_buf[0, dh:dh + H, dw:dw + W, :].reshape(H * W, C)
        acc2 += jnp.dot(patch, w2_ref[t], preferred_element_type=jnp.float32)
    res = stem_buf[0, 1:H + 1, 1:W + 1, :].reshape(H * W, C).astype(jnp.float32)
    y2 = jnp.maximum(acc2 * s2 + b2 + res, 0.0)

    pooled = jnp.mean(y2, axis=0, keepdims=True)           # [1, C]  (GAP)
    feat = pooled * mask_ref[0]                            # dropout (pre-scaled)
    out = jnp.dot(feat, wfc_ref[...], preferred_element_type=jnp.float32)
    out = out + bfc_ref[...]
    o_ref[...] = out.reshape(1, 1, -1).astype(o_ref.dtype)


# ------------------------------ kernel wrapper ------------------------------

def resnet_fused_forward_padded(x_pad, params, mask):
    """x_pad: [B, H+2, W+2, Cin] -> logits [B, 1, N_PAD] (one fused kernel)."""
    B, Hp, Wp, Cin = x_pad.shape
    H, W = Hp - 2, Wp - 2
    C = params["c_pad"]
    N = params["n_pad"]
    return pl.pallas_call(
        functools.partial(_fused_resnet_kernel, H=H, W=W),
        out_shape=jax.ShapeDtypeStruct((B, 1, N), jnp.float32),
        grid_spec=pltpu.PrefetchScalarGridSpec(
            num_scalar_prefetch=0, grid=(B,),
            in_specs=[
                pl.BlockSpec((1, Hp, Wp, Cin), lambda b: (b, 0, 0, 0)),
                pl.BlockSpec((9, Cin, C), lambda b: (0, 0, 0)),
                pl.BlockSpec((1, C), lambda b: (0, 0)),
                pl.BlockSpec((1, C), lambda b: (0, 0)),
                pl.BlockSpec((9, C, C), lambda b: (0, 0, 0)),
                pl.BlockSpec((1, C), lambda b: (0, 0)),
                pl.BlockSpec((1, C), lambda b: (0, 0)),
                pl.BlockSpec((9, C, C), lambda b: (0, 0, 0)),
                pl.BlockSpec((1, C), lambda b: (0, 0)),
                pl.BlockSpec((1, C), lambda b: (0, 0)),
                pl.BlockSpec((1, 1, C), lambda b: (b, 0, 0)),
                pl.BlockSpec((C, N), lambda b: (0, 0)),
                pl.BlockSpec((1, N), lambda b: (0, 0)),
            ],
            out_specs=pl.BlockSpec((1, 1, N), lambda b: (b, 0, 0)),
            scratch_shapes=[
                pltpu.VMEM((1, Hp, Wp, C), jnp.bfloat16),   # stem activation
                pltpu.VMEM((1, Hp, Wp, C), jnp.bfloat16),   # conv1 activation
            ]),
        compiler_params=pltpu.CompilerParams(
            dimension_semantics=("parallel",),   # >=2 grid steps -> both v7x TCs busy
            vmem_limit_bytes=VMEM_LIMIT),
    )(x_pad, params["w_stem"], params["s_stem"], params["b_stem"],
      params["w_b1"], params["s_b1"], params["b_b1"],
      params["w_b2"], params["s_b2"], params["b_b2"],
      mask, params["w_fc"], params["b_fc"])


# ---------------------------- model construction ----------------------------

def init_params(key, cin=3, c=16, num_classes=10):
    """Logical (unpadded) synthetic trunk + head parameters."""
    ks = jax.random.split(key, 8)
    eps = 1e-5

    def bn_fold(k, n):
        gamma = 1.0 + 0.1 * jax.random.normal(k, (1, n), jnp.float32)
        beta = 0.05 * jax.random.normal(jax.random.fold_in(k, 1), (1, n),
                                        jnp.float32)
        run_mean = jnp.zeros((1, n), jnp.float32)
        run_var = jnp.ones((1, n), jnp.float32)
        scale = gamma / jnp.sqrt(run_var + eps)
        bias = beta - run_mean * scale
        return scale, bias

    p = {"cin": cin, "c": c, "num_classes": num_classes}
    p["w_stem"] = 0.2 * jax.random.normal(ks[0], (3, 3, cin, c), jnp.float32)
    p["bn_stem"] = bn_fold(ks[1], c)
    p["w_b1"] = 0.2 * jax.random.normal(ks[2], (3, 3, c, c), jnp.float32)
    p["bn_b1"] = bn_fold(ks[3], c)
    p["w_b2"] = 0.2 * jax.random.normal(ks[4], (3, 3, c, c), jnp.float32)
    p["bn_b2"] = bn_fold(ks[5], c)
    p["w_fc"] = 0.2 * jax.random.normal(ks[6], (c, num_classes), jnp.float32)
    p["b_fc"] = 0.05 * jax.random.normal(ks[7], (1, num_classes), jnp.float32)
    return p


def prepare_padded_params(raw, c_pad=C_PAD, n_pad=N_PAD):
    """Zero-pad channel/class lane axes to 128 (math-inert) + bf16 conv taps."""
    c = raw["c"]
    nc = raw["num_classes"]

    def conv_taps(w, cin_keep):
        kh, kw, ci, co = w.shape
        w9 = w.reshape(kh * kw, ci, co)
        w9 = jnp.pad(w9, ((0, 0), (0, cin_keep - ci), (0, c_pad - co)))
        return w9.astype(jnp.bfloat16)

    def affine(sb):
        s, b = sb
        return (jnp.pad(s, ((0, 0), (0, c_pad - s.shape[-1]))),
                jnp.pad(b, ((0, 0), (0, c_pad - b.shape[-1]))))

    p = {"c_real": c, "c_pad": c_pad, "n_pad": n_pad, "num_classes": nc}
    p["w_stem"] = conv_taps(raw["w_stem"], raw["cin"])      # keep Cin=3
    p["s_stem"], p["b_stem"] = affine(raw["bn_stem"])
    p["w_b1"] = conv_taps(raw["w_b1"], c_pad)
    p["s_b1"], p["b_b1"] = affine(raw["bn_b1"])
    p["w_b2"] = conv_taps(raw["w_b2"], c_pad)
    p["s_b2"], p["b_b2"] = affine(raw["bn_b2"])
    p["w_fc"] = jnp.pad(raw["w_fc"],
                        ((0, c_pad - c), (0, n_pad - nc))).astype(jnp.float32)
    p["b_fc"] = jnp.pad(raw["b_fc"], ((0, 0), (0, n_pad - nc)))
    return p


def _dropout_mask(key, batch, c_real, c_pad, p, training):
    # TODO(synk): PyTorch's exact Dropout RNG stream cannot be reproduced;
    # identical semantics (Bernoulli keep prob 1-p, 1/(1-p) inverted scaling)
    # are implemented with jax.random instead.
    if (not training) or p == 0.0:
        mask = jnp.ones((batch, c_real), jnp.float32)
    else:
        keep = jax.random.bernoulli(key, 1.0 - p, (batch, c_real))
        mask = keep.astype(jnp.float32) * (1.0 / (1.0 - p))
    mask = jnp.pad(mask, ((0, 0), (0, c_pad - c_real)))
    return mask.reshape(batch, 1, c_pad)


def resnet_with_dropout_forward(x_nchw, params, dropout_key,
                                dropout_p=0.5, training=True):
    # NCHW -> NHWC, single cheap spatial pad of the tiny external input.
    x = jnp.transpose(x_nchw, (0, 2, 3, 1)).astype(jnp.float32)
    B = x.shape[0]
    x_pad = jnp.pad(x, ((0, 0), (1, 1), (1, 1), (0, 0)))

    mask = _dropout_mask(dropout_key, B, params["c_real"], params["c_pad"],
                         dropout_p, training)

    # stem + block + pool + dropout + fc, all in ONE fused Pallas kernel.
    out_pad = resnet_fused_forward_padded(x_pad, params, mask)

    nc = params["num_classes"]
    return out_pad.reshape(B, params["n_pad"])[:, :nc]


# ----------------------------------- main -----------------------------------

if __name__ == "__main__":
    key = jax.random.PRNGKey(0)
    k_x, k_p, k_drop = jax.random.split(key, 3)

    B, Cin, H, W = 2, 3, 16, 16
    num_classes = 10
    x = jax.random.normal(k_x, (B, Cin, H, W), jnp.float32)   # NCHW input
    raw = init_params(k_p, cin=Cin, c=16, num_classes=num_classes)
    params = prepare_padded_params(raw)

    out = resnet_with_dropout_forward(x, params, k_drop,
                                      dropout_p=0.5, training=True)
    out = jax.block_until_ready(out)
    assert out.shape == (B, num_classes), out.shape
    assert jnp.all(jnp.isfinite(out))
    print("KERNEL_OK")
</pallas_src>

<mosaic_0001>
module attributes {stable_mosaic.version = 11 : i64} {
  func.func @_fused_resnet_kernel(%arg0: i32, %arg1: memref<1x18x18x3xf32, #tpu.memory_space<vmem>>, %arg2: memref<9x3x128xbf16, #tpu.memory_space<vmem>>, %arg3: memref<1x128xf32, #tpu.memory_space<vmem>>, %arg4: memref<1x128xf32, #tpu.memory_space<vmem>>, %arg5: memref<9x128x128xbf16, #tpu.memory_space<vmem>>, %arg6: memref<1x128xf32, #tpu.memory_space<vmem>>, %arg7: memref<1x128xf32, #tpu.memory_space<vmem>>, %arg8: memref<9x128x128xbf16, #tpu.memory_space<vmem>>, %arg9: memref<1x128xf32, #tpu.memory_space<vmem>>, %arg10: memref<1x128xf32, #tpu.memory_space<vmem>>, %arg11: memref<1x1x128xf32, #tpu.memory_space<vmem>>, %arg12: memref<128x128xf32, #tpu.memory_space<vmem>>, %arg13: memref<1x128xf32, #tpu.memory_space<vmem>>, %arg14: memref<1x1x128xf32, #tpu.memory_space<vmem>>, %arg15: memref<1x18x18x128xbf16, #tpu.memory_space<vmem>>, %arg16: memref<1x18x18x128xbf16, #tpu.memory_space<vmem>>) attributes {dimension_semantics = [#tpu.dimension_semantics<parallel>], iteration_bounds = array<i64: 2>, scalar_prefetch = 0 : i64, scratch_operands = 2 : i64, tpu.core_type = #tpu.core_type<tc>, window_params = [{transform_indices = @transform_0, window_bounds = array<i64: 1, 18, 18, 3>}, {pipeline_mode = #tpu.pipeline_mode<synchronous>, transform_indices = @transform_1, window_bounds = array<i64: 9, 3, 128>}, {pipeline_mode = #tpu.pipeline_mode<synchronous>, transform_indices = @transform_2, window_bounds = array<i64: 1, 128>}, {pipeline_mode = #tpu.pipeline_mode<synchronous>, transform_indices = @transform_3, window_bounds = array<i64: 1, 128>}, {pipeline_mode = #tpu.pipeline_mode<synchronous>, transform_indices = @transform_4, window_bounds = array<i64: 9, 128, 128>}, {pipeline_mode = #tpu.pipeline_mode<synchronous>, transform_indices = @transform_5, window_bounds = array<i64: 1, 128>}, {pipeline_mode = #tpu.pipeline_mode<synchronous>, transform_indices = @transform_6, window_bounds = array<i64: 1, 128>}, {pipeline_mode = #tpu.pipeline_mode<synchronous>, transform_indices = @transform_7, window_bounds = array<i64: 9, 128, 128>}, {pipeline_mode = #tpu.pipeline_mode<synchronous>, transform_indices = @transform_8, window_bounds = array<i64: 1, 128>}, {pipeline_mode = #tpu.pipeline_mode<synchronous>, transform_indices = @transform_9, window_bounds = array<i64: 1, 128>}, {transform_indices = @transform_10, window_bounds = array<i64: 1, 1, 128>}, {pipeline_mode = #tpu.pipeline_mode<synchronous>, transform_indices = @transform_11, window_bounds = array<i64: 128, 128>}, {pipeline_mode = #tpu.pipeline_mode<synchronous>, transform_indices = @transform_12, window_bounds = array<i64: 1, 128>}, {transform_indices = @transform_13, window_bounds = array<i64: 1, 1, 128>}]} {
    %cst = arith.constant 0.000000e+00 : bf16
    %0 = vector.broadcast %cst : bf16 to vector<1x1x18x128xbf16>
    %cst_0 = arith.constant 0.000000e+00 : bf16
    %1 = vector.broadcast %cst_0 : bf16 to vector<1x18x1x128xbf16>
    %c0 = arith.constant 0 : index
    %c0_1 = arith.constant 0 : index
    %c0_2 = arith.constant 0 : index
    %c0_3 = arith.constant 0 : index
    %2 = vector.load %arg15[%c0, %c0_1, %c0_2, %c0_3] : memref<1x18x18x128xbf16, #tpu.memory_space<vmem>>, vector<1x1x18x128xbf16>
    tpu.vector_store %arg15[%c0, %c0_1, %c0_2, %c0_3], %0 {strides = array<i32>} : memref<1x18x18x128xbf16, #tpu.memory_space<vmem>>, vector<1x1x18x128xbf16>,
    %c0_4 = arith.constant 0 : index
    %c17 = arith.constant 17 : index
    %c0_5 = arith.constant 0 : index
    %c0_6 = arith.constant 0 : index
    %3 = vector.load %arg15[%c0_4, %c17, %c0_5, %c0_6] : memref<1x18x18x128xbf16, #tpu.memory_space<vmem>>, vector<1x1x18x128xbf16>
    tpu.vector_store %arg15[%c0_4, %c17, %c0_5, %c0_6], %0 {strides = array<i32>} : memref<1x18x18x128xbf16, #tpu.memory_space<vmem>>, vector<1x1x18x128xbf16>,
    %c0_7 = arith.constant 0 : index
    %c0_8 = arith.constant 0 : index
    %c0_9 = arith.constant 0 : index
    %c0_10 = arith.constant 0 : index
    %4 = vector.load %arg15[%c0_7, %c0_8, %c0_9, %c0_10] : memref<1x18x18x128xbf16, #tpu.memory_space<vmem>>, vector<1x18x1x128xbf16>
    tpu.vector_store %arg15[%c0_7, %c0_8, %c0_9, %c0_10], %1 {strides = array<i32>} : memref<1x18x18x128xbf16, #tpu.memory_space<vmem>>, vector<1x18x1x128xbf16>,
    %c0_11 = arith.constant 0 : index
    %c0_12 = arith.constant 0 : index
    %c17_13 = arith.constant 17 : index
    %c0_14 = arith.constant 0 : index
    %5 = vector.load %arg15[%c0_11, %c0_12, %c17_13, %c0_14] : memref<1x18x18x128xbf16, #tpu.memory_space<vmem>>, vector<1x18x1x128xbf16>
    tpu.vector_store %arg15[%c0_11, %c0_12, %c17_13, %c0_14], %1 {strides = array<i32>} : memref<1x18x18x128xbf16, #tpu.memory_space<vmem>>, vector<1x18x1x128xbf16>,
    %c0_15 = arith.constant 0 : index
    %c0_16 = arith.constant 0 : index
    %c0_17 = arith.constant 0 : index
    %c0_18 = arith.constant 0 : index
    %6 = vector.load %arg16[%c0_15, %c0_16, %c0_17, %c0_18] : memref<1x18x18x128xbf16, #tpu.memory_space<vmem>>, vector<1x1x18x128xbf16>
    tpu.vector_store %arg16[%c0_15, %c0_16, %c0_17, %c0_18], %0 {strides = array<i32>} : memref<1x18x18x128xbf16, #tpu.memory_space<vmem>>, vector<1x1x18x128xbf16>,
    %c0_19 = arith.constant 0 : index
    %c17_20 = arith.constant 17 : index
    %c0_21 = arith.constant 0 : index
    %c0_22 = arith.constant 0 : index
    %7 = vector.load %arg16[%c0_19, %c17_20, %c0_21, %c0_22] : memref<1x18x18x128xbf16, #tpu.memory_space<vmem>>, vector<1x1x18x128xbf16>
    tpu.vector_store %arg16[%c0_19, %c17_20, %c0_21, %c0_22], %0 {strides = array<i32>} : memref<1x18x18x128xbf16, #tpu.memory_space<vmem>>, vector<1x1x18x128xbf16>,
    %c0_23 = arith.constant 0 : index
    %c0_24 = arith.constant 0 : index
    %c0_25 = arith.constant 0 : index
    %c0_26 = arith.constant 0 : index
    %8 = vector.load %arg16[%c0_23, %c0_24, %c0_25, %c0_26] : memref<1x18x18x128xbf16, #tpu.memory_space<vmem>>, vector<1x18x1x128xbf16>
    tpu.vector_store %arg16[%c0_23, %c0_24, %c0_25, %c0_26], %1 {strides = array<i32>} : memref<1x18x18x128xbf16, #tpu.memory_space<vmem>>, vector<1x18x1x128xbf16>,
    %c0_27 = arith.constant 0 : index
    %c0_28 = arith.constant 0 : index
    %c17_29 = arith.constant 17 : index
    %c0_30 = arith.constant 0 : index
    %9 = vector.load %arg16[%c0_27, %c0_28, %c17_29, %c0_30] : memref<1x18x18x128xbf16, #tpu.memory_space<vmem>>, vector<1x18x1x128xbf16>
    tpu.vector_store %arg16[%c0_27, %c0_28, %c17_29, %c0_30], %1 {strides = array<i32>} : memref<1x18x18x128xbf16, #tpu.memory_space<vmem>>, vector<1x18x1x128xbf16>,
    %c0_31 = arith.constant 0 : index
    %c0_32 = arith.constant 0 : index
    %c0_33 = arith.constant 0 : index
    %c0_34 = arith.constant 0 : index
    %10 = vector.load %arg1[%c0_31, %c0_32, %c0_33, %c0_34] : memref<1x18x18x3xf32, #tpu.memory_space<vmem>>, vector<1x18x18x3xf32>
    %11 = vector.shape_cast %10 : vector<1x18x18x3xf32> to vector<18x18x3xf32>
    %12 = arith.truncf %11 : vector<18x18x3xf32> to vector<18x18x3xbf16>
    %c0_35 = arith.constant 0 : index
    %c0_36 = arith.constant 0 : index
    %13 = vector.load %arg3[%c0_35, %c0_36] : memref<1x128xf32, #tpu.memory_space<vmem>>, vector<1x128xf32>
    %c0_37 = arith.constant 0 : index
    %c0_38 = arith.constant 0 : index
    %14 = vector.load %arg4[%c0_37, %c0_38] : memref<1x128xf32, #tpu.memory_space<vmem>>, vector<1x128xf32>
    %cst_39 = arith.constant 0.000000e+00 : f32
    %15 = vector.broadcast %cst_39 : f32 to vector<256x128xf32>
    %16 = vector.extract_strided_slice %12 {offsets = [0, 0, 0], sizes = [16, 16, 3], strides = [1, 1, 1]} : vector<18x18x3xbf16> to vector<16x16x3xbf16>
    %17 = vector.shape_cast %16 : vector<16x16x3xbf16> to vector<256x3xbf16>
    %c0_40 = arith.constant 0 : index
    %c0_41 = arith.constant 0 : index
    %c0_42 = arith.constant 0 : index
    %18 = vector.load %arg2[%c0_40, %c0_41, %c0_42] : memref<9x3x128xbf16, #tpu.memory_space<vmem>>, vector<1x3x128xbf16>
    %19 = vector.shape_cast %18 : vector<1x3x128xbf16> to vector<3x128xbf16>
    %cst_43 = arith.constant dense<0.000000e+00> : vector<256x128xf32>
    %20 = tpu.matmul %17, %19, %cst_43 {dimension_numbers = #tpu.dot_dimension_numbers<[1], [0], [0], [1], [0, 0, 1, 1], [], []>} : vector<256x3xbf16>, vector<3x128xbf16>, vector<256x128xf32> -> vector<256x128xf32>
    %21 = arith.addf %15, %20 : vector<256x128xf32>
    %22 = vector.extract_strided_slice %12 {offsets = [0, 1, 0], sizes = [16, 16, 3], strides = [1, 1, 1]} : vector<18x18x3xbf16> to vector<16x16x3xbf16>
    %23 = vector.shape_cast %22 : vector<16x16x3xbf16> to vector<256x3xbf16>
    %c1 = arith.constant 1 : index
    %c0_44 = arith.constant 0 : index
    %c0_45 = arith.constant 0 : index
    %24 = vector.load %arg2[%c1, %c0_44, %c0_45] : memref<9x3x128xbf16, #tpu.memory_space<vmem>>, vector<1x3x128xbf16>
    %25 = vector.shape_cast %24 : vector<1x3x128xbf16> to vector<3x128xbf16>
    %cst_46 = arith.constant dense<0.000000e+00> : vector<256x128xf32>
    %26 = tpu.matmul %23, %25, %cst_46 {dimension_numbers = #tpu.dot_dimension_numbers<[1], [0], [0], [1], [0, 0, 1, 1], [], []>} : vector<256x3xbf16>, vector<3x128xbf16>, vector<256x128xf32> -> vector<256x128xf32>
    %27 = arith.addf %21, %26 : vector<256x128xf32>
    %28 = vector.extract_strided_slice %12 {offsets = [0, 2, 0], sizes = [16, 16, 3], strides = [1, 1, 1]} : vector<18x18x3xbf16> to vector<16x16x3xbf16>
    %29 = vector.shape_cast %28 : vector<16x16x3xbf16> to vector<256x3xbf16>
    %c2 = arith.constant 2 : index
    %c0_47 = arith.constant 0 : index
    %c0_48 = arith.constant 0 : index
    %30 = vector.load %arg2[%c2, %c0_47, %c0_48] : memref<9x3x128xbf16, #tpu.memory_space<vmem>>, vector<1x3x128xbf16>
    %31 = vector.shape_cast %30 : vector<1x3x128xbf16> to vector<3x128xbf16>
    %cst_49 = arith.constant dense<0.000000e+00> : vector<256x128xf32>
    %32 = tpu.matmul %29, %31, %cst_49 {dimension_numbers = #tpu.dot_dimension_numbers<[1], [0], [0], [1], [0, 0, 1, 1], [], []>} : vector<256x3xbf16>, vector<3x128xbf16>, vector<256x128xf32> -> vector<256x128xf32>
    %33 = arith.addf %27, %32 : vector<256x128xf32>
    %34 = vector.extract_strided_slice %12 {offsets = [1, 0, 0], sizes = [16, 16, 3], strides = [1, 1, 1]} : vector<18x18x3xbf16> to vector<16x16x3xbf16>
    %35 = vector.shape_cast %34 : vector<16x16x3xbf16> to vector<256x3xbf16>
    %c3 = arith.constant 3 : index
    %c0_50 = arith.constant 0 : index
    %c0_51 = arith.constant 0 : index
    %36 = vector.load %arg2[%c3, %c0_50, %c0_51] : memref<9x3x128xbf16, #tpu.memory_space<vmem>>, vector<1x3x128xbf16>
    %37 = vector.shape_cast %36 : vector<1x3x128xbf16> to vector<3x128xbf16>
    %cst_52 = arith.constant dense<0.000000e+00> : vector<256x128xf32>
    %38 = tpu.matmul %35, %37, %cst_52 {dimension_numbers = #tpu.dot_dimension_numbers<[1], [0], [0], [1], [0, 0, 1, 1], [], []>} : vector<256x3xbf16>, vector<3x128xbf16>, vector<256x128xf32> -> vector<256x128xf32>
    %39 = arith.addf %33, %38 : vector<256x128xf32>
    %40 = vector.extract_strided_slice %12 {offsets = [1, 1, 0], sizes = [16, 16, 3], strides = [1, 1, 1]} : vector<18x18x3xbf16> to vector<16x16x3xbf16>
    %41 = vector.shape_cast %40 : vector<16x16x3xbf16> to vector<256x3xbf16>
    %c4 = arith.constant 4 : index
    %c0_53 = arith.constant 0 : index
    %c0_54 = arith.constant 0 : index
    %42 = vector.load %arg2[%c4, %c0_53, %c0_54] : memref<9x3x128xbf16, #tpu.memory_space<vmem>>, vector<1x3x128xbf16>
    %43 = vector.shape_cast %42 : vector<1x3x128xbf16> to vector<3x128xbf16>
    %cst_55 = arith.constant dense<0.000000e+00> : vector<256x128xf32>
    %44 = tpu.matmul %41, %43, %cst_55 {dimension_numbers = #tpu.dot_dimension_numbers<[1], [0], [0], [1], [0, 0, 1, 1], [], []>} : vector<256x3xbf16>, vector<3x128xbf16>, vector<256x128xf32> -> vector<256x128xf32>
    %45 = arith.addf %39, %44 : vector<256x128xf32>
    %46 = vector.extract_strided_slice %12 {offsets = [1, 2, 0], sizes = [16, 16, 3], strides = [1, 1, 1]} : vector<18x18x3xbf16> to vector<16x16x3xbf16>
    %47 = vector.shape_cast %46 : vector<16x16x3xbf16> to vector<256x3xbf16>
    %c5 = arith.constant 5 : index
    %c0_56 = arith.constant 0 : index
    %c0_57 = arith.constant 0 : index
    %48 = vector.load %arg2[%c5, %c0_56, %c0_57] : memref<9x3x128xbf16, #tpu.memory_space<vmem>>, vector<1x3x128xbf16>
    %49 = vector.shape_cast %48 : vector<1x3x128xbf16> to vector<3x128xbf16>
    %cst_58 = arith.constant dense<0.000000e+00> : vector<256x128xf32>
    %50 = tpu.matmul %47, %49, %cst_58 {dimension_numbers = #tpu.dot_dimension_numbers<[1], [0], [0], [1], [0, 0, 1, 1], [], []>} : vector<256x3xbf16>, vector<3x128xbf16>, vector<256x128xf32> -> vector<256x128xf32>
    %51 = arith.addf %45, %50 : vector<256x128xf32>
    %52 = vector.extract_strided_slice %12 {offsets = [2, 0, 0], sizes = [16, 16, 3], strides = [1, 1, 1]} : vector<18x18x3xbf16> to vector<16x16x3xbf16>
    %53 = vector.shape_cast %52 : vector<16x16x3xbf16> to vector<256x3xbf16>
    %c6 = arith.constant 6 : index
    %c0_59 = arith.constant 0 : index
    %c0_60 = arith.constant 0 : index
    %54 = vector.load %arg2[%c6, %c0_59, %c0_60] : memref<9x3x128xbf16, #tpu.memory_space<vmem>>, vector<1x3x128xbf16>
    %55 = vector.shape_cast %54 : vector<1x3x128xbf16> to vector<3x128xbf16>
    %cst_61 = arith.constant dense<0.000000e+00> : vector<256x128xf32>
    %56 = tpu.matmul %53, %55, %cst_61 {dimension_numbers = #tpu.dot_dimension_numbers<[1], [0], [0], [1], [0, 0, 1, 1], [], []>} : vector<256x3xbf16>, vector<3x128xbf16>, vector<256x128xf32> -> vector<256x128xf32>
    %57 = arith.addf %51, %56 : vector<256x128xf32>
    %58 = vector.extract_strided_slice %12 {offsets = [2, 1, 0], sizes = [16, 16, 3], strides = [1, 1, 1]} : vector<18x18x3xbf16> to vector<16x16x3xbf16>
    %59 = vector.shape_cast %58 : vector<16x16x3xbf16> to vector<256x3xbf16>
    %c7 = arith.constant 7 : index
    %c0_62 = arith.constant 0 : index
    %c0_63 = arith.constant 0 : index
    %60 = vector.load %arg2[%c7, %c0_62, %c0_63] : memref<9x3x128xbf16, #tpu.memory_space<vmem>>, vector<1x3x128xbf16>
    %61 = vector.shape_cast %60 : vector<1x3x128xbf16> to vector<3x128xbf16>
    %cst_64 = arith.constant dense<0.000000e+00> : vector<256x128xf32>
    %62 = tpu.matmul %59, %61, %cst_64 {dimension_numbers = #tpu.dot_dimension_numbers<[1], [0], [0], [1], [0, 0, 1, 1], [], []>} : vector<256x3xbf16>, vector<3x128xbf16>, vector<256x128xf32> -> vector<256x128xf32>
    %63 = arith.addf %57, %62 : vector<256x128xf32>
    %64 = vector.extract_strided_slice %12 {offsets = [2, 2, 0], sizes = [16, 16, 3], strides = [1, 1, 1]} : vector<18x18x3xbf16> to vector<16x16x3xbf16>
    %65 = vector.shape_cast %64 : vector<16x16x3xbf16> to vector<256x3xbf16>
    %c8 = arith.constant 8 : index
    %c0_65 = arith.constant 0 : index
    %c0_66 = arith.constant 0 : index
    %66 = vector.load %arg2[%c8, %c0_65, %c0_66] : memref<9x3x128xbf16, #tpu.memory_space<vmem>>, vector<1x3x128xbf16>
    %67 = vector.shape_cast %66 : vector<1x3x128xbf16> to vector<3x128xbf16>
    %cst_67 = arith.constant dense<0.000000e+00> : vector<256x128xf32>
    %68 = tpu.matmul %65, %67, %cst_67 {dimension_numbers = #tpu.dot_dimension_numbers<[1], [0], [0], [1], [0, 0, 1, 1], [], []>} : vector<256x3xbf16>, vector<3x128xbf16>, vector<256x128xf32> -> vector<256x128xf32>
    %69 = arith.addf %63, %68 : vector<256x128xf32>
    %70 = vector.broadcast %13 : vector<1x128xf32> to vector<256x128xf32>
    %71 = arith.mulf %69, %70 : vector<256x128xf32>
    %72 = vector.broadcast %14 : vector<1x128xf32> to vector<256x128xf32>
    %73 = arith.addf %71, %72 : vector<256x128xf32>
    %cst_68 = arith.constant 0.000000e+00 : f32
    %74 = vector.broadcast %cst_68 : f32 to vector<256x128xf32>
    %75 = arith.maximumf %73, %74 : vector<256x128xf32>
    %76 = vector.shape_cast %75 : vector<256x128xf32> to vector<1x16x16x128xf32>
    %77 = arith.truncf %76 : vector<1x16x16x128xf32> to vector<1x16x16x128xbf16>
    %c0_69 = arith.constant 0 : index
    %c1_70 = arith.constant 1 : index
    %c1_71 = arith.constant 1 : index
    %c0_72 = arith.constant 0 : index
    %78 = vector.load %arg15[%c0_69, %c1_70, %c1_71, %c0_72] : memref<1x18x18x128xbf16, #tpu.memory_space<vmem>>, vector<1x16x16x128xbf16>
    tpu.vector_store %arg15[%c0_69, %c1_70, %c1_71, %c0_72], %77 {strides = array<i32>} : memref<1x18x18x128xbf16, #tpu.memory_space<vmem>>, vector<1x16x16x128xbf16>,
    %c0_73 = arith.constant 0 : index
    %c0_74 = arith.constant 0 : index
    %79 = vector.load %arg6[%c0_73, %c0_74] : memref<1x128xf32, #tpu.memory_space<vmem>>, vector<1x128xf32>
    %c0_75 = arith.constant 0 : index
    %c0_76 = arith.constant 0 : index
    %80 = vector.load %arg7[%c0_75, %c0_76] : memref<1x128xf32, #tpu.memory_space<vmem>>, vector<1x128xf32>
    %cst_77 = arith.constant 0.000000e+00 : f32
    %81 = vector.broadcast %cst_77 : f32 to vector<256x128xf32>
    %c0_78 = arith.constant 0 : index
    %c0_79 = arith.constant 0 : index
    %c0_80 = arith.constant 0 : index
    %c0_81 = arith.constant 0 : index
    %82 = vector.load %arg15[%c0_78, %c0_79, %c0_80, %c0_81] : memref<1x18x18x128xbf16, #tpu.memory_space<vmem>>, vector<1x16x16x128xbf16>
    %83 = vector.shape_cast %82 : vector<1x16x16x128xbf16> to vector<16x16x128xbf16>
    %84 = vector.shape_cast %83 : vector<16x16x128xbf16> to vector<256x128xbf16>
    %c0_82 = arith.constant 0 : index
    %c0_83 = arith.constant 0 : index
    %c0_84 = arith.constant 0 : index
    %85 = vector.load %arg5[%c0_82, %c0_83, %c0_84] : memref<9x128x128xbf16, #tpu.memory_space<vmem>>, vector<1x128x128xbf16>
    %86 = vector.shape_cast %85 : vector<1x128x128xbf16> to vector<128x128xbf16>
    %cst_85 = arith.constant dense<0.000000e+00> : vector<256x128xf32>
    %87 = tpu.matmul %84, %86, %cst_85 {dimension_numbers = #tpu.dot_dimension_numbers<[1], [0], [0], [1], [0, 0, 1, 1], [], []>} : vector<256x128xbf16>, vector<128x128xbf16>, vector<256x128xf32> -> vector<256x128xf32>
    %88 = arith.addf %81, %87 : vector<256x128xf32>
    %c0_86 = arith.constant 0 : index
    %c0_87 = arith.constant 0 : index
    %c1_88 = arith.constant 1 : index
    %c0_89 = arith.constant 0 : index
    %89 = vector.load %arg15[%c0_86, %c0_87, %c1_88, %c0_89] : memref<1x18x18x128xbf16, #tpu.memory_space<vmem>>, vector<1x16x16x128xbf16>
    %90 = vector.shape_cast %89 : vector<1x16x16x128xbf16> to vector<16x16x128xbf16>
    %91 = vector.shape_cast %90 : vector<16x16x128xbf16> to vector<256x128xbf16>
    %c1_90 = arith.constant 1 : index
    %c0_91 = arith.constant 0 : index
    %c0_92 = arith.constant 0 : index
    %92 = vector.load %arg5[%c1_90, %c0_91, %c0_92] : memref<9x128x128xbf16, #tpu.memory_space<vmem>>, vector<1x128x128xbf16>
    %93 = vector.shape_cast %92 : vector<1x128x128xbf16> to vector<128x128xbf16>
    %cst_93 = arith.constant dense<0.000000e+00> : vector<256x128xf32>
    %94 = tpu.matmul %91, %93, %cst_93 {dimension_numbers = #tpu.dot_dimension_numbers<[1], [0], [0], [1], [0, 0, 1, 1], [], []>} : vector<256x128xbf16>, vector<128x128xbf16>, vector<256x128xf32> -> vector<256x128xf32>
    %95 = arith.addf %88, %94 : vector<256x128xf32>
    %c0_94 = arith.constant 0 : index
    %c0_95 = arith.constant 0 : index
    %c2_96 = arith.constant 2 : index
    %c0_97 = arith.constant 0 : index
    %96 = vector.load %arg15[%c0_94, %c0_95, %c2_96, %c0_97] : memref<1x18x18x128xbf16, #tpu.memory_space<vmem>>, vector<1x16x16x128xbf16>
    %97 = vector.shape_cast %96 : vector<1x16x16x128xbf16> to vector<16x16x128xbf16>
    %98 = vector.shape_cast %97 : vector<16x16x128xbf16> to vector<256x128xbf16>
    %c2_98 = arith.constant 2 : index
    %c0_99 = arith.constant 0 : index
    %c0_100 = arith.constant 0 : index
    %99 = vector.load %arg5[%c2_98, %c0_99, %c0_100] : memref<9x128x128xbf16, #tpu.memory_space<vmem>>, vector<1x128x128xbf16>
    %100 = vector.shape_cast %99 : vector<1x128x128xbf16> to vector<128x128xbf16>
    %cst_101 = arith.constant dense<0.000000e+00> : vector<256x128xf32>
    %101 = tpu.matmul %98, %100, %cst_101 {dimension_numbers = #tpu.dot_dimension_numbers<[1], [0], [0], [1], [0, 0, 1, 1], [], []>} : vector<256x128xbf16>, vector<128x128xbf16>, vector<256x128xf32> -> vector<256x128xf32>
    %102 = arith.addf %95, %101 : vector<256x128xf32>
    %c0_102 = arith.constant 0 : index
    %c1_103 = arith.constant 1 : index
    %c0_104 = arith.constant 0 : index
    %c0_105 = arith.constant 0 : index
    %103 = vector.load %arg15[%c0_102, %c1_103, %c0_104, %c0_105] : memref<1x18x18x128xbf16, #tpu.memory_space<vmem>>, vector<1x16x16x128xbf16>
    %104 = vector.shape_cast %103 : vector<1x16x16x128xbf16> to vector<16x16x128xbf16>
    %105 = vector.shape_cast %104 : vector<16x16x128xbf16> to vector<256x128xbf16>
    %c3_106 = arith.constant 3 : index
    %c0_107 = arith.constant 0 : index
    %c0_108 = arith.constant 0 : index
    %106 = vector.load %arg5[%c3_106, %c0_107, %c0_108] : memref<9x128x128xbf16, #tpu.memory_space<vmem>>, vector<1x128x128xbf16>
    %107 = vector.shape_cast %106 : vector<1x128x128xbf16> to vector<128x128xbf16>
    %cst_109 = arith.constant dense<0.000000e+00> : vector<256x128xf32>
    %108 = tpu.matmul %105, %107, %cst_109 {dimension_numbers = #tpu.dot_dimension_numbers<[1], [0], [0], [1], [0, 0, 1, 1], [], []>} : vector<256x128xbf16>, vector<128x128xbf16>, vector<256x128xf32> -> vector<256x128xf32>
    %109 = arith.addf %102, %108 : vector<256x128xf32>
    %c0_110 = arith.constant 0 : index
    %c1_111 = arith.constant 1 : index
    %c1_112 = arith.constant 1 : index
    %c0_113 = arith.constant 0 : index
    %110 = vector.load %arg15[%c0_110, %c1_111, %c1_112, %c0_113] : memref<1x18x18x128xbf16, #tpu.memory_space<vmem>>, vector<1x16x16x128xbf16>
    %111 = vector.shape_cast %110 : vector<1x16x16x128xbf16> to vector<16x16x128xbf16>
    %112 = vector.shape_cast %111 : vector<16x16x128xbf16> to vector<256x128xbf16>
    %c4_114 = arith.constant 4 : index
    %c0_115 = arith.constant 0 : index
    %c0_116 = arith.constant 0 : index
    %113 = vector.load %arg5[%c4_114, %c0_115, %c0_116] : memref<9x128x128xbf16, #tpu.memory_space<vmem>>, vector<1x128x128xbf16>
    %114 = vector.shape_cast %113 : vector<1x128x128xbf16> to vector<128x128xbf16>
    %cst_117 = arith.constant dense<0.000000e+00> : vector<256x128xf32>
    %115 = tpu.matmul %112, %114, %cst_117 {dimension_numbers = #tpu.dot_dimension_numbers<[1], [0], [0], [1], [0, 0, 1, 1], [], []>} : vector<256x128xbf16>, vector<128x128xbf16>, vector<256x128xf32> -> vector<256x128xf32>
    %116 = arith.addf %109, %115 : vector<256x128xf32>
    %c0_118 = arith.constant 0 : index
    %c1_119 = arith.constant 1 : index
    %c2_120 = arith.constant 2 : index
    %c0_121 = arith.constant 0 : index
    %117 = vector.load %arg15[%c0_118, %c1_119, %c2_120, %c0_121] : memref<1x18x18x128xbf16, #tpu.memory_space<vmem>>, vector<1x16x16x128xbf16>
    %118 = vector.shape_cast %117 : vector<1x16x16x128xbf16> to vector<16x16x128xbf16>
    %119 = vector.shape_cast %118 : vector<16x16x128xbf16> to vector<256x128xbf16>
    %c5_122 = arith.constant 5 : index
    %c0_123 = arith.constant 0 : index
    %c0_124 = arith.constant 0 : index
    %120 = vector.load %arg5[%c5_122, %c0_123, %c0_124] : memref<9x128x128xbf16, #tpu.memory_space<vmem>>, vector<1x128x128xbf16>
    %121 = vector.shape_cast %120 : vector<1x128x128xbf16> to vector<128x128xbf16>
    %cst_125 = arith.constant dense<0.000000e+00> : vector<256x128xf32>
    %122 = tpu.matmul %119, %121, %cst_125 {dimension_numbers = #tpu.dot_dimension_numbers<[1], [0], [0], [1], [0, 0, 1, 1], [], []>} : vector<256x128xbf16>, vector<128x128xbf16>, vector<256x128xf32> -> vector<256x128xf32>
    %123 = arith.addf %116, %122 : vector<256x128xf32>
    %c0_126 = arith.constant 0 : index
    %c2_127 = arith.constant 2 : index
    %c0_128 = arith.constant 0 : index
    %c0_129 = arith.constant 0 : index
    %124 = vector.load %arg15[%c0_126, %c2_127, %c0_128, %c0_129] : memref<1x18x18x128xbf16, #tpu.memory_space<vmem>>, vector<1x16x16x128xbf16>
    %125 = vector.shape_cast %124 : vector<1x16x16x128xbf16> to vector<16x16x128xbf16>
    %126 = vector.shape_cast %125 : vector<16x16x128xbf16> to vector<256x128xbf16>
    %c6_130 = arith.constant 6 : index
    %c0_131 = arith.constant 0 : index
    %c0_132 = arith.constant 0 : index
    %127 = vector.load %arg5[%c6_130, %c0_131, %c0_132] : memref<9x128x128xbf16, #tpu.memory_space<vmem>>, vector<1x128x128xbf16>
    %128 = vector.shape_cast %127 : vector<1x128x128xbf16> to vector<128x128xbf16>
    %cst_133 = arith.constant dense<0.000000e+00> : vector<256x128xf32>
    %129 = tpu.matmul %126, %128, %cst_133 {dimension_numbers = #tpu.dot_dimension_numbers<[1], [0], [0], [1], [0, 0, 1, 1], [], []>} : vector<256x128xbf16>, vector<128x128xbf16>, vector<256x128xf32> -> vector<256x128xf32>
    %130 = arith.addf %123, %129 : vector<256x128xf32>
    %c0_134 = arith.constant 0 : index
    %c2_135 = arith.constant 2 : index
    %c1_136 = arith.constant 1 : index
    %c0_137 = arith.constant 0 : index
    %131 = vector.load %arg15[%c0_134, %c2_135, %c1_136, %c0_137] : memref<1x18x18x128xbf16, #tpu.memory_space<vmem>>, vector<1x16x16x128xbf16>
    %132 = vector.shape_cast %131 : vector<1x16x16x128xbf16> to vector<16x16x128xbf16>
    %133 = vector.shape_cast %132 : vector<16x16x128xbf16> to vector<256x128xbf16>
    %c7_138 = arith.constant 7 : index
    %c0_139 = arith.constant 0 : index
    %c0_140 = arith.constant 0 : index
    %134 = vector.load %arg5[%c7_138, %c0_139, %c0_140] : memref<9x128x128xbf16, #tpu.memory_space<vmem>>, vector<1x128x128xbf16>
    %135 = vector.shape_cast %134 : vector<1x128x128xbf16> to vector<128x128xbf16>
    %cst_141 = arith.constant dense<0.000000e+00> : vector<256x128xf32>
    %136 = tpu.matmul %133, %135, %cst_141 {dimension_numbers = #tpu.dot_dimension_numbers<[1], [0], [0], [1], [0, 0, 1, 1], [], []>} : vector<256x128xbf16>, vector<128x128xbf16>, vector<256x128xf32> -> vector<256x128xf32>
    %137 = arith.addf %130, %136 : vector<256x128xf32>
    %c0_142 = arith.constant 0 : index
    %c2_143 = arith.constant 2 : index
    %c2_144 = arith.constant 2 : index
    %c0_145 = arith.constant 0 : index
    %138 = vector.load %arg15[%c0_142, %c2_143, %c2_144, %c0_145] : memref<1x18x18x128xbf16, #tpu.memory_space<vmem>>, vector<1x16x16x128xbf16>
    %139 = vector.shape_cast %138 : vector<1x16x16x128xbf16> to vector<16x16x128xbf16>
    %140 = vector.shape_cast %139 : vector<16x16x128xbf16> to vector<256x128xbf16>
    %c8_146 = arith.constant 8 : index
    %c0_147 = arith.constant 0 : index
    %c0_148 = arith.constant 0 : index
    %141 = vector.load %arg5[%c8_146, %c0_147, %c0_148] : memref<9x128x128xbf16, #tpu.memory_space<vmem>>, vector<1x128x128xbf16>
    %142 = vector.shape_cast %141 : vector<1x128x128xbf16> to vector<128x128xbf16>
    %cst_149 = arith.constant dense<0.000000e+00> : vector<256x128xf32>
    %143 = tpu.matmul %140, %142, %cst_149 {dimension_numbers = #tpu.dot_dimension_numbers<[1], [0], [0], [1], [0, 0, 1, 1], [], []>} : vector<256x128xbf16>, vector<128x128xbf16>, vector<256x128xf32> -> vector<256x128xf32>
    %144 = arith.addf %137, %143 : vector<256x128xf32>
    %145 = vector.broadcast %79 : vector<1x128xf32> to vector<256x128xf32>
    %146 = arith.mulf %144, %145 : vector<256x128xf32>
    %147 = vector.broadcast %80 : vector<1x128xf32> to vector<256x128xf32>
    %148 = arith.addf %146, %147 : vector<256x128xf32>
    %cst_150 = arith.constant 0.000000e+00 : f32
    %149 = vector.broadcast %cst_150 : f32 to vector<256x128xf32>
    %150 = arith.maximumf %148, %149 : vector<256x128xf32>
    %151 = vector.shape_cast %150 : vector<256x128xf32> to vector<1x16x16x128xf32>
    %152 = arith.truncf %151 : vector<1x16x16x128xf32> to vector<1x16x16x128xbf16>
    %c0_151 = arith.constant 0 : index
    %c1_152 = arith.constant 1 : index
    %c1_153 = arith.constant 1 : index
    %c0_154 = arith.constant 0 : index
    %153 = vector.load %arg16[%c0_151, %c1_152, %c1_153, %c0_154] : memref<1x18x18x128xbf16, #tpu.memory_space<vmem>>, vector<1x16x16x128xbf16>
    tpu.vector_store %arg16[%c0_151, %c1_152, %c1_153, %c0_154], %152 {strides = array<i32>} : memref<1x18x18x128xbf16, #tpu.memory_space<vmem>>, vector<1x16x16x128xbf16>,
    %c0_155 = arith.constant 0 : index
    %c0_156 = arith.constant 0 : index
    %154 = vector.load %arg9[%c0_155, %c0_156] : memref<1x128xf32, #tpu.memory_space<vmem>>, vector<1x128xf32>
    %c0_157 = arith.constant 0 : index
    %c0_158 = arith.constant 0 : index
    %155 = vector.load %arg10[%c0_157, %c0_158] : memref<1x128xf32, #tpu.memory_space<vmem>>, vector<1x128xf32>
    %cst_159 = arith.constant 0.000000e+00 : f32
    %156 = vector.broadcast %cst_159 : f32 to vector<256x128xf32>
    %c0_160 = arith.constant 0 : index
    %c0_161 = arith.constant 0 : index
    %c0_162 = arith.constant 0 : index
    %c0_163 = arith.constant 0 : index
    %157 = vector.load %arg16[%c0_160, %c0_161, %c0_162, %c0_163] : memref<1x18x18x128xbf16, #tpu.memory_space<vmem>>, vector<1x16x16x128xbf16>
    %158 = vector.shape_cast %157 : vector<1x16x16x128xbf16> to vector<16x16x128xbf16>
    %159 = vector.shape_cast %158 : vector<16x16x128xbf16> to vector<256x128xbf16>
    %c0_164 = arith.constant 0 : index
    %c0_165 = arith.constant 0 : index
    %c0_166 = arith.constant 0 : index
    %160 = vector.load %arg8[%c0_164, %c0_165, %c0_166] : memref<9x128x128xbf16, #tpu.memory_space<vmem>>, vector<1x128x128xbf16>
    %161 = vector.shape_cast %160 : vector<1x128x128xbf16> to vector<128x128xbf16>
    %cst_167 = arith.constant dense<0.000000e+00> : vector<256x128xf32>
    %162 = tpu.matmul %159, %161, %cst_167 {dimension_numbers = #tpu.dot_dimension_numbers<[1], [0], [0], [1], [0, 0, 1, 1], [], []>} : vector<256x128xbf16>, vector<128x128xbf16>, vector<256x128xf32> -> vector<256x128xf32>
    %163 = arith.addf %156, %162 : vector<256x128xf32>
    %c0_168 = arith.constant 0 : index
    %c0_169 = arith.constant 0 : index
    %c1_170 = arith.constant 1 : index
    %c0_171 = arith.constant 0 : index
    %164 = vector.load %arg16[%c0_168, %c0_169, %c1_170, %c0_171] : memref<1x18x18x128xbf16, #tpu.memory_space<vmem>>, vector<1x16x16x128xbf16>
    %165 = vector.shape_cast %164 : vector<1x16x16x128xbf16> to vector<16x16x128xbf16>
    %166 = vector.shape_cast %165 : vector<16x16x128xbf16> to vector<256x128xbf16>
    %c1_172 = arith.constant 1 : index
    %c0_173 = arith.constant 0 : index
    %c0_174 = arith.constant 0 : index
    %167 = vector.load %arg8[%c1_172, %c0_173, %c0_174] : memref<9x128x128xbf16, #tpu.memory_space<vmem>>, vector<1x128x128xbf16>
    %168 = vector.shape_cast %167 : vector<1x128x128xbf16> to vector<128x128xbf16>
    %cst_175 = arith.constant dense<0.000000e+00> : vector<256x128xf32>
    %169 = tpu.matmul %166, %168, %cst_175 {dimension_numbers = #tpu.dot_dimension_numbers<[1], [0], [0], [1], [0, 0, 1, 1], [], []>} : vector<256x128xbf16>, vector<128x128xbf16>, vector<256x128xf32> -> vector<256x128xf32>
    %170 = arith.addf %163, %169 : vector<256x128xf32>
    %c0_176 = arith.constant 0 : index
    %c0_177 = arith.constant 0 : index
    %c2_178 = arith.constant 2 : index
    %c0_179 = arith.constant 0 : index
    %171 = vector.load %arg16[%c0_176, %c0_177, %c2_178, %c0_179] : memref<1x18x18x128xbf16, #tpu.memory_space<vmem>>, vector<1x16x16x128xbf16>
    %172 = vector.shape_cast %171 : vector<1x16x16x128xbf16> to vector<16x16x128xbf16>
    %173 = vector.shape_cast %172 : vector<16x16x128xbf16> to vector<256x128xbf16>
    %c2_180 = arith.constant 2 : index
    %c0_181 = arith.constant 0 : index
    %c0_182 = arith.constant 0 : index
    %174 = vector.load %arg8[%c2_180, %c0_181, %c0_182] : memref<9x128x128xbf16, #tpu.memory_space<vmem>>, vector<1x128x128xbf16>
    %175 = vector.shape_cast %174 : vector<1x128x128xbf16> to vector<128x128xbf16>
    %cst_183 = arith.constant dense<0.000000e+00> : vector<256x128xf32>
    %176 = tpu.matmul %173, %175, %cst_183 {dimension_numbers = #tpu.dot_dimension_numbers<[1], [0], [0], [1], [0, 0, 1, 1], [], []>} : vector<256x128xbf16>, vector<128x128xbf16>, vector<256x128xf32> -> vector<256x128xf32>
    %177 = arith.addf %170, %176 : vector<256x128xf32>
    %c0_184 = arith.constant 0 : index
    %c1_185 = arith.constant 1 : index
    %c0_186 = arith.constant 0 : index
    %c0_187 = arith.constant 0 : index
    %178 = vector.load %arg16[%c0_184, %c1_185, %c0_186, %c0_187] : memref<1x18x18x128xbf16, #tpu.memory_space<vmem>>, vector<1x16x16x128xbf16>
    %179 = vector.shape_cast %178 : vector<1x16x16x128xbf16> to vector<16x16x128xbf16>
    %180 = vector.shape_cast %179 : vector<16x16x128xbf16> to vector<256x128xbf16>
    %c3_188 = arith.constant 3 : index
    %c0_189 = arith.constant 0 : index
    %c0_190 = arith.constant 0 : index
    %181 = vector.load %arg8[%c3_188, %c0_189, %c0_190] : memref<9x128x128xbf16, #tpu.memory_space<vmem>>, vector<1x128x128xbf16>
    %182 = vector.shape_cast %181 : vector<1x128x128xbf16> to vector<128x128xbf16>
    %cst_191 = arith.constant dense<0.000000e+00> : vector<256x128xf32>
    %183 = tpu.matmul %180, %182, %cst_191 {dimension_numbers = #tpu.dot_dimension_numbers<[1], [0], [0], [1], [0, 0, 1, 1], [], []>} : vector<256x128xbf16>, vector<128x128xbf16>, vector<256x128xf32> -> vector<256x128xf32>
    %184 = arith.addf %177, %183 : vector<256x128xf32>
    %c0_192 = arith.constant 0 : index
    %c1_193 = arith.constant 1 : index
    %c1_194 = arith.constant 1 : index
    %c0_195 = arith.constant 0 : index
    %185 = vector.load %arg16[%c0_192, %c1_193, %c1_194, %c0_195] : memref<1x18x18x128xbf16, #tpu.memory_space<vmem>>, vector<1x16x16x128xbf16>
    %186 = vector.shape_cast %185 : vector<1x16x16x128xbf16> to vector<16x16x128xbf16>
    %187 = vector.shape_cast %186 : vector<16x16x128xbf16> to vector<256x128xbf16>
    %c4_196 = arith.constant 4 : index
    %c0_197 = arith.constant 0 : index
    %c0_198 = arith.constant 0 : index
    %188 = vector.load %arg8[%c4_196, %c0_197, %c0_198] : memref<9x128x128xbf16, #tpu.memory_space<vmem>>, vector<1x128x128xbf16>
    %189 = vector.shape_cast %188 : vector<1x128x128xbf16> to vector<128x128xbf16>
    %cst_199 = arith.constant dense<0.000000e+00> : vector<256x128xf32>
    %190 = tpu.matmul %187, %189, %cst_199 {dimension_numbers = #tpu.dot_dimension_numbers<[1], [0], [0], [1], [0, 0, 1, 1], [], []>} : vector<256x128xbf16>, vector<128x128xbf16>, vector<256x128xf32> -> vector<256x128xf32>
    %191 = arith.addf %184, %190 : vector<256x128xf32>
    %c0_200 = arith.constant 0 : index
    %c1_201 = arith.constant 1 : index
    %c2_202 = arith.constant 2 : index
    %c0_203 = arith.constant 0 : index
    %192 = vector.load %arg16[%c0_200, %c1_201, %c2_202, %c0_203] : memref<1x18x18x128xbf16, #tpu.memory_space<vmem>>, vector<1x16x16x128xbf16>
    %193 = vector.shape_cast %192 : vector<1x16x16x128xbf16> to vector<16x16x128xbf16>
    %194 = vector.shape_cast %193 : vector<16x16x128xbf16> to vector<256x128xbf16>
    %c5_204 = arith.constant 5 : index
    %c0_205 = arith.constant 0 : index
    %c0_206 = arith.constant 0 : index
    %195 = vector.load %arg8[%c5_204, %c0_205, %c0_206] : memref<9x128x128xbf16, #tpu.memory_space<vmem>>, vector<1x128x128xbf16>
    %196 = vector.shape_cast %195 : vector<1x128x128xbf16> to vector<128x128xbf16>
    %cst_207 = arith.constant dense<0.000000e+00> : vector<256x128xf32>
    %197 = tpu.matmul %194, %196, %cst_207 {dimension_numbers = #tpu.dot_dimension_numbers<[1], [0], [0], [1], [0, 0, 1, 1], [], []>} : vector<256x128xbf16>, vector<128x128xbf16>, vector<256x128xf32> -> vector<256x128xf32>
    %198 = arith.addf %191, %197 : vector<256x128xf32>
    %c0_208 = arith.constant 0 : index
    %c2_209 = arith.constant 2 : index
    %c0_210 = arith.constant 0 : index
    %c0_211 = arith.constant 0 : index
    %199 = vector.load %arg16[%c0_208, %c2_209, %c0_210, %c0_211] : memref<1x18x18x128xbf16, #tpu.memory_space<vmem>>, vector<1x16x16x128xbf16>
    %200 = vector.shape_cast %199 : vector<1x16x16x128xbf16> to vector<16x16x128xbf16>
    %201 = vector.shape_cast %200 : vector<16x16x128xbf16> to vector<256x128xbf16>
    %c6_212 = arith.constant 6 : index
    %c0_213 = arith.constant 0 : index
    %c0_214 = arith.constant 0 : index
    %202 = vector.load %arg8[%c6_212, %c0_213, %c0_214] : memref<9x128x128xbf16, #tpu.memory_space<vmem>>, vector<1x128x128xbf16>
    %203 = vector.shape_cast %202 : vector<1x128x128xbf16> to vector<128x128xbf16>
    %cst_215 = arith.constant dense<0.000000e+00> : vector<256x128xf32>
    %204 = tpu.matmul %201, %203, %cst_215 {dimension_numbers = #tpu.dot_dimension_numbers<[1], [0], [0], [1], [0, 0, 1, 1], [], []>} : vector<256x128xbf16>, vector<128x128xbf16>, vector<256x128xf32> -> vector<256x128xf32>
    %205 = arith.addf %198, %204 : vector<256x128xf32>
    %c0_216 = arith.constant 0 : index
    %c2_217 = arith.constant 2 : index
    %c1_218 = arith.constant 1 : index
    %c0_219 = arith.constant 0 : index
    %206 = vector.load %arg16[%c0_216, %c2_217, %c1_218, %c0_219] : memref<1x18x18x128xbf16, #tpu.memory_space<vmem>>, vector<1x16x16x128xbf16>
    %207 = vector.shape_cast %206 : vector<1x16x16x128xbf16> to vector<16x16x128xbf16>
    %208 = vector.shape_cast %207 : vector<16x16x128xbf16> to vector<256x128xbf16>
    %c7_220 = arith.constant 7 : index
    %c0_221 = arith.constant 0 : index
    %c0_222 = arith.constant 0 : index
    %209 = vector.load %arg8[%c7_220, %c0_221, %c0_222] : memref<9x128x128xbf16, #tpu.memory_space<vmem>>, vector<1x128x128xbf16>
    %210 = vector.shape_cast %209 : vector<1x128x128xbf16> to vector<128x128xbf16>
    %cst_223 = arith.constant dense<0.000000e+00> : vector<256x128xf32>
    %211 = tpu.matmul %208, %210, %cst_223 {dimension_numbers = #tpu.dot_dimension_numbers<[1], [0], [0], [1], [0, 0, 1, 1], [], []>} : vector<256x128xbf16>, vector<128x128xbf16>, vector<256x128xf32> -> vector<256x128xf32>
    %212 = arith.addf %205, %211 : vector<256x128xf32>
    %c0_224 = arith.constant 0 : index
    %c2_225 = arith.constant 2 : index
    %c2_226 = arith.constant 2 : index
    %c0_227 = arith.constant 0 : index
    %213 = vector.load %arg16[%c0_224, %c2_225, %c2_226, %c0_227] : memref<1x18x18x128xbf16, #tpu.memory_space<vmem>>, vector<1x16x16x128xbf16>
    %214 = vector.shape_cast %213 : vector<1x16x16x128xbf16> to vector<16x16x128xbf16>
    %215 = vector.shape_cast %214 : vector<16x16x128xbf16> to vector<256x128xbf16>
    %c8_228 = arith.constant 8 : index
    %c0_229 = arith.constant 0 : index
    %c0_230 = arith.constant 0 : index
    %216 = vector.load %arg8[%c8_228, %c0_229, %c0_230] : memref<9x128x128xbf16, #tpu.memory_space<vmem>>, vector<1x128x128xbf16>
    %217 = vector.shape_cast %216 : vector<1x128x128xbf16> to vector<128x128xbf16>
    %cst_231 = arith.constant dense<0.000000e+00> : vector<256x128xf32>
    %218 = tpu.matmul %215, %217, %cst_231 {dimension_numbers = #tpu.dot_dimension_numbers<[1], [0], [0], [1], [0, 0, 1, 1], [], []>} : vector<256x128xbf16>, vector<128x128xbf16>, vector<256x128xf32> -> vector<256x128xf32>
    %219 = arith.addf %212, %218 : vector<256x128xf32>
    %c0_232 = arith.constant 0 : index
    %c1_233 = arith.constant 1 : index
    %c1_234 = arith.constant 1 : index
    %c0_235 = arith.constant 0 : index
    %220 = vector.load %arg15[%c0_232, %c1_233, %c1_234, %c0_235] : memref<1x18x18x128xbf16, #tpu.memory_space<vmem>>, vector<1x16x16x128xbf16>
    %221 = vector.shape_cast %220 : vector<1x16x16x128xbf16> to vector<16x16x128xbf16>
    %222 = vector.shape_cast %221 : vector<16x16x128xbf16> to vector<256x128xbf16>
    %223 = arith.extf %222 : vector<256x128xbf16> to vector<256x128xf32>
    %224 = vector.broadcast %154 : vector<1x128xf32> to vector<256x128xf32>
    %225 = arith.mulf %219, %224 : vector<256x128xf32>
    %226 = vector.broadcast %155 : vector<1x128xf32> to vector<256x128xf32>
    %227 = arith.addf %225, %226 : vector<256x128xf32>
    %228 = arith.addf %227, %223 : vector<256x128xf32>
    %cst_236 = arith.constant 0.000000e+00 : f32
    %229 = vector.broadcast %cst_236 : f32 to vector<256x128xf32>
    %230 = arith.maximumf %228, %229 : vector<256x128xf32>
    %cst_237 = arith.constant dense<0.000000e+00> : vector<128xf32>
    %231 = vector.multi_reduction <add>, %230, %cst_237 [0] : vector<256x128xf32> to vector<128xf32>
    %232 = vector.shape_cast %231 : vector<128xf32> to vector<1x128xf32>
    %cst_238 = arith.constant 2.560000e+02 : f32
    %233 = vector.broadcast %cst_238 : f32 to vector<1x128xf32>
    %234 = arith.divf %232, %233 : vector<1x128xf32>
    %c0_239 = arith.constant 0 : index
    %c0_240 = arith.constant 0 : index
    %c0_241 = arith.constant 0 : index
    %235 = vector.load %arg11[%c0_239, %c0_240, %c0_241] : memref<1x1x128xf32, #tpu.memory_space<vmem>>, vector<1x1x128xf32>
    %236 = vector.shape_cast %235 : vector<1x1x128xf32> to vector<1x128xf32>
    %237 = arith.mulf %234, %236 : vector<1x128xf32>
    %c0_242 = arith.constant 0 : index
    %c0_243 = arith.constant 0 : index
    %238 = vector.load %arg12[%c0_242, %c0_243] : memref<128x128xf32, #tpu.memory_space<vmem>>, vector<128x128xf32>
    %cst_244 = arith.constant dense<0.000000e+00> : vector<1x128xf32>
    %239 = tpu.matmul %237, %238, %cst_244 {dimension_numbers = #tpu.dot_dimension_numbers<[1], [0], [0], [1], [0, 0, 1, 1], [], []>} : vector<1x128xf32>, vector<128x128xf32>, vector<1x128xf32> -> vector<1x128xf32>
    %c0_245 = arith.constant 0 : index
    %c0_246 = arith.constant 0 : index
    %240 = vector.load %arg13[%c0_245, %c0_246] : memref<1x128xf32, #tpu.memory_space<vmem>>, vector<1x128xf32>
    %241 = arith.addf %239, %240 : vector<1x128xf32>
    %242 = vector.shape_cast %241 : vector<1x128xf32> to vector<1x1x128xf32>
    %c0_247 = arith.constant 0 : index
    %c0_248 = arith.constant 0 : index
    %c0_249 = arith.constant 0 : index
    %243 = vector.load %arg14[%c0_247, %c0_248, %c0_249] : memref<1x1x128xf32, #tpu.memory_space<vmem>>, vector<1x1x128xf32>
    tpu.vector_store %arg14[%c0_247, %c0_248, %c0_249], %242 {strides = array<i32>} : memref<1x1x128xf32, #tpu.memory_space<vmem>>, vector<1x1x128xf32>,
    return
  }
  func.func @transform_0(%arg0: i32) -> (i32, i32, i32, i32) {
    %c0_i32 = arith.constant 0 : i32
    %c0_i32_0 = arith.constant 0 : i32
    %c0_i32_1 = arith.constant 0 : i32
    %c0_i32_2 = arith.constant 0 : i32
    return %arg0, %c0_i32, %c0_i32_0, %c0_i32_1 : i32, i32, i32, i32
  }
  func.func @transform_1(%arg0: i32) -> (i32, i32, i32) {
    %c0_i32 = arith.constant 0 : i32
    %c0_i32_0 = arith.constant 0 : i32
    %c0_i32_1 = arith.constant 0 : i32
    %c0_i32_2 = arith.constant 0 : i32
    return %c0_i32, %c0_i32_0, %c0_i32_1 : i32, i32, i32
  }
  func.func @transform_2(%arg0: i32) -> (i32, i32) {
    %c0_i32 = arith.constant 0 : i32
    %c0_i32_0 = arith.constant 0 : i32
    %c0_i32_1 = arith.constant 0 : i32
    return %c0_i32, %c0_i32_0 : i32, i32
  }
  func.func @transform_3(%arg0: i32) -> (i32, i32) {
    %c0_i32 = arith.constant 0 : i32
    %c0_i32_0 = arith.constant 0 : i32
    %c0_i32_1 = arith.constant 0 : i32
    return %c0_i32, %c0_i32_0 : i32, i32
  }
  func.func @transform_4(%arg0: i32) -> (i32, i32, i32) {
    %c0_i32 = arith.constant 0 : i32
    %c0_i32_0 = arith.constant 0 : i32
    %c0_i32_1 = arith.constant 0 : i32
    %c0_i32_2 = arith.constant 0 : i32
    return %c0_i32, %c0_i32_0, %c0_i32_1 : i32, i32, i32
  }
  func.func @transform_5(%arg0: i32) -> (i32, i32) {
    %c0_i32 = arith.constant 0 : i32
    %c0_i32_0 = arith.constant 0 : i32
    %c0_i32_1 = arith.constant 0 : i32
    return %c0_i32, %c0_i32_0 : i32, i32
  }
  func.func @transform_6(%arg0: i32) -> (i32, i32) {
    %c0_i32 = arith.constant 0 : i32
    %c0_i32_0 = arith.constant 0 : i32
    %c0_i32_1 = arith.constant 0 : i32
    return %c0_i32, %c0_i32_0 : i32, i32
  }
  func.func @transform_7(%arg0: i32) -> (i32, i32, i32) {
    %c0_i32 = arith.constant 0 : i32
    %c0_i32_0 = arith.constant 0 : i32
    %c0_i32_1 = arith.constant 0 : i32
    %c0_i32_2 = arith.constant 0 : i32
    return %c0_i32, %c0_i32_0, %c0_i32_1 : i32, i32, i32
  }
  func.func @transform_8(%arg0: i32) -> (i32, i32) {
    %c0_i32 = arith.constant 0 : i32
    %c0_i32_0 = arith.constant 0 : i32
    %c0_i32_1 = arith.constant 0 : i32
    return %c0_i32, %c0_i32_0 : i32, i32
  }
  func.func @transform_9(%arg0: i32) -> (i32, i32) {
    %c0_i32 = arith.constant 0 : i32
    %c0_i32_0 = arith.constant 0 : i32
    %c0_i32_1 = arith.constant 0 : i32
    return %c0_i32, %c0_i32_0 : i32, i32
  }
  func.func @transform_10(%arg0: i32) -> (i32, i32, i32) {
    %c0_i32 = arith.constant 0 : i32
    %c0_i32_0 = arith.constant 0 : i32
    %c0_i32_1 = arith.constant 0 : i32
    return %arg0, %c0_i32, %c0_i32_0 : i32, i32, i32
  }
  func.func @transform_11(%arg0: i32) -> (i32, i32) {
    %c0_i32 = arith.constant 0 : i32
    %c0_i32_0 = arith.constant 0 : i32
    %c0_i32_1 = arith.constant 0 : i32
    return %c0_i32, %c0_i32_0 : i32, i32
  }
  func.func @transform_12(%arg0: i32) -> (i32, i32) {
    %c0_i32 = arith.constant 0 : i32
    %c0_i32_0 = arith.constant 0 : i32
    %c0_i32_1 = arith.constant 0 : i32
    return %c0_i32, %c0_i32_0 : i32, i32
  }
  func.func @transform_13(%arg0: i32) -> (i32, i32, i32) {
    %c0_i32 = arith.constant 0 : i32
    %c0_i32_0 = arith.constant 0 : i32
    %c0_i32_1 = arith.constant 0 : i32
    return %arg0, %c0_i32, %c0_i32_0 : i32, i32, i32
  }
}

</mosaic_0001>

<bundles_post_ra>
// kernel: tpu_custom_call.1
= control target key start
LH: loop header
LB: loop body
LE: loop exit
PB: predicated region body
PF: predicated region fallthrough
CT: control target
= control target key end

     0   :  { %18 = vsyncpa [#allocation5], 0  ;;  %s23698_s0 = inlined_call_operand.vmem [shape: f32[2,18,18,3], index: 0, kind: input, shape index: {}]   ;;  %s23699_s1 = inlined_call_operand.vmem [shape: bf16[9,3,128], index: 1, kind: input, shape index: {}]   ;;  %s23700_s2 = inlined_call_operand.vmem [shape: f32[1,128], index: 2, kind: input, shape index: {}]   ;;  %s23701_s3 = inlined_call_operand.vmem [shape: f32[1,128], index: 3, kind: input, shape index: {}]   ;;  %s23702_s4 = inlined_call_operand.vmem [shape: bf16[9,128,128], index: 4, kind: input, shape index: {}]   ;;  %s23703_s5 = inlined_call_operand.vmem [shape: f32[1,128], index: 5, kind: input, shape index: {}]   ;;  %s23704_s6 = inlined_call_operand.vmem [shape: f32[1,128], index: 6, kind: input, shape index: {}]   ;;  %s23705_s7 = inlined_call_operand.hbm [shape: bf16[9,128,128], index: 7, kind: input, shape index: {}]   ;;  %s23706_s8 = inlined_call_operand.vmem [shape: f32[1,128], index: 8, kind: input, shape index: {}]   ;;  %s23707_s9 = inlined_call_operand.vmem [shape: f32[1,128], index: 9, kind: input, shape index: {}]   ;;  %s23708_s10 = inlined_call_operand.vmem [shape: f32[2,1,128], index: 10, kind: input, shape index: {}]   ;;  %s23709_s11 = inlined_call_operand.vmem [shape: f32[128,128], index: 11, kind: input, shape index: {}]   ;;  %s23710_s12 = inlined_call_operand.vmem [shape: f32[1,128], index: 12, kind: input, shape index: {}]   ;;  %s23711_s13 = inlined_call_operand.hbm [shape: f32[2,1,128], index: 13, kind: output, shape index: {}]  }
   0x1   :  { %19 = vsyncpa [#allocation6], 0 }
   0x2   :  { %21 = vsyncpa [#allocation6 + $0x1], 0  ;;  %s18827_s25 = smov 0   ;;  %s18829_s26 = smov 0  }
   0x3   :  { %s18831_s27 = smov 0   ;;  %s18833_s28 = smov 0  }
   0x4 LB: > { %23861 = sst [smem:[#allocation10_spill]] %s18742_s27  ;;  %s18848_s29 = sadd.s32 4294967295, %s18746_s28   ;;  %s18746_s28 = sphi %s18833_s28, %s24257_s28   ;;  %s18742_s27 = sphi %s18831_s27, %s24259_s27   ;;  %s18738_s26 = sphi %s18829_s26, %s24261_s26   ;;  %s18734_s25 = sphi %s18827_s25, %s24260_s25  }
   0x5   : > { %s14715_s30 = sadd.s32 4294967294, %s18746_s28   ;;  %s18852_s14 = sadd.s32 1, %s18746_s28  }
   0x6   : > { %23862 = sst [smem:[#allocation11_spill]] %s18852_s14  ;;  %s317_s15 = sadd.s32 1, %s18742_s27 }
   0x7   : > { %s314_s16 = ssub.s32 %s18746_s28, %s18852_s14  ;;  %p327_p0 = scmp.ne.s32.totalorder %s18742_s27, %s18738_s26 }
   0x8   : > { %p315_p1 = scmp.eq.s32.totalorder %s314_s16, 0  ;;  %p328_p2 = scmp.eq.s32.totalorder %s18848_s29, 1 }
   0x9   : > { %p333_p3 = scmp.ne.s32.totalorder %s18738_s26, %s18734_s25  ;;  %p334_p4 = scmp.eq.s32.totalorder %s14715_s30, 1 }
   0xa   : > { %s18863_s17 = scalar_select %p315_p1, %s18742_s27, %s317_s15  }
   0xb   : > { %p18865_p5 = por %p328_p2, %p327_p0  ;;  %p18869_p6 = por %p334_p4, %p333_p3 }
   0xc   : > { %23863 = sst [smem:[#allocation12_spill]] %s18863_s17  ;;  %p14716_p7 = scmp.ge.s32.totalorder %s18746_s28, 1 }
   0xd   : > { %s23864_s18 = scalar_select %p18865_p5, 1, 0 }
   0xe   : > { %s23865_s19 = scalar_select %p18869_p6, 1, 0 }
   0xf   : > { %p341_p8 = scmp.lt.s32.totalorder %s18746_s28, 3  ;;  %p23715_p9 = scmp.eq.s32.totalorder %s18848_s29, 0 }
  0x10   : > { %s18748_s21 = smov [#allocation4]   ;;  %s18652_s15 = scalar_lea.hbm %s23705_s7, 9216 }
  0x11   : > { %p18876_p10 = pnand %p14716_p7, %p341_p8  ;;  %s371_s22 = sshll.u32 %s18748_s21, 4  ;;  %s372_s22 = int_to_ptr.vmem [resolvable:$true] %s371_s22 }
  0x12   : > { %p18653_p13 = scmp.ne.s32.totalorder %s23705_s7, %s18652_s15  ;;  %p18659_p3 = scmp.lt.u32.totalorder %s18652_s15, %s23705_s7 }
  0x13   : > { %s23866_s20 = scalar_select %p18876_p10, 1, 0 }
  0x14   : > { %p18275_p11 = pneg %p18876_p10 }
  0x16   : > { %p18884_p12 = pnand %p23715_p9, %p18275_p11 }
  0x18   : > { %p18654_p0 = pneg %p18884_p12 }
  0x1a   : > { %p18655_p1 = pnand %p18654_p0, %p18653_p13 }
  0x1c   : > { %p18656_p2 = pneg %p18655_p1 }
  0x1e   : > { %p18661_p4 = pnand %p18659_p3, %p18656_p2 }
  0x20   : > { %18664 = shalt.err (!%p18661_p4)
}
  0x21   : > { %s18665_s14 = scalar_lea.vmem %s372_s22, 9216  ;;  %p18673_p9 = scmp.lt.s32.totalorder %s372_s22, %s372_s22 }
  0x22   : > { %p18666_p7 = scmp.ne.s32.totalorder %s372_s22, %s18665_s14  ;;  %p18674_p6 = scmp.lt.s32.totalorder %s18665_s14, %s18665_s14 }
  0x24   : > { %p18668_p8 = pnand %p18666_p7, %p18654_p0  ;;  %p18675_p5 = por %p18674_p6, %p18673_p9 }
  0x26   : > { %p18669_p11 = pneg %p18668_p8 }
  0x28   : > { %p18676_p10 = pnand %p18675_p5, %p18669_p11 }
  0x2a   : > { %18679 = shalt.err (!%p18676_p10)
}
  0x2b   : > { %s18749_s17 = smov 64   ;;  %s18750_s24 = smov 4  }
  0x2c   : > { %18278 = dma.hbm_to_vmem [thread:$0]  (!%p18884_p12), %s23705_s7, 9216, %s372_s22, [#allocation5], %s18749_s17, %s18749_s17, %s18750_s24  }
  0x2d   : > { %p23868_p13 = scmp.ne.s32.totalorder %s23866_s20, 0 }
  0x2f   : > { %413 = sbr.rel (%p23868_p13) target bundleno = 2521 (0x9d9), region = 72 }
  0x36   : > { %p23869_p1 = scmp.eq.s32.totalorder %s18848_s29, 0 }
  0x38   : > { %18725 = dma.done.wait (%p23869_p1), [#allocation5], 9216   ;;  %p23870_p0 = pmov %p23869_p1 }
  0x39   : > { %vm475_vm0 = vcmask 1040384   ;;  %p459_p5 = scmp.lt.s32.totalorder %s18848_s29, 1  ;;  %vm1041_vm1 = vcmask 1041408   ;;  %v18751_v0 = vmov 65535   ;;  %v14789_v3 = vld [vmem:[%s23699_s1 + $0x8] sm:$0x3] }
  0x3a   : > { %18727 = vsyncadd (%p23870_p0), [#allocation5], 4294958080  ;;  %v1042_v1 = vsel %vm475_vm0, 4294967295, %v18751_v0  ;;  %v14722_v4 = vld [vmem:[%s23699_s1 + $0x2] sm:$0x3]  ;;  %vm991_vm3 = vcmask 23552  }
  0x3b   : > { %s18913_s27 = scalar_select %p459_p5, %s18848_s29, 1  ;;  %v18915_v2 = vsel %vm1041_vm1, %v1042_v1, 0  ;;  %v14806_v5 = vld [vmem:[%s23699_s1 + $0xa] sm:$0x3]  ;;  %vm796_vm2 = vsmask.f32 7424 }
  0x3c   : > { %v1949_v6 = vand.u32 %v14789_v3, %v18915_v2  ;;  %v1045_v7 = vand.u32 %v14722_v4, %v18915_v2  ;;  %v18938_v11 = vand.u32 %v14806_v5, %v18915_v2  ;;  %vm1436_vm4 = vcmask 1046528   ;;  %p24255_p9 = scmp.ne.s32.totalorder %s23864_s18, 0 }
  0x3d   : > { %s18268_s14 = smul.u32 432, %s18913_s27  ;;  %vm476_vm5 = vsmask.f32 256  ;;  %vm532_vm7 = vsmask.f32 7938  ;;  %vm3496_vm12 = vcmask 1043456   ;;  %s466_s16 = scalar_lea.vmem %s23708_s10, %s18913_s27 }
  0x3e   : > { %16405 = vmatprep.subr.bf16.mxu0 %v1949_v6  ;;  %16269 = vmatprep.subr.bf16.mxu1 %v1045_v7  ;;  %vm19575_vm6 = vmand %vm475_vm0, %vm476_vm5  ;;  %vm3676_vm9 = vsmask.f32 3328  ;;  %vm3677_vm10 = vsmask.f32 7440  ;;  %vm3173_vm13 = vsmask.f32 4368 }
  0x3f   : > { %s18927_s24 = scalar_lea.vmem %s23698_s0, %s18268_s14  ;;  %16406 = vmatpush3.bf16.msra.mxu0 %v1949_v6  ;;  %16270 = vmatpush3.bf16.msra.mxu1 %v1045_v7  ;;  %vm19583_vm8 = vmand %vm475_vm0, %vm532_vm7  ;;  %vm4706_vm0 = vcmask 1042432   ;;  %vm4707_vm1 = vcmask 1046532   ;;  %s457_s14 = sand.u32 1, %s18738_s26  }
  0x40   : > { %v703_v8 = vld [vmem:[%s18927_s24] sm:$0xff]  ;;  %v704_v9 = vld [vmem:[%s18927_s24 + $0x8] sm:$0xff]  ;;  %v705_v10 = vld [vmem:[%s18927_s24 + $0x10] sm:$0x3]  ;;  %16439 = vmatprep.subr.bf16.mxu0 %v18938_v11  ;;  %s458_s23 = scalar_lea.vmem [#allocation7], %s457_s14  ;;  %s14627_s30 = scalar_lea.sflag [#allocation6], %s457_s14 }
  0x41   : > { %v18940_v12 = vpack.c.bf16 %v704_v9, %v703_v8  ;;  %v18942_v13 = vpack.c.bf16 %v705_v10, %v705_v10  ;;  %v706_v14 = vld [vmem:[%s18927_s24 + $0x18] sm:$0xff]  ;;  %v707_v15 = vld [vmem:[%s18927_s24 + $0x20] sm:$0xff]  ;;  %v708_v16 = vld [vmem:[%s18927_s24 + $0x28] sm:$0x3]  ;;  %s14639_s15 = sshll.u32 %s458_s23, 4  ;;  %s23658_s15 = int_to_ptr.vmem [resolvable:$true] %s14639_s15 }
  0x42   : > { %v18947_v17 = vpack.c.bf16 %v707_v15, %v706_v14  ;;  %v18949_v18 = vpack.c.bf16 %v708_v16, %v708_v16  ;;  %v709_v19 = vld [vmem:[%s18927_s24 + $0x30] sm:$0xff]  ;;  %v710_v20 = vld [vmem:[%s18927_s24 + $0x38] sm:$0xff]  ;;  %v711_v21 = vld [vmem:[%s18927_s24 + $0x40] sm:$0x3] }
  0x43   : > { %v798_v22 = vshrl.u32 %v18940_v12, 16  ;;  %v800_v23 = vshll.u32 %v18940_v12, 16  ;;  %v805_v24 = vshll.u32 %v18942_v13, 16  ;;  %v18957_v25 = vpack.c.bf16 %v710_v20, %v709_v19  ;;  %v712_v26 = vld [vmem:[%s18927_s24 + $0x48] sm:$0xff]  ;;  %v713_v27 = vld [vmem:[%s18927_s24 + $0x50] sm:$0xff]  ;;  %v715_v28 = vld [vmem:[%s18927_s24 + $0x60] sm:$0xff] }
  0x44   : > { %v810_v29 = vshrl.u32 %v18947_v17, 16  ;;  %v812_v30 = vshll.u32 %v18947_v17, 16  ;;  %v817_v31 = vshll.u32 %v18949_v18, 16  ;;  %v18966_v32 = vpack.c.bf16 %v711_v21, %v711_v21  ;;  %v714_v33 = vld [vmem:[%s18927_s24 + $0x58] sm:$0x3]  ;;  %v716_v34 = vld [vmem:[%s18927_s24 + $0x68] sm:$0xff]  ;;  %vm19706_vm11 = vmor %vm3676_vm9, %vm3677_vm10 }
  0x45   : > { %v802_v35 = vrot.slane %v800_v23, 1  ;;  %v807_v36 = vrot.slane %v805_v24, 1  ;;  %v822_v37 = vshrl.u32 %v18957_v25, 16  ;;  %v824_v38 = vshll.u32 %v18957_v25, 16  ;;  %v717_v39 = vld [vmem:[%s18927_s24 + $0x70] sm:$0x3]  ;;  %vm19798_vm14 = vmand %vm3496_vm12, %vm532_vm7 }
  0x46   : > { %v814_v40 = vrot.slane %v812_v30, 1  ;;  %v819_v41 = vrot.slane %v817_v31, 1  ;;  %v829_v42 = vshll.u32 %v18966_v32, 16  ;;  %v18974_v45 = vpack.c.bf16 %v713_v27, %v712_v26  ;;  %v718_v51 = vld [vmem:[%s18927_s24 + $0x78] sm:$0xff]  ;;  %v719_v52 = vld [vmem:[%s18927_s24 + $0x80] sm:$0xff]  ;;  %v721_v58 = vld [vmem:[%s18927_s24 + $0x90] sm:$0xff] }
  0x47   : > { %v803_v43 = vor.u32 %v802_v35, %v798_v22  ;;  %v826_v44 = vrot.slane %v824_v38, 1  ;;  %v18976_v46 = vpack.c.bf16 %v714_v33, %v714_v33  ;;  %v18978_v49 = vpack.c.bf16 %v716_v34, %v715_v28  ;;  %v720_v57 = vld [vmem:[%s18927_s24 + $0x88] sm:$0x3]  ;;  %v722_v59 = vld [vmem:[%s18927_s24 + $0x98] sm:$0xff]  ;;  %v723_v5 = vld [vmem:[%s18927_s24 + $0xa0] sm:$0x3] }
  0x48   : > { %v815_v47 = vor.u32 %v814_v40, %v810_v29  ;;  %v831_v48 = vrot.slane %v829_v42, 1  ;;  %v18980_v50 = vpack.c.bf16 %v717_v39, %v717_v39  ;;  %v834_v55 = vshrl.u32 %v18974_v45, 16  ;;  %v724_v10 = vld [vmem:[%s18927_s24 + $0xa8] sm:$0xff]  ;;  %v725_v14 = vld [vmem:[%s18927_s24 + $0xb0] sm:$0xff]  ;;  %v726_v21 = vld [vmem:[%s18927_s24 + $0xb8] sm:$0x3] }
  0x49   : > { %v808_v53 = vsel %vm796_vm2, %v803_v43, %v807_v36  ;;  %v827_v54 = vor.u32 %v826_v44, %v822_v37  ;;  %v836_v56 = vshll.u32 %v18974_v45, 16  ;;  %v841_v61 = vshll.u32 %v18976_v46, 16  ;;  %v727_v29 = vld [vmem:[%s18927_s24 + $0xc0] sm:$0xff]  ;;  %v728_v30 = vld [vmem:[%s18927_s24 + $0xc8] sm:$0xff]  ;;  %vm19830_vm15 = vmor %vm476_vm5, %vm3173_vm13 }
  0x4a   : > { %16271 = vmatprep.mubr.msk.bf16.mxu1 %vm991_vm3, %v808_v53  ;;  %v820_v60 = vsel %vm796_vm2, %v815_v47, %v819_v41  ;;  %v846_v62 = vshrl.u32 %v18978_v49, 16  ;;  %v848_v63 = vshll.u32 %v18978_v49, 16  ;;  %v853_v3 = vshll.u32 %v18980_v50, 16  ;;  %v795_v36 = vld [vmem:[%s23699_s1] sm:$0x3]  ;;  %v730_v47 = vld [vmem:[%s18927_s24 + $0xd8] sm:$0xff] }
  0x4b   : > { %16407 = vmatprep.mubr.msk.bf16.mxu0 %vm991_vm3, %v820_v60  ;;  %16272 = vmatmul.mubr.msk.bf16.vlgmr.msra.gmra.mrb[0].mxu1 %vm991_vm3, %v820_v60  ;;  %v18998_v0 = vsel %vm796_vm2, %v827_v54, %v831_v48  ;;  %v838_v1 = vrot.slane %v836_v56, 1  ;;  %v19001_v4 = vpack.c.bf16 %v719_v52, %v718_v51  ;;  %v843_v6 = vrot.slane %v841_v61, 1  ;;  %v729_v41 = vld [vmem:[%s18927_s24 + $0xd0] sm:$0x3]  ;;  %v731_v48 = vld [vmem:[%s18927_s24 + $0xe0] sm:$0xff] }
  0x4c   : > { %16408 = vmatmul.mubr.msk.bf16.vlgmr.msra.gmra.mrb[0].mxu0 %vm991_vm3, %v18998_v0  ;;  %16275 = vmatprep.mubr.msk.bf16.mxu1 %vm991_vm3, %v18998_v0  ;;  %v850_v7 = vrot.slane %v848_v63, 1  ;;  %v19008_v8 = vpack.c.bf16 %v720_v57, %v720_v57  ;;  %v19010_v9 = vpack.c.bf16 %v722_v59, %v721_v58  ;;  %v855_v16 = vrot.slane %v853_v3, 1  ;;  %v732_v54 = vld [vmem:[%s18927_s24 + $0xe8] sm:$0x3]  ;;  %v733_v56 = vld [vmem:[%s18927_s24 + $0xf0] sm:$0xff]  ;;  %v734_v57 = vld [vmem:[%s18927_s24 + $0xf8] sm:$0xff] }
  0x4d   : > { %16440 = vmatpush3.bf16.msra.mxu0 %v18938_v11  ;;  %v839_v15 = vor.u32 %v838_v1, %v834_v55  ;;  %v858_v19 = vshrl.u32 %v19001_v4, 16  ;;  %v860_v20 = vshll.u32 %v19001_v4, 16  ;;  %v19019_v24 = vpack.c.bf16 %v723_v5, %v723_v5  ;;  %v735_v5 = vld [vmem:[%s18927_s24 + $0x100] sm:$0x3] }
  0x4e   : > { %v851_v22 = vor.u32 %v850_v7, %v846_v62  ;;  %v865_v23 = vshll.u32 %v19008_v8, 16  ;;  %v872_v28 = vshll.u32 %v19010_v9, 16  ;;  %v19025_v11 = vpack.c.bf16 %v725_v14, %v724_v10  ;;  %v736_v62 = vld [vmem:[%s18927_s24 + $0x108] sm:$0xff] }
  0x4f   : > { %v19022_v26 = vsel %vm796_vm2, %v839_v15, %v843_v6  ;;  %v862_v27 = vrot.slane %v860_v20, 1  ;;  %v870_v34 = vshrl.u32 %v19010_v9, 16  ;;  %v19035_v35 = vpack.c.bf16 %v726_v21, %v726_v21  ;;  %v737_v6 = vld [vmem:[%s18927_s24 + $0x110] sm:$0xff] }
  0x50   : > { %23871 = vst [vmem:[#allocation13_spill] sm:$0xff] %v19022_v26  ;;  %16411 = vmatprep.mubr.msk.bf16.mxu0 %vm991_vm3, %v19022_v26  ;;  %v19032_v31 = vsel %vm796_vm2, %v851_v22, %v855_v16  ;;  %v867_v33 = vrot.slane %v865_v23, 1  ;;  %v874_v38 = vrot.slane %v872_v28, 1  ;;  %v877_v39 = vshll.u32 %v19019_v24, 16  ;;  %v738_v16 = vld [vmem:[%s18927_s24 + $0x118] sm:$0x3] }
  0x51   : > { %23872 = vst [vmem:[#allocation14_spill] sm:$0xff] %v19032_v31  ;;  %v863_v37 = vor.u32 %v862_v27, %v858_v19  ;;  %v884_v40 = vshll.u32 %v19025_v11, 16  ;;  %v882_v42 = vshrl.u32 %v19025_v11, 16  ;;  %v889_v43 = vshll.u32 %v19035_v35, 16  ;;  %v739_v23 = vld [vmem:[%s18927_s24 + $0x120] sm:$0xff]  ;;  %v740_v27 = vld [vmem:[%s18927_s24 + $0x128] sm:$0xff] }
  0x52   : > { %v19045_v44 = vpack.c.bf16 %v728_v30, %v727_v29  ;;  %v1241_v53 = vand.u32 %v18915_v2, %v795_v36  ;;  %v19060_v55 = vpack.c.bf16 %v729_v41, %v729_v41  ;;  %v875_v58 = vor.u32 %v874_v38, %v870_v34  ;;  %v741_v36 = vld [vmem:[%s18927_s24 + $0x130] sm:$0x3] }
  0x53   : > { %16276 = vmatmul.mubr.msk.bf16.gmra.mrb[4].mxu1 %vm991_vm3, %v19022_v26  ;;  %v19052_v51 = vsel %vm796_vm2, %v863_v37, %v867_v33  ;;  %v886_v52 = vrot.slane %v884_v40, 1  ;;  %v879_v59 = vrot.slane %v877_v39, 1  ;;  %v19067_v61 = vpack.c.bf16 %v731_v48, %v730_v47  ;;  %v742_v37 = vld [vmem:[%s18927_s24 + $0x138] sm:$0xff]  ;;  %v743_v40 = vld [vmem:[%s18927_s24 + $0x140] sm:$0xff]  ;;  %v744_v47 = vld [vmem:[%s18927_s24 + $0x148] sm:$0x3] }
  0x54   : > { %23873 = vst [vmem:[#allocation15_spill] sm:$0xff] %v19052_v51  ;;  %16412 = vmatmul.mubr.msk.bf16.gmra.mrb[4].mxu0 %vm991_vm3, %v19032_v31  ;;  %16279 = vmatprep.mubr.msk.bf16.mxu1 %vm991_vm3, %v19032_v31  ;;  %v896_v60 = vshll.u32 %v19045_v44, 16  ;;  %v891_v1 = vrot.slane %v889_v43, 1  ;;  %v19070_v3 = vpack.c.bf16 %v732_v54, %v732_v54  ;;  %v19075_v10 = vpack.c.bf16 %v734_v57, %v733_v56  ;;  %v745_v54 = vld [vmem:[%s18927_s24 + $0x150] sm:$0xff] }
  0x55   : > { %16415 = vmatprep.mubr.msk.bf16.mxu0 %vm991_vm3, %v19052_v51  ;;  %16303 = vmatprep.subr.bf16.mxu1 %v1241_v53  ;;  %v887_v63 = vor.u32 %v886_v52, %v882_v42  ;;  %v908_v7 = vshll.u32 %v19067_v61, 16  ;;  %v894_v14 = vshrl.u32 %v19045_v44, 16  ;;  %v901_v15 = vshll.u32 %v19060_v55, 16 }
  0x56   : > { %16304 = vmatpush3.bf16.msra.mxu1 %v1241_v53  ;;  %v19081_v19 = vsel %vm796_vm2, %v875_v58, %v879_v59  ;;  %v898_v20 = vrot.slane %v896_v60, 1  ;;  %v906_v21 = vshrl.u32 %v19067_v61, 16  ;;  %v19084_v22 = vpack.c.bf16 %v737_v6, %v736_v62  ;;  %v746_v60 = vld [vmem:[%s18927_s24 + $0x158] sm:$0xff]  ;;  %v747_v62 = vld [vmem:[%s18927_s24 + $0x160] sm:$0x3]  ;;  %v749_v6 = vld [vmem:[%s18927_s24 + $0x170] sm:$0xff] }
  0x57   : > { %23874 = vst [vmem:[#allocation16_spill] sm:$0xff] %v19081_v19  ;;  %v19089_v28 = vsel %vm796_vm2, %v887_v63, %v891_v1  ;;  %v910_v29 = vrot.slane %v908_v7, 1  ;;  %v913_v30 = vshll.u32 %v19070_v3, 16  ;;  %v19094_v33 = vpack.c.bf16 %v735_v5, %v735_v5  ;;  %v748_v5 = vld [vmem:[%s18927_s24 + $0x168] sm:$0xff]  ;;  %v750_v7 = vld [vmem:[%s18927_s24 + $0x178] sm:$0x3] }
  0x58   : > { %23875 = vst [vmem:[#allocation17_spill] sm:$0xff] %v19089_v28  ;;  %v920_v34 = vshll.u32 %v19075_v10, 16  ;;  %v19104_v39 = vpack.c.bf16 %v738_v16, %v738_v16  ;;  %v899_v41 = vor.u32 %v898_v20, %v894_v14  ;;  %v903_v42 = vrot.slane %v901_v15, 1  ;;  %v751_v14 = vld [vmem:[%s18927_s24 + $0x180] sm:$0xff] }
  0x59   : > { %v932_v43 = vshll.u32 %v19084_v22, 16  ;;  %v911_v48 = vor.u32 %v910_v29, %v906_v21  ;;  %v915_v52 = vrot.slane %v913_v30, 1  ;;  %v19111_v53 = vpack.c.bf16 %v740_v27, %v739_v23  ;;  %v752_v29 = vld [vmem:[%s18927_s24 + $0x188] sm:$0xff]  ;;  %v753_v30 = vld [vmem:[%s18927_s24 + $0x190] sm:$0x3] }
  0x5a   : > { %v918_v56 = vshrl.u32 %v19075_v10, 16  ;;  %v922_v57 = vrot.slane %v920_v34, 1  ;;  %v925_v58 = vshll.u32 %v19094_v33, 16  ;;  %v19116_v59 = vpack.c.bf16 %v743_v40, %v742_v37 }
  0x5b   : > { %16280 = vmatmul.mubr.msk.bf16.gmra.mrb[8].mxu1 %vm991_vm3, %v19052_v51  ;;  %v937_v63 = vshll.u32 %v19104_v39, 16  ;;  %v19121_v1 = vpack.c.bf16 %v741_v36, %v741_v36  ;;  %v19128_v15 = vsel %vm796_vm2, %v899_v41, %v903_v42  ;;  %v930_v16 = vshrl.u32 %v19084_v22, 16 }
  0x5c   : > { %16416 = vmatmul.mubr.msk.bf16.gmra.mrb[8].mxu0 %vm991_vm3, %v19081_v19  ;;  %16283 = vmatprep.mubr.msk.bf16.mxu1 %vm991_vm3, %v19081_v19  ;;  %23876 = vst [vmem:[#allocation18_spill] sm:$0xff] %v19128_v15  ;;  %v934_v20 = vrot.slane %v932_v43, 1  ;;  %v19132_v21 = vsel %vm796_vm2, %v911_v48, %v915_v52  ;;  %v944_v23 = vshll.u32 %v19111_v53, 16  ;;  %v19135_v27 = vpack.c.bf16 %v744_v47, %v744_v47  ;;  %v14823_v48 = vld [vmem:[%s23699_s1 + $0xc] sm:$0x3] }
  0x5d   : > { %16419 = vmatprep.mubr.msk.bf16.mxu0 %vm991_vm3, %v19089_v28  ;;  %23877 = vst [vmem:[#allocation19_spill] sm:$0xff] %v19132_v21  ;;  %v923_v34 = vor.u32 %v922_v57, %v918_v56  ;;  %v927_v36 = vrot.slane %v925_v58, 1  ;;  %v956_v37 = vshll.u32 %v19116_v59, 16  ;;  %v19142_v40 = vpack.c.bf16 %v746_v60, %v745_v54 }
  0x5e   : > { %v939_v41 = vrot.slane %v937_v63, 1  ;;  %v942_v42 = vshrl.u32 %v19111_v53, 16  ;;  %v949_v43 = vshll.u32 %v19121_v1, 16  ;;  %v19150_v47 = vpack.c.bf16 %v747_v62, %v747_v62 }
  0x5f   : > { %v935_v52 = vor.u32 %v934_v20, %v930_v16  ;;  %v19157_v54 = vpack.c.bf16 %v749_v6, %v748_v5  ;;  %v19159_v56 = vpack.c.bf16 %v750_v7, %v750_v7  ;;  %v19161_v57 = vpack.c.bf16 %v752_v29, %v751_v14  ;;  %v14755_v29 = vld [vmem:[%s23699_s1 + $0x4] sm:$0x3] }
  0x60   : > { %v946_v58 = vrot.slane %v944_v23, 1  ;;  %v954_v60 = vshrl.u32 %v19116_v59, 16  ;;  %v961_v62 = vshll.u32 %v19135_v27, 16  ;;  %v19165_v63 = vpack.c.bf16 %v753_v30, %v753_v30 }
  0x61   : > { %v958_v38 = vrot.slane %v956_v37, 1  ;;  %v19172_v5 = vsel %vm796_vm2, %v923_v34, %v927_v36  ;;  %v973_v6 = vshll.u32 %v19150_v47, 16  ;;  %v951_v14 = vrot.slane %v949_v43, 1 }
  0x62   : > { %23878 = vst [vmem:[#allocation20_spill] sm:$0xff] %v19172_v5  ;;  %v980_v16 = vshll.u32 %v19157_v54, 16  ;;  %v985_v20 = vshll.u32 %v19159_v56, 16  ;;  %v1934_v23 = vshll.u32 %v19161_v57, 16  ;;  %v19184_v30 = vsel %vm796_vm2, %v935_v52, %v939_v41 }
  0x63   : > { %16284 = vmatmul.mubr.msk.bf16.gmra.mrb[12].mxu1 %vm991_vm3, %v19089_v28  ;;  %v19169_v28 = vand.u32 %v14823_v48, %v18915_v2  ;;  %23879 = vst [vmem:[#allocation21_spill] sm:$0xff] %v19184_v30  ;;  %v947_v34 = vor.u32 %v946_v58, %v942_v42  ;;  %v963_v36 = vrot.slane %v961_v62, 1  ;;  %v1939_v37 = vshll.u32 %v19165_v63, 16 }
  0x64   : > { %16420 = vmatmul.mubr.msk.bf16.gmra.mrb[12].mxu0 %vm991_vm3, %v19128_v15  ;;  %16287 = vmatprep.mubr.msk.bf16.mxu1 %vm991_vm3, %v19128_v15  ;;  %v968_v15 = vshll.u32 %v19142_v40, 16  ;;  %v959_v43 = vor.u32 %v958_v38, %v954_v60  ;;  %v966_v48 = vshrl.u32 %v19142_v40, 16  ;;  %v978_v19 = vshrl.u32 %v19157_v54, 16 }
  0x65   : > { %16423 = vmatprep.mubr.msk.bf16.mxu0 %vm991_vm3, %v19132_v21  ;;  %16473 = vmatprep.subr.bf16.mxu0 %v19169_v28  ;;  %v975_v41 = vrot.slane %v973_v6, 1  ;;  %v1441_v42 = vrot.slane %v18949_v18, 1  ;;  %v982_v52 = vrot.slane %v980_v16, 1  ;;  %v987_v58 = vrot.slane %v985_v20, 1 }
  0x66   : > { %v970_v7 = vrot.slane %v968_v15, 1  ;;  %v1932_v38 = vshrl.u32 %v19161_v57, 16  ;;  %v1936_v60 = vrot.slane %v1934_v23, 1  ;;  %v1941_v15 = vrot.slane %v1939_v37, 1 }
  0x67   : > { %v1443_v62 = vrot.slane %v18957_v25, 1  ;;  %v19202_v51 = vsel %vm796_vm2, %v947_v34, %v951_v14  ;;  %v19205_v6 = vsel %vm796_vm2, %v959_v43, %v963_v36  ;;  %v1446_v18 = vrot.slane %v18974_v45, 1 }
  0x68   : > { %v1449_v16 = vrot.slane %v18978_v49, 1  ;;  %v1450_v20 = vrot.slane %v18980_v50, 1  ;;  %v1452_v23 = vrot.slane %v19001_v4, 1  ;;  %v1453_v37 = vrot.slane %v19008_v8, 1 }
  0x69   : > { %v1456_v14 = vrot.slane %v19019_v24, 1  ;;  %v1458_v34 = vrot.slane %v19025_v11, 1  ;;  %v1459_v36 = vrot.slane %v19035_v35, 1  ;;  %v1464_v31 = vrot.slane %v19067_v61, 1 }
  0x6a   : > { %v1465_v50 = vrot.slane %v19070_v3, 1  ;;  %v1470_v24 = vrot.slane %v19084_v22, 1  ;;  %v1471_v35 = vrot.slane %v19104_v39, 1  ;;  %v1474_v3 = vrot.slane %v19121_v1, 1 }
  0x6b   : > { %16288 = vmatmul.mubr.msk.bf16.gmra.mrb[16].mxu1 %vm991_vm3, %v19132_v21  ;;  %v1536_v21 = vand.u32 %v14755_v29, %v18915_v2  ;;  %v1455_v29 = vrot.slane %v19010_v9, 1  ;;  %v971_v8 = vor.u32 %v970_v7, %v966_v48  ;;  %v983_v43 = vor.u32 %v982_v52, %v978_v19 }
  0x6c   : > { %16424 = vmatmul.mubr.msk.bf16.gmra.mrb[16].mxu0 %vm991_vm3, %v19172_v5  ;;  %16291 = vmatprep.mubr.msk.bf16.mxu1 %vm991_vm3, %v19172_v5  ;;  %v1447_v5 = vrot.slane %v18976_v46, 1  ;;  %v1462_v46 = vrot.slane %v19060_v55, 1  ;;  %v1473_v55 = vrot.slane %v19111_v53, 1  ;;  %v1937_v39 = vor.u32 %v1936_v60, %v1932_v38  ;;  %v14772_v38 = vld [vmem:[%s23699_s1 + $0x6] sm:$0x3] }
  0x6d   : > { %16427 = vmatprep.mubr.msk.bf16.mxu0 %vm991_vm3, %v19184_v30  ;;  %16337 = vmatprep.subr.bf16.mxu1 %v1536_v21  ;;  %v19236_v26 = vsel %vm796_vm2, %v971_v8, %v975_v41  ;;  %v1476_v7 = vrot.slane %v19116_v59, 1  ;;  %v1477_v48 = vrot.slane %v19135_v27, 1  ;;  %v1479_v41 = vrot.slane %v19142_v40, 1 }
  0x6e   : > { %v19250_v19 = vsel %vm796_vm2, %v1937_v39, %v1941_v15  ;;  %v1480_v52 = vrot.slane %v19150_v47, 1  ;;  %v1482_v27 = vrot.slane %v19157_v54, 1  ;;  %v1483_v47 = vrot.slane %v19159_v56, 1 }
  0x6f   : > { %v23881_v60 = vrot.slane %v18966_v32, 1  ;;  %v19283_v8 = vsel %vm1436_vm4, %v1446_v18, %v1447_v5  ;;  %v1737_v56 = vand.u32 %v14772_v38, %v18915_v2  ;;  %v19297_v32 = vsel %vm1436_vm4, %v1449_v16, %v1450_v20 }
  0x70   : > { %v19300_v5 = vsel %vm1436_vm4, %v1452_v23, %v1453_v37  ;;  %v19330_v16 = vsel %vm1436_vm4, %v1464_v31, %v1465_v50  ;;  %v23883_v20 = vrot.slane %v19094_v33, 1  ;;  %v23884_v23 = vrot.slane %v19075_v10, 1 }
  0x71   : > { %v19280_v15 = vsel %vm1436_vm4, %v1443_v62, %v23881_v60  ;;  %v23882_v62 = vrot.slane %v19045_v44, 1  ;;  %v19348_v31 = vsel %vm1436_vm4, %v1470_v24, %v1471_v35  ;;  %v19363_v33 = vsel %vm1436_vm4, %v1473_v55, %v1474_v3  ;;  %v23885_v3 = vld [vmem:[#allocation13_spill] sm:$0xff]  ;;  %v564_v60 = vld [vmem:[#allocation2 + $0x80] sm:$0x1] }
  0x72   : > { %v19345_v37 = vsel %vm1436_vm4, %v23884_v23, %v23883_v20  ;;  %v19377_v1 = vsel %vm1436_vm4, %v1479_v41, %v1480_v52  ;;  %v1438_v50 = vrot.slane %v18942_v13, 1  ;;  %v508_v41 = vld [vmem:[#allocation2 + $0x78] sm:$0x1]  ;;  %v511_v20 = vld [vmem:[#allocation2 + $0x84] sm:$0x1] }
  0x73   : > { %16292 = vmatmul.mubr.msk.bf16.gmra.mrb[20].mxu1 %vm991_vm3, %v19184_v30  ;;  %v19239_v30 = vsel %vm796_vm2, %v983_v43, %v987_v58  ;;  %v23880_v58 = vrot.slane %v18947_v17, 1  ;;  %v19327_v18 = vsel %vm1436_vm4, %v23882_v62, %v1462_v46  ;;  %v1437_v46 = vrot.slane %v18940_v12, 1  ;;  %v514_v62 = vld [vmem:[#allocation2 + $0x90] sm:$0x1] }
  0x74   : > { %16428 = vmatmul.mubr.msk.bf16.gmra.mrb[20].mxu0 %vm991_vm3, %v19202_v51  ;;  %16295 = vmatprep.mubr.msk.bf16.mxu1 %vm991_vm3, %v19202_v51  ;;  %v509_v52 = vsel %vm19575_vm6, 0, %v508_v41 }
  0x75   : > { %16431 = vmatprep.mubr.msk.bf16.mxu0 %vm991_vm3, %v19205_v6  ;;  %v19259_v43 = vsel %vm1436_vm4, %v23880_v58, %v1441_v42  ;;  %v14840_v42 = vld [vmem:[%s23699_s1 + $0xe] sm:$0x3]  ;;  %v1439_v35 = vsel %vm1436_vm4, %v1437_v46, %v1438_v50  ;;  %v481_v58 = vld [vmem:[#allocation2 + $0xc] sm:$0x1]  ;;  %510 = vst [vmem:[#allocation2 + $0x78] sm:$0x1] %v509_v52 }
  0x76   : > { %v2568_v39 = vand.u32 %v14840_v42, %v18915_v2  ;;  %v540_v42 = vld [vmem:[#allocation2 + $0x20] sm:$0x1]  ;;  %v567_v50 = vld [vmem:[#allocation2 + $0x8c] sm:$0x1] }
  0x77   : > { %v541_v38 = vsel %vm19583_vm8, 0, %v540_v42  ;;  %v523_v42 = vld [vmem:[#allocation2 + $0xb4] sm:$0x1] }
  0x78   : > { %542 = vst [vmem:[#allocation2 + $0x20] sm:$0x1] %v541_v38  ;;  %v524_v38 = vsel %vm19575_vm6, 0, %v523_v42 }
  0x79   : > { %525 = vst [vmem:[#allocation2 + $0xb4] sm:$0x1] %v524_v38 }
  0x7b   : > { %16296 = vmatmul.mubr.msk.bf16.gmra.mrb[24].mxu1 %vm991_vm3, %v19205_v6 }
  0x7c   : > { %16432 = vmatmul.mubr.msk.bf16.gmra.mrb[24].mxu0 %vm991_vm3, %v19236_v26  ;;  %16299 = vmatprep.mubr.msk.bf16.mxu1 %vm991_vm3, %v19236_v26 }
  0x7d   : > { %16435 = vmatprep.mubr.msk.bf16.mxu0 %vm991_vm3, %v19239_v30 }
  0x83   : > { %16300 = vmatmul.mubr.msk.bf16.gmra.mrb[28].mxu1 %vm991_vm3, %v19239_v30 }
  0x84   : > { %16436 = vmatmul.mubr.msk.bf16.gmra.mrb[28].mxu0 %vm991_vm3, %v19250_v19  ;;  %16305 = vmatprep.mubr.msk.bf16.mxu1 %vm991_vm3, %v18940_v12  ;;  %v14857_v12 = vld [vmem:[%s23699_s1 + $0x10] sm:$0x3] }
  0x85   : > { %16441 = vmatprep.mubr.msk.bf16.mxu0 %vm991_vm3, %v19259_v43  ;;  %v2774_v13 = vand.u32 %v14857_v12, %v18915_v2  ;;  %v754_v2 = vld [vmem:[%s18927_s24 + $0x198] sm:$0xff] }
  0x8b   : > { %16306 = vmatmul.mubr.msk.bf16.vlgmr.msra.gmra.mrb[0].mxu1 %vm991_vm3, %v18947_v17 }
  0x8c   : > { %16442 = vmatmul.mubr.msk.bf16.vlgmr.msra.gmra.mrb[0].mxu0 %vm991_vm3, %v19280_v15  ;;  %16309 = vmatprep.mubr.msk.bf16.mxu1 %vm991_vm3, %v18957_v25 }
  0x8d   : > { %16474 = vmatpush3.bf16.msra.mxu0 %v19169_v28  ;;  %16445 = vmatprep.mubr.msk.bf16.mxu0 %vm991_vm3, %v19283_v8  ;;  %v19311_v28 = vsel %vm1436_vm4, %v1455_v29, %v1456_v14  ;;  %v19366_v29 = vsel %vm1436_vm4, %v1476_v7, %v1477_v48  ;;  %v19380_v14 = vsel %vm1436_vm4, %v1482_v27, %v1483_v47  ;;  %v23886_v7 = vld [vmem:[#allocation14_spill] sm:$0xff]  ;;  %v23897_v48 = vmov 0 }
  0x8e   : > { %16338 = vmatpush3.bf16.msra.mxu1 %v1536_v21  ;;  %16507 = vmatprep.subr.bf16.mxu0 %v2568_v39  ;;  %v19314_v21 = vsel %vm1436_vm4, %v1458_v34, %v1459_v36  ;;  %v2146_v34 = vrot.slane %v19161_v57, 1  ;;  %v2147_v36 = vrot.slane %v19165_v63, 1  ;;  %v755_v63 = vld [vmem:[%s18927_s24 + $0x1a0] sm:$0xff]  ;;  %v23898_v48 = vsel %vm19583_vm8, 4294967295, %v23897_v48 }
  0x8f   : > { %16371 = vmatprep.subr.bf16.mxu1 %v1737_v56  ;;  %v19467_v55 = vpack.c.bf16 %v755_v63, %v754_v2  ;;  %23899 = vst [vmem:[#allocation14_spill] sm:$0xff] %v23898_v48  ;;  %v482_v27 = vsel %vm19575_vm6, 0, %v481_v58  ;;  %v493_v63 = vld [vmem:[#allocation2 + $0x3c] sm:$0x1]  ;;  %v499_v58 = vld [vmem:[#allocation2 + $0x54] sm:$0x1] }
  0x90   : > { %v19395_v24 = vsel %vm1436_vm4, %v2146_v34, %v2147_v36  ;;  %483 = vst [vmem:[#allocation2 + $0xc] sm:$0x1] %v482_v27  ;;  %v543_v34 = vld [vmem:[#allocation2 + $0x2c] sm:$0x1]  ;;  %v18328_v36 = vld [vmem:[%s23702_s4 + $0x50] sm:$0xff]   ;;  %v500_v27 = vsel %vm19575_vm6, 0, %v499_v58 }
  0x91   : > { %v544_v46 = vsel %vm19583_vm8, 0, %v543_v34  ;;  %501 = vst [vmem:[#allocation2 + $0x54] sm:$0x1] %v500_v27  ;;  %v3509_v48 = vld [vmem:[#allocation2 + $0x20] sm:$0x1] }
  0x92   : > { %545 = vst [vmem:[#allocation2 + $0x2c] sm:$0x1] %v544_v46 }
  0x93   : > { %16310 = vmatmul.mubr.msk.bf16.gmra.mrb[4].mxu1 %vm991_vm3, %v18974_v45 }
  0x94   : > { %16446 = vmatmul.mubr.msk.bf16.gmra.mrb[4].mxu0 %vm991_vm3, %v19297_v32  ;;  %16313 = vmatprep.mubr.msk.bf16.mxu1 %vm991_vm3, %v18978_v49 }
  0x95   : > { %16449 = vmatprep.mubr.msk.bf16.mxu0 %vm991_vm3, %v19300_v5 }
  0x9b   : > { %16314 = vmatmul.mubr.msk.bf16.gmra.mrb[8].mxu1 %vm991_vm3, %v19001_v4 }
  0x9c   : > { %16450 = vmatmul.mubr.msk.bf16.gmra.mrb[8].mxu0 %vm991_vm3, %v19311_v28  ;;  %16317 = vmatprep.mubr.msk.bf16.mxu1 %vm991_vm3, %v19010_v9 }
  0x9d   : > { %16453 = vmatprep.mubr.msk.bf16.mxu0 %vm991_vm3, %v19314_v21 }
  0xa3   : > { %16318 = vmatmul.mubr.msk.bf16.gmra.mrb[12].mxu1 %vm991_vm3, %v19025_v11 }
  0xa4   : > { %16454 = vmatmul.mubr.msk.bf16.gmra.mrb[12].mxu0 %vm991_vm3, %v19327_v18  ;;  %16321 = vmatprep.mubr.msk.bf16.mxu1 %vm991_vm3, %v19045_v44 }
  0xa5   : > { %16457 = vmatprep.mubr.msk.bf16.mxu0 %vm991_vm3, %v19330_v16 }
  0xab   : > { %16322 = vmatmul.mubr.msk.bf16.gmra.mrb[16].mxu1 %vm991_vm3, %v19067_v61 }
  0xac   : > { %16458 = vmatmul.mubr.msk.bf16.gmra.mrb[16].mxu0 %vm991_vm3, %v19345_v37  ;;  %16325 = vmatprep.mubr.msk.bf16.mxu1 %vm991_vm3, %v19075_v10 }
  0xad   : > { %16461 = vmatprep.mubr.msk.bf16.mxu0 %vm991_vm3, %v19348_v31 }
  0xb3   : > { %16326 = vmatmul.mubr.msk.bf16.gmra.mrb[20].mxu1 %vm991_vm3, %v19084_v22 }
  0xb4   : > { %16462 = vmatmul.mubr.msk.bf16.gmra.mrb[20].mxu0 %vm991_vm3, %v19363_v33  ;;  %16329 = vmatprep.mubr.msk.bf16.mxu1 %vm991_vm3, %v19111_v53 }
  0xb5   : > { %16465 = vmatprep.mubr.msk.bf16.mxu0 %vm991_vm3, %v19366_v29 }
  0xbb   : > { %16330 = vmatmul.mubr.msk.bf16.gmra.mrb[24].mxu1 %vm991_vm3, %v19116_v59 }
  0xbc   : > { %16466 = vmatmul.mubr.msk.bf16.gmra.mrb[24].mxu0 %vm991_vm3, %v19377_v1  ;;  %16333 = vmatprep.mubr.msk.bf16.mxu1 %vm991_vm3, %v19142_v40 }
  0xbd   : > { %16469 = vmatprep.mubr.msk.bf16.mxu0 %vm991_vm3, %v19380_v14 }
  0xc3   : > { %16334 = vmatmul.mubr.msk.bf16.gmra.mrb[28].mxu1 %vm991_vm3, %v19157_v54 }
  0xc4   : > { %16470 = vmatmul.mubr.msk.bf16.gmra.mrb[28].mxu0 %vm991_vm3, %v19395_v24  ;;  %16339 = vmatprep.mubr.msk.bf16.mxu1 %vm991_vm3, %v1439_v35  ;;  %v496_v35 = vld [vmem:[#allocation2 + $0x48] sm:$0x1] }
  0xc5   : > { %16475 = vmatprep.mubr.msk.bf16.mxu0 %vm991_vm3, %v18957_v25  ;;  %v497_v12 = vsel %vm19575_vm6, 0, %v496_v35 }
  0xc6   : > { %498 = vst [vmem:[#allocation2 + $0x48] sm:$0x1] %v497_v12 }
  0xcb   : > { %16340 = vmatmul.mubr.msk.bf16.vlgmr.msra.gmra.mrb[0].mxu1 %vm991_vm3, %v19259_v43  ;;  %v505_v43 = vld [vmem:[#allocation2 + $0x6c] sm:$0x1] }
  0xcc   : > { %16476 = vmatmul.mubr.msk.bf16.vlgmr.msra.gmra.mrb[0].mxu0 %vm991_vm3, %v18974_v45  ;;  %16343 = vmatprep.mubr.msk.bf16.mxu1 %vm991_vm3, %v19280_v15  ;;  %v506_v47 = vsel %vm19575_vm6, 0, %v505_v43 }
  0xcd   : > { %16508 = vmatpush3.bf16.msra.mxu0 %v2568_v39  ;;  %16479 = vmatprep.mubr.msk.bf16.mxu0 %vm991_vm3, %v18978_v49  ;;  %507 = vst [vmem:[#allocation2 + $0x6c] sm:$0x1] %v506_v47  ;;  %v18326_v39 = vld [vmem:[%s23702_s4 + $0x40] sm:$0xff]  }
  0xce   : > { %16372 = vmatpush3.bf16.msra.mxu1 %v1737_v56  ;;  %16541 = vmatprep.subr.bf16.mxu0 %v2774_v13 }
  0xcf   : > { %17498 = vmatprep.subr.bf16.mxu1 %v2774_v13 }
  0xd3   : > { %16344 = vmatmul.mubr.msk.bf16.gmra.mrb[4].mxu1 %vm991_vm3, %v19283_v8 }
  0xd4   : > { %16480 = vmatmul.mubr.msk.bf16.gmra.mrb[4].mxu0 %vm991_vm3, %v19001_v4  ;;  %16347 = vmatprep.mubr.msk.bf16.mxu1 %vm991_vm3, %v19297_v32 }
  0xd5   : > { %16483 = vmatprep.mubr.msk.bf16.mxu0 %vm991_vm3, %v19010_v9 }
  0xdb   : > { %16348 = vmatmul.mubr.msk.bf16.gmra.mrb[8].mxu1 %vm991_vm3, %v19300_v5 }
  0xdc   : > { %16484 = vmatmul.mubr.msk.bf16.gmra.mrb[8].mxu0 %vm991_vm3, %v19025_v11  ;;  %16351 = vmatprep.mubr.msk.bf16.mxu1 %vm991_vm3, %v19311_v28 }
  0xdd   : > { %16487 = vmatprep.mubr.msk.bf16.mxu0 %vm991_vm3, %v19045_v44 }
  0xe3   : > { %16352 = vmatmul.mubr.msk.bf16.gmra.mrb[12].mxu1 %vm991_vm3, %v19314_v21 }
  0xe4   : > { %16488 = vmatmul.mubr.msk.bf16.gmra.mrb[12].mxu0 %vm991_vm3, %v19067_v61  ;;  %16355 = vmatprep.mubr.msk.bf16.mxu1 %vm991_vm3, %v19327_v18 }
  0xe5   : > { %16491 = vmatprep.mubr.msk.bf16.mxu0 %vm991_vm3, %v19075_v10 }
  0xeb   : > { %16356 = vmatmul.mubr.msk.bf16.gmra.mrb[16].mxu1 %vm991_vm3, %v19330_v16 }
  0xec   : > { %16492 = vmatmul.mubr.msk.bf16.gmra.mrb[16].mxu0 %vm991_vm3, %v19084_v22  ;;  %16359 = vmatprep.mubr.msk.bf16.mxu1 %vm991_vm3, %v19345_v37 }
  0xed   : > { %16495 = vmatprep.mubr.msk.bf16.mxu0 %vm991_vm3, %v19111_v53 }
  0xf3   : > { %16360 = vmatmul.mubr.msk.bf16.gmra.mrb[20].mxu1 %vm991_vm3, %v19348_v31 }
  0xf4   : > { %16496 = vmatmul.mubr.msk.bf16.gmra.mrb[20].mxu0 %vm991_vm3, %v19116_v59  ;;  %16363 = vmatprep.mubr.msk.bf16.mxu1 %vm991_vm3, %v19363_v33 }
  0xf5   : > { %16499 = vmatprep.mubr.msk.bf16.mxu0 %vm991_vm3, %v19142_v40 }
  0xfb   : > { %16364 = vmatmul.mubr.msk.bf16.gmra.mrb[24].mxu1 %vm991_vm3, %v19366_v29 }
  0xfc   : > { %16500 = vmatmul.mubr.msk.bf16.gmra.mrb[24].mxu0 %vm991_vm3, %v19157_v54  ;;  %16367 = vmatprep.mubr.msk.bf16.mxu1 %vm991_vm3, %v19377_v1 }
  0xfd   : > { %16503 = vmatprep.mubr.msk.bf16.mxu0 %vm991_vm3, %v19161_v57 }
 0x103   : > { %16368 = vmatmul.mubr.msk.bf16.gmra.mrb[28].mxu1 %vm991_vm3, %v19380_v14 }
 0x104   : > { %16504 = vmatmul.mubr.msk.bf16.gmra.mrb[28].mxu0 %vm991_vm3, %v19467_v55  ;;  %16373 = vmatprep.mubr.msk.bf16.mxu1 %vm991_vm3, %v18947_v17  ;;  %v23887_v17 = vld [vmem:[#allocation15_spill] sm:$0xff] }
 0x105   : > { %16509 = vmatprep.mubr.msk.bf16.mxu0 %vm991_vm3, %v18998_v0  ;;  %v23891_v0 = vld [vmem:[#allocation19_spill] sm:$0xff] }
 0x10b   : > { %16374 = vmatmul.mubr.msk.bf16.vlgmr.msra.gmra.mrb[0].mxu1 %vm991_vm3, %v18957_v25  ;;  %v23888_v25 = vld [vmem:[#allocation16_spill] sm:$0xff] }
 0x10c   : > { %16510 = vmatmul.mubr.msk.bf16.vlgmr.msra.gmra.mrb[0].mxu0 %vm991_vm3, %v23885_v3  ;;  %16377 = vmatprep.mubr.msk.bf16.mxu1 %vm991_vm3, %v18974_v45  ;;  %v23889_v45 = vld [vmem:[#allocation17_spill] sm:$0xff]  ;;  %v494_v3 = vsel %vm19575_vm6, 0, %v493_v63 }
 0x10d   : > { %16542 = vmatpush3.bf16.msra.mxu0 %v2774_v13  ;;  %16513 = vmatprep.mubr.msk.bf16.mxu0 %vm991_vm3, %v23886_v7  ;;  %495 = vst [vmem:[#allocation2 + $0x3c] sm:$0x1] %v494_v3 }
 0x10e   : > { %17499 = vmatpush3.bf16.msra.mxu1 %v2774_v13  ;;  %v520_v13 = vld [vmem:[#allocation2 + $0xa8] sm:$0x1] }
 0x10f   : > { %16575 = vmatprep.subr.bf16.mxu1 %v18326_v39  ;;  %v521_v2 = vsel %vm19575_vm6, 0, %v520_v13 }
 0x110   : > { %522 = vst [vmem:[#allocation2 + $0xa8] sm:$0x1] %v521_v2  ;;  %v18333_v2 = vld [vmem:[%s23702_s4 + $0x78] sm:$0xff]  }
 0x113   : > { %16378 = vmatmul.mubr.msk.bf16.gmra.mrb[4].mxu1 %vm991_vm3, %v18978_v49  ;;  %v23890_v49 = vld [vmem:[#allocation18_spill] sm:$0xff] }
 0x114   : > { %16514 = vmatmul.mubr.msk.bf16.gmra.mrb[4].mxu0 %vm991_vm3, %v23887_v17  ;;  %16381 = vmatprep.mubr.msk.bf16.mxu1 %vm991_vm3, %v19001_v4  ;;  %v23892_v4 = vld [vmem:[#allocation20_spill] sm:$0xff] }
 0x115   : > { %16517 = vmatprep.mubr.msk.bf16.mxu0 %vm991_vm3, %v23888_v25  ;;  %v552_v17 = vld [vmem:[#allocation2 + $0x50] sm:$0x1] }
 0x116   : > { %v576_v25 = vld [vmem:[#allocation2 + $0xb0] sm:$0x1] }
 0x11b   : > { %16382 = vmatmul.mubr.msk.bf16.gmra.mrb[8].mxu1 %vm991_vm3, %v19010_v9  ;;  %v23893_v9 = vld [vmem:[#allocation21_spill] sm:$0xff] }
 0x11c   : > { %16518 = vmatmul.mubr.msk.bf16.gmra.mrb[8].mxu0 %vm991_vm3, %v23889_v45  ;;  %16385 = vmatprep.mubr.msk.bf16.mxu1 %vm991_vm3, %v19025_v11  ;;  %v756_v11 = vld [vmem:[%s18927_s24 + $0x1a8] sm:$0x3]  ;;  %v553_v45 = vsel %vm19583_vm8, 0, %v552_v17  ;;  %s15600_s24 = sshll.u32 %s18848_s29, 4  ;;  %s18756_s29 = smov [#allocation7]  }
 0x11d   : > { %16521 = vmatprep.mubr.msk.bf16.mxu0 %vm991_vm3, %v23890_v49  ;;  %v577_v49 = vsel %vm19583_vm8, 0, %v576_v25  ;;  %554 = vst [vmem:[#allocation2 + $0x50] sm:$0x1] %v553_v45  ;;  %v23900_v25 = vmov 0  ;;  %s23656_s17 = scalar_lea.hbm %s23711_s13, %s15600_s24  ;;  %s18684_s20 = sshll.u32 %s18756_s29, 4  ;;  %s18685_s20 = int_to_ptr.vmem [resolvable:$false] %s18684_s20 }
 0x11e   : > { %578 = vst [vmem:[#allocation2 + $0xb0] sm:$0x1] %v577_v49  ;;  %v23901_v25 = vsel %vm19706_vm11, 4294967295, %v23900_v25  ;;  %s18686_s22 = scalar_lea.vmem %s18685_s20, 32  ;;  %p18687_p2 = scmp.lt.s32.totalorder %s23658_s15, %s18685_s20 }
 0x11f   : > { %23902 = vst [vmem:[#allocation15_spill] sm:$0xff] %v23901_v25 }
 0x123   : > { %16386 = vmatmul.mubr.msk.bf16.gmra.mrb[12].mxu1 %vm991_vm3, %v19045_v44  ;;  %v792_v44 = vpack.c.bf16 %v756_v11, %v756_v11  ;;  %v549_v11 = vld [vmem:[#allocation2 + $0x44] sm:$0x1] }
 0x124   : > { %16522 = vmatmul.mubr.msk.bf16.gmra.mrb[12].mxu0 %vm991_vm3, %v23891_v0  ;;  %16389 = vmatprep.mubr.msk.bf16.mxu1 %vm991_vm3, %v19067_v61  ;;  %v2553_v61 = vshll.u32 %v19467_v55, 16  ;;  %v18329_v0 = vld [vmem:[%s23702_s4 + $0x58] sm:$0xff]  }
 0x125   : > { %16525 = vmatprep.mubr.msk.bf16.mxu0 %vm991_vm3, %v23892_v4  ;;  %v18330_v4 = vld [vmem:[%s23702_s4 + $0x60] sm:$0xff]  }
 0x12b   : > { %16390 = vmatmul.mubr.msk.bf16.gmra.mrb[16].mxu1 %vm991_vm3, %v19075_v10  ;;  %v2551_v10 = vshrl.u32 %v19467_v55, 16 }
 0x12c   : > { %16526 = vmatmul.mubr.msk.bf16.gmra.mrb[16].mxu0 %vm991_vm3, %v23893_v9  ;;  %16393 = vmatprep.mubr.msk.bf16.mxu1 %vm991_vm3, %v19084_v22  ;;  %v2555_v22 = vrot.slane %v2553_v61, 1 }
 0x12d   : > { %16529 = vmatprep.mubr.msk.bf16.mxu0 %vm991_vm3, %v19202_v51  ;;  %v2558_v51 = vshll.u32 %v792_v44, 16 }
 0x133   : > { %16394 = vmatmul.mubr.msk.bf16.gmra.mrb[20].mxu1 %vm991_vm3, %v19111_v53  ;;  %v2560_v53 = vrot.slane %v2558_v51, 1 }
 0x134   : > { %16530 = vmatmul.mubr.msk.bf16.gmra.mrb[20].mxu0 %vm991_vm3, %v19205_v6  ;;  %16397 = vmatprep.mubr.msk.bf16.mxu1 %vm991_vm3, %v19116_v59  ;;  %v484_v6 = vld [vmem:[#allocation2 + $0x18] sm:$0x1] }
 0x135   : > { %16533 = vmatprep.mubr.msk.bf16.mxu0 %vm991_vm3, %v19236_v26  ;;  %v2556_v26 = vor.u32 %v2555_v22, %v2551_v10  ;;  %v550_v10 = vsel %vm19583_vm8, 0, %v549_v11  ;;  %v573_v22 = vld [vmem:[#allocation2 + $0xa4] sm:$0x1] }
 0x136   : > { %551 = vst [vmem:[#allocation2 + $0x44] sm:$0x1] %v550_v10 }
 0x137   : > { %v2561_v59 = vsel %vm796_vm2, %v2556_v26, %v2560_v53  ;;  %v574_v26 = vsel %vm19583_vm8, 0, %v573_v22  ;;  %vm20380_vm2 = vmor %vm4706_vm0, %vm4707_vm1 }
 0x138   : > { %575 = vst [vmem:[#allocation2 + $0xa4] sm:$0x1] %v574_v26 }
 0x13b   : > { %16398 = vmatmul.mubr.msk.bf16.gmra.mrb[24].mxu1 %vm991_vm3, %v19142_v40  ;;  %v2765_v40 = vrot.slane %v19467_v55, 1  ;;  %v517_v55 = vld [vmem:[#allocation2 + $0x9c] sm:$0x1] }
 0x13c   : > { %16534 = vmatmul.mubr.msk.bf16.gmra.mrb[24].mxu0 %vm991_vm3, %v19239_v30  ;;  %16401 = vmatprep.mubr.msk.bf16.mxu1 %vm991_vm3, %v19157_v54  ;;  %v2766_v54 = vrot.slane %v792_v44, 1  ;;  %v23894_v30 = vmov 0  ;;  %v518_v7 = vsel %vm19575_vm6, 0, %v517_v55  ;;  %v18752_v44 = vmov 0  }
 0x13d   : > { %16537 = vmatprep.mubr.msk.bf16.mxu0 %vm991_vm3, %v19250_v19  ;;  %v23895_v30 = vsel %vm19575_vm6, 4294967295, %v23894_v30  ;;  %v485_v19 = vsel %vm19575_vm6, 0, %v484_v6  ;;  %519 = vst [vmem:[#allocation2 + $0x9c] sm:$0x1] %v518_v7  ;;  %468 = vst [vmem:[#allocation2] sm:$0xf] %v18752_v44 }
 0x13e   : > { %23896 = vst [vmem:[#allocation13_spill] sm:$0xff] %v23895_v30  ;;  %486 = vst [vmem:[#allocation2 + $0x18] sm:$0x1] %v485_v19 }
 0x13f   : > { %469 = vst [vmem:[#allocation2 + $0x4] sm:$0xf] %v18752_v44  ;;  %470 = vst [vmem:[#allocation2 + $0x8] sm:$0x1] %v18752_v44 }
 0x140   : > { %472 = vst [vmem:[#allocation2 + $0xcc] sm:$0xf] %v18752_v44  ;;  %473 = vst [vmem:[#allocation2 + $0xd0] sm:$0xf] %v18752_v44 }
 0x141   : > { %474 = vst [vmem:[#allocation2 + $0xd4] sm:$0x1] %v18752_v44  ;;  %588 = vst [vmem:[#allocation3] sm:$0xf] %v18752_v44 }
 0x142   : > { %589 = vst [vmem:[#allocation3 + $0x4] sm:$0xf] %v18752_v44  ;;  %590 = vst [vmem:[#allocation3 + $0x8] sm:$0x1] %v18752_v44 }
 0x143   : > { %16402 = vmatmul.mubr.msk.bf16.gmra.mrb[28].mxu1 %vm991_vm3, %v19161_v57  ;;  %v2767_v57 = vsel %vm1436_vm4, %v2765_v40, %v2766_v54  ;;  %592 = vst [vmem:[#allocation3 + $0xcc] sm:$0xf] %v18752_v44  ;;  %593 = vst [vmem:[#allocation3 + $0xd0] sm:$0xf] %v18752_v44  ;;  %v526_v40 = vld [vmem:[#allocation2 + $0xc0] sm:$0x1] }
 0x144   : > { %16538 = vmatmul.mubr.msk.bf16.gmra.mrb[28].mxu0 %vm991_vm3, %v2561_v59  ;;  %16559 = vmatprep.mubr.msk.bf16.mxu1 %vm991_vm3, %v19345_v37  ;;  %v512_v37 = vsel %vm19575_vm6, 0, %v511_v20  ;;  %594 = vst [vmem:[#allocation3 + $0xd4] sm:$0x1] %v18752_v44  ;;  %v502_v59 = vld [vmem:[#allocation2 + $0x60] sm:$0x1]  ;;  %v527_v19 = vsel %vm19575_vm6, 0, %v526_v40 }
 0x145   : > { %16543 = vmatprep.mubr.msk.bf16.mxu0 %vm991_vm3, %v19280_v15  ;;  %v565_v15 = vsel %vm19583_vm8, 0, %v564_v60  ;;  %513 = vst [vmem:[#allocation2 + $0x84] sm:$0x1] %v512_v37  ;;  %v478_v54 = vld [vmem:[#allocation2] sm:$0x1]  ;;  %v503_v6 = vsel %vm19575_vm6, 0, %v502_v59 }
 0x146   : > { %566 = vst [vmem:[#allocation2 + $0x80] sm:$0x1] %v565_v15  ;;  %v479_v41 = vsel %vm19575_vm6, 0, %v478_v54  ;;  %504 = vst [vmem:[#allocation2 + $0x60] sm:$0x1] %v503_v6  ;;  %v18332_v37 = vld [vmem:[%s23702_s4 + $0x70] sm:$0xff]  }
 0x147   : > { %528 = vst [vmem:[#allocation2 + $0xc0] sm:$0x1] %v527_v19  ;;  %480 = vst [vmem:[#allocation2] sm:$0x1] %v479_v41  ;;  %v534_v60 = vld [vmem:[#allocation2 + $0x8] sm:$0x1] }
 0x148   : > { %v535_v15 = vsel %vm19583_vm8, 0, %v534_v60  ;;  %v18334_v40 = vld [vmem:[%s23702_s4] sm:$0xff]  }
 0x149   : > { %536 = vst [vmem:[#allocation2 + $0x8] sm:$0x1] %v535_v15 }
 0x14b   : > { %16560 = vmatmul.mubr.msk.bf16.vlgmr.msra.gmra.mrb[32].mxu1 %vm991_vm3, %v19348_v31  ;;  %v546_v31 = vld [vmem:[#allocation2 + $0x38] sm:$0x1] }
 0x14c   : > { %16544 = vmatmul.mubr.msk.bf16.vlgmr.msra.gmra.mrb[0].mxu0 %vm991_vm3, %v19283_v8  ;;  %16563 = vmatprep.mubr.msk.bf16.mxu1 %vm991_vm3, %v19363_v33  ;;  %v537_v8 = vld [vmem:[#allocation2 + $0x14] sm:$0x1]  ;;  %v570_v33 = vld [vmem:[#allocation2 + $0x98] sm:$0x1] }
 0x14d   : > { %16547 = vmatprep.mubr.msk.bf16.mxu0 %vm991_vm3, %v19297_v32  ;;  %v538_v56 = vsel %vm19583_vm8, 0, %v537_v8  ;;  %16576 = vmatpush3.bf16.msra.mxu1 %v18326_v39  ;;  %v561_v32 = vld [vmem:[#allocation2 + $0x74] sm:$0x1]  ;;  %v18331_v8 = vld [vmem:[%s23702_s4 + $0x68] sm:$0xff]  }
 0x14e   : > { %539 = vst [vmem:[#allocation2 + $0x14] sm:$0x1] %v538_v56 }
 0x153   : > { %16564 = vmatmul.mubr.msk.bf16.gmra.mrb[36].mxu1 %vm991_vm3, %v19366_v29  ;;  %v547_v29 = vsel %vm19583_vm8, 0, %v546_v31 }
 0x154   : > { %16548 = vmatmul.mubr.msk.bf16.gmra.mrb[4].mxu0 %vm991_vm3, %v19300_v5  ;;  %16567 = vmatprep.mubr.msk.bf16.mxu1 %vm991_vm3, %v19377_v1  ;;  %v562_v5 = vsel %vm19583_vm8, 0, %v561_v32  ;;  %v571_v1 = vsel %vm19583_vm8, 0, %v570_v33  ;;  %548 = vst [vmem:[#allocation2 + $0x38] sm:$0x1] %v547_v29  ;;  %v3612_v32 = vld [vmem:[#allocation2] sm:$0xf] }
 0x155   : > { %16551 = vmatprep.mubr.msk.bf16.mxu0 %vm991_vm3, %v19311_v28  ;;  %563 = vst [vmem:[#allocation2 + $0x74] sm:$0x1] %v562_v5  ;;  %v490_v28 = vld [vmem:[#allocation2 + $0x30] sm:$0x1]  ;;  %572 = vst [vmem:[#allocation2 + $0x98] sm:$0x1] %v571_v1 }
 0x156   : > { %v3613_v5 = vld [vmem:[#allocation2 + $0x4] sm:$0xf]  ;;  %v582_v33 = vld [vmem:[#allocation2 + $0xc8] sm:$0x1] }
 0x157   : > { %v583_v34 = vsel %vm19583_vm8, 0, %v582_v33 }
 0x158   : > { %584 = vst [vmem:[#allocation2 + $0xc8] sm:$0x1] %v583_v34 }
 0x15b   : > { %16568 = vmatmul.mubr.msk.bf16.gmra.mrb[40].mxu1 %vm991_vm3, %v19380_v14  ;;  %v18327_v14 = vld [vmem:[%s23702_s4 + $0x48] sm:$0xff]  }
 0x15c   : > { %16552 = vmatmul.mubr.msk.bf16.gmra.mrb[8].mxu0 %vm991_vm3, %v19314_v21  ;;  %16571 = vmatprep.mubr.msk.bf16.mxu1 %vm991_vm3, %v19395_v24  ;;  %v491_v21 = vsel %vm19575_vm6, 0, %v490_v28  ;;  %v568_v24 = vsel %vm19583_vm8, 0, %v567_v50  ;;  %v555_v50 = vld [vmem:[#allocation2 + $0x5c] sm:$0x1] }
 0x15d   : > { %16555 = vmatprep.mubr.msk.bf16.mxu0 %vm991_vm3, %v19327_v18  ;;  %492 = vst [vmem:[#allocation2 + $0x30] sm:$0x1] %v491_v21  ;;  %v515_v18 = vsel %vm19575_vm6, 0, %v514_v62  ;;  %16577 = vmatprep.subr.bf16.mxu1 %v18327_v14  ;;  %569 = vst [vmem:[#allocation2 + $0x8c] sm:$0x1] %v568_v24  ;;  %v3680_v21 = vshrl.u32 %v3612_v32, 16 }
 0x15e   : > { %516 = vst [vmem:[#allocation2 + $0x90] sm:$0x1] %v515_v18  ;;  %16578 = vmatpush3.bf16.msra.mxu1 %v18327_v14  ;;  %v3683_v62 = vshll.u32 %v3612_v32, 16  ;;  %v3689_v18 = vshll.u32 %v3613_v5, 16  ;;  %v579_v24 = vld [vmem:[#allocation2 + $0xbc] sm:$0x1] }
 0x15f   : > { %16579 = vmatprep.subr.bf16.mxu1 %v18328_v36  ;;  %v3682_v29 = vrot.slane %v3680_v21, 4  ;;  %v556_v12 = vsel %vm19583_vm8, 0, %v555_v50  ;;  %v580_v13 = vsel %vm19583_vm8, 0, %v579_v24 }
 0x160   : > { %v3685_v1 = vrot.slane %v3683_v62, 5  ;;  %v3691_v14 = vrot.slane %v3689_v18, 5  ;;  %557 = vst [vmem:[#allocation2 + $0x5c] sm:$0x1] %v556_v12  ;;  %581 = vst [vmem:[#allocation2 + $0xbc] sm:$0x1] %v580_v13 }
 0x162   : > { %16580 = vmatpush3.bf16.msra.mxu1 %v18328_v36  ;;  %v3660_v36 = vld [vmem:[#allocation2 + $0x8] sm:$0x1]  ;;  %v3686_v35 = vor.u32 %v3685_v1, %v3682_v29 }
 0x163   : > { %16572 = vmatmul.mubr.msk.bf16.gmra.mrb[44].mxu1 %vm991_vm3, %v2767_v57  ;;  %16581 = vmatprep.subr.bf16.mxu1 %v18329_v0  ;;  %v3699_v55 = vshll.u32 %v3660_v36, 16 }
 0x164   : > { %16556 = vmatmul.mubr.msk.bf16.gmra.mrb[12].mxu0 %vm991_vm3, %v19330_v16  ;;  %v487_v16 = vld [vmem:[#allocation2 + $0x24] sm:$0x1]  ;;  %v3687_v7 = vrot.slane %v3686_v35, 4  ;;  %vm18754_vm3 = vmmov 0  }
 0x165   : > { %v488_v23 = vsel %vm19575_vm6, 0, %v487_v16  ;;  %v3693_v16 = vshrl.u32 %v3613_v5, 16  ;;  %v3701_v49 = vrot.slane %v3699_v55, 5 }
 0x166   : > { %489 = vst [vmem:[#allocation2 + $0x24] sm:$0x1] %v488_v23  ;;  %16582 = vmatpush3.bf16.msra.mxu1 %v18329_v0  ;;  %v558_v23 = vld [vmem:[#allocation2 + $0x68] sm:$0x1] }
 0x167   : > { %16583 = vmatprep.subr.bf16.mxu1 %v18330_v4  ;;  %v559_v31 = vsel %vm19583_vm8, 0, %v558_v23  ;;  %v3695_v46 = vrot.slane %v3693_v16, 4 }
 0x168   : > { %560 = vst [vmem:[#allocation2 + $0x68] sm:$0x1] %v559_v31 }
 0x169   : > { %v3696_v63 = vor.u32 %v3695_v46, %v3691_v14 }
 0x16a   : > { %16584 = vmatpush3.bf16.msra.mxu1 %v18330_v4  ;;  %v3692_v4 = vsel %vm19706_vm11, %v3687_v7, %v3691_v14 }
 0x16b   : > { %16585 = vmatprep.subr.bf16.mxu1 %v18331_v8  ;;  %v3697_v45 = vrot.slane %v3696_v63, 4 }
 0x16d   : > { %v3702_v44 = vsel %vm19706_vm11, %v3697_v45, %v3701_v49 }
 0x16e   : > { %16586 = vmatpush3.bf16.msra.mxu1 %v18331_v8  ;;  %v14924_v10 = vcombine.low %v3692_v4, %v3702_v44 }
 0x16f   : > { %16587 = vmatprep.subr.bf16.mxu1 %v18332_v37 }
 0x170   : > { %16591 = vmatprep.mubr.bf16.mxu1 %v14924_v10 }
 0x172   : > { %16588 = vmatpush3.bf16.msra.mxu1 %v18332_v37 }
 0x173   : > { %16589 = vmatprep.subr.bf16.mxu1 %v18333_v2 }
 0x176   : > { %16590 = vmatpush3.bf16.msra.mxu1 %v18333_v2 }
 0x177   : > { %16623 = vmatprep.subr.bf16.mxu1 %v18334_v40 }
 0x1de   : > { %v19644_v9 = vpop.f32.mrb[0].mxu1 }
 0x1df   : > { %v19646_v61 = vpop.f32.mrb[1].mxu1 }
 0x1e0   : > { %v19650_v51 = vpop.f32.mrb[2].mxu1 }
 0x1e1   : > { %v19654_v53 = vpop.f32.mrb[3].mxu1 }
 0x1e6   : > { %v19656_v57 = vpop.f32.mrb[4].mxu1 }
 0x1e7   : > { %v19664_v52 = vpop.f32.mrb[5].mxu1 }
 0x1e8   : > { %v19666_v43 = vpop.f32.mrb[6].mxu1 }
 0x1e9   : > { %v19670_v47 = vpop.f32.mrb[7].mxu1 }
 0x1ee   : > { %v19679_v39 = vpop.f32.mrb[8].mxu1 }
 0x1ef   : > { %v19681_v56 = vpop.f32.mrb[9].mxu1 }
 0x1f0   : > { %v19683_v28 = vpop.f32.mrb[10].mxu1 }
 0x1f1   : > { %v19685_v20 = vpop.f32.mrb[11].mxu1 }
 0x1f6   : > { %v19701_v3 = vpop.f32.mrb[12].mxu1 }
 0x1f7   : > { %v19703_v17 = vpop.f32.mrb[13].mxu1 }
 0x1f8   : > { %v19710_v0 = vpop.f32.mrb[14].mxu1 }
 0x1f9   : > { %23903 = vst [vmem:[#allocation16_spill] sm:$0xff] %v19710_v0  ;;  %v19714_v11 = vpop.f32.mrb[15].mxu1 }
 0x1fa   : > { %23904 = vst [vmem:[#allocation17_spill] sm:$0xff] %v19714_v11 }
 0x1fe   : > { %v16391_v22 = vpop.f32.mrb[16].mxu1 }
 0x1ff   : > { %v16527_v26 = vpop.f32.mrb[16].mxu0  ;;  %v1837_v59 = vpop.f32.mrb[17].mxu1 }
 0x200   : > { %v17516_v54 = vadd.f32 %v16527_v26, %v16391_v22  ;;  %v2668_v6 = vpop.f32.mrb[17].mxu0  ;;  %v16392_v19 = vpop.f32.mrb[18].mxu1 }
 0x201   : > { %v17518_v41 = vadd.f32 %v2668_v6, %v1837_v59  ;;  %v16528_v58 = vpop.f32.mrb[18].mxu0  ;;  %v1840_v27 = vpop.f32.mrb[19].mxu1  ;;  %v19748_v6 = vld [vmem:[%s23700_s2] ss:$0 sm:$0xff] }
 0x202   : > { %v17520_v42 = vadd.f32 %v16528_v58, %v16392_v19  ;;  %v2671_v38 = vpop.f32.mrb[19].mxu0 }
 0x203   : > { %v17522_v60 = vadd.f32 %v2671_v38, %v1840_v27 }
 0x206   : > { %v16395_v15 = vpop.f32.mrb[20].mxu1 }
 0x207   : > { %v16531_v8 = vpop.f32.mrb[20].mxu0  ;;  %v1853_v32 = vpop.f32.mrb[21].mxu1 }
 0x208   : > { %v19721_v5 = vadd.f32 %v16531_v8, %v16395_v15  ;;  %v2684_v21 = vpop.f32.mrb[21].mxu0  ;;  %v16396_v62 = vpop.f32.mrb[22].mxu1  ;;  %v19753_v15 = vld [vmem:[%s23701_s3] ss:$0 sm:$0xff] }
 0x209   : > { %v19723_v18 = vadd.f32 %v2684_v21, %v1853_v32  ;;  %v16532_v16 = vpop.f32.mrb[22].mxu0  ;;  %v1856_v23 = vpop.f32.mrb[23].mxu1 }
 0x20a   : > { %v19725_v37 = vadd.f32 %v16532_v16, %v16396_v62  ;;  %v2687_v31 = vpop.f32.mrb[23].mxu0 }
 0x20b   : > { %v19727_v33 = vadd.f32 %v2687_v31, %v1856_v23 }
 0x20e   : > { %v16399_v29 = vpop.f32.mrb[24].mxu1 }
 0x20f   : > { %v16535_v1 = vpop.f32.mrb[24].mxu0  ;;  %v1869_v14 = vpop.f32.mrb[25].mxu1 }
 0x210   : > { %v19729_v34 = vadd.f32 %v16535_v1, %v16399_v29  ;;  %v2700_v36 = vpop.f32.mrb[25].mxu0  ;;  %v16400_v46 = vpop.f32.mrb[26].mxu1 }
 0x211   : > { %v19731_v50 = vadd.f32 %v2700_v36, %v1869_v14  ;;  %v16536_v24 = vpop.f32.mrb[26].mxu0  ;;  %v1872_v35 = vpop.f32.mrb[27].mxu1 }
 0x212   : > { %v19733_v12 = vadd.f32 %v16536_v24, %v16400_v46  ;;  %v2703_v13 = vpop.f32.mrb[27].mxu0 }
 0x213   : > { %v19735_v2 = vadd.f32 %v2703_v13, %v1872_v35 }
 0x216   : > { %v16403_v63 = vpop.f32.mrb[28].mxu1 }
 0x217   : > { %v16539_v55 = vpop.f32.mrb[28].mxu0  ;;  %v1885_v7 = vpop.f32.mrb[29].mxu1 }
 0x218   : > { %v19737_v45 = vadd.f32 %v16539_v55, %v16403_v63  ;;  %v2716_v49 = vpop.f32.mrb[29].mxu0  ;;  %v16404_v4 = vpop.f32.mrb[30].mxu1 }
 0x219   : > { %v19739_v44 = vadd.f32 %v2716_v49, %v1885_v7  ;;  %v16540_v10 = vpop.f32.mrb[30].mxu0  ;;  %v1888_v22 = vpop.f32.mrb[31].mxu1 }
 0x21a   : > { %v19741_v26 = vadd.f32 %v16540_v10, %v16404_v4  ;;  %v2719_v59 = vpop.f32.mrb[31].mxu0 }
 0x21b   : > { %v19743_v40 = vadd.f32 %v2719_v59, %v1888_v22 }
 0x21c   : > { %23905 = vst [vmem:[#allocation18_spill] sm:$0xff] %v19741_v26 }
 0x21d   : > { %23906 = vst [vmem:[#allocation19_spill] sm:$0xff] %v19743_v40 }
 0x21e   : > { %v16561_v19 = vpop.f32.mrb[32].mxu1 }
 0x21f   : > { %v16545_v58 = vpop.f32.mrb[0].mxu0  ;;  %v17517_v27 = vadd.f32 %v17516_v54, %v16561_v19  ;;  %v2874_v38 = vpop.f32.mrb[33].mxu1 }
 0x220   : > { %v17500_v8 = vadd.f32 %v16545_v58, %v19644_v9  ;;  %v2810_v32 = vpop.f32.mrb[1].mxu0  ;;  %v17519_v21 = vadd.f32 %v17518_v41, %v2874_v38  ;;  %v16562_v62 = vpop.f32.mrb[34].mxu1 }
 0x221   : > { %v2993_v16 = vmul.f32 %v17517_v27, %v19748_v6  ;;  %v17501_v23 = vadd.f32 %v2810_v32, %v19646_v61  ;;  %v16546_v31 = vpop.f32.mrb[2].mxu0  ;;  %v17521_v29 = vadd.f32 %v17520_v42, %v16562_v62  ;;  %v2877_v1 = vpop.f32.mrb[35].mxu1 }
 0x222   : > { %v2977_v54 = vmul.f32 %v17500_v8, %v19748_v6  ;;  %v2991_v14 = vmul.f32 %v17519_v21, %v19748_v6  ;;  %v17502_v36 = vadd.f32 %v16546_v31, %v19650_v51  ;;  %v2813_v46 = vpop.f32.mrb[3].mxu0  ;;  %v17523_v24 = vadd.f32 %v17522_v60, %v2877_v1 }
 0x223   : > { %v3031_v9 = vadd.f32 %v19753_v15, %v2993_v16  ;;  %v2975_v41 = vmul.f32 %v17501_v23, %v19748_v6  ;;  %v2994_v35 = vmul.f32 %v17521_v29, %v19748_v6  ;;  %v17503_v13 = vadd.f32 %v2813_v46, %v19654_v53 }
 0x224   : > { %v3015_v61 = vadd.f32 %v19753_v15, %v2977_v54  ;;  %v3029_v42 = vadd.f32 %v19753_v15, %v2991_v14  ;;  %v2978_v63 = vmul.f32 %v17502_v36, %v19748_v6  ;;  %v2992_v55 = vmul.f32 %v17523_v24, %v19748_v6 }
 0x225   : > { %v3063_v7 = vmax.f32 %v3031_v9, 0.0  ;;  %v3013_v51 = vadd.f32 %v19753_v15, %v2975_v41  ;;  %v3032_v60 = vadd.f32 %v19753_v15, %v2994_v35  ;;  %v2976_v49 = vmul.f32 %v17503_v13, %v19748_v6 }
 0x226   : > { %v3047_v4 = vmax.f32 %v3015_v61, 0.0  ;;  %v3061_v10 = vmax.f32 %v3029_v42, 0.0  ;;  %v3016_v22 = vadd.f32 %v19753_v15, %v2978_v63  ;;  %v19774_v53 = vadd.f32 %v19753_v15, %v2992_v55  ;;  %v19776_v59 = vpop.f32.mrb[36].mxu1  ;;  %v3505_v42 = vld [vmem:[#allocation2 + $0x18] sm:$0xf] }
 0x227   : > { %v15621_v19 = vpack.c.bf16 %v3063_v7, %v3063_v7  ;;  %v3045_v58 = vmax.f32 %v3013_v51, 0.0  ;;  %v3064_v27 = vmax.f32 %v3032_v60, 0.0  ;;  %v19779_v38 = vadd.f32 %v19753_v15, %v2976_v49  ;;  %v19781_v8 = vpop.f32.mrb[4].mxu0  ;;  %v19783_v32 = vpop.f32.mrb[37].mxu1 }
 0x228   : > { %v15605_v21 = vpack.c.bf16 %v3047_v4, %v3047_v4  ;;  %v15619_v62 = vpack.c.bf16 %v3061_v10, %v3061_v10  ;;  %v3048_v16 = vmax.f32 %v3016_v22, 0.0  ;;  %v3062_v23 = vmax.f32 %v19774_v53, 0.0  ;;  %v19786_v31 = vpop.f32.mrb[5].mxu0  ;;  %v19788_v29 = vpop.f32.mrb[38].mxu1  ;;  %v3561_v4 = vld [vmem:[#allocation2 + $0x78] sm:$0xf] }
 0x229   : > { %v3329_v1 = vshrl.u32 %v15621_v19, 16  ;;  %v3332_v54 = vshll.u32 %v15621_v19, 16  ;;  %v15603_v14 = vpack.c.bf16 %v3045_v58, %v3045_v58  ;;  %v15622_v36 = vpack.c.bf16 %v3064_v27, %v3064_v27  ;;  %v19790_v46 = vpop.f32.mrb[6].mxu0  ;;  %v19792_v24 = vpop.f32.mrb[39].mxu1 }
 0x22a   : > { %v3193_v9 = vshrl.u32 %v15605_v21, 16  ;;  %v3196_v41 = vshll.u32 %v15605_v21, 16  ;;  %v3312_v35 = vshrl.u32 %v15619_v62, 16  ;;  %v3315_v13 = vshll.u32 %v15619_v62, 16  ;;  %v19794_v61 = vpop.f32.mrb[7].mxu0 }
 0x22b   : > { %v3331_v63 = vrot.slane %v3329_v1, 7  ;;  %v3176_v55 = vshrl.u32 %v15603_v14, 16  ;;  %v3179_v7 = vshll.u32 %v15603_v14, 16  ;;  %v15606_v51 = vpack.c.bf16 %v3048_v16, %v3048_v16  ;;  %v3554_v21 = vld [vmem:[#allocation2 + $0x6c] sm:$0xf] }
 0x22c   : > { %v3195_v60 = vrot.slane %v3193_v9, 7  ;;  %v23907_v49 = vmov 0  ;;  %v19802_v10 = vrot.slane %v3312_v35, 7  ;;  %v3337_v22 = vshrl.u32 %v15622_v36, 16  ;;  %v3498_v14 = vld [vmem:[#allocation2 + $0xc] sm:$0xf] }
 0x22d   : > { %v23908_v49 = vsel %vm19798_vm14, 4294967295, %v23907_v49  ;;  %v3340_v53 = vshll.u32 %v15622_v36, 16  ;;  %v3334_v19 = vor.u32 %v3332_v54, %v3331_v63  ;;  %v3335_v58 = vrot.slane %v3331_v63, 4 }
 0x22e   : > { %23909 = vst [vmem:[#allocation20_spill] sm:$0xff] %v23908_v49  ;;  %v19804_v27 = vrot.slane %v3176_v55, 7  ;;  %v3201_v62 = vshrl.u32 %v15606_v51, 16  ;;  %v3198_v1 = vor.u32 %v3196_v41, %v3195_v60  ;;  %v3199_v16 = vrot.slane %v3195_v60, 4  ;;  %v19808_v25 = vpop.f32.mrb[40].mxu1 }
 0x22f   : > { %v3317_v9 = vor.u32 %v3315_v13, %v19802_v10  ;;  %v3562_v35 = vsel %vm19798_vm14, %v3334_v19, %v3561_v4  ;;  %v19814_v55 = vpop.f32.mrb[8].mxu0  ;;  %v19816_v40 = vpop.f32.mrb[41].mxu1  ;;  %v3204_v60 = vshll.u32 %v15606_v51, 16  ;;  %v3339_v11 = vrot.slane %v3337_v22, 7 }
 0x230   : > { %v3181_v36 = vor.u32 %v3179_v7, %v19804_v27  ;;  %v3203_v63 = vrot.slane %v3201_v62, 7  ;;  %v3506_v41 = vsel %vm19798_vm14, %v3198_v1, %v3505_v42  ;;  %3563 = vst [vmem:[#allocation2 + $0x78] sm:$0xf] %v3562_v35  ;;  %v19822_v4 = vpop.f32.mrb[9].mxu0  ;;  %v19824_v7 = vpop.f32.mrb[42].mxu1  ;;  %v23910_v42 = vmov 0 }
 0x231   : > { %v3555_v13 = vsel %vm19798_vm14, %v3317_v9, %v3554_v21  ;;  %3507 = vst [vmem:[#allocation2 + $0x18] sm:$0xf] %v3506_v41  ;;  %v23911_v42 = vsel %vm19830_vm15, 4294967295, %v23910_v42  ;;  %v3565_v21 = vld [vmem:[#allocation2 + $0x80] sm:$0x1]  ;;  %v3046_v51 = vmax.f32 %v19779_v38, 0.0  ;;  %v15620_v22 = vpack.c.bf16 %v3062_v23, %v3062_v23 }
 0x232   : > { %v3499_v19 = vsel %vm19798_vm14, %v3181_v36, %v3498_v14  ;;  %3556 = vst [vmem:[#allocation2 + $0x6c] sm:$0xf] %v3555_v13  ;;  %23912 = vst [vmem:[#allocation21_spill] sm:$0xff] %v23911_v42  ;;  %v3208_v62 = vrot.slane %v3203_v63, 4  ;;  %v19835_v1 = vpop.f32.mrb[10].mxu0  ;;  %v19837_v9 = vpop.f32.mrb[43].mxu1  ;;  %v3206_v35 = vor.u32 %v3204_v60, %v3203_v63  ;;  %v3342_v41 = vor.u32 %v3340_v53, %v3339_v11 }
 0x233   : > { %3500 = vst [vmem:[#allocation2 + $0xc] sm:$0xf] %v3499_v19  ;;  %v3344_v14 = vrot.slane %v3339_v11, 4  ;;  %v17504_v36 = vadd.f32 %v19781_v8, %v19656_v57  ;;  %v19841_v13 = vpop.f32.mrb[11].mxu0  ;;  %v15604_v26 = vpack.c.bf16 %v3046_v51, %v3046_v51  ;;  %v3320_v0 = vshrl.u32 %v15620_v22, 16 }
 0x234   : > { %v3510_v54 = vsel %vm19575_vm6, %v3208_v62, %v3509_v48  ;;  %v3323_v38 = vshll.u32 %v15620_v22, 16  ;;  %v3207_v23 = vsel %vm19830_vm15, %v3199_v16, %v3206_v35  ;;  %v3343_v63 = vsel %vm19830_vm15, %v3335_v58, %v3342_v41  ;;  %v3558_v19 = vld [vmem:[#allocation2 + $0x74] sm:$0x1] }
 0x235   : > { %3511 = vst [vmem:[#allocation2 + $0x20] sm:$0x1] %v3510_v54  ;;  %v3566_v11 = vsel %vm19575_vm6, %v3344_v14, %v3565_v21  ;;  %v2981_v57 = vmul.f32 %v17504_v36, %v19748_v6  ;;  %3508 = vst [vmem:[#allocation2 + $0x1c] sm:$0xf] %v3207_v23  ;;  %v3184_v8 = vshrl.u32 %v15604_v26, 16  ;;  %v3187_v48 = vshll.u32 %v15604_v26, 16 }
 0x236   : > { %3564 = vst [vmem:[#allocation2 + $0x7c] sm:$0xf] %v3343_v63  ;;  %3567 = vst [vmem:[#allocation2 + $0x80] sm:$0x1] %v3566_v11  ;;  %v3322_v53 = vrot.slane %v3320_v0, 7  ;;  %v17525_v60 = vadd.f32 %v19721_v5, %v19776_v59  ;;  %v17505_v58 = vadd.f32 %v19786_v31, %v19664_v52  ;;  %v17527_v54 = vadd.f32 %v19723_v18, %v19783_v32  ;;  %v19861_v21 = vpop.f32.mrb[44].mxu1 }
 0x237   : > { %v3019_v16 = vadd.f32 %v19753_v15, %v2981_v57  ;;  %v17506_v62 = vadd.f32 %v19790_v46, %v19666_v43  ;;  %v3186_v51 = vrot.slane %v3184_v8, 7  ;;  %v19864_v5 = vpop.f32.mrb[12].mxu0  ;;  %v19866_v59 = vpop.f32.mrb[45].mxu1  ;;  %v3502_v35 = vld [vmem:[#allocation2 + $0x14] sm:$0x1]  ;;  %v23913_v36 = vrot.slane %v19802_v10, 4 }
 0x238   : > { %v3325_v26 = vor.u32 %v3323_v38, %v3322_v53  ;;  %v3327_v0 = vrot.slane %v3322_v53, 4  ;;  %v2997_v22 = vmul.f32 %v17525_v60, %v19748_v6  ;;  %v2979_v52 = vmul.f32 %v17505_v58, %v19748_v6  ;;  %v19871_v43 = vpop.f32.mrb[13].mxu0  ;;  %v19873_v31 = vpop.f32.mrb[46].mxu1 }
 0x239   : > { %v3051_v41 = vmax.f32 %v3019_v16, 0.0  ;;  %v2995_v18 = vmul.f32 %v17527_v54, %v19748_v6  ;;  %v2982_v32 = vmul.f32 %v17506_v62, %v19748_v6  ;;  %v3189_v46 = vor.u32 %v3187_v48, %v3186_v51  ;;  %v19881_v63 = vpop.f32.mrb[14].mxu0  ;;  %v19883_v11 = vpop.f32.mrb[47].mxu1 }
 0x23a   : > { %v3191_v14 = vrot.slane %v3186_v51, 4  ;;  %v3326_v38 = vsel %vm19830_vm15, %v23913_v36, %v3325_v26  ;;  %v3559_v23 = vsel %vm19575_vm6, %v3327_v0, %v3558_v19  ;;  %v3035_v8 = vadd.f32 %v19753_v15, %v2997_v22  ;;  %v19888_v10 = vpop.f32.mrb[15].mxu0 }
 0x23b   : > { %3557 = vst [vmem:[#allocation2 + $0x70] sm:$0xf] %v3326_v38  ;;  %3560 = vst [vmem:[#allocation2 + $0x74] sm:$0x1] %v3559_v23  ;;  %v15609_v57 = vpack.c.bf16 %v3051_v41, %v3051_v41  ;;  %v3017_v48 = vadd.f32 %v19753_v15, %v2979_v52  ;;  %v3033_v53 = vadd.f32 %v19753_v15, %v2995_v18  ;;  %v23914_v60 = vrot.slane %v19804_v27, 4 }
 0x23c   : > { %v3503_v16 = vsel %vm19575_vm6, %v3191_v14, %v3502_v35  ;;  %v3020_v58 = vadd.f32 %v19753_v15, %v2982_v32  ;;  %v17529_v54 = vadd.f32 %v19725_v37, %v19788_v29  ;;  %v3067_v26 = vmax.f32 %v3035_v8, 0.0  ;;  %v3519_v37 = vld [vmem:[#allocation2 + $0x30] sm:$0xf] }
 0x23d   : > { %v3190_v19 = vsel %vm19830_vm15, %v23914_v60, %v3189_v46  ;;  %3504 = vst [vmem:[#allocation2 + $0x14] sm:$0x1] %v3503_v16  ;;  %v3227_v62 = vshrl.u32 %v15609_v57, 16  ;;  %v3230_v51 = vshll.u32 %v15609_v57, 16  ;;  %v3049_v0 = vmax.f32 %v3017_v48, 0.0 }
 0x23e   : > { %3501 = vst [vmem:[#allocation2 + $0x10] sm:$0xf] %v3190_v19  ;;  %v3065_v22 = vmax.f32 %v3033_v53, 0.0  ;;  %v3052_v41 = vmax.f32 %v3020_v58, 0.0  ;;  %v2998_v27 = vmul.f32 %v17529_v54, %v19748_v6  ;;  %v17507_v52 = vadd.f32 %v19794_v61, %v19670_v47  ;;  %v3575_v58 = vld [vmem:[#allocation2 + $0x90] sm:$0xf] }
 0x23f   : > { %v3229_v18 = vrot.slane %v3227_v62, 7  ;;  %v15625_v35 = vpack.c.bf16 %v3067_v26, %v3067_v26  ;;  %v15607_v46 = vpack.c.bf16 %v3049_v0, %v3049_v0  ;;  %v17531_v32 = vadd.f32 %v19727_v33, %v19792_v24 }
 0x240   : > { %v15623_v29 = vpack.c.bf16 %v3065_v22, %v3065_v22  ;;  %v15610_v14 = vpack.c.bf16 %v3052_v41, %v3052_v41  ;;  %v3036_v36 = vadd.f32 %v19753_v15, %v2998_v27  ;;  %v2980_v38 = vmul.f32 %v17507_v52, %v19748_v6  ;;  %v3512_v41 = vld [vmem:[#allocation2 + $0x24] sm:$0xf] }
 0x241   : > { %v3232_v23 = vor.u32 %v3230_v51, %v3229_v18  ;;  %v3233_v57 = vrot.slane %v3229_v18, 4  ;;  %v3363_v8 = vshrl.u32 %v15625_v35, 16  ;;  %v3366_v48 = vshll.u32 %v15625_v35, 16  ;;  %v3568_v27 = vld [vmem:[#allocation2 + $0x84] sm:$0xf] }
 0x242   : > { %v3210_v53 = vshrl.u32 %v15607_v46, 16  ;;  %v3213_v60 = vshll.u32 %v15607_v46, 16  ;;  %v3346_v47 = vshrl.u32 %v15623_v29, 16  ;;  %v3349_v61 = vshll.u32 %v15623_v29, 16 }
 0x243   : > { %v3520_v19 = vsel %vm19798_vm14, %v3232_v23, %v3519_v37  ;;  %v3365_v16 = vrot.slane %v3363_v8, 7  ;;  %v3235_v33 = vshrl.u32 %v15610_v14, 16  ;;  %v3238_v24 = vshll.u32 %v15610_v14, 16  ;;  %v3523_v14 = vld [vmem:[#allocation2 + $0x38] sm:$0x1] }
 0x244   : > { %3521 = vst [vmem:[#allocation2 + $0x30] sm:$0xf] %v3520_v19  ;;  %v19908_v54 = vrot.slane %v3210_v53, 7  ;;  %v19910_v62 = vrot.slane %v3346_v47, 7  ;;  %v3068_v51 = vmax.f32 %v3036_v36, 0.0  ;;  %v3018_v26 = vadd.f32 %v19753_v15, %v2980_v38 }
 0x245   : > { %v3368_v0 = vor.u32 %v3366_v48, %v3365_v16  ;;  %v3369_v22 = vrot.slane %v3365_v16, 4  ;;  %v3237_v52 = vrot.slane %v3235_v33, 7  ;;  %v2996_v18 = vmul.f32 %v17531_v32, %v19748_v6 }
 0x246   : > { %v3215_v35 = vor.u32 %v3213_v60, %v19908_v54  ;;  %v3216_v46 = vrot.slane %v19908_v54, 4  ;;  %v3351_v37 = vor.u32 %v3349_v61, %v19910_v62  ;;  %v3352_v29 = vrot.slane %v19910_v62, 4 }
 0x247   : > { %v3576_v36 = vsel %vm19798_vm14, %v3368_v0, %v3575_v58  ;;  %v3240_v38 = vor.u32 %v3238_v24, %v3237_v52  ;;  %v3242_v23 = vrot.slane %v3237_v52, 4  ;;  %v15626_v8 = vpack.c.bf16 %v3068_v51, %v3068_v51 }
 0x248   : > { %3577 = vst [vmem:[#allocation2 + $0x90] sm:$0xf] %v3576_v36  ;;  %v3513_v48 = vsel %vm19798_vm14, %v3215_v35, %v3512_v41  ;;  %v3569_v32 = vsel %vm19798_vm14, %v3351_v37, %v3568_v27  ;;  %v3050_v53 = vmax.f32 %v3018_v26, 0.0  ;;  %v3034_v60 = vadd.f32 %v19753_v15, %v2996_v18  ;;  %v3579_v26 = vld [vmem:[#allocation2 + $0x98] sm:$0x1] }
 0x249   : > { %3514 = vst [vmem:[#allocation2 + $0x24] sm:$0xf] %v3513_v48  ;;  %3570 = vst [vmem:[#allocation2 + $0x84] sm:$0xf] %v3569_v32  ;;  %v3241_v47 = vsel %vm19830_vm15, %v3233_v57, %v3240_v38  ;;  %v3524_v61 = vsel %vm19575_vm6, %v3242_v23, %v3523_v14  ;;  %v3371_v19 = vshrl.u32 %v15626_v8, 16  ;;  %v3374_v16 = vshll.u32 %v15626_v8, 16 }
 0x24a   : > { %3522 = vst [vmem:[#allocation2 + $0x34] sm:$0xf] %v3241_v47  ;;  %3525 = vst [vmem:[#allocation2 + $0x38] sm:$0x1] %v3524_v61  ;;  %v15608_v33 = vpack.c.bf16 %v3050_v53, %v3050_v53  ;;  %v3066_v24 = vmax.f32 %v3034_v60, 0.0  ;;  %v17508_v58 = vadd.f32 %v19814_v55, %v19679_v39  ;;  %v17533_v54 = vadd.f32 %v19729_v34, %v19808_v25 }
 0x24b   : > { %v3373_v51 = vrot.slane %v3371_v19, 7  ;;  %v17509_v57 = vadd.f32 %v19822_v4, %v19681_v56  ;;  %v17535_v0 = vadd.f32 %v19731_v50, %v19816_v40  ;;  %v17510_v41 = vadd.f32 %v19835_v1, %v19683_v28  ;;  %v3516_v40 = vld [vmem:[#allocation2 + $0x2c] sm:$0x1] }
 0x24c   : > { %v3218_v27 = vshrl.u32 %v15608_v33, 16  ;;  %v3221_v52 = vshll.u32 %v15608_v33, 16  ;;  %v15624_v18 = vpack.c.bf16 %v3066_v24, %v3066_v24  ;;  %v2985_v35 = vmul.f32 %v17508_v58, %v19748_v6  ;;  %v3572_v32 = vld [vmem:[#allocation2 + $0x8c] sm:$0x1] }
 0x24d   : > { %v3376_v39 = vor.u32 %v3374_v16, %v3373_v51  ;;  %v3378_v55 = vrot.slane %v3373_v51, 4  ;;  %v3001_v25 = vmul.f32 %v17533_v54, %v19748_v6  ;;  %v2983_v34 = vmul.f32 %v17509_v57, %v19748_v6 }
 0x24e   : > { %v3220_v37 = vrot.slane %v3218_v27, 7  ;;  %v3354_v14 = vshrl.u32 %v15624_v18, 16  ;;  %v3357_v56 = vshll.u32 %v15624_v18, 16  ;;  %v3023_v4 = vadd.f32 %v19753_v15, %v2985_v35 }
 0x24f   : > { %v3377_v50 = vsel %vm19830_vm15, %v3369_v22, %v3376_v39  ;;  %v3580_v28 = vsel %vm19575_vm6, %v3378_v55, %v3579_v26  ;;  %v3039_v1 = vadd.f32 %v19753_v15, %v3001_v25  ;;  %v3021_v36 = vadd.f32 %v19753_v15, %v2983_v34 }
 0x250   : > { %3578 = vst [vmem:[#allocation2 + $0x94] sm:$0xf] %v3377_v50  ;;  %3581 = vst [vmem:[#allocation2 + $0x98] sm:$0x1] %v3580_v28  ;;  %v3223_v38 = vor.u32 %v3221_v52, %v3220_v37  ;;  %v3225_v23 = vrot.slane %v3220_v37, 4  ;;  %v3356_v8 = vrot.slane %v3354_v14, 7  ;;  %v2999_v47 = vmul.f32 %v17535_v0, %v19748_v6 }
 0x251   : > { %v3055_v48 = vmax.f32 %v3023_v4, 0.0  ;;  %v3071_v53 = vmax.f32 %v3039_v1, 0.0  ;;  %v3053_v60 = vmax.f32 %v3021_v36, 0.0  ;;  %v2986_v22 = vmul.f32 %v17510_v41, %v19748_v6 }
 0x252   : > { %v3224_v61 = vsel %vm19830_vm15, %v3216_v46, %v3223_v38  ;;  %v3517_v19 = vsel %vm19575_vm6, %v3225_v23, %v3516_v40  ;;  %v3359_v16 = vor.u32 %v3357_v56, %v3356_v8  ;;  %v3361_v33 = vrot.slane %v3356_v8, 4  ;;  %v3526_v38 = vld [vmem:[#allocation2 + $0x3c] sm:$0xf] }
 0x253   : > { %3515 = vst [vmem:[#allocation2 + $0x28] sm:$0xf] %v3224_v61  ;;  %3518 = vst [vmem:[#allocation2 + $0x2c] sm:$0x1] %v3517_v19  ;;  %v15613_v24 = vpack.c.bf16 %v3055_v48, %v3055_v48  ;;  %v15629_v58 = vpack.c.bf16 %v3071_v53, %v3071_v53  ;;  %v15611_v54 = vpack.c.bf16 %v3053_v60, %v3053_v60  ;;  %v3582_v61 = vld [vmem:[#allocation2 + $0x9c] sm:$0xf] }
 0x254   : > { %v3037_v51 = vadd.f32 %v19753_v15, %v2999_v47  ;;  %v3360_v26 = vsel %vm19830_vm15, %v3352_v29, %v3359_v16  ;;  %v3573_v46 = vsel %vm19575_vm6, %v3361_v33, %v3572_v32  ;;  %v3024_v57 = vadd.f32 %v19753_v15, %v2986_v22  ;;  %v3533_v29 = vld [vmem:[#allocation2 + $0x48] sm:$0xf] }
 0x255   : > { %v17537_v0 = vadd.f32 %v19733_v12, %v19824_v7  ;;  %3571 = vst [vmem:[#allocation2 + $0x88] sm:$0xf] %v3360_v26  ;;  %3574 = vst [vmem:[#allocation2 + $0x8c] sm:$0x1] %v3573_v46  ;;  %v3261_v41 = vshrl.u32 %v15613_v24, 16  ;;  %v3264_v27 = vshll.u32 %v15613_v24, 16  ;;  %v17511_v14 = vadd.f32 %v19841_v13, %v19685_v20 }
 0x256   : > { %v3397_v52 = vshrl.u32 %v15629_v58, 16  ;;  %v3400_v18 = vshll.u32 %v15629_v58, 16  ;;  %v3244_v35 = vshrl.u32 %v15611_v54, 16  ;;  %v3247_v39 = vshll.u32 %v15611_v54, 16  ;;  %v3589_v12 = vld [vmem:[#allocation2 + $0xa8] sm:$0xf] }
 0x257   : > { %v3069_v62 = vmax.f32 %v3037_v51, 0.0  ;;  %v3056_v55 = vmax.f32 %v3024_v57, 0.0  ;;  %v3263_v25 = vrot.slane %v3261_v41, 7  ;;  %v3002_v37 = vmul.f32 %v17537_v0, %v19748_v6  ;;  %v3537_v51 = vld [vmem:[#allocation2 + $0x50] sm:$0x1] }
 0x258   : > { %v19965_v34 = vrot.slane %v3397_v52, 7  ;;  %v19970_v7 = vrot.slane %v3244_v35, 7  ;;  %v17539_v50 = vadd.f32 %v19735_v2, %v19837_v9  ;;  %v2984_v22 = vmul.f32 %v17511_v14, %v19748_v6 }
 0x259   : > { %v15627_v56 = vpack.c.bf16 %v3069_v62, %v3069_v62  ;;  %v15614_v4 = vpack.c.bf16 %v3056_v55, %v3056_v55  ;;  %v3266_v28 = vor.u32 %v3264_v27, %v3263_v25  ;;  %v3267_v40 = vrot.slane %v3263_v25, 4 }
 0x25a   : > { %v3402_v1 = vor.u32 %v3400_v18, %v19965_v34  ;;  %v3403_v36 = vrot.slane %v19965_v34, 4  ;;  %v3249_v23 = vor.u32 %v3247_v39, %v19970_v7  ;;  %v3250_v8 = vrot.slane %v19970_v7, 4 }
 0x25b   : > { %v3380_v20 = vshrl.u32 %v15627_v56, 16  ;;  %v3383_v13 = vshll.u32 %v15627_v56, 16  ;;  %v3534_v48 = vsel %vm19798_vm14, %v3266_v28, %v3533_v29  ;;  %v3269_v2 = vshrl.u32 %v15614_v4, 16 }
 0x25c   : > { %v3590_v32 = vsel %vm19798_vm14, %v3402_v1, %v3589_v12  ;;  %v3272_v9 = vshll.u32 %v15614_v4, 16  ;;  %3535 = vst [vmem:[#allocation2 + $0x48] sm:$0xf] %v3534_v48  ;;  %v3527_v53 = vsel %vm19798_vm14, %v3249_v23, %v3526_v38  ;;  %v3040_v47 = vadd.f32 %v19753_v15, %v3002_v37  ;;  %v3593_v1 = vld [vmem:[#allocation2 + $0xb0] sm:$0x1] }
 0x25d   : > { %3591 = vst [vmem:[#allocation2 + $0xa8] sm:$0xf] %v3590_v32  ;;  %v19984_v60 = vrot.slane %v3380_v20, 7  ;;  %3528 = vst [vmem:[#allocation2 + $0x3c] sm:$0xf] %v3527_v53  ;;  %v3271_v19 = vrot.slane %v3269_v2, 7  ;;  %v3000_v16 = vmul.f32 %v17539_v50, %v19748_v6  ;;  %v17512_v33 = vadd.f32 %v19864_v5, %v19701_v3 }
 0x25e   : > { %v17541_v24 = vadd.f32 %v19737_v45, %v19861_v21  ;;  %v3072_v26 = vmax.f32 %v3040_v47, 0.0  ;;  %v3022_v46 = vadd.f32 %v19753_v15, %v2984_v22  ;;  %v17513_v12 = vadd.f32 %v19871_v43, %v19703_v17 }
 0x25f   : > { %v3385_v58 = vor.u32 %v3383_v13, %v19984_v60  ;;  %v3386_v54 = vrot.slane %v19984_v60, 4  ;;  %v3274_v57 = vor.u32 %v3272_v9, %v3271_v19  ;;  %v3276_v0 = vrot.slane %v3271_v19, 4  ;;  %v3530_v9 = vld [vmem:[#allocation2 + $0x44] sm:$0x1] }
 0x260   : > { %v3038_v41 = vadd.f32 %v19753_v15, %v3000_v16  ;;  %v2989_v27 = vmul.f32 %v17512_v33, %v19748_v6  ;;  %v15630_v5 = vpack.c.bf16 %v3072_v26, %v3072_v26  ;;  %v3054_v52 = vmax.f32 %v3022_v46, 0.0  ;;  %v3586_v16 = vld [vmem:[#allocation2 + $0xa4] sm:$0x1]  ;;  %v3547_v26 = vld [vmem:[#allocation2 + $0x60] sm:$0xf] }
 0x261   : > { %v3583_v3 = vsel %vm19798_vm14, %v3385_v58, %v3582_v61  ;;  %v3005_v45 = vmul.f32 %v17541_v24, %v19748_v6  ;;  %v3275_v21 = vsel %vm19830_vm15, %v3267_v40, %v3274_v57  ;;  %v3538_v18 = vsel %vm19575_vm6, %v3276_v0, %v3537_v51 }
 0x262   : > { %3584 = vst [vmem:[#allocation2 + $0x9c] sm:$0xf] %v3583_v3  ;;  %v3070_v35 = vmax.f32 %v3038_v41, 0.0  ;;  %v3027_v39 = vadd.f32 %v19753_v15, %v2989_v27  ;;  %3536 = vst [vmem:[#allocation2 + $0x4c] sm:$0xf] %v3275_v21  ;;  %v3405_v62 = vshrl.u32 %v15630_v5, 16  ;;  %v15612_v25 = vpack.c.bf16 %v3054_v52, %v3054_v52 }
 0x263   : > { %3539 = vst [vmem:[#allocation2 + $0x50] sm:$0x1] %v3538_v18  ;;  %v3408_v55 = vshll.u32 %v15630_v5, 16  ;;  %v3043_v29 = vadd.f32 %v19753_v15, %v3005_v45  ;;  %v17543_v56 = vadd.f32 %v19739_v44, %v19866_v59  ;;  %v2987_v13 = vmul.f32 %v17513_v12, %v19748_v6  ;;  %v23915_v52 = vld [vmem:[#allocation16_spill] sm:$0xff]  ;;  %v3603_v45 = vld [vmem:[#allocation2 + $0xc0] sm:$0xf] }
 0x264   : > { %v15628_v37 = vpack.c.bf16 %v3070_v35, %v3070_v35  ;;  %v3059_v14 = vmax.f32 %v3027_v39, 0.0  ;;  %v3407_v4 = vrot.slane %v3405_v62, 7  ;;  %v3252_v50 = vshrl.u32 %v15612_v25, 16  ;;  %v23916_v21 = vld [vmem:[#allocation18_spill] sm:$0xff]  ;;  %v23917_v35 = vld [vmem:[#allocation17_spill] sm:$0xff]  ;;  %v23918_v62 = vld [vmem:[#allocation19_spill] sm:$0xff] }
 0x265   : > { %v3255_v28 = vshll.u32 %v15612_v25, 16  ;;  %v3075_v40 = vmax.f32 %v3043_v29, 0.0  ;;  %v3025_v44 = vadd.f32 %v19753_v15, %v2987_v13  ;;  %v3003_v5 = vmul.f32 %v17543_v56, %v19748_v6  ;;  %v20048_v25 = vld [vmem:[#allocation2 + $0xc] sm:$0xf]  ;;  %v20065_v13 = vld [vmem:[#allocation2 + $0x10] sm:$0xf] }
 0x266   : > { %v3388_v38 = vshrl.u32 %v15628_v37, 16  ;;  %v3391_v23 = vshll.u32 %v15628_v37, 16  ;;  %v15617_v20 = vpack.c.bf16 %v3059_v14, %v3059_v14  ;;  %v3410_v48 = vor.u32 %v3408_v55, %v3407_v4  ;;  %v20298_v42 = vld [vmem:[#allocation2 + $0xa8] sm:$0xf] }
 0x267   : > { %v3412_v32 = vrot.slane %v3407_v4, 4  ;;  %v3254_v2 = vrot.slane %v3252_v50, 7  ;;  %v15633_v53 = vpack.c.bf16 %v3075_v40, %v3075_v40  ;;  %v3057_v57 = vmax.f32 %v3025_v44, 0.0  ;;  %v3540_v50 = vld [vmem:[#allocation2 + $0x54] sm:$0xf] }
 0x268   : > { %v3390_v47 = vrot.slane %v3388_v38, 7  ;;  %v3295_v17 = vshrl.u32 %v15617_v20, 16  ;;  %v3298_v43 = vshll.u32 %v15617_v20, 16  ;;  %v3411_v59 = vsel %vm19830_vm15, %v3403_v36, %v3410_v48 }
 0x269   : > { %v3594_v22 = vsel %vm19575_vm6, %v3412_v32, %v3593_v1  ;;  %v3257_v61 = vor.u32 %v3255_v28, %v3254_v2  ;;  %v3259_v19 = vrot.slane %v3254_v2, 4  ;;  %3592 = vst [vmem:[#allocation2 + $0xac] sm:$0xf] %v3411_v59  ;;  %v3431_v51 = vshrl.u32 %v15633_v53, 16 }
 0x26a   : > { %3595 = vst [vmem:[#allocation2 + $0xb0] sm:$0x1] %v3594_v22  ;;  %v3393_v33 = vor.u32 %v3391_v23, %v3390_v47  ;;  %v3395_v24 = vrot.slane %v3390_v47, 4  ;;  %v20019_v58 = vrot.slane %v3295_v17, 7  ;;  %v3434_v46 = vshll.u32 %v15633_v53, 16 }
 0x26b   : > { %v3258_v34 = vsel %vm19830_vm15, %v3250_v8, %v3257_v61  ;;  %v3531_v36 = vsel %vm19575_vm6, %v3259_v19, %v3530_v9  ;;  %v20035_v27 = vrot.slane %v3431_v51, 7  ;;  %v15615_v3 = vpack.c.bf16 %v3057_v57, %v3057_v57 }
 0x26c   : > { %3529 = vst [vmem:[#allocation2 + $0x40] sm:$0xf] %v3258_v34  ;;  %3532 = vst [vmem:[#allocation2 + $0x44] sm:$0x1] %v3531_v36  ;;  %v3394_v0 = vsel %vm19830_vm15, %v3386_v54, %v3393_v33  ;;  %v3587_v41 = vsel %vm19575_vm6, %v3395_v24, %v3586_v16  ;;  %v3300_v7 = vor.u32 %v3298_v43, %v20019_v58  ;;  %v3301_v8 = vrot.slane %v20019_v58, 4 }
 0x26d   : > { %3585 = vst [vmem:[#allocation2 + $0xa0] sm:$0xf] %v3394_v0  ;;  %3588 = vst [vmem:[#allocation2 + $0xa4] sm:$0x1] %v3587_v41  ;;  %v17514_v60 = vadd.f32 %v19881_v63, %v23915_v52  ;;  %v17545_v18 = vadd.f32 %v23916_v21, %v19873_v31  ;;  %v17515_v39 = vadd.f32 %v19888_v10, %v23917_v35  ;;  %v3437_v63 = vrot.slane %v20035_v27, 4 }
 0x26e   : > { %v3548_v54 = vsel %vm19798_vm14, %v3300_v7, %v3547_v26  ;;  %v17547_v55 = vadd.f32 %v23918_v62, %v19883_v11  ;;  %v3436_v29 = vor.u32 %v3434_v46, %v20035_v27  ;;  %v3278_v37 = vshrl.u32 %v15615_v3, 16  ;;  %v3551_v41 = vld [vmem:[#allocation2 + $0x68] sm:$0x1] }
 0x26f   : > { %3549 = vst [vmem:[#allocation2 + $0x60] sm:$0xf] %v3548_v54  ;;  %v3281_v14 = vshll.u32 %v15615_v3, 16  ;;  %v3041_v12 = vadd.f32 %v19753_v15, %v3003_v5  ;;  %v2990_v56 = vmul.f32 %v17514_v60, %v19748_v6  ;;  %v3006_v31 = vmul.f32 %v17545_v18, %v19748_v6  ;;  %v3607_v18 = vld [vmem:[#allocation2 + $0xc8] sm:$0x1] }
 0x270   : > { %v2988_v10 = vmul.f32 %v17515_v39, %v19748_v6  ;;  %v3604_v11 = vsel %vm19798_vm14, %v3436_v29, %v3603_v45  ;;  %v20058_v4 = vrot.slane %v3278_v37, 7  ;;  %v3004_v28 = vmul.f32 %v17547_v55, %v19748_v6 }
 0x271   : > { %v3704_v40 = vshrl.u32 %v20048_v25, 16  ;;  %3605 = vst [vmem:[#allocation2 + $0xc0] sm:$0xf] %v3604_v11  ;;  %v3073_v1 = vmax.f32 %v3041_v12, 0.0  ;;  %v3028_v38 = vadd.f32 %v19753_v15, %v2990_v56  ;;  %v3044_v23 = vadd.f32 %v19753_v15, %v3006_v31  ;;  %v3544_v56 = vld [vmem:[#allocation2 + $0x5c] sm:$0x1] }
 0x272   : > { %v3026_v20 = vadd.f32 %v19753_v15, %v2988_v10  ;;  %v3283_v48 = vor.u32 %v3281_v14, %v20058_v4  ;;  %v3284_v32 = vrot.slane %v20058_v4, 4  ;;  %v3042_v2 = vadd.f32 %v19753_v15, %v3004_v28  ;;  %v3596_v15 = vld [vmem:[#allocation2 + $0xb4] sm:$0xf]  ;;  %v3600_v31 = vld [vmem:[#allocation2 + $0xbc] sm:$0x1] }
 0x273   : > { %v20070_v9 = vrot.slane %v3704_v40, 4  ;;  %v15631_v6 = vpack.c.bf16 %v3073_v1, %v3073_v1  ;;  %v3060_v53 = vmax.f32 %v3028_v38, 0.0  ;;  %v3076_v47 = vmax.f32 %v3044_v23, 0.0  ;;  %v3661_v28 = vld [vmem:[#allocation2 + $0x14] sm:$0x1] }
 0x274   : > { %v3058_v17 = vmax.f32 %v3026_v20, 0.0  ;;  %v3541_v43 = vsel %vm19798_vm14, %v3283_v48, %v3540_v50  ;;  %v3074_v44 = vmax.f32 %v3042_v2, 0.0  ;;  %v3707_v59 = vshll.u32 %v20048_v25, 16  ;;  %v20081_v40 = vld [vmem:[#allocation2 + $0x18] sm:$0xf] }
 0x275   : > { %v3713_v22 = vshll.u32 %v20065_v13, 16  ;;  %3542 = vst [vmem:[#allocation2 + $0x54] sm:$0xf] %v3541_v43  ;;  %v3414_v61 = vshrl.u32 %v15631_v6, 16  ;;  %v3417_v19 = vshll.u32 %v15631_v6, 16  ;;  %v15618_v16 = vpack.c.bf16 %v3060_v53, %v3060_v53 }
 0x276   : > { %v15634_v33 = vpack.c.bf16 %v3076_v47, %v3076_v47  ;;  %v15616_v24 = vpack.c.bf16 %v3058_v17, %v3058_v17  ;;  %v15632_v51 = vpack.c.bf16 %v3074_v44, %v3074_v44  ;;  %v3709_v34 = vrot.slane %v3707_v59, 5  ;;  %v20093_v48 = vld [vmem:[#allocation2 + $0x1c] sm:$0xf]  ;;  %v20110_v59 = vld [vmem:[#allocation2 + $0x24] sm:$0xf] }
 0x277   : > { %v20076_v36 = vrot.slane %v3713_v22, 5  ;;  %v3416_v26 = vrot.slane %v3414_v61, 7  ;;  %v3303_v46 = vshrl.u32 %v15618_v16, 16  ;;  %v3306_v57 = vshll.u32 %v15618_v16, 16 }
 0x278   : > { %v3439_v0 = vshrl.u32 %v15634_v33, 16  ;;  %v3442_v7 = vshll.u32 %v15634_v33, 16  ;;  %v3286_v3 = vshrl.u32 %v15616_v24, 16  ;;  %v3289_v5 = vshll.u32 %v15616_v24, 16 }
 0x279   : > { %v3422_v52 = vshrl.u32 %v15632_v51, 16  ;;  %v3419_v60 = vor.u32 %v3417_v19, %v3416_v26  ;;  %v3420_v54 = vrot.slane %v3416_v26, 4  ;;  %v3305_v45 = vrot.slane %v3303_v46, 7  ;;  %v3663_v46 = vld [vmem:[#allocation2 + $0x2c] sm:$0x1] }
 0x27a   : > { %v3441_v21 = vrot.slane %v3439_v0, 7  ;;  %v3288_v35 = vrot.slane %v3286_v3, 7  ;;  %v3425_v62 = vshll.u32 %v15632_v51, 16  ;;  %v3710_v55 = vor.u32 %v3709_v34, %v20070_v9  ;;  %v3662_v9 = vld [vmem:[#allocation2 + $0x20] sm:$0x1] }
 0x27b   : > { %v3424_v39 = vrot.slane %v3422_v52, 7  ;;  %v3597_v29 = vsel %vm19798_vm14, %v3419_v60, %v3596_v15  ;;  %v3308_v37 = vor.u32 %v3306_v57, %v3305_v45  ;;  %v3310_v14 = vrot.slane %v3305_v45, 4  ;;  %v20115_v15 = vld [vmem:[#allocation2 + $0x28] sm:$0xf] }
 0x27c   : > { %v3444_v12 = vor.u32 %v3442_v7, %v3441_v21  ;;  %3598 = vst [vmem:[#allocation2 + $0xb4] sm:$0xf] %v3597_v29  ;;  %v3446_v10 = vrot.slane %v3441_v21, 4  ;;  %v3291_v11 = vor.u32 %v3289_v5, %v3288_v35  ;;  %v3293_v4 = vrot.slane %v3288_v35, 4 }
 0x27d   : > { %v3427_v50 = vor.u32 %v3425_v62, %v3424_v39  ;;  %v3309_v1 = vsel %vm19830_vm15, %v3301_v8, %v3308_v37  ;;  %v3552_v38 = vsel %vm19575_vm6, %v3310_v14, %v3551_v41  ;;  %v3429_v20 = vrot.slane %v3424_v39, 4 }
 0x27e   : > { %v3445_v23 = vsel %vm19830_vm15, %v3437_v63, %v3444_v12  ;;  %3550 = vst [vmem:[#allocation2 + $0x64] sm:$0xf] %v3309_v1  ;;  %3553 = vst [vmem:[#allocation2 + $0x68] sm:$0x1] %v3552_v38  ;;  %v3608_v58 = vsel %vm19575_vm6, %v3446_v10, %v3607_v18  ;;  %v3292_v8 = vsel %vm19830_vm15, %v3284_v32, %v3291_v11  ;;  %v3711_v6 = vrot.slane %v3710_v55, 4 }
 0x27f   : > { %3606 = vst [vmem:[#allocation2 + $0xc4] sm:$0xf] %v3445_v23  ;;  %v3545_v2 = vsel %vm19575_vm6, %v3293_v4, %v3544_v56  ;;  %v3428_v27 = vsel %vm19830_vm15, %v3420_v54, %v3427_v50  ;;  %3609 = vst [vmem:[#allocation2 + $0xc8] sm:$0x1] %v3608_v58  ;;  %v3601_v63 = vsel %vm19575_vm6, %v3429_v20, %v3600_v31  ;;  %v3717_v53 = vshrl.u32 %v20065_v13, 16  ;;  %v18335_v50 = vld [vmem:[%s23702_s4 + $0x8] sm:$0xff]  }
 0x280   : > { %3543 = vst [vmem:[#allocation2 + $0x58] sm:$0xf] %v3292_v8  ;;  %3546 = vst [vmem:[#allocation2 + $0x5c] sm:$0x1] %v3545_v2  ;;  %v3723_v47 = vshll.u32 %v3661_v28, 16  ;;  %v3728_v32 = vshrl.u32 %v20081_v40, 16  ;;  %v3716_v61 = vsel %vm19706_vm11, %v3711_v6, %v20076_v36 }
 0x281   : > { %3599 = vst [vmem:[#allocation2 + $0xb8] sm:$0xf] %v3428_v27  ;;  %3602 = vst [vmem:[#allocation2 + $0xbc] sm:$0x1] %v3601_v63  ;;  %v3731_v17 = vshll.u32 %v20081_v40, 16  ;;  %v3737_v43 = vshll.u32 %v20093_v48, 16 }
 0x282   : > { %v3741_v44 = vshrl.u32 %v20093_v48, 16  ;;  %v3719_v19 = vrot.slane %v3717_v53, 4  ;;  %v3725_v16 = vrot.slane %v3723_v47, 5  ;;  %v3747_v33 = vshll.u32 %v3662_v9, 16  ;;  %v20122_v54 = vld [vmem:[#allocation2 + $0x30] sm:$0xf] }
 0x283   : > { %v3730_v24 = vrot.slane %v3728_v32, 4  ;;  %v3733_v51 = vrot.slane %v3731_v17, 5  ;;  %v3739_v34 = vrot.slane %v3737_v43, 5  ;;  %v3752_v41 = vshrl.u32 %v20110_v59, 16  ;;  %v20126_v12 = vld [vmem:[#allocation2 + $0x34] sm:$0xf] }
 0x284   : > { %v3743_v26 = vrot.slane %v3741_v44, 4  ;;  %v3720_v57 = vor.u32 %v3719_v19, %v20076_v36  ;;  %v3749_v0 = vrot.slane %v3747_v33, 5  ;;  %v3755_v7 = vshll.u32 %v20110_v59, 16  ;;  %v20128_v56 = vld [vmem:[#allocation2 + $0x38] sm:$0x1]  ;;  %v18566_v47 = vld [vmem:[%s23702_s4] sm:$0xff]  }
 0x285   : > { %v3734_v3 = vor.u32 %v3733_v51, %v3730_v24  ;;  %v3761_v52 = vshll.u32 %v20115_v15, 16  ;;  %v3765_v60 = vshrl.u32 %v20115_v15, 16  ;;  %v3754_v21 = vrot.slane %v3752_v41, 4  ;;  %v20138_v1 = vld [vmem:[#allocation2 + $0x3c] sm:$0xf]  ;;  %v18336_v24 = vld [vmem:[%s23702_s4 + $0x10] sm:$0xff]  }
 0x286   : > { %v3744_v5 = vor.u32 %v3743_v26, %v3739_v34  ;;  %v3721_v45 = vrot.slane %v3720_v57, 4  ;;  %v3757_v18 = vrot.slane %v3755_v7, 5  ;;  %v3771_v35 = vshll.u32 %v3663_v46, 16  ;;  %v20141_v8 = vld [vmem:[#allocation2 + $0x40] sm:$0xf] }
 0x287   : > { %v3735_v39 = vrot.slane %v3734_v3, 4  ;;  %v3763_v36 = vrot.slane %v3761_v52, 5  ;;  %v3767_v55 = vrot.slane %v3765_v60, 4  ;;  %v3776_v31 = vshrl.u32 %v20122_v54, 16  ;;  %v20143_v2 = vld [vmem:[#allocation2 + $0x44] sm:$0x1] }
 0x288   : > { %v3745_v62 = vrot.slane %v3744_v5, 4  ;;  %v3726_v29 = vsel %vm19706_vm11, %v3721_v45, %v3725_v16  ;;  %v3758_v37 = vor.u32 %v3757_v18, %v3754_v21  ;;  %v3773_v14 = vrot.slane %v3771_v35, 5  ;;  %v20148_v53 = vld [vmem:[#allocation2 + $0x48] sm:$0xf]  ;;  %v20165_v52 = vld [vmem:[#allocation2 + $0x4c] sm:$0xf] }
 0x289   : > { %v14925_v10 = vcombine.low %v3716_v61, %v3726_v29  ;;  %v3740_v11 = vsel %vm19706_vm11, %v3735_v39, %v3739_v34  ;;  %v3768_v28 = vor.u32 %v3767_v55, %v3763_v36  ;;  %v3778_v20 = vrot.slane %v3776_v31, 4  ;;  %v18337_v21 = vld [vmem:[%s23702_s4 + $0x18] sm:$0xff]   ;;  %v20176_v31 = vld [vmem:[#allocation2 + $0x54] sm:$0xf] }
 0x28a   : > { %v3750_v4 = vsel %vm19706_vm11, %v3745_v62, %v3749_v0  ;;  %v3759_v23 = vrot.slane %v3758_v37, 4  ;;  %v3779_v58 = vshll.u32 %v20122_v54, 16  ;;  %v3785_v9 = vshll.u32 %v20126_v12, 16 }
 0x28b   : > { %v14926_v38 = vcombine.low %v3740_v11, %v3750_v4  ;;  %16592 = vmatmul.mubr.bf16.vlgmr.msra.gmra.mrb[48].mxu1 %v14925_v10  ;;  %v3769_v27 = vrot.slane %v3768_v28, 4  ;;  %v3789_v63 = vshrl.u32 %v20126_v12, 16  ;;  %v3795_v6 = vshll.u32 %v20128_v56, 16  ;;  %v20182_v28 = vld [vmem:[#allocation2 + $0x58] sm:$0xf] }
 0x28c   : > { %16624 = vmatpush3.bf16.msra.mxu1 %v18566_v47  ;;  %v3764_v32 = vsel %vm19706_vm11, %v3759_v23, %v3763_v36  ;;  %v3781_v17 = vrot.slane %v3779_v58, 5  ;;  %v3800_v43 = vshrl.u32 %v20138_v1, 16  ;;  %v3803_v44 = vshll.u32 %v20138_v1, 16  ;;  %v20172_v36 = vld [vmem:[#allocation2 + $0x50] sm:$0x1] }
 0x28d   : > { %16595 = vmatprep.mubr.bf16.mxu1 %v14926_v38  ;;  %16625 = vmatprep.subr.bf16.mxu1 %v18335_v50  ;;  %v3774_v61 = vsel %vm19706_vm11, %v3769_v27, %v3773_v14  ;;  %v3787_v19 = vrot.slane %v3785_v9, 5  ;;  %v3791_v16 = vrot.slane %v3789_v63, 4  ;;  %v3797_v33 = vrot.slane %v3795_v6, 5  ;;  %v18338_v27 = vld [vmem:[%s23702_s4 + $0x20] sm:$0xff]  }
 0x28e   : > { %v14927_v51 = vcombine.low %v3764_v32, %v3774_v61  ;;  %v3782_v34 = vor.u32 %v3781_v17, %v3778_v20  ;;  %v3802_v26 = vrot.slane %v3800_v43, 4  ;;  %v3805_v46 = vrot.slane %v3803_v44, 5  ;;  %v20191_v32 = vld [vmem:[#allocation2 + $0x60] sm:$0xf]  ;;  %v20193_v44 = vld [vmem:[#allocation2 + $0x5c] sm:$0x1] }
 0x28f   : > { %v3792_v57 = vor.u32 %v3791_v16, %v3787_v19  ;;  %v3809_v0 = vshll.u32 %v20141_v8, 16  ;;  %v3813_v41 = vshrl.u32 %v20141_v8, 16  ;;  %v3819_v7 = vshll.u32 %v20143_v2, 16 }
 0x290   : > { %16626 = vmatpush3.bf16.msra.mxu1 %v18335_v50  ;;  %v3783_v3 = vrot.slane %v3782_v34, 4  ;;  %v3806_v5 = vor.u32 %v3805_v46, %v3802_v26  ;;  %v3824_v60 = vshrl.u32 %v20148_v53, 16  ;;  %v3827_v45 = vshll.u32 %v20148_v53, 16  ;;  %v20200_v34 = vld [vmem:[#allocation2 + $0x64] sm:$0xf] }
 0x291   : > { %v3793_v18 = vrot.slane %v3792_v57, 4  ;;  %16627 = vmatprep.subr.bf16.mxu1 %v18336_v24  ;;  %v3811_v35 = vrot.slane %v3809_v0, 5  ;;  %v3815_v39 = vrot.slane %v3813_v41, 4  ;;  %v3821_v62 = vrot.slane %v3819_v7, 5  ;;  %v18339_v41 = vld [vmem:[%s23702_s4 + $0x28] sm:$0xff]  }
 0x292   : > { %v3788_v55 = vsel %vm19706_vm11, %v3783_v3, %v3787_v19  ;;  %v3807_v29 = vrot.slane %v3806_v5, 4  ;;  %v3826_v37 = vrot.slane %v3824_v60, 4  ;;  %v3829_v14 = vrot.slane %v3827_v45, 5  ;;  %v20209_v45 = vld [vmem:[#allocation2 + $0x6c] sm:$0xf] }
 0x293   : > { %16596 = vmatmul.mubr.bf16.gmra.mrb[52].mxu1 %v14927_v51  ;;  %v3798_v10 = vsel %vm19706_vm11, %v3793_v18, %v3797_v33  ;;  %v3816_v11 = vor.u32 %v3815_v39, %v3811_v35  ;;  %v3833_v4 = vshll.u32 %v20165_v52, 16  ;;  %v3837_v50 = vshrl.u32 %v20165_v52, 16 }
 0x294   : > { %v14928_v38 = vcombine.low %v3788_v55, %v3798_v10  ;;  %v3812_v23 = vsel %vm19706_vm11, %v3807_v29, %v3811_v35  ;;  %16628 = vmatpush3.bf16.msra.mxu1 %v18336_v24  ;;  %v3830_v20 = vor.u32 %v3829_v14, %v3826_v37  ;;  %v3843_v58 = vshll.u32 %v20172_v36, 16  ;;  %v20211_v35 = vld [vmem:[#allocation2 + $0x68] sm:$0x1]  ;;  %v20218_v10 = vld [vmem:[#allocation2 + $0x70] sm:$0xf] }
 0x295   : > { %v3817_v9 = vrot.slane %v3816_v11, 4  ;;  %v3835_v63 = vrot.slane %v3833_v4, 5  ;;  %v3839_v6 = vrot.slane %v3837_v50, 4  ;;  %16629 = vmatprep.subr.bf16.mxu1 %v18337_v21  ;;  %v3848_v47 = vshrl.u32 %v20176_v31, 16 }
 0x296   : > { %16599 = vmatprep.mubr.bf16.mxu1 %v14928_v38  ;;  %v3831_v17 = vrot.slane %v3830_v20, 4  ;;  %v3845_v43 = vrot.slane %v3843_v58, 5  ;;  %v3851_v61 = vshll.u32 %v20176_v31, 16  ;;  %v3857_v19 = vshll.u32 %v20182_v28, 16 }
 0x297   : > { %v3822_v16 = vsel %vm19706_vm11, %v3817_v9, %v3821_v62  ;;  %v3840_v33 = vor.u32 %v3839_v6, %v3835_v63  ;;  %v3850_v24 = vrot.slane %v3848_v47, 4  ;;  %v3861_v51 = vshrl.u32 %v20182_v28, 16 }
 0x298   : > { %v14929_v26 = vcombine.low %v3812_v23, %v3822_v16  ;;  %v3836_v46 = vsel %vm19706_vm11, %v3831_v17, %v3835_v63  ;;  %v3853_v57 = vrot.slane %v3851_v61, 5  ;;  %v3859_v0 = vrot.slane %v3857_v19, 5  ;;  %16630 = vmatpush3.bf16.msra.mxu1 %v18337_v21  ;;  %v18340_v63 = vld [vmem:[%s23702_s4 + $0x30] sm:$0xff]   ;;  %v20231_v61 = vld [vmem:[#allocation2 + $0x78] sm:$0xf] }
 0x299   : > { %v3841_v7 = vrot.slane %v3840_v33, 4  ;;  %v3863_v3 = vrot.slane %v3861_v51, 4  ;;  %v3867_v5 = vshll.u32 %v20193_v44, 16  ;;  %v3872_v60 = vshrl.u32 %v20191_v32, 16  ;;  %16631 = vmatprep.subr.bf16.mxu1 %v18338_v27  ;;  %v20227_v17 = vld [vmem:[#allocation2 + $0x74] sm:$0x1] }
 0x29a   : > { %v3854_v18 = vor.u32 %v3853_v57, %v3850_v24  ;;  %v3875_v39 = vshll.u32 %v20191_v32, 16  ;;  %v3881_v21 = vshll.u32 %v20200_v34, 16  ;;  %v3885_v62 = vshrl.u32 %v20200_v34, 16  ;;  %v20235_v51 = vld [vmem:[#allocation2 + $0x7c] sm:$0xf] }
 0x29b   : > { %16600 = vmatmul.mubr.bf16.gmra.mrb[56].mxu1 %v14929_v26  ;;  %v3846_v55 = vsel %vm19706_vm11, %v3841_v7, %v3845_v43  ;;  %v3864_v29 = vor.u32 %v3863_v3, %v3859_v0  ;;  %v3869_v37 = vrot.slane %v3867_v5, 5  ;;  %v3874_v14 = vrot.slane %v3872_v60, 4  ;;  %v20239_v60 = vld [vmem:[#allocation2 + $0x80] sm:$0x1] }
 0x29c   : > { %v14930_v11 = vcombine.low %v3836_v46, %v3846_v55  ;;  %v3855_v4 = vrot.slane %v3854_v18, 4  ;;  %v3877_v50 = vrot.slane %v3875_v39, 5  ;;  %v3883_v38 = vrot.slane %v3881_v21, 5  ;;  %16632 = vmatpush3.bf16.msra.mxu1 %v18338_v27  ;;  %23920 = vst [vmem:[#allocation16_spill] sm:$0xff] %v20239_v60  ;;  %v18341_v39 = vld [vmem:[%s23702_s4 + $0x38] sm:$0xff]  }
 0x29d   : > { %v3865_v23 = vrot.slane %v3864_v29, 4  ;;  %v3887_v20 = vrot.slane %v3885_v62, 4  ;;  %v3891_v58 = vshll.u32 %v20211_v35, 16  ;;  %v3896_v9 = vshrl.u32 %v20209_v45, 16  ;;  %16633 = vmatprep.subr.bf16.mxu1 %v18339_v41 }
 0x29e   : > { %16603 = vmatprep.mubr.bf16.mxu1 %v14930_v11  ;;  %v3860_v6 = vsel %vm19706_vm11, %v3855_v4, %v3859_v0  ;;  %v3878_v47 = vor.u32 %v3877_v50, %v3874_v14  ;;  %v3899_v27 = vshll.u32 %v20209_v45, 16  ;;  %v3905_v43 = vshll.u32 %v20218_v10, 16  ;;  %v20253_v4 = vld [vmem:[#allocation2 + $0x88] sm:$0xf] }
 0x29f   : > { %v3870_v19 = vsel %vm19706_vm11, %v3865_v23, %v3869_v37  ;;  %v3888_v16 = vor.u32 %v3887_v20, %v3883_v38  ;;  %v3893_v33 = vrot.slane %v3891_v58, 5  ;;  %v3898_v24 = vrot.slane %v3896_v9, 4  ;;  %v20255_v9 = vld [vmem:[#allocation2 + $0x8c] sm:$0x1] }
 0x2a0   : > { %v14931_v26 = vcombine.low %v3860_v6, %v3870_v19  ;;  %v3879_v46 = vrot.slane %v3878_v47, 4  ;;  %v3901_v57 = vrot.slane %v3899_v27, 5  ;;  %v3907_v0 = vrot.slane %v3905_v43, 5  ;;  %16634 = vmatpush3.bf16.msra.mxu1 %v18339_v41  ;;  %v20247_v41 = vld [vmem:[#allocation2 + $0x84] sm:$0xf]  ;;  %23921 = vst [vmem:[#allocation18_spill] sm:$0xff] %v20255_v9 }
 0x2a1   : > { %v3889_v7 = vrot.slane %v3888_v16, 4  ;;  %v3909_v3 = vshrl.u32 %v20218_v10, 16  ;;  %v3915_v5 = vshll.u32 %v20227_v17, 16  ;;  %v3920_v18 = vshrl.u32 %v20231_v61, 16  ;;  %16635 = vmatprep.subr.bf16.mxu1 %v18340_v63  ;;  %v20257_v6 = vld [vmem:[#allocation2 + $0x90] sm:$0xf] }
 0x2a2   : > { %v3902_v21 = vor.u32 %v3901_v57, %v3898_v24  ;;  %v3923_v62 = vshll.u32 %v20231_v61, 16  ;;  %v3929_v55 = vshll.u32 %v20235_v51, 16  ;;  %v3884_v29 = vsel %vm19706_vm11, %v3879_v46, %v3883_v38  ;;  %v20264_v19 = vld [vmem:[%s23702_s4 + $0x80] sm:$0xff]  }
 0x2a3   : > { %16604 = vmatmul.mubr.bf16.gmra.mrb[60].mxu1 %v14931_v26  ;;  %v3894_v37 = vsel %vm19706_vm11, %v3889_v7, %v3893_v33  ;;  %v3911_v14 = vrot.slane %v3909_v3, 4  ;;  %v3922_v11 = vrot.slane %v3920_v18, 4  ;;  %v3917_v20 = vrot.slane %v3915_v5, 5 }
 0x2a4   : > { %v14932_v50 = vcombine.low %v3884_v29, %v3894_v37  ;;  %v3903_v23 = vrot.slane %v3902_v21, 4  ;;  %v3925_v58 = vrot.slane %v3923_v62, 5  ;;  %16636 = vmatpush3.bf16.msra.mxu1 %v18340_v63  ;;  %v3931_v27 = vrot.slane %v3929_v55, 5  ;;  %v20272_v62 = vld [vmem:[#allocation2 + $0x94] sm:$0xf] }
 0x2a5   : > { %v3912_v47 = vor.u32 %v3911_v14, %v3907_v0  ;;  %v3933_v38 = vshrl.u32 %v20235_v51, 16  ;;  %v3944_v43 = vshrl.u32 %v20247_v41, 16  ;;  %16637 = vmatprep.subr.bf16.mxu1 %v18341_v39  ;;  %v3939_v33 = vshll.u32 %v20239_v60, 16  ;;  %v20277_v14 = vld [vmem:[#allocation2 + $0x98] sm:$0x1] }
 0x2a6   : > { %16607 = vmatprep.mubr.bf16.mxu1 %v14932_v50  ;;  %v3926_v16 = vor.u32 %v3925_v58, %v3922_v11  ;;  %v3947_v24 = vshll.u32 %v20247_v41, 16  ;;  %v3953_v63 = vshll.u32 %v20253_v4, 16  ;;  %v3908_v26 = vsel %vm19706_vm11, %v3903_v23, %v3907_v0  ;;  %23922 = vst [vmem:[#allocation17_spill] sm:$0xff] %v20277_v14  ;;  %v20280_v11 = vld [vmem:[#allocation2 + $0x9c] sm:$0xf] }
 0x2a7   : > { %v3913_v46 = vrot.slane %v3912_v47, 4  ;;  %v3935_v57 = vrot.slane %v3933_v38, 4  ;;  %v3946_v7 = vrot.slane %v3944_v43, 4  ;;  %v3957_v21 = vshrl.u32 %v20253_v4, 16 }
 0x2a8   : > { %v3927_v3 = vrot.slane %v3926_v16, 4  ;;  %v3949_v5 = vrot.slane %v3947_v24, 5  ;;  %v3955_v18 = vrot.slane %v3953_v63, 5  ;;  %16638 = vmatpush3.bf16.msra.mxu1 %v18341_v39  ;;  %v3963_v37 = vshll.u32 %v20255_v9, 16  ;;  %v20286_v16 = vld [vmem:[#allocation2 + $0xa0] sm:$0xf] }
 0x2a9   : > { %v3918_v55 = vsel %vm19706_vm11, %v3913_v46, %v3917_v20  ;;  %v3936_v29 = vor.u32 %v3935_v57, %v3931_v27  ;;  %v3968_v0 = vshrl.u32 %v20257_v6, 16  ;;  %16671 = vmatprep.subr.bf16.mxu1 %v20264_v19  ;;  %v3941_v23 = vrot.slane %v3939_v33, 5 }
 0x2aa   : > { %v14933_v50 = vcombine.low %v3908_v26, %v3918_v55  ;;  %v3950_v58 = vor.u32 %v3949_v5, %v3946_v7  ;;  %v3959_v47 = vrot.slane %v3957_v21, 4  ;;  %v3932_v39 = vsel %vm19706_vm11, %v3927_v3, %v3931_v27  ;;  %v20292_v5 = vld [vmem:[#allocation2 + $0xa4] sm:$0x1] }
 0x2ab   : > { %v3937_v38 = vrot.slane %v3936_v29, 4  ;;  %v3970_v20 = vrot.slane %v3968_v0, 4  ;;  %v3971_v43 = vshll.u32 %v20257_v6, 16  ;;  %v3977_v46 = vshll.u32 %v20272_v62, 16  ;;  %23923 = vst [vmem:[#allocation19_spill] sm:$0xff] %v20292_v5 }
 0x2ac   : > { %16608 = vmatmul.mubr.bf16.gmra.mrb[64].mxu1 %v14933_v50  ;;  %v3951_v24 = vrot.slane %v3950_v58, 4  ;;  %v3960_v63 = vor.u32 %v3959_v47, %v3955_v18  ;;  %v3981_v57 = vshrl.u32 %v20272_v62, 16  ;;  %v3965_v26 = vrot.slane %v3963_v37, 5 }
 0x2ad   : > { %v3942_v33 = vsel %vm19706_vm11, %v3937_v38, %v3941_v23  ;;  %v3973_v7 = vrot.slane %v3971_v43, 5  ;;  %v3992_v27 = vshrl.u32 %v20280_v11, 16  ;;  %v3979_v55 = vrot.slane %v3977_v46, 5 }
 0x2ae   : > { %v14934_v3 = vcombine.low %v3932_v39, %v3942_v33  ;;  %v3961_v21 = vrot.slane %v3960_v63, 4  ;;  %v3987_v29 = vshll.u32 %v20277_v14, 16  ;;  %v3956_v0 = vsel %vm19706_vm11, %v3951_v24, %v3955_v18 }
 0x2af   : > { %v3974_v50 = vor.u32 %v3973_v7, %v3970_v20  ;;  %v3983_v58 = vrot.slane %v3981_v57, 4  ;;  %v3994_v47 = vrot.slane %v3992_v27, 4  ;;  %v3995_v23 = vshll.u32 %v20280_v11, 16  ;;  %v20306_v20 = vld [vmem:[#allocation2 + $0xac] sm:$0xf] }
 0x2b0   : > { %16611 = vmatprep.mubr.bf16.mxu1 %v14934_v3  ;;  %v3966_v37 = vsel %vm19706_vm11, %v3961_v21, %v3965_v26  ;;  %v4001_v39 = vshll.u32 %v20286_v16, 16  ;;  %v4005_v38 = vshrl.u32 %v20286_v16, 16  ;;  %v4011_v18 = vshll.u32 %v20292_v5, 16  ;;  %v20308_v7 = vld [vmem:[#allocation2 + $0xb0] sm:$0x1] }
 0x2b1   : > { %v14935_v43 = vcombine.low %v3956_v0, %v3966_v37  ;;  %v3975_v63 = vrot.slane %v3974_v50, 4  ;;  %v3984_v46 = vor.u32 %v3983_v58, %v3979_v55  ;;  %v3997_v24 = vrot.slane %v3995_v23, 5  ;;  %v20311_v27 = vld [vmem:[#allocation2 + $0xb4] sm:$0xf]  ;;  %v20316_v58 = vld [vmem:[#allocation2 + $0xb8] sm:$0xf] }
 0x2b2   : > { %v4003_v57 = vrot.slane %v4001_v39, 5  ;;  %v4007_v33 = vrot.slane %v4005_v38, 4  ;;  %v4016_v26 = vshrl.u32 %v20298_v42, 16  ;;  %v3989_v0 = vrot.slane %v3987_v29, 5 }
 0x2b3   : > { %v3980_v3 = vsel %vm19706_vm11, %v3975_v63, %v3979_v55  ;;  %v3985_v21 = vrot.slane %v3984_v46, 4  ;;  %v4019_v50 = vshll.u32 %v20298_v42, 16  ;;  %v3998_v37 = vor.u32 %v3997_v24, %v3994_v47 }
 0x2b4   : > { %16612 = vmatmul.mubr.bf16.gmra.mrb[68].mxu1 %v14935_v43  ;;  %v4008_v23 = vor.u32 %v4007_v33, %v4003_v57  ;;  %v4018_v39 = vrot.slane %v4016_v26, 4  ;;  %v4025_v38 = vshll.u32 %v20306_v20, 16  ;;  %v4013_v30 = vrot.slane %v4011_v18, 5 }
 0x2b5   : > { %v3990_v49 = vsel %vm19706_vm11, %v3985_v21, %v3989_v0  ;;  %v4021_v5 = vrot.slane %v4019_v50, 5  ;;  %v4029_v14 = vshrl.u32 %v20306_v20, 16  ;;  %v3999_v63 = vrot.slane %v3998_v37, 4  ;;  %v20330_v21 = vld [vmem:[#allocation2 + $0xbc] sm:$0x1] }
 0x2b6   : > { %v14936_v55 = vcombine.low %v3980_v3, %v3990_v49  ;;  %v4009_v29 = vrot.slane %v4008_v23, 4  ;;  %v4027_v46 = vrot.slane %v4025_v38, 5  ;;  %v4035_v43 = vshll.u32 %v20308_v7, 16 }
 0x2b7   : > { %v4022_v9 = vor.u32 %v4021_v5, %v4018_v39  ;;  %v4031_v60 = vrot.slane %v4029_v14, 4  ;;  %v4040_v47 = vshrl.u32 %v20311_v27, 16  ;;  %v4043_v33 = vshll.u32 %v20311_v27, 16 }
 0x2b8   : > { %16615 = vmatprep.mubr.bf16.mxu1 %v14936_v55  ;;  %v4014_v24 = vsel %vm19706_vm11, %v4009_v29, %v4013_v30  ;;  %v4049_v18 = vshll.u32 %v20316_v58, 16  ;;  %v4004_v49 = vsel %vm19706_vm11, %v3999_v63, %v4003_v57  ;;  %v4053_v37 = vshrl.u32 %v20316_v58, 16 }
 0x2b9   : > { %v4023_v26 = vrot.slane %v4022_v9, 4  ;;  %v4032_v3 = vor.u32 %v4031_v60, %v4027_v46  ;;  %v4042_v14 = vrot.slane %v4040_v47, 4  ;;  %v14937_v5 = vcombine.low %v4004_v49, %v4014_v24 }
 0x2ba   : > { %v4045_v0 = vrot.slane %v4043_v33, 5  ;;  %v4051_v50 = vrot.slane %v4049_v18, 5  ;;  %v4037_v39 = vrot.slane %v4035_v43, 5  ;;  %v4055_v38 = vrot.slane %v4053_v37, 4  ;;  %v23929_v33 = vld [vmem:[#allocation19_spill] sm:$0xff] }
 0x2bb   : > { %v4033_v23 = vrot.slane %v4032_v3, 4  ;;  %v4059_v55 = vshll.u32 %v20330_v21, 16  ;;  %v4028_v57 = vsel %vm19706_vm11, %v4023_v26, %v4027_v46  ;;  %v14952_v9 = vcombine.low %v20122_v54, %v20126_v12 }
 0x2bc   : > { %16616 = vmatmul.mubr.bf16.gmra.mrb[72].mxu1 %v14937_v5  ;;  %v4046_v30 = vor.u32 %v4045_v0, %v4042_v14  ;;  %v4056_v43 = vor.u32 %v4055_v38, %v4051_v50  ;;  %v18567_v38 = vld [vmem:[#allocation2] sm:$0xf]  ;;  %v4788_v18 = vrot.slane %v20253_v4, 5  ;;  %v4812_v63 = vrot.slane %v20308_v7, 5  ;;  %v5567_v7 = vld [vmem:[#allocation2 + $0xa4] sm:$0x1] }
 0x2bd   : > { %v4038_v60 = vsel %vm19706_vm11, %v4033_v23, %v4037_v39  ;;  %v4061_v3 = vrot.slane %v4059_v55, 5  ;;  %v20366_v55 = vld [vmem:[#allocation2 + $0x4] sm:$0xf]  ;;  %v14949_v23 = vcombine.low %v20048_v25, %v20065_v13  ;;  %v4742_v13 = vrot.slane %v20128_v56, 5  ;;  %v4666_v14 = vld [vmem:[#allocation2 + $0x60] sm:$0xe] }
 0x2be   : > { %v14938_v29 = vcombine.low %v4028_v57, %v4038_v60  ;;  %v4047_v47 = vrot.slane %v4046_v30, 4  ;;  %v4057_v26 = vrot.slane %v4056_v43, 4  ;;  %v14948_v57 = vcombine.low %v18567_v38, %v20366_v55  ;;  %v4663_v43 = vld [vmem:[#allocation2 + $0x3c] sm:$0xe] }
 0x2bf   : > { %v4746_v38 = vrot.slane %v20141_v8, 5 }
 0x2c0   : > { %16619 = vmatprep.mubr.bf16.mxu1 %v14938_v29  ;;  %v4052_v39 = vsel %vm19706_vm11, %v4047_v47, %v4051_v50  ;;  %v4062_v30 = vsel %vm19706_vm11, %v4057_v26, %v4061_v3  ;;  %v4662_v29 = vld [vmem:[#allocation2 + $0x30] sm:$0xe]  ;;  %v4739_v50 = vrot.slane %v20126_v12, 5  ;;  %v4664_v47 = vld [vmem:[#allocation2 + $0x48] sm:$0xe]  ;;  %v14950_v26 = vcombine.low %v20081_v40, %v20093_v48 }
 0x2c1   : > { %v14939_v60 = vcombine.low %v4052_v39, %v4062_v30  ;;  %v18346_v3 = vld [vmem:[%s23702_s4 + $0x88] sm:$0xff]   ;;  %v14951_v39 = vcombine.low %v20110_v59, %v20115_v15  ;;  %v14976_v30 = vrot.slane %v4662_v29, 9  ;;  %v4749_v40 = vrot.slane %v20143_v2, 5  ;;  %v4665_v48 = vld [vmem:[#allocation2 + $0x54] sm:$0xe] }
 0x2c2   : > { %v4741_v25 = vrot.slane %v4739_v50, 4  ;;  %v4748_v0 = vrot.slane %v4746_v38, 4  ;;  %v14978_v59 = vrot.slane %v4664_v47, 9  ;;  %v4753_v29 = vrot.slane %v20165_v52, 5 }
 0x2c3   : > { %v20388_v37 = vsel %vm20380_vm2, %v14976_v30, %v4739_v50  ;;  %v4756_v2 = vrot.slane %v20172_v36, 5  ;;  %v14979_v30 = vrot.slane %v4665_v48, 9  ;;  %v18349_v36 = vld [vmem:[%s23702_s4 + $0x90] sm:$0xff]   ;;  %v4767_v48 = vrot.slane %v20200_v34, 5  ;;  %v4669_v50 = vld [vmem:[#allocation2 + $0x84] sm:$0xe] }
 0x2c4   : > { %16620 = vmatmul.mubr.bf16.gmra.mrb[76].mxu1 %v14939_v60  ;;  %v14977_v60 = vrot.slane %v4663_v43, 9  ;;  %v20393_v5 = vsel %vm20380_vm2, %v4741_v25, %v4742_v13  ;;  %v4760_v43 = vrot.slane %v20182_v28, 5  ;;  %v4755_v47 = vrot.slane %v4753_v29, 4  ;;  %v4667_v13 = vld [vmem:[#allocation2 + $0x6c] sm:$0xe] }
 0x2c5   : > { %16639 = vmatprep.mubr.bf16.mxu1 %v14948_v57  ;;  %v4763_v25 = vrot.slane %v20193_v44, 5  ;;  %v4770_v44 = vrot.slane %v20211_v35, 5  ;;  %v14983_v46 = vrot.slane %v4669_v50, 9 }
 0x2c6   : > { %v20397_v56 = vsel %vm20380_vm2, %v14977_v60, %v4746_v38  ;;  %v20424_v60 = vsel %vm20380_vm2, %v14979_v30, %v4760_v43  ;;  %v4668_v38 = vld [vmem:[#allocation2 + $0x78] sm:$0xe]  ;;  %v4777_v30 = vrot.slane %v20227_v17, 5 }
 0x2c7   : > { %v20481_v12 = vsel %vm20380_vm2, %v14983_v46, %v4788_v18 }
 0x2cc   : > { %16640 = vmatmul.mubr.bf16.vlgmr.msra.gmra.mrb[48].mxu1 %v14949_v23  ;;  %v20406_v23 = vsel %vm20380_vm2, %v4748_v0, %v4749_v40  ;;  %v20420_v0 = vsel %vm20380_vm2, %v4755_v47, %v4756_v2  ;;  %v14980_v40 = vrot.slane %v4666_v14, 9  ;;  %v4774_v2 = vrot.slane %v20218_v10, 5 }
 0x2cd   : > { %16672 = vmatpush3.bf16.msra.mxu1 %v20264_v19  ;;  %16643 = vmatprep.mubr.bf16.mxu1 %v14950_v26  ;;  %v20415_v19 = vsel %vm20380_vm2, %v14978_v59, %v4753_v29  ;;  %v4762_v26 = vrot.slane %v4760_v43, 4  ;;  %v4769_v47 = vrot.slane %v4767_v48, 4  ;;  %v14981_v14 = vrot.slane %v4667_v13, 9  ;;  %v18352_v59 = vld [vmem:[%s23702_s4 + $0x98] sm:$0xff]   ;;  %v23926_v13 = vld [vmem:[#allocation16_spill] sm:$0xff] }
 0x2ce   : > { %16673 = vmatprep.subr.bf16.mxu1 %v18346_v3  ;;  %v4776_v35 = vrot.slane %v4774_v2, 4  ;;  %v4784_v49 = vrot.slane %v23926_v13, 5  ;;  %v4671_v13 = vld [vmem:[#allocation2 + $0x9c] sm:$0xe] }
 0x2cf   : > { %v20431_v29 = vsel %vm20380_vm2, %v4762_v26, %v4763_v25  ;;  %v20443_v26 = vsel %vm20380_vm2, %v14980_v40, %v4767_v48  ;;  %v14982_v25 = vrot.slane %v4668_v38, 9  ;;  %v20448_v43 = vsel %vm20380_vm2, %v4769_v47, %v4770_v44  ;;  %v4670_v44 = vld [vmem:[#allocation2 + $0x90] sm:$0xe] }
 0x2d0   : > { %v20452_v17 = vsel %vm20380_vm2, %v14981_v14, %v4774_v2  ;;  %v20460_v38 = vsel %vm20380_vm2, %v4776_v35, %v4777_v30  ;;  %v4790_v47 = vrot.slane %v4788_v18, 4  ;;  %v18355_v30 = vld [vmem:[%s23702_s4 + $0xa0] sm:$0xff]   ;;  %v23928_v2 = vld [vmem:[#allocation17_spill] sm:$0xff]  ;;  %v14985_v18 = vrot.slane %v4671_v13, 9 }
 0x2d1   : > { %16674 = vmatpush3.bf16.msra.mxu1 %v18346_v3  ;;  %v4781_v3 = vrot.slane %v20235_v51, 5  ;;  %v4798_v46 = vrot.slane %v23928_v2, 5 }
 0x2d2   : > { %16675 = vmatprep.subr.bf16.mxu1 %v18349_v36 }
 0x2d3   : > { %v4783_v48 = vrot.slane %v4781_v3, 4  ;;  %v20473_v50 = vsel %vm20380_vm2, %v14982_v25, %v4781_v3  ;;  %v4802_v25 = vrot.slane %v20286_v16, 5  ;;  %v4672_v3 = vld [vmem:[#allocation2 + $0xa8] sm:$0xe] }
 0x2d4   : > { %16644 = vmatmul.mubr.bf16.gmra.mrb[52].mxu1 %v14951_v39  ;;  %v23927_v39 = vld [vmem:[#allocation18_spill] sm:$0xff]  ;;  %v14986_v13 = vrot.slane %v4672_v3, 9 }
 0x2d5   : > { %16647 = vmatprep.mubr.bf16.mxu1 %v14952_v9  ;;  %16676 = vmatpush3.bf16.msra.mxu1 %v18349_v36  ;;  %v4791_v14 = vrot.slane %v23927_v39, 5  ;;  %v20477_v54 = vsel %vm20380_vm2, %v4783_v48, %v4784_v49  ;;  %v4795_v9 = vrot.slane %v20272_v62, 5  ;;  %v14984_v39 = vrot.slane %v4670_v44, 9  ;;  %v18358_v49 = vld [vmem:[%s23702_s4 + $0xa8] sm:$0xff]  }
 0x2d6   : > { %16677 = vmatprep.subr.bf16.mxu1 %v18352_v59  ;;  %v4804_v36 = vrot.slane %v4802_v25, 4  ;;  %v4809_v44 = vrot.slane %v20306_v20, 5 }
 0x2d7   : > { %v20488_v35 = vsel %vm20380_vm2, %v4790_v47, %v4791_v14  ;;  %v4797_v48 = vrot.slane %v4795_v9, 4  ;;  %v20496_v40 = vsel %vm20380_vm2, %v14984_v39, %v4795_v9  ;;  %v4805_v47 = vrot.slane %v23929_v33, 5  ;;  %v4673_v14 = vld [vmem:[#allocation2 + $0xb4] sm:$0xe] }
 0x2d8   : > { %v4816_v9 = vrot.slane %v20316_v58, 5  ;;  %v4811_v24 = vrot.slane %v4809_v44, 4  ;;  %v14987_v3 = vrot.slane %v4673_v14, 9  ;;  %v23931_v33 = vcombine.low %v20148_v53, %v20165_v52 }
 0x2d9   : > { %16678 = vmatpush3.bf16.msra.mxu1 %v18352_v59  ;;  %v20505_v2 = vsel %vm20380_vm2, %v4797_v48, %v4798_v46  ;;  %v20509_v59 = vsel %vm20380_vm2, %v14985_v18, %v4802_v25  ;;  %v20516_v39 = vsel %vm20380_vm2, %v4804_v36, %v4805_v47  ;;  %v23930_v48 = vcombine.low %v20138_v1, %v20141_v8  ;;  %v18361_v8 = vld [vmem:[%s23702_s4 + $0xb0] sm:$0xff]   ;;  %v18366_v47 = vld [vmem:[%s23702_s4 + $0xc0] sm:$0xff]   ;;  %v6295_v25 = vld [vmem:[#allocation2 + $0x9c] sm:$0xe] }
 0x2da   : > { %16679 = vmatprep.subr.bf16.mxu1 %v18355_v30  ;;  %v4818_v46 = vrot.slane %v4816_v9, 4  ;;  %v4819_v18 = vrot.slane %v20330_v21, 5  ;;  %v20530_v36 = vsel %vm20380_vm2, %v14986_v13, %v4809_v44  ;;  %v20534_v1 = vsel %vm20380_vm2, %v4811_v24, %v4812_v63  ;;  %v18364_v63 = vld [vmem:[%s23702_s4 + $0xb8] sm:$0xff]   ;;  %v4658_v44 = vld [vmem:[#allocation2] sm:$0xe] }
 0x2db   : > { %v20543_v53 = vsel %vm20380_vm2, %v14987_v3, %v4816_v9  ;;  %v23932_v24 = vcombine.low %v20176_v31, %v20182_v28  ;;  %v23935_v31 = vcombine.low %v20231_v61, %v20235_v51  ;;  %v23936_v28 = vcombine.low %v20247_v41, %v20253_v4  ;;  %v18569_v9 = vld [vmem:[#allocation2 + $0x8] sm:$0x1]  ;;  %v18570_v4 = vld [vmem:[#allocation2 + $0x10] sm:$0xf] }
 0x2dc   : > { %16648 = vmatmul.mubr.bf16.gmra.mrb[56].mxu1 %v23930_v48  ;;  %v20547_v52 = vsel %vm20380_vm2, %v4818_v46, %v4819_v18  ;;  %v14972_v14 = vrot.slane %v4658_v44, 9  ;;  %v23939_v61 = vcombine.low %v20298_v42, %v20306_v20  ;;  %v18572_v42 = vld [vmem:[#allocation2 + $0x14] sm:$0x1]  ;;  %v4660_v46 = vld [vmem:[#allocation2 + $0x18] sm:$0xe] }
 0x2dd   : > { %16651 = vmatprep.mubr.bf16.mxu1 %v23931_v33  ;;  %16680 = vmatpush3.bf16.msra.mxu1 %v18355_v30  ;;  %v23933_v30 = vcombine.low %v20191_v32, %v20200_v34  ;;  %v23937_v32 = vcombine.low %v20257_v6, %v20272_v62  ;;  %v4711_v34 = vrot.slane %v20366_v55, 5  ;;  %v4718_v6 = vrot.slane %v18570_v4, 5  ;;  %v18571_v62 = vld [vmem:[#allocation2 + $0x1c] sm:$0xf]  ;;  %v18573_v18 = vld [vmem:[#allocation2 + $0x20] sm:$0x1] }
 0x2de   : > { %16681 = vmatprep.subr.bf16.mxu1 %v18358_v49  ;;  %v4725_v55 = vrot.slane %v18571_v62, 5  ;;  %v4721_v20 = vrot.slane %v18572_v42, 5  ;;  %v18370_v4 = vld [vmem:[%s23702_s4 + $0xe0] sm:$0xff]   ;;  %v23942_v62 = vcombine.low %v20397_v56, %v20406_v23  ;;  %v18373_v56 = vld [vmem:[%s23702_s4 + $0xf8] sm:$0xff]   ;;  %v20636_v23 = vld [vmem:[#allocation2 + $0x34] sm:$0xf] }
 0x2df   : > { %v4713_v13 = vrot.slane %v4711_v34, 4  ;;  %v4712_v51 = vsel %vm20380_vm2, %v14972_v14, %v4711_v34  ;;  %v4720_v48 = vrot.slane %v4718_v6, 4  ;;  %v4661_v14 = vld [vmem:[#allocation2 + $0x24] sm:$0xe]  ;;  %v20646_v42 = vld [vmem:[#allocation2 + $0x44] sm:$0x1] }
 0x2e0   : > { %v4727_v3 = vrot.slane %v4725_v55, 4  ;;  %v6294_v21 = vld [vmem:[#allocation2 + $0x90] sm:$0xe] }
 0x2e1   : > { %16682 = vmatpush3.bf16.msra.mxu1 %v18358_v49  ;;  %v23934_v49 = vcombine.low %v20209_v45, %v20218_v10  ;;  %v4714_v45 = vrot.slane %v18569_v9, 5  ;;  %v23938_v10 = vcombine.low %v20280_v11, %v20286_v16  ;;  %v23940_v11 = vcombine.low %v20311_v27, %v20316_v58  ;;  %v4659_v16 = vld [vmem:[#allocation2 + $0xc] sm:$0xe]  ;;  %v18368_v9 = vld [vmem:[%s23702_s4 + $0xd0] sm:$0xff]  }
 0x2e2   : > { %16683 = vmatprep.subr.bf16.mxu1 %v18361_v8 }
 0x2e3   : > { %v4715_v41 = vsel %vm20380_vm2, %v4713_v13, %v4714_v45  ;;  %v14975_v45 = vrot.slane %v4661_v14, 9 }
 0x2e4   : > { %16652 = vmatmul.mubr.bf16.gmra.mrb[60].mxu1 %v23932_v24  ;;  %v15004_v33 = vcombine.low %v4712_v51, %v4715_v41  ;;  %v4722_v24 = vsel %vm20380_vm2, %v4720_v48, %v4721_v20  ;;  %v23941_v41 = vcombine.low %v20388_v37, %v20393_v5  ;;  %v23943_v5 = vcombine.low %v20415_v19, %v20420_v0  ;;  %v18372_v37 = vld [vmem:[%s23702_s4 + $0xf0] sm:$0xff]   ;;  %v6285_v19 = vld [vmem:[#allocation2 + $0x24] sm:$0xe]  ;;  %v20638_v0 = vld [vmem:[#allocation2 + $0x38] sm:$0x1] }
 0x2e5   : > { %16655 = vmatprep.mubr.bf16.mxu1 %v23933_v30  ;;  %16684 = vmatpush3.bf16.msra.mxu1 %v18361_v8  ;;  %v4728_v8 = vrot.slane %v18573_v18, 5  ;;  %v4732_v30 = vrot.slane %v20115_v15, 5  ;;  %v18574_v15 = vld [vmem:[#allocation2 + $0x2c] sm:$0x1]  ;;  %v6287_v20 = vld [vmem:[#allocation2 + $0x3c] sm:$0xe] }
 0x2e6   : > { %16685 = vmatprep.subr.bf16.mxu1 %v18364_v63  ;;  %v4735_v13 = vrot.slane %v18574_v15, 5  ;;  %v20651_v18 = vld [vmem:[#allocation2 + $0x4c] sm:$0xf]  ;;  %v6373_v15 = vrot.slane %v20638_v0, 5 }
 0x2e7   : > { %v4734_v44 = vrot.slane %v4732_v30, 4 }
 0x2e9   : > { %16686 = vmatpush3.bf16.msra.mxu1 %v18364_v63  ;;  %v14973_v63 = vrot.slane %v4659_v16, 9  ;;  %v23944_v16 = vcombine.low %v20424_v60, %v20431_v29  ;;  %v20657_v60 = vld [vmem:[%s23702_s4 + $0x100] sm:$0xff]   ;;  %v20659_v29 = vld [vmem:[#allocation2 + $0x50] sm:$0x1] }
 0x2ea   : > { %16719 = vmatprep.subr.bf16.mxu1 %v18366_v47 }
 0x2eb   : > { %v4719_v27 = vsel %vm20380_vm2, %v14973_v63, %v4718_v6  ;;  %v18371_v6 = vld [vmem:[%s23702_s4 + $0xe8] sm:$0xff]  }
 0x2ec   : > { %16656 = vmatmul.mubr.bf16.gmra.mrb[64].mxu1 %v23934_v49  ;;  %v14974_v49 = vrot.slane %v4660_v46, 9  ;;  %v15005_v58 = vcombine.low %v4719_v27, %v4722_v24  ;;  %v23945_v46 = vcombine.low %v20443_v26, %v20448_v43  ;;  %v20662_v43 = vld [vmem:[#allocation2 + $0x58] sm:$0xf]  ;;  %v15112_v27 = vrot.slane %v6287_v20, 9  ;;  %v20708_v20 = vld [vmem:[#allocation2 + $0x68] sm:$0x1] }
 0x2ed   : > { %16659 = vmatprep.mubr.bf16.mxu1 %v23935_v31  ;;  %v4729_v31 = vsel %vm20380_vm2, %v4727_v3, %v4728_v8  ;;  %v20644_v3 = vld [vmem:[#allocation2 + $0x40] sm:$0xf]  ;;  %v15110_v8 = vrot.slane %v6285_v19, 9 }
 0x2f4   : > { %16660 = vmatmul.mubr.bf16.gmra.mrb[68].mxu1 %v23936_v28  ;;  %v4726_v28 = vsel %vm20380_vm2, %v14974_v49, %v4725_v55  ;;  %v20629_v55 = vld [vmem:[#allocation2 + $0x28] sm:$0xf]  ;;  %v6370_v49 = vrot.slane %v20636_v23, 5 }
 0x2f5   : > { %16663 = vmatprep.mubr.bf16.mxu1 %v23937_v32  ;;  %v18367_v32 = vld [vmem:[%s23702_s4 + $0xc8] sm:$0xff]   ;;  %v15006_v34 = vcombine.low %v4726_v28, %v4729_v31  ;;  %v6363_v48 = vrot.slane %v20629_v55, 5 }
 0x2f6   : > { %v6288_v28 = vld [vmem:[#allocation2 + $0x48] sm:$0xe]  ;;  %v6372_v14 = vrot.slane %v6370_v49, 4 }
 0x2f7   : > { %v6365_v63 = vrot.slane %v6363_v48, 4  ;;  %v20666_v26 = vsel %vm20380_vm2, %v15110_v8, %v6363_v48  ;;  %v20765_v8 = vld [vmem:[#allocation2 + $0xa0] sm:$0xf] }
 0x2fc   : > { %16664 = vmatmul.mubr.bf16.gmra.mrb[72].mxu1 %v23938_v10  ;;  %v4736_v10 = vsel %vm20380_vm2, %v4734_v44, %v4735_v13  ;;  %v6289_v13 = vld [vmem:[#allocation2 + $0x54] sm:$0xe] }
 0x2fd   : > { %16667 = vmatprep.mubr.bf16.mxu1 %v23939_v61  ;;  %v4733_v61 = vsel %vm20380_vm2, %v14975_v45, %v4732_v30  ;;  %v15114_v48 = vrot.slane %v6289_v13, 9 }
 0x2fe   : > { %v15007_v51 = vcombine.low %v4733_v61, %v4736_v10  ;;  %v6380_v61 = vrot.slane %v20646_v42, 5 }
 0x304   : > { %16668 = vmatmul.mubr.bf16.gmra.mrb[76].mxu1 %v23940_v11  ;;  %v6286_v11 = vld [vmem:[#allocation2 + $0x30] sm:$0xe] }
 0x305   : > { %16687 = vmatprep.mubr.bf16.mxu1 %v15004_v33  ;;  %v20631_v33 = vld [vmem:[#allocation2 + $0x2c] sm:$0x1]  ;;  %v15111_v30 = vrot.slane %v6286_v11, 9  ;;  %v6291_v11 = vld [vmem:[#allocation2 + $0x6c] sm:$0xe] }
 0x306   : > { %v6366_v24 = vrot.slane %v20631_v33, 5  ;;  %v15116_v13 = vrot.slane %v6291_v11, 9 }
 0x307   : > { %v20679_v44 = vsel %vm20380_vm2, %v15111_v30, %v6370_v49  ;;  %v23953_v49 = vcombine.low %v20473_v50, %v20477_v54 }
 0x308   : > { %v20670_v31 = vsel %vm20380_vm2, %v6365_v63, %v6366_v24  ;;  %23947 = vst [vmem:[#allocation16_spill] sm:$0xff] %v20679_v44  ;;  %v7928_v44 = vld [vmem:[#allocation2 + $0x60] sm:$0xe] }
 0x309   : > { %23946 = vst [vmem:[#allocation15_spill] sm:$0xff] %v20670_v31  ;;  %v7197_v31 = vld [vmem:[#allocation2 + $0x8c] sm:$0x1] }
 0x30c   : > { %16688 = vmatmul.mubr.bf16.vlgmr.msra.gmra.mrb[48].mxu1 %v15005_v58  ;;  %v6377_v58 = vrot.slane %v20644_v3, 5 }
 0x30d   : > { %16720 = vmatpush3.bf16.msra.mxu1 %v18366_v47  ;;  %16691 = vmatprep.mubr.bf16.mxu1 %v15006_v34  ;;  %v18369_v47 = vld [vmem:[%s23702_s4 + $0xd8] sm:$0xff]  }
 0x30e   : > { %16721 = vmatprep.subr.bf16.mxu1 %v18367_v32  ;;  %v20686_v45 = vsel %vm20380_vm2, %v15112_v27, %v6377_v58  ;;  %v6379_v10 = vrot.slane %v6377_v58, 4 }
 0x30f   : > { %23948 = vst [vmem:[#allocation18_spill] sm:$0xff] %v20686_v45  ;;  %v18397_v45 = vld [vmem:[#allocation2 + $0xc0] sm:$0xff]  }
 0x311   : > { %16722 = vmatpush3.bf16.msra.mxu1 %v18367_v32  ;;  %v20673_v32 = vld [vmem:[#allocation2 + $0x5c] sm:$0x1] }
 0x312   : > { %16723 = vmatprep.subr.bf16.mxu1 %v18368_v9  ;;  %v6394_v30 = vrot.slane %v20673_v32, 5 }
 0x314   : > { %16692 = vmatmul.mubr.bf16.gmra.mrb[52].mxu1 %v15007_v51  ;;  %v6384_v51 = vrot.slane %v20651_v18, 5 }
 0x315   : > { %16695 = vmatprep.mubr.bf16.mxu1 %v23941_v41  ;;  %16724 = vmatpush3.bf16.msra.mxu1 %v18368_v9  ;;  %v20682_v9 = vld [vmem:[#allocation2 + $0x64] sm:$0xf]  ;;  %v15113_v41 = vrot.slane %v6288_v28, 9 }
 0x316   : > { %16725 = vmatprep.subr.bf16.mxu1 %v18369_v47  ;;  %v6386_v19 = vrot.slane %v6384_v51, 4 }
 0x317   : > { %v20716_v63 = vsel %vm20380_vm2, %v15113_v41, %v6384_v51  ;;  %v5561_v51 = vld [vmem:[#allocation2 + $0x8c] sm:$0x1] }
 0x318   : > { %23952 = vst [vmem:[#allocation22_spill] sm:$0xff] %v20716_v63 }
 0x319   : > { %16726 = vmatpush3.bf16.msra.mxu1 %v18369_v47  ;;  %v20693_v47 = vsel %vm20380_vm2, %v6372_v14, %v6373_v15  ;;  %v6398_v14 = vrot.slane %v20682_v9, 5  ;;  %v20735_v15 = vld [vmem:[#allocation2 + $0x88] sm:$0xf] }
 0x31a   : > { %16727 = vmatprep.subr.bf16.mxu1 %v18370_v4  ;;  %23949 = vst [vmem:[#allocation17_spill] sm:$0xff] %v20693_v47  ;;  %v6419_v50 = vrot.slane %v20735_v15, 5 }
 0x31c   : > { %16696 = vmatmul.mubr.bf16.gmra.mrb[56].mxu1 %v23942_v62  ;;  %v6290_v62 = vld [vmem:[#allocation2 + $0x60] sm:$0xe] }
 0x31d   : > { %16699 = vmatprep.mubr.bf16.mxu1 %v23943_v5  ;;  %16728 = vmatpush3.bf16.msra.mxu1 %v18370_v4  ;;  %v6387_v4 = vrot.slane %v20659_v29, 5  ;;  %v20697_v5 = vld [vmem:[#allocation2 + $0x70] sm:$0xf]  ;;  %v15115_v28 = vrot.slane %v6290_v62, 9  ;;  %v6401_v62 = vrot.slane %v20708_v20, 5 }
 0x31e   : > { %16729 = vmatprep.subr.bf16.mxu1 %v18371_v6 }
 0x31f   : > { %v20728_v27 = vsel %vm20380_vm2, %v6386_v19, %v6387_v4  ;;  %v20748_v4 = vsel %vm20380_vm2, %v15115_v28, %v6398_v14  ;;  %v6293_v19 = vld [vmem:[#allocation2 + $0x84] sm:$0xe] }
 0x320   : > { %23954 = vst [vmem:[#allocation23_spill] sm:$0xff] %v20728_v27  ;;  %23957 = vst [vmem:[#allocation26_spill] sm:$0xff] %v20748_v4  ;;  %v15118_v34 = vrot.slane %v6293_v19, 9  ;;  %v7925_v4 = vld [vmem:[#allocation2 + $0x3c] sm:$0xe] }
 0x321   : > { %16730 = vmatpush3.bf16.msra.mxu1 %v18371_v6  ;;  %v6391_v6 = vrot.slane %v20662_v43, 5 }
 0x322   : > { %16731 = vmatprep.subr.bf16.mxu1 %v18372_v37 }
 0x323   : > { %v6393_v24 = vrot.slane %v6391_v6, 4  ;;  %v20732_v58 = vsel %vm20380_vm2, %v15114_v48, %v6391_v6  ;;  %v6400_v6 = vrot.slane %v6398_v14, 4  ;;  %v20751_v48 = vld [vmem:[#allocation2 + $0x94] sm:$0xf] }
 0x324   : > { %16700 = vmatmul.mubr.bf16.gmra.mrb[60].mxu1 %v23944_v16  ;;  %v23951_v16 = vcombine.low %v20452_v17, %v20460_v38  ;;  %v20722_v17 = vld [vmem:[#allocation2 + $0x7c] sm:$0xf]  ;;  %v20724_v38 = vld [vmem:[#allocation2 + $0x80] sm:$0x1]  ;;  %23955 = vst [vmem:[#allocation24_spill] sm:$0xff] %v20732_v58 }
 0x325   : > { %16703 = vmatprep.mubr.bf16.mxu1 %v23945_v46  ;;  %16732 = vmatpush3.bf16.msra.mxu1 %v18372_v37  ;;  %v20710_v46 = vld [vmem:[#allocation2 + $0x74] sm:$0x1]  ;;  %v20741_v54 = vsel %vm20380_vm2, %v6393_v24, %v6394_v30  ;;  %v6412_v30 = vrot.slane %v20722_v17, 5  ;;  %v20761_v28 = vsel %vm20380_vm2, %v6400_v6, %v6401_v62  ;;  %v6415_v41 = vrot.slane %v20724_v38, 5  ;;  %v20778_v58 = vld [vmem:[#allocation2 + $0xac] sm:$0xf] }
 0x326   : > { %16733 = vmatprep.subr.bf16.mxu1 %v18373_v56  ;;  %23956 = vst [vmem:[#allocation25_spill] sm:$0xff] %v20741_v54  ;;  %v6408_v24 = vrot.slane %v20710_v46, 5  ;;  %23959 = vst [vmem:[#allocation28_spill] sm:$0xff] %v20761_v28  ;;  %v6421_v6 = vrot.slane %v6419_v50, 4  ;;  %v6422_v62 = vrot.slane %v5561_v51, 5  ;;  %v23961_v54 = vcombine.low %v20481_v12, %v20488_v35 }
 0x327   : > { %v6414_v37 = vrot.slane %v6412_v30, 4  ;;  %v6426_v51 = vrot.slane %v20751_v48, 5  ;;  %v23965_v12 = vcombine.low %v20496_v40, %v20505_v2  ;;  %v20796_v35 = vld [vmem:[#allocation2 + $0xb8] sm:$0xf]  ;;  %v15120_v2 = vrot.slane %v6295_v25, 9 }
 0x328   : > { %v6447_v25 = vrot.slane %v20796_v35, 5  ;;  %v21045_v28 = vld [vmem:[#allocation2 + $0x40] sm:$0xf] }
 0x329   : > { %16734 = vmatpush3.bf16.msra.mxu1 %v18373_v56  ;;  %v20703_v56 = vsel %vm20380_vm2, %v6379_v10, %v6380_v61  ;;  %v6405_v10 = vrot.slane %v20697_v5, 5  ;;  %v6292_v61 = vld [vmem:[#allocation2 + $0x78] sm:$0xe]  ;;  %v20786_v19 = vsel %vm20380_vm2, %v6414_v37, %v6415_v41  ;;  %v15119_v37 = vrot.slane %v6294_v21, 9  ;;  %v5575_v21 = vld [vmem:[#allocation2 + $0xc4] sm:$0xf] }
 0x32a   : > { %16767 = vmatprep.subr.bf16.mxu1 %v20657_v60  ;;  %23950 = vst [vmem:[#allocation19_spill] sm:$0xff] %v20703_v56  ;;  %v15117_v14 = vrot.slane %v6292_v61, 9  ;;  %23963 = vst [vmem:[#allocation31_spill] sm:$0xff] %v20786_v19  ;;  %v6433_v41 = vrot.slane %v20765_v8, 5  ;;  %v6428_v61 = vrot.slane %v6426_v51, 4  ;;  %v6436_v19 = vrot.slane %v5567_v7, 5 }
 0x32b   : > { %v20755_v11 = vsel %vm20380_vm2, %v15116_v13, %v6405_v10  ;;  %v5570_v13 = vld [vmem:[#allocation2 + $0xb0] sm:$0x1]  ;;  %23987 = vst [vmem:[#allocation51_spill] sm:$0xff] %v21045_v28 }
 0x32c   : > { %16704 = vmatmul.mubr.bf16.gmra.mrb[64].mxu1 %v23951_v16  ;;  %23958 = vst [vmem:[#allocation27_spill] sm:$0xff] %v20755_v11  ;;  %v6407_v16 = vrot.slane %v6405_v10, 4 }
 0x32d   : > { %16707 = vmatprep.mubr.bf16.mxu1 %v23953_v49  ;;  %v5564_v49 = vld [vmem:[#allocation2 + $0x98] sm:$0x1] }
 0x32e   : > { %v20771_v10 = vsel %vm20380_vm2, %v6407_v16, %v6408_v24  ;;  %v20782_v16 = vsel %vm20380_vm2, %v15117_v14, %v6412_v30  ;;  %v20790_v24 = vsel %vm20380_vm2, %v15118_v34, %v6419_v50  ;;  %v20802_v30 = vsel %vm20380_vm2, %v6421_v6, %v6422_v62  ;;  %v6296_v34 = vld [vmem:[#allocation2 + $0xa8] sm:$0xe]  ;;  %v5573_v50 = vld [vmem:[#allocation2 + $0xbc] sm:$0x1]  ;;  %v6297_v62 = vld [vmem:[#allocation2 + $0xb4] sm:$0xe] }
 0x32f   : > { %23960 = vst [vmem:[#allocation29_spill] sm:$0xff] %v20771_v10  ;;  %23962 = vst [vmem:[#allocation30_spill] sm:$0xff] %v20782_v16  ;;  %v6429_v40 = vrot.slane %v5564_v49, 5  ;;  %v6440_v6 = vrot.slane %v20778_v58, 5  ;;  %v20818_v14 = vsel %vm20380_vm2, %v15120_v2, %v6433_v41  ;;  %v15121_v49 = vrot.slane %v6296_v34, 9 }
 0x330   : > { %23964 = vst [vmem:[#allocation32_spill] sm:$0xff] %v20790_v24  ;;  %23966 = vst [vmem:[#allocation33_spill] sm:$0xff] %v20802_v30  ;;  %v5576_v30 = vld [vmem:[#allocation2 + $0xc8] sm:$0x1]  ;;  %v6443_v24 = vrot.slane %v5570_v13, 5  ;;  %v6449_v10 = vrot.slane %v6447_v25, 4 }
 0x331   : > { %v20814_v16 = vsel %vm20380_vm2, %v6428_v61, %v6429_v40  ;;  %23969 = vst [vmem:[#allocation36_spill] sm:$0xff] %v20818_v14  ;;  %v15122_v40 = vrot.slane %v6297_v62, 9  ;;  %v6298_v2 = vld [vmem:[#allocation2 + $0xc0] sm:$0xe]  ;;  %v20831_v34 = vsel %vm20380_vm2, %v15121_v49, %v6440_v6  ;;  %v6457_v62 = vrot.slane %v5576_v30, 5  ;;  %v18378_v30 = vld [vmem:[%s23702_s4 + $0x108] sm:$0xff]  }
 0x332   : > { %23968 = vst [vmem:[#allocation35_spill] sm:$0xff] %v20814_v16  ;;  %23971 = vst [vmem:[#allocation38_spill] sm:$0xff] %v20831_v34  ;;  %v6454_v16 = vrot.slane %v5575_v21, 5  ;;  %v5535_v13 = vld [vmem:[#allocation2 + $0x24] sm:$0xf] }
 0x333   : > { %v20883_v61 = vld [vmem:[#allocation2 + $0x14] sm:$0x1]  ;;  %v5541_v14 = vld [vmem:[#allocation2 + $0x3c] sm:$0xf] }
 0x334   : > { %16708 = vmatmul.mubr.bf16.gmra.mrb[68].mxu1 %v23961_v54  ;;  %v6435_v54 = vrot.slane %v6433_v41, 4  ;;  %v6450_v41 = vrot.slane %v5573_v50, 5  ;;  %v5674_v11 = vshrl.u32 %v5541_v14, 16 }
 0x335   : > { %16711 = vmatprep.mubr.bf16.mxu1 %v23965_v12  ;;  %v20809_v12 = vsel %vm20380_vm2, %v15119_v37, %v6426_v51  ;;  %v6442_v37 = vrot.slane %v6440_v6, 4 }
 0x336   : > { %23967 = vst [vmem:[#allocation34_spill] sm:$0xff] %v20809_v12  ;;  %v20825_v7 = vsel %vm20380_vm2, %v6435_v54, %v6436_v19  ;;  %v23973_v19 = vcombine.low %v20509_v59, %v20516_v39  ;;  %v20844_v54 = vsel %vm20380_vm2, %v15122_v40, %v6447_v25  ;;  %v20848_v50 = vsel %vm20380_vm2, %v6449_v10, %v6450_v41  ;;  %v18374_v25 = vld [vmem:[#allocation2 + $0xc] sm:$0xff]   ;;  %v18385_v12 = vld [vmem:[#allocation2 + $0x60] sm:$0xff]  }
 0x337   : > { %23970 = vst [vmem:[#allocation37_spill] sm:$0xff] %v20825_v7  ;;  %v20835_v51 = vsel %vm20380_vm2, %v6442_v37, %v6443_v24  ;;  %23974 = vst [vmem:[#allocation40_spill] sm:$0xff] %v20844_v54  ;;  %v23976_v24 = vcombine.low %v20530_v36, %v20534_v1  ;;  %v15123_v59 = vrot.slane %v6298_v2, 9  ;;  %v6456_v39 = vrot.slane %v6454_v16, 4  ;;  %v18376_v1 = vld [vmem:[#allocation2 + $0x18] sm:$0xff]   ;;  %v18381_v37 = vld [vmem:[%s23702_s4 + $0x110] sm:$0xff]  }
 0x338   : > { %23972 = vst [vmem:[#allocation39_spill] sm:$0xff] %v20835_v51  ;;  %23975 = vst [vmem:[#allocation41_spill] sm:$0xff] %v20848_v50  ;;  %v23979_v36 = vcombine.low %v20543_v53, %v20547_v52  ;;  %v5529_v40 = vld [vmem:[#allocation2 + $0xc] sm:$0xf]  ;;  %v5530_v41 = vld [vmem:[#allocation2 + $0x10] sm:$0xf] }
 0x339   : > { %v20857_v21 = vsel %vm20380_vm2, %v15123_v59, %v6454_v16  ;;  %v20861_v49 = vsel %vm20380_vm2, %v6456_v39, %v6457_v62  ;;  %v18377_v16 = vld [vmem:[#allocation2 + $0x24] sm:$0xff]   ;;  %v5578_v53 = vshrl.u32 %v5529_v40, 16  ;;  %v5581_v52 = vshll.u32 %v5529_v40, 16  ;;  %v18384_v59 = vld [vmem:[%s23702_s4 + $0x118] sm:$0xff]   ;;  %v5538_v54 = vld [vmem:[#allocation2 + $0x30] sm:$0xf] }
 0x33a   : > { %23977 = vst [vmem:[#allocation42_spill] sm:$0xff] %v20857_v21  ;;  %23978 = vst [vmem:[#allocation43_spill] sm:$0xff] %v20861_v49  ;;  %v5587_v2 = vshll.u32 %v5530_v41, 16  ;;  %v5532_v39 = vld [vmem:[#allocation2 + $0x18] sm:$0xf]  ;;  %v5626_v21 = vshrl.u32 %v5535_v13, 16 }
 0x33b   : > { %v5533_v62 = vld [vmem:[#allocation2 + $0x1c] sm:$0xf]  ;;  %v5602_v40 = vshrl.u32 %v5532_v39, 16  ;;  %v5635_v50 = vshll.u32 %v20629_v55, 16 }
 0x33c   : > { %16712 = vmatmul.mubr.bf16.gmra.mrb[72].mxu1 %v23973_v19  ;;  %v5591_v19 = vshrl.u32 %v5530_v41, 16  ;;  %v5605_v41 = vshll.u32 %v5532_v39, 16  ;;  %v5611_v10 = vshll.u32 %v5533_v62, 16  ;;  %v5615_v6 = vshrl.u32 %v5533_v62, 16  ;;  %v18383_v62 = vld [vmem:[#allocation2 + $0x54] sm:$0xff]  }
 0x33d   : > { %16715 = vmatprep.mubr.bf16.mxu1 %v23976_v24  ;;  %v18379_v24 = vld [vmem:[#allocation2 + $0x30] sm:$0xff]   ;;  %v5628_v51 = vrot.slane %v5626_v21, 4 }
 0x33e   : > { %v20889_v49 = vrot.slane %v5611_v10, 5  ;;  %v5617_v39 = vrot.slane %v5615_v6, 4  ;;  %v18393_v10 = vld [vmem:[%s23702_s4 + $0x130] sm:$0xff]  }
 0x344   : > { %16716 = vmatmul.mubr.bf16.gmra.mrb[76].mxu1 %v23979_v36  ;;  %v5583_v36 = vrot.slane %v5581_v52, 5  ;;  %v18382_v52 = vld [vmem:[#allocation2 + $0x48] sm:$0xff]  }
 0x345   : > { %16735 = vmatprep.mubr.bf16.mxu1 %v18374_v25  ;;  %v5580_v25 = vrot.slane %v5578_v53, 4  ;;  %v5534_v53 = vld [vmem:[#allocation2 + $0x20] sm:$0x1] }
 0x34c   : > { %16736 = vmatmul.mubr.bf16.vlgmr.msra.gmra.mrb[48].mxu1 %v18376_v1  ;;  %v20878_v1 = vrot.slane %v5587_v2, 5  ;;  %v18390_v2 = vld [vmem:[%s23702_s4 + $0x128] sm:$0xff]  }
 0x34d   : > { %16768 = vmatpush3.bf16.msra.mxu1 %v20657_v60  ;;  %16739 = vmatprep.mubr.bf16.mxu1 %v18377_v16  ;;  %v18380_v60 = vld [vmem:[#allocation2 + $0x3c] sm:$0xff]  }
 0x34e   : > { %16769 = vmatprep.subr.bf16.mxu1 %v18378_v30  ;;  %v18387_v16 = vld [vmem:[%s23702_s4 + $0x120] sm:$0xff]  }
 0x351   : > { %16770 = vmatpush3.bf16.msra.mxu1 %v18378_v30  ;;  %v5593_v30 = vrot.slane %v5591_v19, 4  ;;  %v5604_v19 = vrot.slane %v5602_v40, 4 }
 0x352   : > { %16771 = vmatprep.subr.bf16.mxu1 %v18381_v37 }
 0x354   : > { %16740 = vmatmul.mubr.bf16.gmra.mrb[52].mxu1 %v18379_v24  ;;  %v5584_v24 = vor.u32 %v5583_v36, %v5580_v25  ;;  %v5639_v25 = vshrl.u32 %v20629_v55, 16  ;;  %v5597_v36 = vshll.u32 %v20883_v61, 16  ;;  %v20898_v55 = vrot.slane %v5635_v50, 5 }
 0x355   : > { %16743 = vmatprep.mubr.bf16.mxu1 %v18380_v60  ;;  %16772 = vmatpush3.bf16.msra.mxu1 %v18381_v37  ;;  %v5594_v37 = vor.u32 %v5593_v30, %v20878_v1  ;;  %v5607_v60 = vrot.slane %v5605_v41, 5  ;;  %v5621_v30 = vshll.u32 %v5534_v53, 16 }
 0x356   : > { %16773 = vmatprep.subr.bf16.mxu1 %v18384_v59  ;;  %v5585_v6 = vrot.slane %v5584_v24, 4  ;;  %v5599_v7 = vrot.slane %v5597_v36, 5  ;;  %v18396_v24 = vld [vmem:[%s23702_s4 + $0x138] sm:$0xff]  }
 0x357   : > { %v5595_v40 = vrot.slane %v5594_v37, 4  ;;  %v5608_v41 = vor.u32 %v5607_v60, %v5604_v19  ;;  %v5623_v53 = vrot.slane %v5621_v30, 5  ;;  %v18386_v60 = vld [vmem:[#allocation2 + $0x6c] sm:$0xff]   ;;  %v5663_v30 = vshrl.u32 %v20636_v23, 16 }
 0x358   : > { %v5590_v21 = vsel %vm19706_vm11, %v5585_v6, %v20878_v1 }
 0x359   : > { %16774 = vmatpush3.bf16.msra.mxu1 %v18384_v59  ;;  %v5629_v59 = vshll.u32 %v5535_v13, 16  ;;  %v5618_v13 = vor.u32 %v5617_v39, %v20889_v49  ;;  %v5600_v50 = vsel %vm19706_vm11, %v5595_v40, %v5599_v7  ;;  %v5609_v37 = vrot.slane %v5608_v41, 4 }
 0x35a   : > { %16775 = vmatprep.subr.bf16.mxu1 %v18387_v16  ;;  %v5645_v39 = vshll.u32 %v20631_v33, 16  ;;  %v20912_v1 = vcombine.low %v5590_v21, %v5600_v50  ;;  %v5677_v7 = vshll.u32 %v5541_v14, 16 }
 0x35b   : > { %v5631_v34 = vrot.slane %v5629_v59, 5  ;;  %v5619_v19 = vrot.slane %v5618_v13, 4  ;;  %v5659_v59 = vshll.u32 %v20636_v23, 16  ;;  %v5614_v33 = vsel %vm19706_vm11, %v5609_v37, %v20889_v49  ;;  %v18388_v37 = vld [vmem:[#allocation2 + $0x78] sm:$0xff]  }
 0x35c   : > { %16744 = vmatmul.mubr.bf16.gmra.mrb[56].mxu1 %v18382_v52  ;;  %v5641_v52 = vrot.slane %v5639_v25, 4  ;;  %v5683_v23 = vshll.u32 %v20644_v3, 16  ;;  %v5647_v40 = vrot.slane %v5645_v39, 5  ;;  %v5679_v49 = vrot.slane %v5677_v7, 5  ;;  %v5550_v7 = vld [vmem:[#allocation2 + $0x60] sm:$0xf] }
 0x35d   : > { %16747 = vmatprep.mubr.bf16.mxu1 %v18383_v62  ;;  %16776 = vmatpush3.bf16.msra.mxu1 %v18387_v16  ;;  %v5650_v62 = vshrl.u32 %v5538_v54, 16  ;;  %v5653_v16 = vshll.u32 %v5538_v54, 16  ;;  %v5632_v54 = vor.u32 %v5631_v34, %v5628_v51  ;;  %v20917_v51 = vld [vmem:[%s23702_s4 + $0x140] sm:$0xff]   ;;  %v5687_v34 = vshrl.u32 %v20644_v3, 16 }
 0x35e   : > { %16777 = vmatprep.subr.bf16.mxu1 %v18390_v2  ;;  %v20926_v41 = vrot.slane %v5659_v59, 5  ;;  %v5731_v39 = vshll.u32 %v20662_v43, 16  ;;  %v5735_v59 = vshrl.u32 %v20662_v43, 16 }
 0x35f   : > { %v5652_v25 = vrot.slane %v5650_v62, 4  ;;  %v5655_v36 = vrot.slane %v5653_v16, 5  ;;  %v5633_v6 = vrot.slane %v5632_v54, 4  ;;  %v5669_v62 = vshll.u32 %v20638_v0, 16 }
 0x360   : > { %v5676_v16 = vrot.slane %v5674_v11, 4  ;;  %v5711_v54 = vshrl.u32 %v20651_v18, 16  ;;  %v20948_v43 = vrot.slane %v5731_v39, 5  ;;  %v18392_v39 = vld [vmem:[#allocation2 + $0x9c] sm:$0xff]  }
 0x361   : > { %16778 = vmatpush3.bf16.msra.mxu1 %v18390_v2  ;;  %v5642_v2 = vor.u32 %v5641_v52, %v20898_v55  ;;  %v5656_v13 = vor.u32 %v5655_v36, %v5652_v25  ;;  %v5665_v52 = vrot.slane %v5663_v30, 4  ;;  %v5638_v0 = vsel %vm19706_vm11, %v5633_v6, %v20898_v55 }
 0x362   : > { %16779 = vmatprep.subr.bf16.mxu1 %v18393_v10  ;;  %v5671_v30 = vrot.slane %v5669_v62, 5 }
 0x363   : > { %v5643_v14 = vrot.slane %v5642_v2, 4  ;;  %v18389_v2 = vld [vmem:[#allocation2 + $0x84] sm:$0xff]   ;;  %v5657_v25 = vrot.slane %v5656_v13, 4  ;;  %v5666_v36 = vor.u32 %v5665_v52, %v20926_v41  ;;  %v5746_v13 = vshrl.u32 %v5550_v7, 16 }
 0x364   : > { %16748 = vmatmul.mubr.bf16.gmra.mrb[60].mxu1 %v18385_v12  ;;  %v5624_v12 = vsel %vm19706_vm11, %v5619_v19, %v5623_v53  ;;  %v5707_v53 = vshll.u32 %v20651_v18, 16  ;;  %v20933_v19 = vrot.slane %v5683_v23, 5  ;;  %v5693_v18 = vshll.u32 %v20646_v42, 16 }
 0x365   : > { %16751 = vmatprep.mubr.bf16.mxu1 %v18386_v60  ;;  %16780 = vmatpush3.bf16.msra.mxu1 %v18393_v10  ;;  %v5544_v10 = vld [vmem:[#allocation2 + $0x48] sm:$0xf]  ;;  %v20931_v3 = vcombine.low %v5614_v33, %v5624_v12  ;;  %v5689_v60 = vrot.slane %v5687_v34, 4  ;;  %v5648_v11 = vsel %vm19706_vm11, %v5643_v14, %v5647_v40  ;;  %v5680_v33 = vor.u32 %v5679_v49, %v5676_v16 }
 0x366   : > { %16781 = vmatprep.subr.bf16.mxu1 %v18396_v24  ;;  %v5698_v21 = vshrl.u32 %v5544_v10, 16  ;;  %v5701_v50 = vshll.u32 %v5544_v10, 16  ;;  %v20945_v23 = vrot.slane %v5707_v53, 5  ;;  %v5713_v10 = vrot.slane %v5711_v54, 4  ;;  %v18391_v54 = vld [vmem:[#allocation2 + $0x90] sm:$0xff]  }
 0x367   : > { %v5690_v34 = vor.u32 %v5689_v60, %v20933_v19  ;;  %v5737_v40 = vrot.slane %v5735_v59, 4  ;;  %v5749_v52 = vshll.u32 %v5550_v7, 16  ;;  %v20950_v62 = vcombine.low %v5638_v0, %v5648_v11  ;;  %v5553_v60 = vld [vmem:[#allocation2 + $0x6c] sm:$0xf] }
 0x368   : > { %v5700_v12 = vrot.slane %v5698_v21, 4  ;;  %v5703_v55 = vrot.slane %v5701_v50, 5  ;;  %v5662_v42 = vsel %vm19706_vm11, %v5657_v25, %v20926_v41  ;;  %v5755_v16 = vshll.u32 %v20682_v9, 16 }
 0x369   : > { %16782 = vmatpush3.bf16.msra.mxu1 %v18396_v24  ;;  %v5547_v24 = vld [vmem:[#allocation2 + $0x54] sm:$0xf]  ;;  %v5759_v49 = vshrl.u32 %v20682_v9, 16  ;;  %v5667_v21 = vrot.slane %v5666_v36, 4  ;;  %v5681_v50 = vrot.slane %v5680_v33, 4  ;;  %v5695_v53 = vrot.slane %v5693_v18, 5 }
 0x36a   : > { %16815 = vmatprep.subr.bf16.mxu1 %v20917_v51  ;;  %v5722_v6 = vshrl.u32 %v5547_v24, 16  ;;  %v5725_v14 = vshll.u32 %v5547_v24, 16  ;;  %v5714_v24 = vor.u32 %v5713_v10, %v20945_v23  ;;  %v5717_v0 = vshll.u32 %v20659_v29, 16 }
 0x36b   : > { %v5738_v41 = vor.u32 %v5737_v40, %v20948_v43  ;;  %v5748_v25 = vrot.slane %v5746_v13, 4  ;;  %v5751_v7 = vrot.slane %v5749_v52, 5  ;;  %v20960_v9 = vrot.slane %v5755_v16, 5  ;;  %v20981_v16 = vld [vmem:[#allocation2 + $0x78] sm:$0xf] }
 0x36c   : > { %16752 = vmatmul.mubr.bf16.gmra.mrb[64].mxu1 %v18388_v37  ;;  %v5704_v37 = vor.u32 %v5703_v55, %v5700_v12  ;;  %v5724_v11 = vrot.slane %v5722_v6, 4  ;;  %v5727_v59 = vrot.slane %v5725_v14, 5  ;;  %v5761_v36 = vrot.slane %v5759_v49, 4 }
 0x36d   : > { %16755 = vmatprep.mubr.bf16.mxu1 %v18389_v2  ;;  %v5691_v2 = vrot.slane %v5690_v34, 4  ;;  %v5770_v18 = vshrl.u32 %v5553_v60, 16  ;;  %v5773_v33 = vshll.u32 %v5553_v60, 16  ;;  %v5672_v12 = vsel %vm19706_vm11, %v5667_v21, %v5671_v30 }
 0x36e   : > { %v5686_v29 = vsel %vm19706_vm11, %v5681_v50, %v20933_v19  ;;  %v20967_v55 = vrot.slane %v5704_v37, 4  ;;  %v5741_v34 = vshll.u32 %v20673_v32, 16  ;;  %v20972_v6 = vrot.slane %v5714_v24, 4  ;;  %v18394_v24 = vld [vmem:[#allocation2 + $0xa8] sm:$0xff]  }
 0x36f   : > { %v5696_v10 = vsel %vm19706_vm11, %v5691_v2, %v5695_v53  ;;  %v5779_v14 = vshll.u32 %v20697_v5, 16  ;;  %v5783_v40 = vshrl.u32 %v20697_v5, 16  ;;  %v20976_v13 = vrot.slane %v5717_v0, 5  ;;  %v20988_v53 = vld [vmem:[#allocation2 + $0x1c] sm:$0xf] }
 0x370   : > { %v5728_v30 = vor.u32 %v5727_v59, %v5724_v11  ;;  %v20978_v52 = vrot.slane %v5738_v41, 4  ;;  %v5765_v19 = vshll.u32 %v20708_v20, 16  ;;  %v5752_v49 = vor.u32 %v5751_v7, %v5748_v25  ;;  %23980 = vst [vmem:[#allocation44_spill] sm:$0xff] %v20988_v53  ;;  %v21002_v2 = vld [vmem:[#allocation2 + $0x28] sm:$0xf]  ;;  %v18395_v25 = vld [vmem:[#allocation2 + $0xb4] sm:$0xff]  }
 0x371   : > { %v5762_v32 = vor.u32 %v5761_v36, %v20960_v9  ;;  %v20984_v21 = vrot.slane %v5770_v18, 4  ;;  %v20986_v50 = vrot.slane %v5773_v33, 5  ;;  %v20990_v37 = vcombine.low %v5662_v42, %v5672_v12  ;;  %23982 = vst [vmem:[#allocation46_spill] sm:$0xff] %v21002_v2  ;;  %v21013_v59 = vld [vmem:[#allocation2 + $0x34] sm:$0xf] }
 0x372   : > { %v20992_v5 = vcombine.low %v5686_v29, %v5696_v10  ;;  %v20998_v60 = vrot.slane %v5741_v34, 5  ;;  %v21008_v0 = vrot.slane %v5779_v14, 5  ;;  %v21010_v11 = vrot.slane %v5783_v40, 4  ;;  %23983 = vst [vmem:[#allocation47_spill] sm:$0xff] %v21013_v59  ;;  %v7922_v41 = vld [vmem:[#allocation2 + $0x18] sm:$0xe] }
 0x373   : > { %v21015_v7 = vrot.slane %v5728_v30, 4  ;;  %v21021_v18 = vrot.slane %v5765_v19, 5  ;;  %v21023_v33 = vld [vmem:[#allocation2 + $0x2c] sm:$0x1]  ;;  %v7988_v12 = vrot.slane %v20988_v53, 5  ;;  %v21026_v29 = vrot.slane %v5752_v49, 4 }
 0x374   : > { %16756 = vmatmul.mubr.bf16.gmra.mrb[68].mxu1 %v18391_v54  ;;  %v21000_v54 = vld [vmem:[#allocation2 + $0x20] sm:$0x1]  ;;  %23984 = vst [vmem:[#allocation48_spill] sm:$0xff] %v21023_v33  ;;  %v21028_v34 = vrot.slane %v5762_v32, 4  ;;  %v21033_v40 = vld [vmem:[#allocation2 + $0x38] sm:$0x1] }
 0x375   : > { %16759 = vmatprep.mubr.bf16.mxu1 %v18392_v39  ;;  %23981 = vst [vmem:[#allocation45_spill] sm:$0xff] %v21000_v54  ;;  %v5794_v39 = vshrl.u32 %v20981_v16, 16  ;;  %23985 = vst [vmem:[#allocation49_spill] sm:$0xff] %v21033_v40  ;;  %v7923_v30 = vld [vmem:[#allocation2 + $0x24] sm:$0xe]  ;;  %v5803_v19 = vshll.u32 %v20722_v17, 16 }
 0x376   : > { %v15244_v36 = vrot.slane %v7922_v41, 9  ;;  %v7990_v20 = vrot.slane %v7988_v12, 4  ;;  %v7991_v42 = vrot.slane %v21000_v54, 5  ;;  %v21042_v53 = vld [vmem:[#allocation2 + $0x4c] sm:$0xf]  ;;  %v7995_v14 = vrot.slane %v21002_v2, 5 }
 0x377   : > { %v21039_v32 = vrot.slane %v5794_v39, 4  ;;  %23986 = vst [vmem:[#allocation50_spill] sm:$0xff] %v21042_v53  ;;  %v15245_v49 = vrot.slane %v7923_v30, 9  ;;  %v8002_v39 = vrot.slane %v21013_v59, 5  ;;  %v21056_v10 = vld [vmem:[#allocation2 + $0x44] sm:$0x1] }
 0x378   : > { %v21049_v41 = vsel %vm20380_vm2, %v15244_v36, %v7988_v12  ;;  %v21053_v54 = vsel %vm20380_vm2, %v7990_v20, %v7991_v42  ;;  %23990 = vst [vmem:[#allocation54_spill] sm:$0xff] %v21056_v10  ;;  %v7997_v27 = vrot.slane %v7995_v14, 4  ;;  %v7998_v63 = vrot.slane %v21023_v33, 5  ;;  %v7926_v30 = vld [vmem:[#allocation2 + $0x48] sm:$0xe] }
 0x379   : > { %23988 = vst [vmem:[#allocation52_spill] sm:$0xff] %v21049_v41  ;;  %23989 = vst [vmem:[#allocation53_spill] sm:$0xff] %v21053_v54  ;;  %v21061_v36 = vrot.slane %v5803_v19, 5  ;;  %v21065_v20 = vsel %vm20380_vm2, %v15245_v49, %v7995_v14  ;;  %v8004_v42 = vrot.slane %v8002_v39, 4  ;;  %v8005_v12 = vrot.slane %v21033_v40, 5 }
 0x37a   : > { %23991 = vst [vmem:[#allocation55_spill] sm:$0xff] %v21065_v20  ;;  %v21068_v59 = vld [vmem:[#allocation2 + $0x58] sm:$0xf]  ;;  %v21072_v2 = vsel %vm20380_vm2, %v7997_v27, %v7998_v63  ;;  %v15247_v19 = vrot.slane %v7925_v4, 9  ;;  %v8009_v54 = vrot.slane %v21045_v28, 5  ;;  %v8012_v63 = vrot.slane %v21056_v10, 5 }
 0x37b   : > { %23992 = vst [vmem:[#allocation56_spill] sm:$0xff] %v21068_v59  ;;  %23993 = vst [vmem:[#allocation57_spill] sm:$0xff] %v21072_v2  ;;  %v7927_v41 = vld [vmem:[#allocation2 + $0x54] sm:$0xe]  ;;  %v7185_v14 = vld [vmem:[#allocation2 + $0x5c] sm:$0x1]  ;;  %v21085_v33 = vsel %vm20380_vm2, %v8004_v42, %v8005_v12 }
 0x37c   : > { %16760 = vmatmul.mubr.bf16.gmra.mrb[72].mxu1 %v18394_v24  ;;  %v7924_v24 = vld [vmem:[#allocation2 + $0x30] sm:$0xe]  ;;  %v21079_v49 = vld [vmem:[#allocation2 + $0x64] sm:$0xf]  ;;  %23996 = vst [vmem:[#allocation60_spill] sm:$0xff] %v21085_v33  ;;  %v8016_v27 = vrot.slane %v21042_v53, 5  ;;  %v21094_v42 = vsel %vm20380_vm2, %v15247_v19, %v8009_v54 }
 0x37d   : > { %16763 = vmatprep.mubr.bf16.mxu1 %v18395_v25  ;;  %v7182_v25 = vld [vmem:[#allocation2 + $0x50] sm:$0x1]  ;;  %v15246_v56 = vrot.slane %v7924_v24, 9  ;;  %23995 = vst [vmem:[#allocation59_spill] sm:$0xff] %v21079_v49  ;;  %v15248_v28 = vrot.slane %v7926_v30, 9  ;;  %23997 = vst [vmem:[#allocation61_spill] sm:$0xff] %v21094_v42 }
 0x37e   : > { %v8019_v47 = vrot.slane %v7182_v25, 5  ;;  %v7188_v40 = vld [vmem:[#allocation2 + $0x68] sm:$0x1]  ;;  %v8018_v12 = vrot.slane %v8016_v27, 4  ;;  %v15249_v2 = vrot.slane %v7927_v41, 9  ;;  %v8023_v20 = vrot.slane %v21068_v59, 5 }
 0x37f   : > { %v21076_v24 = vsel %vm20380_vm2, %v15246_v56, %v8002_v39  ;;  %v7190_v56 = vld [vmem:[#allocation2 + $0x70] sm:$0xf]  ;;  %v8011_v39 = vrot.slane %v8009_v54, 4  ;;  %v21103_v25 = vsel %vm20380_vm2, %v15248_v28, %v8016_v27  ;;  %v8026_v30 = vrot.slane %v7185_v14, 5  ;;  %v7929_v4 = vld [vmem:[#allocation2 + $0x6c] sm:$0xe] }
 0x380   : > { %23994 = vst [vmem:[#allocation58_spill] sm:$0xff] %v21076_v24  ;;  %23999 = vst [vmem:[#allocation63_spill] sm:$0xff] %v21103_v25  ;;  %v7193_v33 = vld [vmem:[#allocation2 + $0x7c] sm:$0xf]  ;;  %v7194_v54 = vld [vmem:[#allocation2 + $0x80] sm:$0x1]  ;;  %v21110_v19 = vsel %vm20380_vm2, %v8018_v12, %v8019_v47  ;;  %v21116_v14 = vsel %vm20380_vm2, %v15249_v2, %v8023_v20 }
 0x381   : > { %v21099_v10 = vsel %vm20380_vm2, %v8011_v39, %v8012_v63  ;;  %24000 = vst [vmem:[#allocation64_spill] sm:$0xff] %v21110_v19  ;;  %v8025_v24 = vrot.slane %v8023_v20, 4  ;;  %v15250_v63 = vrot.slane %v7928_v44, 9  ;;  %v7196_v39 = vld [vmem:[#allocation2 + $0x88] sm:$0xf]  ;;  %v15251_v47 = vrot.slane %v7929_v4, 9 }
 0x382   : > { %23998 = vst [vmem:[#allocation62_spill] sm:$0xff] %v21099_v10  ;;  %v7199_v59 = vld [vmem:[#allocation2 + $0x94] sm:$0xf]  ;;  %v7930_v53 = vld [vmem:[#allocation2 + $0x78] sm:$0xe]  ;;  %v8037_v12 = vrot.slane %v7190_v56, 5 }
 0x383   : > { %v21120_v41 = vsel %vm20380_vm2, %v8025_v24, %v8026_v30  ;;  %v7931_v10 = vld [vmem:[#allocation2 + $0x84] sm:$0xe]  ;;  %v18399_v2 = vld [vmem:[%s23702_s4 + $0x148] sm:$0xff]   ;;  %v7200_v20 = vld [vmem:[#allocation2 + $0x98] sm:$0x1]  ;;  %v8044_v30 = vrot.slane %v7193_v33, 5 }
 0x384   : > { %16764 = vmatmul.mubr.bf16.gmra.mrb[76].mxu1 %v18397_v45  ;;  %v7191_v45 = vld [vmem:[#allocation2 + $0x74] sm:$0x1]  ;;  %24001 = vst [vmem:[#allocation65_spill] sm:$0xff] %v21120_v41  ;;  %v8039_v4 = vrot.slane %v8037_v12, 4  ;;  %v15252_v56 = vrot.slane %v7930_v53, 9  ;;  %v21140_v42 = vsel %vm20380_vm2, %v15251_v47, %v8037_v12  ;;  %v15253_v41 = vrot.slane %v7931_v10, 9 }
 0x385   : > { %16783 = vmatprep.mubr.bf16.mxu1 %v20912_v1  ;;  %v8030_v1 = vrot.slane %v21079_v49, 5  ;;  %v8033_v49 = vrot.slane %v7188_v40, 5  ;;  %v8040_v24 = vrot.slane %v7191_v45, 5  ;;  %v7932_v19 = vld [vmem:[#allocation2 + $0x90] sm:$0xe]  ;;  %v8046_v40 = vrot.slane %v8044_v30, 4 }
 0x386   : > { %v7205_v25 = vld [vmem:[#allocation2 + $0xac] sm:$0xf]  ;;  %v7202_v33 = vld [vmem:[#allocation2 + $0xa0] sm:$0xf]  ;;  %v7203_v45 = vld [vmem:[#allocation2 + $0xa4] sm:$0x1] }
 0x387   : > { %v8032_v27 = vrot.slane %v8030_v1, 4  ;;  %v21124_v44 = vsel %vm20380_vm2, %v15250_v63, %v8030_v1  ;;  %v8047_v63 = vrot.slane %v7194_v54, 5  ;;  %v21146_v53 = vsel %vm20380_vm2, %v8039_v4, %v8040_v24  ;;  %v18400_v10 = vld [vmem:[%s23702_s4 + $0x150] sm:$0xff]   ;;  %v7933_v24 = vld [vmem:[#allocation2 + $0x9c] sm:$0xe] }
 0x388   : > { %v8054_v54 = vrot.slane %v7197_v31, 5  ;;  %v15254_v12 = vrot.slane %v7932_v19, 9  ;;  %v8061_v4 = vrot.slane %v7200_v20, 5  ;;  %v7208_v1 = vld [vmem:[#allocation2 + $0xb8] sm:$0xf] }
 0x389   : > { %v21133_v28 = vsel %vm20380_vm2, %v8032_v27, %v8033_v49  ;;  %v8051_v49 = vrot.slane %v7196_v39, 5  ;;  %v8058_v27 = vrot.slane %v7199_v59, 5  ;;  %v21159_v39 = vsel %vm20380_vm2, %v8046_v40, %v8047_v63  ;;  %v7212_v63 = vld [vmem:[#allocation2 + $0xc8] sm:$0x1] }
 0x38a   : > { %24002 = vst [vmem:[#allocation66_spill] sm:$0xff] %v21133_v28  ;;  %24003 = vst [vmem:[#allocation67_spill] sm:$0xff] %v21159_v39  ;;  %v7211_v28 = vld [vmem:[#allocation2 + $0xc4] sm:$0xf]  ;;  %v7935_v39 = vld [vmem:[#allocation2 + $0xb4] sm:$0xe] }
 0x38b   : > { %v8053_v47 = vrot.slane %v8051_v49, 4  ;;  %v8060_v59 = vrot.slane %v8058_v27, 4  ;;  %v21174_v19 = vsel %vm20380_vm2, %v15254_v12, %v8058_v27  ;;  %v7209_v27 = vld [vmem:[#allocation2 + $0xbc] sm:$0x1] }
 0x38c   : > { %16784 = vmatmul.mubr.bf16.vlgmr.msra.gmra.mrb[48].mxu1 %v20931_v3  ;;  %v21150_v3 = vsel %vm20380_vm2, %v15252_v56, %v8044_v30  ;;  %v5807_v30 = vshrl.u32 %v20722_v17, 16  ;;  %v7934_v56 = vld [vmem:[#allocation2 + $0xa8] sm:$0xe]  ;;  %v8065_v17 = vrot.slane %v7202_v33, 5 }
 0x38d   : > { %16816 = vmatpush3.bf16.msra.mxu1 %v20917_v51  ;;  %16787 = vmatprep.mubr.bf16.mxu1 %v20950_v62  ;;  %v7206_v51 = vld [vmem:[#allocation2 + $0xb0] sm:$0x1]  ;;  %v21166_v62 = vsel %vm20380_vm2, %v15253_v41, %v8051_v49  ;;  %v21170_v40 = vsel %vm20380_vm2, %v8053_v47, %v8054_v54  ;;  %v21180_v31 = vsel %vm20380_vm2, %v8060_v59, %v8061_v4  ;;  %v15255_v41 = vrot.slane %v7933_v24, 9  ;;  %v18401_v54 = vld [vmem:[%s23702_s4 + $0x158] sm:$0xff]   ;;  %v7936_v4 = vld [vmem:[#allocation2 + $0xc0] sm:$0xe] }
 0x38e   : > { %16817 = vmatprep.subr.bf16.mxu1 %v18399_v2  ;;  %24004 = vst [vmem:[#allocation68_spill] sm:$0xff] %v21170_v40  ;;  %v8072_v49 = vrot.slane %v7205_v25, 5  ;;  %v8067_v33 = vrot.slane %v8065_v17, 4  ;;  %v8068_v47 = vrot.slane %v7203_v45, 5  ;;  %v15256_v12 = vrot.slane %v7934_v56, 9 }
 0x38f   : > { %v21189_v20 = vsel %vm20380_vm2, %v15255_v41, %v8065_v17  ;;  %v8075_v24 = vrot.slane %v7206_v51, 5  ;;  %v8079_v25 = vrot.slane %v7208_v1, 5  ;;  %v15257_v45 = vrot.slane %v7935_v39, 9  ;;  %v18402_v41 = vld [vmem:[%s23702_s4 + $0x160] sm:$0xff]  }
 0x390   : > { %v8074_v59 = vrot.slane %v8072_v49, 4  ;;  %v21194_v40 = vsel %vm20380_vm2, %v8067_v33, %v8068_v47  ;;  %v8086_v56 = vrot.slane %v7211_v28, 5  ;;  %v8082_v17 = vrot.slane %v7209_v27, 5 }
 0x391   : > { %16818 = vmatpush3.bf16.msra.mxu1 %v18399_v2  ;;  %v21198_v2 = vsel %vm20380_vm2, %v15256_v12, %v8072_v49  ;;  %v15287_v51 = vcombine.low %v21189_v20, %v21194_v40  ;;  %v5559_v49 = vld [vmem:[#allocation2 + $0x84] sm:$0xf]  ;;  %v8089_v39 = vrot.slane %v7212_v63, 5  ;;  %v5809_v33 = vrot.slane %v5807_v30, 4 }
 0x392   : > { %16819 = vmatprep.subr.bf16.mxu1 %v18400_v10  ;;  %v21205_v1 = vsel %vm20380_vm2, %v8074_v59, %v8075_v24  ;;  %v5827_v47 = vshll.u32 %v20735_v15, 16  ;;  %v21215_v12 = vsel %vm20380_vm2, %v15257_v45, %v8079_v25  ;;  %v5831_v59 = vshrl.u32 %v20735_v15, 16 }
 0x393   : > { %v15288_v28 = vcombine.low %v21198_v2, %v21205_v1  ;;  %v24005_v63 = vshll.u32 %v20981_v16, 16  ;;  %v5818_v45 = vshrl.u32 %v5559_v49, 16  ;;  %v5734_v16 = vsel %vm19706_vm11, %v21015_v7, %v20948_v43  ;;  %v18446_v2 = vld [vmem:[#allocation4 + $0x40] sm:$0xff]  }
 0x394   : > { %16788 = vmatmul.mubr.bf16.gmra.mrb[52].mxu1 %v20990_v37  ;;  %v8081_v37 = vrot.slane %v8079_v25, 4  ;;  %v5768_v43 = vsel %vm19706_vm11, %v21028_v34, %v21021_v18  ;;  %v5810_v7 = vor.u32 %v5809_v33, %v21061_v36  ;;  %v5813_v18 = vshll.u32 %v20724_v38, 16  ;;  %v5565_v38 = vld [vmem:[#allocation2 + $0x9c] sm:$0xf]  ;;  %17007 = vmatprep.subr.bf16.mxu0 %v18446_v2 }
 0x395   : > { %16791 = vmatprep.mubr.bf16.mxu1 %v20992_v5  ;;  %16820 = vmatpush3.bf16.msra.mxu1 %v18400_v10  ;;  %v15258_v5 = vrot.slane %v7936_v4, 9  ;;  %v8088_v10 = vrot.slane %v8086_v56, 4  ;;  %v5799_v25 = vrot.slane %v24005_v63, 5  ;;  %v21275_v63 = vrot.slane %v5827_v47, 5 }
 0x396   : > { %16821 = vmatprep.subr.bf16.mxu1 %v18401_v54  ;;  %v21219_v27 = vsel %vm20380_vm2, %v8081_v37, %v8082_v17  ;;  %v5821_v37 = vshll.u32 %v5559_v49, 16  ;;  %v24006_v17 = vsel %vm19706_vm11, %v20972_v6, %v20976_v13  ;;  %v18403_v6 = vld [vmem:[%s23702_s4 + $0x168] sm:$0xff]   ;;  %v24010_v13 = vshll.u32 %v20710_v46, 16  ;;  %17008 = vmatpush3.bf16.msra.mxu0 %v18446_v2 }
 0x397   : > { %v21226_v4 = vsel %vm20380_vm2, %v15258_v5, %v8086_v56  ;;  %v21230_v30 = vsel %vm20380_vm2, %v8088_v10, %v8089_v39  ;;  %v24007_v56 = vsel %vm19706_vm11, %v20967_v55, %v20945_v23  ;;  %v24009_v23 = vsel %vm19706_vm11, %v20978_v52, %v20998_v60  ;;  %v5562_v10 = vld [vmem:[#allocation2 + $0x90] sm:$0xf] }
 0x398   : > { %v15089_v5 = vcombine.low %v24007_v56, %v24006_v17  ;;  %v15090_v55 = vcombine.low %v5734_v16, %v24009_v23  ;;  %v5758_v39 = vsel %vm19706_vm11, %v21026_v29, %v20960_v9  ;;  %v24011_v52 = vor.u32 %v20986_v50, %v20984_v21  ;;  %v18404_v21 = vld [vmem:[%s23702_s4 + $0x170] sm:$0xff]   ;;  %v18575_v23 = vld [vmem:[#allocation2 + $0x8c] sm:$0x1] }
 0x399   : > { %16822 = vmatpush3.bf16.msra.mxu1 %v18401_v54  ;;  %v24008_v54 = vor.u32 %v21010_v11, %v21008_v0  ;;  %v5791_v11 = vrot.slane %v24010_v13, 5  ;;  %v5833_v17 = vrot.slane %v5831_v59, 4  ;;  %v5800_v46 = vor.u32 %v5799_v25, %v21039_v32 }
 0x39a   : > { %16823 = vmatprep.subr.bf16.mxu1 %v18402_v41  ;;  %v5777_v60 = vrot.slane %v24011_v52, 4  ;;  %v5820_v34 = vrot.slane %v5818_v45, 4  ;;  %v5823_v33 = vrot.slane %v5821_v37, 5  ;;  %v15091_v56 = vcombine.low %v5758_v39, %v5768_v43 }
 0x39b   : > { %v5787_v49 = vrot.slane %v24008_v54, 4  ;;  %v5842_v9 = vshrl.u32 %v5562_v10, 16  ;;  %v5811_v50 = vrot.slane %v5810_v7, 4  ;;  %v5845_v29 = vshll.u32 %v5562_v10, 16 }
 0x39c   : > { %16792 = vmatmul.mubr.bf16.gmra.mrb[56].mxu1 %v15089_v5  ;;  %v5851_v47 = vshll.u32 %v20751_v48, 16  ;;  %v5855_v32 = vshrl.u32 %v20751_v48, 16  ;;  %v5834_v59 = vor.u32 %v5833_v17, %v21275_v63  ;;  %v5875_v25 = vshll.u32 %v20765_v8, 16 }
 0x39d   : > { %16795 = vmatprep.mubr.bf16.mxu1 %v15090_v55  ;;  %16824 = vmatpush3.bf16.msra.mxu1 %v18402_v41  ;;  %v5792_v5 = vsel %vm19706_vm11, %v5787_v49, %v5791_v11  ;;  %v5782_v41 = vsel %vm19706_vm11, %v5777_v60, %v21008_v0  ;;  %v5879_v45 = vshrl.u32 %v20765_v8, 16  ;;  %v5801_v16 = vrot.slane %v5800_v46, 4  ;;  %v18405_v0 = vld [vmem:[%s23702_s4 + $0x178] sm:$0xff]  }
 0x39e   : > { %16825 = vmatprep.subr.bf16.mxu1 %v18403_v6  ;;  %v15092_v37 = vcombine.low %v5782_v41, %v5792_v5  ;;  %v5815_v54 = vrot.slane %v5813_v18, 5  ;;  %v5824_v49 = vor.u32 %v5823_v33, %v5820_v34  ;;  %v5837_v55 = vshll.u32 %v18575_v23, 16  ;;  %v5568_v5 = vld [vmem:[#allocation2 + $0xa8] sm:$0xf] }
 0x39f   : > { %v5844_v43 = vrot.slane %v5842_v9, 4  ;;  %v5866_v48 = vshrl.u32 %v5565_v38, 16  ;;  %v5869_v13 = vshll.u32 %v5565_v38, 16  ;;  %v5847_v7 = vrot.slane %v5845_v29, 5 }
 0x3a0   : > { %v5816_v11 = vsel %vm19706_vm11, %v5811_v50, %v5815_v54  ;;  %v21297_v8 = vrot.slane %v5851_v47, 5  ;;  %v5857_v10 = vrot.slane %v5855_v32, 4  ;;  %v5835_v39 = vrot.slane %v5834_v59, 4  ;;  %v18576_v47 = vld [vmem:[#allocation2 + $0xac] sm:$0xf] }
 0x3a1   : > { %16826 = vmatpush3.bf16.msra.mxu1 %v18403_v6  ;;  %v21299_v6 = vrot.slane %v5875_v25, 5  ;;  %v5881_v52 = vrot.slane %v5879_v45, 4  ;;  %v5806_v60 = vsel %vm19706_vm11, %v5801_v16, %v21061_v36  ;;  %v5825_v17 = vrot.slane %v5824_v49, 4  ;;  %v5571_v32 = vld [vmem:[#allocation2 + $0xb4] sm:$0xf] }
 0x3a2   : > { %16827 = vmatprep.subr.bf16.mxu1 %v18404_v21  ;;  %v15093_v46 = vcombine.low %v5806_v60, %v5816_v11  ;;  %v5839_v18 = vrot.slane %v5837_v55, 5  ;;  %v5868_v34 = vrot.slane %v5866_v48, 4  ;;  %v5871_v33 = vrot.slane %v5869_v13, 5  ;;  %v18577_v45 = vld [vmem:[#allocation2 + $0x98] sm:$0x1] }
 0x3a3   : > { %v5848_v9 = vor.u32 %v5847_v7, %v5844_v43  ;;  %v5858_v50 = vor.u32 %v5857_v10, %v21297_v8  ;;  %v5899_v29 = vshll.u32 %v20778_v58, 16  ;;  %v5903_v36 = vshrl.u32 %v18576_v47, 16  ;;  %v18578_v49 = vld [vmem:[#allocation2 + $0xa4] sm:$0x1] }
 0x3a4   : > { %16796 = vmatmul.mubr.bf16.gmra.mrb[60].mxu1 %v15091_v56  ;;  %v21307_v56 = vld [vmem:[%s23702_s4 + $0x180] sm:$0xff]   ;;  %v5882_v38 = vor.u32 %v5881_v52, %v21299_v6  ;;  %v5923_v41 = vshll.u32 %v20796_v35, 16  ;;  %v5927_v59 = vshrl.u32 %v20796_v35, 16  ;;  %v5830_v25 = vsel %vm19706_vm11, %v5825_v17, %v21275_v63 }
 0x3a5   : > { %16799 = vmatprep.mubr.bf16.mxu1 %v15092_v37  ;;  %16828 = vmatpush3.bf16.msra.mxu1 %v18404_v21  ;;  %v5840_v21 = vsel %vm19706_vm11, %v5835_v39, %v5839_v18  ;;  %v5861_v37 = vshll.u32 %v18577_v45, 16  ;;  %v5890_v16 = vshrl.u32 %v5568_v5, 16  ;;  %v5893_v58 = vshll.u32 %v5568_v5, 16  ;;  %v5574_v5 = vld [vmem:[#allocation2 + $0xc0] sm:$0xf] }
 0x3a6   : > { %16829 = vmatprep.subr.bf16.mxu1 %v18405_v0  ;;  %v5872_v54 = vor.u32 %v5871_v33, %v5868_v34  ;;  %v5885_v23 = vshll.u32 %v18578_v49, 16  ;;  %v5914_v55 = vshrl.u32 %v5571_v32, 16  ;;  %v5917_v43 = vshll.u32 %v5571_v32, 16 }
 0x3a7   : > { %v15094_v48 = vcombine.low %v5830_v25, %v5840_v21  ;;  %v5859_v13 = vrot.slane %v5858_v50, 4  ;;  %v5901_v11 = vrot.slane %v5899_v29, 5  ;;  %v5905_v35 = vrot.slane %v5903_v36, 4  ;;  %v18579_v29 = vld [vmem:[#allocation2 + $0xc4] sm:$0xf] }
 0x3a8   : > { %v5849_v7 = vrot.slane %v5848_v9, 4  ;;  %v5883_v10 = vrot.slane %v5882_v38, 4  ;;  %v5925_v63 = vrot.slane %v5923_v41, 5  ;;  %v5929_v39 = vrot.slane %v5927_v59, 4  ;;  %v18580_v41 = vld [vmem:[#allocation2 + $0xb0] sm:$0x1] }
 0x3a9   : > { %16830 = vmatpush3.bf16.msra.mxu1 %v18405_v0  ;;  %v5863_v52 = vrot.slane %v5861_v37, 5  ;;  %v5892_v60 = vrot.slane %v5890_v16, 4  ;;  %v5895_v0 = vrot.slane %v5893_v58, 5  ;;  %v5873_v17 = vrot.slane %v5872_v54, 4  ;;  %v18581_v54 = vld [vmem:[#allocation2 + $0xbc] sm:$0x1] }
 0x3aa   : > { %16863 = vmatprep.subr.bf16.mxu1 %v21307_v56  ;;  %v5887_v18 = vrot.slane %v5885_v23, 5  ;;  %v5916_v34 = vrot.slane %v5914_v55, 4  ;;  %v5919_v33 = vrot.slane %v5917_v43, 5  ;;  %v5906_v50 = vor.u32 %v5905_v35, %v5901_v11 }
 0x3ab   : > { %v5864_v47 = vsel %vm19706_vm11, %v5859_v13, %v5863_v52  ;;  %v5947_v36 = vshll.u32 %v18579_v29, 16  ;;  %v5854_v9 = vsel %vm19706_vm11, %v5849_v7, %v21297_v8  ;;  %v5930_v21 = vor.u32 %v5929_v39, %v5925_v63 }
 0x3ac   : > { %16800 = vmatmul.mubr.bf16.gmra.mrb[64].mxu1 %v15093_v46  ;;  %v5951_v46 = vshrl.u32 %v18579_v29, 16  ;;  %v5888_v32 = vsel %vm19706_vm11, %v5883_v10, %v5887_v18  ;;  %v5896_v38 = vor.u32 %v5895_v0, %v5892_v60  ;;  %v5909_v59 = vshll.u32 %v18580_v41, 16  ;;  %v529_v41 = vld [vmem:[#allocation2 + $0xcc] sm:$0x1] }
 0x3ad   : > { %16803 = vmatprep.mubr.bf16.mxu1 %v15094_v48  ;;  %v5938_v25 = vshrl.u32 %v5574_v5, 16  ;;  %v5941_v45 = vshll.u32 %v5574_v5, 16  ;;  %v15095_v37 = vcombine.low %v5854_v9, %v5864_v47  ;;  %v5878_v16 = vsel %vm19706_vm11, %v5873_v17, %v21299_v6  ;;  %v18582_v17 = vld [vmem:[#allocation2 + $0x10] sm:$0xf]  ;;  %v18583_v5 = vld [vmem:[#allocation2 + $0xc8] sm:$0x1] }
 0x3ae   : > { %v5920_v58 = vor.u32 %v5919_v33, %v5916_v34  ;;  %v5933_v49 = vshll.u32 %v18581_v54, 16  ;;  %v15096_v23 = vcombine.low %v5878_v16, %v5888_v32  ;;  %v5907_v55 = vrot.slane %v5906_v50, 4 }
 0x3af   : > { %v5949_v8 = vrot.slane %v5947_v36, 5  ;;  %v5953_v43 = vrot.slane %v5951_v46, 4  ;;  %v5931_v48 = vrot.slane %v5930_v21, 4  ;;  %v5897_v13 = vrot.slane %v5896_v38, 4  ;;  %v6283_v38 = vld [vmem:[#allocation2 + $0xc] sm:$0xe] }
 0x3b0   : > { %v5911_v35 = vrot.slane %v5909_v59, 5  ;;  %v5940_v7 = vrot.slane %v5938_v25, 4  ;;  %v5943_v10 = vrot.slane %v5941_v45, 5  ;;  %v5921_v39 = vrot.slane %v5920_v58, 4 }
 0x3b1   : > { %v5935_v52 = vrot.slane %v5933_v49, 5  ;;  %v5954_v6 = vor.u32 %v5953_v43, %v5949_v8  ;;  %v6349_v18 = vrot.slane %v18582_v17, 5  ;;  %v5902_v34 = vsel %vm19706_vm11, %v5897_v13, %v5901_v11  ;;  %v6284_v43 = vld [vmem:[#allocation2 + $0x18] sm:$0xe]  ;;  %v24015_v17 = vld [vmem:[#allocation16_spill] sm:$0xff] }
 0x3b2   : > { %v5912_v60 = vsel %vm19706_vm11, %v5907_v55, %v5911_v35  ;;  %v5944_v33 = vor.u32 %v5943_v10, %v5940_v7  ;;  %v5957_v47 = vshll.u32 %v18583_v5, 16  ;;  %v5926_v29 = vsel %vm19706_vm11, %v5921_v39, %v5925_v63 }
 0x3b3   : > { %v5936_v0 = vsel %vm19706_vm11, %v5931_v48, %v5935_v52  ;;  %v15097_v50 = vcombine.low %v5902_v34, %v5912_v60  ;;  %v5955_v46 = vrot.slane %v5954_v6, 4  ;;  %v6351_v9 = vrot.slane %v6349_v18, 4  ;;  %v18585_v48 = vld [vmem:[#allocation2 + $0x20] sm:$0x1]  ;;  %v24013_v52 = vld [vmem:[#allocation15_spill] sm:$0xff]  ;;  %v18408_v6 = vld [vmem:[%s23702_s4 + $0x190] sm:$0xff]  }
 0x3b4   : > { %16804 = vmatmul.mubr.bf16.gmra.mrb[68].mxu1 %v15095_v37  ;;  %v15098_v36 = vcombine.low %v5926_v29, %v5936_v0  ;;  %v5945_v32 = vrot.slane %v5944_v33, 4  ;;  %v5959_v21 = vrot.slane %v5957_v47, 5  ;;  %v6352_v59 = vrot.slane %v20883_v61, 5  ;;  %v18584_v37 = vld [vmem:[#allocation2 + $0x1c] sm:$0xf]  ;;  %v24019_v33 = vld [vmem:[#allocation19_spill] sm:$0xff] }
 0x3b5   : > { %16807 = vmatprep.mubr.bf16.mxu1 %v15096_v23  ;;  %v530_v11 = vsel %vm19575_vm6, 0, %v529_v41  ;;  %v6356_v16 = vrot.slane %v18584_v37, 5  ;;  %v15108_v63 = vrot.slane %v6283_v38, 9  ;;  %v6359_v13 = vrot.slane %v18585_v48, 5  ;;  %v18409_v0 = vld [vmem:[%s23702_s4 + $0x198] sm:$0xff]   ;;  %v18411_v47 = vld [vmem:[%s23702_s4 + $0x1a8] sm:$0xff]  }
 0x3b6   : > { %v5960_v45 = vsel %vm19706_vm11, %v5955_v46, %v5959_v21  ;;  %531 = vst [vmem:[#allocation2 + $0xcc] sm:$0x1] %v530_v11  ;;  %v6353_v58 = vsel %vm20380_vm2, %v6351_v9, %v6352_v59  ;;  %v5950_v54 = vsel %vm19706_vm11, %v5945_v32, %v5949_v8  ;;  %v15109_v35 = vrot.slane %v6284_v43, 9  ;;  %v18407_v8 = vld [vmem:[%s23702_s4 + $0x188] sm:$0xff]   ;;  %v24025_v9 = vld [vmem:[#allocation25_spill] sm:$0xff]  ;;  %v24027_v41 = vld [vmem:[#allocation26_spill] sm:$0xff] }
 0x3b7   : > { %v15099_v49 = vcombine.low %v5950_v54, %v5960_v45  ;;  %v6350_v61 = vsel %vm20380_vm2, %v15108_v63, %v6349_v18  ;;  %v6358_v55 = vrot.slane %v6356_v16, 4  ;;  %v24014_v60 = vcombine.low %v20666_v26, %v24013_v52  ;;  %v24016_v18 = vld [vmem:[#allocation17_spill] sm:$0xff]  ;;  %v18410_v26 = vld [vmem:[%s23702_s4 + $0x1a0] sm:$0xff]   ;;  %v24024_v46 = vld [vmem:[#allocation24_spill] sm:$0xff] }
 0x3b8   : > { %v15140_v23 = vcombine.low %v6350_v61, %v6353_v58  ;;  %v6357_v10 = vsel %vm20380_vm2, %v15109_v35, %v6356_v16  ;;  %v24017_v34 = vcombine.low %v24015_v17, %v24016_v18  ;;  %v24022_v29 = vld [vmem:[#allocation23_spill] sm:$0xff]  ;;  %v24026_v32 = vcombine.low %v24024_v46, %v24025_v9  ;;  %v18412_v21 = vld [vmem:[%s23702_s4 + $0x1b0] sm:$0xff]   ;;  %v18413_v38 = vld [vmem:[%s23702_s4 + $0x1b8] sm:$0xff]  }
 0x3b9   : > { %v6360_v7 = vsel %vm20380_vm2, %v6358_v55, %v6359_v13  ;;  %v24028_v59 = vld [vmem:[#allocation28_spill] sm:$0xff]  ;;  %v24030_v45 = vld [vmem:[#allocation27_spill] sm:$0xff]  ;;  %v24031_v37 = vld [vmem:[#allocation29_spill] sm:$0xff] }
 0x3ba   : > { %v15141_v39 = vcombine.low %v6357_v10, %v6360_v7  ;;  %v24029_v11 = vcombine.low %v24027_v41, %v24028_v59  ;;  %v24032_v16 = vcombine.low %v24030_v45, %v24031_v37  ;;  %v18415_v63 = vld [vmem:[%s23702_s4 + $0x1c0] sm:$0xff]   ;;  %v24036_v61 = vld [vmem:[#allocation32_spill] sm:$0xff]  ;;  %v24043_v7 = vld [vmem:[#allocation37_spill] sm:$0xff] }
 0x3bb   : > { %v24033_v58 = vld [vmem:[#allocation30_spill] sm:$0xff]  ;;  %v24034_v54 = vld [vmem:[#allocation31_spill] sm:$0xff]  ;;  %v24042_v35 = vld [vmem:[#allocation36_spill] sm:$0xff] }
 0x3bc   : > { %16808 = vmatmul.mubr.bf16.gmra.mrb[72].mxu1 %v15097_v50  ;;  %v24021_v50 = vld [vmem:[#allocation22_spill] sm:$0xff]  ;;  %v24040_v48 = vld [vmem:[#allocation35_spill] sm:$0xff]  ;;  %v24044_v10 = vcombine.low %v24042_v35, %v24043_v7  ;;  %v585_v17 = vld [vmem:[#allocation2 + $0xd4] sm:$0x1] }
 0x3bd   : > { %16811 = vmatprep.mubr.bf16.mxu1 %v15098_v36  ;;  %v24023_v36 = vcombine.low %v24021_v50, %v24022_v29  ;;  %v24039_v43 = vld [vmem:[#allocation34_spill] sm:$0xff]  ;;  %v18418_v50 = vld [vmem:[%s23702_s4 + $0x1c8] sm:$0xff]   ;;  %v18417_v29 = vld [vmem:[#allocation2 + $0x30] sm:$0xff]  }
 0x3be   : > { %v24041_v13 = vcombine.low %v24039_v43, %v24040_v48  ;;  %v18419_v46 = vld [vmem:[#allocation2 + $0x3c] sm:$0xff]   ;;  %v18430_v41 = vld [vmem:[%s23702_s4 + $0x1e8] sm:$0xff]  }
 0x3bf   : > { %v18424_v9 = vld [vmem:[%s23702_s4 + $0x1d8] sm:$0xff]   ;;  %v18423_v59 = vld [vmem:[#allocation2 + $0x60] sm:$0xff]   ;;  %v18425_v45 = vld [vmem:[#allocation2 + $0x6c] sm:$0xff]  }
 0x3c0   : > { %v18436_v37 = vld [vmem:[%s23702_s4 + $0x1f8] sm:$0xff]  }
 0x3c4   : > { %16812 = vmatmul.mubr.bf16.gmra.mrb[76].mxu1 %v15099_v49  ;;  %v24035_v49 = vcombine.low %v24033_v58, %v24034_v54  ;;  %v7168_v58 = vld [vmem:[#allocation2 + $0x18] sm:$0xf]  ;;  %v24055_v54 = vld [vmem:[#allocation44_spill] sm:$0xff] }
 0x3c5   : > { %16831 = vmatprep.mubr.bf16.mxu1 %v15140_v23  ;;  %v24037_v23 = vld [vmem:[#allocation33_spill] sm:$0xff]  ;;  %v7217_v43 = vshrl.u32 %v7168_v58, 16  ;;  %v7220_v48 = vshll.u32 %v7168_v58, 16 }
 0x3c6   : > { %v24038_v55 = vcombine.low %v24036_v61, %v24037_v23  ;;  %v7230_v61 = vshrl.u32 %v24055_v54, 16  ;;  %v7171_v23 = vld [vmem:[#allocation2 + $0x24] sm:$0xf] }
 0x3c8   : > { %v7232_v7 = vrot.slane %v7230_v61, 4 }
 0x3cc   : > { %16832 = vmatmul.mubr.bf16.vlgmr.msra.gmra.mrb[48].mxu1 %v15141_v39  ;;  %v24045_v39 = vld [vmem:[#allocation38_spill] sm:$0xff] }
 0x3cd   : > { %16864 = vmatpush3.bf16.msra.mxu1 %v21307_v56  ;;  %16835 = vmatprep.mubr.bf16.mxu1 %v24014_v60  ;;  %v24018_v56 = vld [vmem:[#allocation18_spill] sm:$0xff]  ;;  %v24048_v60 = vld [vmem:[#allocation40_spill] sm:$0xff] }
 0x3ce   : > { %16865 = vmatprep.subr.bf16.mxu1 %v18407_v8  ;;  %v24020_v5 = vcombine.low %v24018_v56, %v24019_v33  ;;  %v18414_v56 = vld [vmem:[#allocation2 + $0x18] sm:$0xff]  }
 0x3cf   : > { %v24052_v33 = vld [vmem:[#allocation42_spill] sm:$0xff] }
 0x3d1   : > { %16866 = vmatpush3.bf16.msra.mxu1 %v18407_v8  ;;  %v24046_v8 = vld [vmem:[#allocation39_spill] sm:$0xff] }
 0x3d2   : > { %16867 = vmatprep.subr.bf16.mxu1 %v18408_v6  ;;  %v24047_v52 = vcombine.low %v24045_v39, %v24046_v8  ;;  %v7244_v39 = vshll.u32 %v7171_v23, 16  ;;  %v7219_v8 = vrot.slane %v7217_v43, 4 }
 0x3d4   : > { %16836 = vmatmul.mubr.bf16.gmra.mrb[52].mxu1 %v24017_v34  ;;  %v586_v34 = vsel %vm19583_vm8, 0, %v585_v17 }
 0x3d5   : > { %16839 = vmatprep.mubr.bf16.mxu1 %v24020_v5  ;;  %16868 = vmatpush3.bf16.msra.mxu1 %v18408_v6  ;;  %v24049_v6 = vld [vmem:[#allocation41_spill] sm:$0xff]  ;;  %587 = vst [vmem:[#allocation2 + $0xd4] sm:$0x1] %v586_v34  ;;  %v24053_v5 = vld [vmem:[#allocation43_spill] sm:$0xff] }
 0x3d6   : > { %16869 = vmatprep.subr.bf16.mxu1 %v18409_v0 }
 0x3d9   : > { %16870 = vmatpush3.bf16.msra.mxu1 %v18409_v0  ;;  %v24050_v0 = vcombine.low %v24048_v60, %v24049_v6  ;;  %v24056_v60 = vld [vmem:[#allocation46_spill] sm:$0xff] }
 0x3da   : > { %16871 = vmatprep.subr.bf16.mxu1 %v18410_v26  ;;  %v7250_v6 = vshll.u32 %v24056_v60, 16 }
 0x3dc   : > { %16840 = vmatmul.mubr.bf16.gmra.mrb[56].mxu1 %v24023_v36  ;;  %v18421_v36 = vld [vmem:[%s23702_s4 + $0x1d0] sm:$0xff]  }
 0x3dd   : > { %16843 = vmatprep.mubr.bf16.mxu1 %v24026_v32  ;;  %16872 = vmatpush3.bf16.msra.mxu1 %v18410_v26  ;;  %v24054_v26 = vcombine.low %v24052_v33, %v24053_v5  ;;  %v18420_v32 = vld [vmem:[#allocation2 + $0x48] sm:$0xff]   ;;  %v7174_v33 = vld [vmem:[#allocation2 + $0x30] sm:$0xf]  ;;  %v18431_v5 = vld [vmem:[#allocation2 + $0x9c] sm:$0xff]  }
 0x3de   : > { %16873 = vmatprep.subr.bf16.mxu1 %v18411_v47 }
 0x3e1   : > { %16874 = vmatpush3.bf16.msra.mxu1 %v18411_v47  ;;  %v18416_v47 = vld [vmem:[#allocation2 + $0x24] sm:$0xff]  }
 0x3e2   : > { %16875 = vmatprep.subr.bf16.mxu1 %v18412_v21 }
 0x3e4   : > { %16844 = vmatmul.mubr.bf16.gmra.mrb[60].mxu1 %v24029_v11  ;;  %v18433_v11 = vld [vmem:[%s23702_s4 + $0x1f0] sm:$0xff]  }
 0x3e5   : > { %16847 = vmatprep.mubr.bf16.mxu1 %v24032_v16  ;;  %16876 = vmatpush3.bf16.msra.mxu1 %v18412_v21  ;;  %v18427_v21 = vld [vmem:[%s23702_s4 + $0x1e0] sm:$0xff]   ;;  %v18426_v16 = vld [vmem:[#allocation2 + $0x78] sm:$0xff]  }
 0x3e6   : > { %16877 = vmatprep.subr.bf16.mxu1 %v18413_v38 }
 0x3e9   : > { %16878 = vmatpush3.bf16.msra.mxu1 %v18413_v38  ;;  %v18422_v38 = vld [vmem:[#allocation2 + $0x54] sm:$0xff]  }
 0x3ea   : > { %16911 = vmatprep.subr.bf16.mxu1 %v18415_v63 }
 0x3ec   : > { %16848 = vmatmul.mubr.bf16.gmra.mrb[64].mxu1 %v24035_v49  ;;  %v7226_v49 = vshll.u32 %v24055_v54, 16  ;;  %v7177_v54 = vld [vmem:[#allocation2 + $0x3c] sm:$0xf] }
 0x3ed   : > { %16851 = vmatprep.mubr.bf16.mxu1 %v24038_v55  ;;  %v18428_v55 = vld [vmem:[#allocation2 + $0x84] sm:$0xff]  }
 0x3ee   : > { %v7228_v35 = vrot.slane %v7226_v49, 5 }
 0x3f0   : > { %v7233_v17 = vor.u32 %v7232_v7, %v7228_v35  ;;  %v7289_v7 = vshrl.u32 %v7177_v54, 16 }
 0x3f4   : > { %16852 = vmatmul.mubr.bf16.gmra.mrb[68].mxu1 %v24041_v13  ;;  %v18429_v13 = vld [vmem:[#allocation2 + $0x90] sm:$0xff]  }
 0x3f5   : > { %16855 = vmatprep.mubr.bf16.mxu1 %v24044_v10  ;;  %v7241_v10 = vshrl.u32 %v7171_v23, 16 }
 0x3f7   : > { %v7243_v34 = vrot.slane %v7241_v10, 4  ;;  %v18434_v10 = vld [vmem:[#allocation2 + $0xb4] sm:$0xff]  }
 0x3fc   : > { %16856 = vmatmul.mubr.bf16.gmra.mrb[72].mxu1 %v24047_v52  ;;  %v7222_v52 = vrot.slane %v7220_v48, 5 }
 0x3fd   : > { %16859 = vmatprep.mubr.bf16.mxu1 %v24050_v0  ;;  %v7254_v0 = vshrl.u32 %v24056_v60, 16 }
 0x404   : > { %16860 = vmatmul.mubr.bf16.gmra.mrb[76].mxu1 %v24054_v26  ;;  %v7223_v26 = vor.u32 %v7222_v52, %v7219_v8  ;;  %v24060_v52 = vld [vmem:[#allocation49_spill] sm:$0xff] }
 0x405   : > { %16879 = vmatprep.mubr.bf16.mxu1 %v18414_v56  ;;  %v7246_v56 = vrot.slane %v7244_v39, 5  ;;  %v7284_v60 = vshll.u32 %v24060_v52, 16 }
 0x40c   : > { %16880 = vmatmul.mubr.bf16.vlgmr.msra.gmra.mrb[48].mxu1 %v18416_v47  ;;  %v24057_v47 = vld [vmem:[#allocation45_spill] sm:$0xff] }
 0x40d   : > { %16912 = vmatpush3.bf16.msra.mxu1 %v18415_v63  ;;  %16883 = vmatprep.mubr.bf16.mxu1 %v18417_v29  ;;  %v21446_v63 = vld [vmem:[%s23702_s4 + $0x200] sm:$0xff]   ;;  %v18432_v29 = vld [vmem:[#allocation2 + $0xa8] sm:$0xff]  }
 0x40e   : > { %16913 = vmatprep.subr.bf16.mxu1 %v18418_v50 }
 0x411   : > { %16914 = vmatpush3.bf16.msra.mxu1 %v18418_v50  ;;  %v7236_v50 = vshll.u32 %v24057_v47, 16 }
 0x412   : > { %16915 = vmatprep.subr.bf16.mxu1 %v18421_v36 }
 0x414   : > { %16884 = vmatmul.mubr.bf16.gmra.mrb[52].mxu1 %v18419_v46  ;;  %v7256_v46 = vrot.slane %v7254_v0, 4  ;;  %v18435_v0 = vld [vmem:[#allocation2 + $0xc0] sm:$0xff]  }
 0x415   : > { %16887 = vmatprep.mubr.bf16.mxu1 %v18420_v32  ;;  %16916 = vmatpush3.bf16.msra.mxu1 %v18421_v36  ;;  %v21454_v36 = vrot.slane %v7250_v6, 5  ;;  %v7292_v6 = vshll.u32 %v7177_v54, 16 }
 0x416   : > { %16917 = vmatprep.subr.bf16.mxu1 %v18424_v9 }
 0x417   : > { %v7257_v49 = vor.u32 %v7256_v46, %v21454_v36 }
 0x419   : > { %16918 = vmatpush3.bf16.msra.mxu1 %v18424_v9  ;;  %v24058_v9 = vld [vmem:[#allocation47_spill] sm:$0xff] }
 0x41a   : > { %16919 = vmatprep.subr.bf16.mxu1 %v18427_v21  ;;  %v7274_v32 = vshll.u32 %v24058_v9, 16 }
 0x41c   : > { %16888 = vmatmul.mubr.bf16.gmra.mrb[56].mxu1 %v18422_v38  ;;  %v7234_v38 = vrot.slane %v7233_v17, 4  ;;  %v21460_v61 = vrot.slane %v7274_v32, 5  ;;  %v21479_v32 = vld [vmem:[#allocation2 + $0xd4] sm:$0x1] }
 0x41d   : > { %16891 = vmatprep.mubr.bf16.mxu1 %v18423_v59  ;;  %16920 = vmatpush3.bf16.msra.mxu1 %v18427_v21  ;;  %v7278_v21 = vshrl.u32 %v24058_v9, 16  ;;  %v7265_v59 = vshrl.u32 %v7174_v33, 16  ;;  %v21477_v9 = vld [vmem:[#allocation2 + $0xd0] sm:$0xf] }
 0x41e   : > { %16921 = vmatprep.subr.bf16.mxu1 %v18430_v41 }
 0x41f   : > { %v7280_v23 = vrot.slane %v7278_v21, 4  ;;  %v7267_v48 = vrot.slane %v7265_v59, 4  ;;  %v7291_v21 = vrot.slane %v7289_v7, 4  ;;  %v8093_v59 = vrot.slane %v21477_v9, 5 }
 0x421   : > { %16922 = vmatpush3.bf16.msra.mxu1 %v18430_v41  ;;  %v7247_v41 = vor.u32 %v7246_v56, %v7243_v34  ;;  %v7258_v34 = vrot.slane %v7257_v49, 4  ;;  %v7281_v56 = vor.u32 %v7280_v23, %v21460_v61 }
 0x422   : > { %16923 = vmatprep.subr.bf16.mxu1 %v18433_v11 }
 0x423   : > { %v21464_v43 = vrot.slane %v7247_v41, 4  ;;  %v7937_v41 = vld [vmem:[#allocation2 + $0xcc] sm:$0xe]  ;;  %v7282_v49 = vrot.slane %v7281_v56, 4  ;;  %v7286_v56 = vrot.slane %v7284_v60, 5 }
 0x424   : > { %16892 = vmatmul.mubr.bf16.gmra.mrb[60].mxu1 %v18425_v45  ;;  %v7224_v45 = vrot.slane %v7223_v26, 4  ;;  %v7180_v26 = vld [vmem:[#allocation2 + $0x48] sm:$0xf]  ;;  %v15259_v54 = vrot.slane %v7937_v41, 9 }
 0x425   : > { %16895 = vmatprep.mubr.bf16.mxu1 %v18426_v16  ;;  %16924 = vmatpush3.bf16.msra.mxu1 %v18433_v11  ;;  %v7268_v11 = vshll.u32 %v7174_v33, 16  ;;  %v24059_v16 = vld [vmem:[#allocation48_spill] sm:$0xff]  ;;  %v24061_v33 = vld [vmem:[#allocation51_spill] sm:$0xff]  ;;  %v7253_v47 = vsel %vm19706_vm11, %v21464_v43, %v21454_v36  ;;  %v7183_v36 = vld [vmem:[#allocation2 + $0x54] sm:$0xf]  ;;  %v8095_v43 = vrot.slane %v8093_v59, 4 }
 0x426   : > { %16925 = vmatprep.subr.bf16.mxu1 %v18436_v37  ;;  %v7260_v58 = vshll.u32 %v24059_v16, 16  ;;  %v7229_v39 = vsel %vm19706_vm11, %v7224_v45, %v7228_v35  ;;  %v7302_v35 = vshrl.u32 %v24061_v33, 16  ;;  %v7294_v45 = vrot.slane %v7292_v6, 5 }
 0x427   : > { %v7316_v7 = vshll.u32 %v7180_v26, 16  ;;  %v7337_v6 = vshrl.u32 %v7183_v36, 16 }
 0x428   : > { %v7262_v8 = vrot.slane %v7260_v58, 5  ;;  %v7295_v41 = vor.u32 %v7294_v45, %v7291_v21 }
 0x429   : > { %16926 = vmatpush3.bf16.msra.mxu1 %v18436_v37  ;;  %v7238_v37 = vrot.slane %v7236_v50, 5 }
 0x42a   : > { %16959 = vmatprep.subr.bf16.mxu1 %v21446_v63 }
 0x42c   : > { %16896 = vmatmul.mubr.bf16.gmra.mrb[64].mxu1 %v18428_v55  ;;  %v7239_v55 = vsel %vm19706_vm11, %v7234_v38, %v7238_v37  ;;  %v24063_v37 = vld [vmem:[#allocation56_spill] sm:$0xff] }
 0x42d   : > { %16899 = vmatprep.mubr.bf16.mxu1 %v18429_v13  ;;  %v7270_v13 = vrot.slane %v7268_v11, 5  ;;  %v15220_v17 = vcombine.low %v7229_v39, %v7239_v55  ;;  %v8096_v11 = vrot.slane %v21479_v32, 5  ;;  %v7346_v16 = vshll.u32 %v24063_v37, 16 }
 0x42e   : > { %v7350_v58 = vshrl.u32 %v24063_v37, 16  ;;  %v7313_v55 = vshrl.u32 %v7180_v26, 16  ;;  %v21492_v39 = vsel %vm20380_vm2, %v15259_v54, %v8093_v59  ;;  %v24064_v59 = vld [vmem:[#allocation54_spill] sm:$0xff] }
 0x42f   : > { %v7271_v50 = vor.u32 %v7270_v13, %v7267_v48  ;;  %v18437_v48 = vld [vmem:[#allocation2 + $0xcc] sm:$0xff]   ;;  %v7304_v13 = vrot.slane %v7302_v35, 4  ;;  %v7263_v35 = vsel %vm19706_vm11, %v7258_v34, %v7262_v8  ;;  %v7186_v37 = vld [vmem:[#allocation2 + $0x60] sm:$0xf] }
 0x430   : > { %v15221_v34 = vcombine.low %v7253_v47, %v7263_v35  ;;  %v7361_v21 = vshrl.u32 %v7186_v37, 16  ;;  %v7364_v45 = vshll.u32 %v7186_v37, 16  ;;  %v18587_v47 = vld [vmem:[#allocation2 + $0x5c] sm:$0x1] }
 0x431   : > { %v7356_v35 = vshll.u32 %v18587_v47, 16  ;;  %v18590_v47 = vld [vmem:[#allocation2 + $0x7c] sm:$0xf] }
 0x434   : > { %16900 = vmatmul.mubr.bf16.gmra.mrb[68].mxu1 %v18431_v5  ;;  %v7298_v5 = vshll.u32 %v24061_v33, 16  ;;  %v21496_v33 = vsel %vm20380_vm2, %v8095_v43, %v8096_v11  ;;  %v7287_v11 = vsel %vm19706_vm11, %v7282_v49, %v7286_v56  ;;  %v7339_v43 = vrot.slane %v7337_v6, 4 }
 0x435   : > { %16903 = vmatprep.mubr.bf16.mxu1 %v18432_v29  ;;  %v24062_v29 = vld [vmem:[#allocation50_spill] sm:$0xff] }
 0x436   : > { %v7322_v46 = vshll.u32 %v24062_v29, 16  ;;  %v7326_v38 = vshrl.u32 %v24062_v29, 16  ;;  %v21486_v23 = vrot.slane %v7298_v5, 5  ;;  %v21498_v5 = vrot.slane %v7346_v16, 5 }
 0x437   : > { %v7352_v29 = vrot.slane %v7350_v58, 4  ;;  %v7318_v16 = vrot.slane %v7316_v7, 5  ;;  %v601_v58 = vld [vmem:[#allocation3 + $0x18] sm:$0x1] }
 0x438   : > { %v7328_v52 = vrot.slane %v7326_v38, 4  ;;  %v7308_v38 = vshll.u32 %v24064_v59, 16  ;;  %v7305_v60 = vor.u32 %v7304_v13, %v21486_v23  ;;  %v602_v8 = vsel %vm19575_vm6, 0, %v601_v58 }
 0x439   : > { %603 = vst [vmem:[#allocation3 + $0x18] sm:$0x1] %v602_v8  ;;  %v7363_v8 = vrot.slane %v7361_v21, 4 }
 0x43a   : > { %v7310_v56 = vrot.slane %v7308_v38, 5 }
 0x43c   : > { %16904 = vmatmul.mubr.bf16.gmra.mrb[72].mxu1 %v18434_v10  ;;  %v21488_v10 = vrot.slane %v7322_v46, 5  ;;  %v7272_v46 = vrot.slane %v7271_v50, 4  ;;  %v7353_v50 = vor.u32 %v7352_v29, %v21498_v5  ;;  %v7306_v29 = vrot.slane %v7305_v60, 4 }
 0x43d   : > { %16907 = vmatprep.mubr.bf16.mxu1 %v18435_v0  ;;  %v7340_v0 = vshll.u32 %v7183_v36, 16  ;;  %v7315_v36 = vrot.slane %v7313_v55, 4  ;;  %v18586_v55 = vld [vmem:[#allocation2 + $0x50] sm:$0x1]  ;;  %v7358_v60 = vrot.slane %v7356_v35, 5  ;;  %v7418_v35 = vshll.u32 %v18590_v47, 16 }
 0x43e   : > { %v7329_v54 = vor.u32 %v7328_v52, %v21488_v10  ;;  %v7277_v49 = vsel %vm19706_vm11, %v7272_v46, %v21460_v61  ;;  %v7189_v52 = vld [vmem:[#allocation2 + $0x6c] sm:$0xf]  ;;  %v7354_v46 = vrot.slane %v7353_v50, 4 }
 0x43f   : > { %v7342_v26 = vrot.slane %v7340_v0, 5  ;;  %v15222_v6 = vcombine.low %v7277_v49, %v7287_v11  ;;  %v7296_v0 = vrot.slane %v7295_v41, 4  ;;  %v7319_v59 = vor.u32 %v7318_v16, %v7315_v36  ;;  %v18439_v61 = vld [vmem:[%s23702_s4 + $0x208] sm:$0xff]  }
 0x440   : > { %v7330_v37 = vrot.slane %v7329_v54, 4  ;;  %v7385_v15 = vshrl.u32 %v7189_v52, 16  ;;  %v7388_v41 = vshll.u32 %v7189_v52, 16  ;;  %v7192_v54 = vld [vmem:[#allocation2 + $0x78] sm:$0xf] }
 0x441   : > { %v7343_v58 = vor.u32 %v7342_v26, %v7339_v43  ;;  %v7301_v38 = vsel %vm19706_vm11, %v7296_v0, %v21486_v23  ;;  %v18588_v26 = vld [vmem:[#allocation2 + $0x70] sm:$0xf]  ;;  %v7311_v43 = vsel %vm19706_vm11, %v7306_v29, %v7310_v56  ;;  %v7320_v50 = vrot.slane %v7319_v59, 4 }
 0x442   : > { %v7394_v36 = vshll.u32 %v18588_v26, 16  ;;  %v7398_v16 = vshrl.u32 %v18588_v26, 16  ;;  %v18440_v23 = vld [vmem:[%s23702_s4 + $0x210] sm:$0xff]   ;;  %v7390_v52 = vrot.slane %v7388_v41, 5  ;;  %v7412_v0 = vshll.u32 %v7192_v54, 16 }
 0x443   : > { %v7422_v29 = vshrl.u32 %v18590_v47, 16  ;;  %v15223_v59 = vcombine.low %v7301_v38, %v7311_v43  ;;  %v7195_v41 = vld [vmem:[#allocation2 + $0x84] sm:$0xf] }
 0x444   : > { %16908 = vmatmul.mubr.bf16.gmra.mrb[76].mxu1 %v18437_v48  ;;  %v7332_v48 = vshll.u32 %v18586_v55, 16  ;;  %v7366_v55 = vrot.slane %v7364_v45, 5  ;;  %v7359_v45 = vsel %vm19706_vm11, %v7354_v46, %v7358_v60  ;;  %v21536_v56 = vrot.slane %v7394_v36, 5 }
 0x445   : > { %16927 = vmatprep.mubr.bf16.mxu1 %v15220_v17  ;;  %v24065_v17 = vld [vmem:[#allocation59_spill] sm:$0xff]  ;;  %v7414_v36 = vrot.slane %v7412_v0, 5  ;;  %v7424_v43 = vrot.slane %v7422_v29, 4 }
 0x446   : > { %v7370_v13 = vshll.u32 %v24065_v17, 16  ;;  %v7374_v7 = vshrl.u32 %v24065_v17, 16  ;;  %v7334_v24 = vrot.slane %v7332_v48, 5  ;;  %v7367_v49 = vor.u32 %v7366_v55, %v7363_v8  ;;  %v18589_v48 = vld [vmem:[#allocation2 + $0x68] sm:$0x1] }
 0x448   : > { %v21520_v17 = vrot.slane %v7370_v13, 5  ;;  %v7376_v11 = vrot.slane %v7374_v7, 4  ;;  %v7335_v21 = vsel %vm19706_vm11, %v7330_v37, %v7334_v24  ;;  %v7387_v13 = vrot.slane %v7385_v15, 4 }
 0x449   : > { %v7400_v24 = vrot.slane %v7398_v16, 4  ;;  %v7325_v37 = vsel %vm19706_vm11, %v7320_v50, %v21488_v10  ;;  %v7368_v8 = vrot.slane %v7367_v49, 4  ;;  %v7198_v10 = vld [vmem:[#allocation2 + $0x90] sm:$0xf]  ;;  %v7433_v50 = vshrl.u32 %v7195_v41, 16 }
 0x44a   : > { %v7377_v7 = vor.u32 %v7376_v11, %v21520_v17  ;;  %v18441_v11 = vld [vmem:[%s23702_s4 + $0x218] sm:$0xff]   ;;  %v7391_v38 = vor.u32 %v7390_v52, %v7387_v13  ;;  %v7460_v13 = vshll.u32 %v7198_v10, 16 }
 0x44b   : > { %v7373_v0 = vsel %vm19706_vm11, %v7368_v8, %v21520_v17 }
 0x44c   : > { %16928 = vmatmul.mubr.bf16.vlgmr.msra.gmra.mrb[48].mxu1 %v15221_v34  ;;  %v7344_v34 = vrot.slane %v7343_v58, 4  ;;  %v15224_v58 = vcombine.low %v7325_v37, %v7335_v21  ;;  %v7378_v16 = vrot.slane %v7377_v7, 4  ;;  %v7436_v21 = vshll.u32 %v7195_v41, 16  ;;  %v18593_v7 = vld [vmem:[#allocation2 + $0x94] sm:$0xf] }
 0x44d   : > { %16960 = vmatpush3.bf16.msra.mxu1 %v21446_v63  ;;  %16931 = vmatprep.mubr.bf16.mxu1 %v15222_v6  ;;  %v7380_v63 = vshll.u32 %v18589_v48, 16  ;;  %v7409_v6 = vshrl.u32 %v7192_v54, 16  ;;  %v21548_v54 = vrot.slane %v7418_v35, 5  ;;  %v18442_v48 = vld [vmem:[%s23702_s4 + $0x220] sm:$0xff]   ;;  %v7466_v52 = vshll.u32 %v18593_v7, 16 }
 0x44e   : > { %16961 = vmatprep.subr.bf16.mxu1 %v18439_v61  ;;  %v7349_v15 = vsel %vm19706_vm11, %v7344_v34, %v21498_v5  ;;  %v7401_v5 = vor.u32 %v7400_v24, %v21536_v56  ;;  %v18592_v34 = vld [vmem:[#allocation2 + $0x88] sm:$0xf]  ;;  %v18594_v37 = vld [vmem:[#allocation2 + $0x80] sm:$0x1]  ;;  %v7438_v41 = vrot.slane %v7436_v21, 5  ;;  %v7462_v8 = vrot.slane %v7460_v13, 5 }
 0x44f   : > { %v15225_v46 = vcombine.low %v7349_v15, %v7359_v45  ;;  %v7382_v55 = vrot.slane %v7380_v63, 5  ;;  %v7411_v26 = vrot.slane %v7409_v6, 4  ;;  %v7442_v45 = vshll.u32 %v18592_v34, 16 }
 0x450   : > { %v7446_v49 = vshrl.u32 %v18592_v34, 16  ;;  %v7457_v63 = vshrl.u32 %v7198_v10, 16  ;;  %v7470_v6 = vshrl.u32 %v18593_v7, 16  ;;  %v7402_v29 = vrot.slane %v7401_v5, 4  ;;  %v7201_v34 = vld [vmem:[#allocation2 + $0x9c] sm:$0xf] }
 0x451   : > { %16962 = vmatpush3.bf16.msra.mxu1 %v18439_v61  ;;  %v18591_v61 = vld [vmem:[#allocation2 + $0x74] sm:$0x1]  ;;  %v7415_v47 = vor.u32 %v7414_v36, %v7411_v26  ;;  %v7383_v35 = vsel %vm19706_vm11, %v7378_v16, %v7382_v55  ;;  %v7428_v15 = vshll.u32 %v18594_v37, 16  ;;  %v18443_v55 = vld [vmem:[%s23702_s4 + $0x228] sm:$0xff]   ;;  %v7481_v21 = vshrl.u32 %v7201_v34, 16 }
 0x452   : > { %16963 = vmatprep.subr.bf16.mxu1 %v18440_v23  ;;  %v7404_v60 = vshll.u32 %v18591_v61, 16  ;;  %v21559_v61 = vrot.slane %v7442_v45, 5  ;;  %v7448_v10 = vrot.slane %v7446_v49, 4  ;;  %v7459_v17 = vrot.slane %v7457_v63, 4  ;;  %v18595_v63 = vld [vmem:[#allocation2 + $0x8c] sm:$0x1] }
 0x453   : > { %v15226_v26 = vcombine.low %v7373_v0, %v7383_v35  ;;  %v7416_v36 = vrot.slane %v7415_v47, 4  ;;  %v7484_v45 = vshll.u32 %v7201_v34, 16  ;;  %v7430_v49 = vrot.slane %v7428_v15, 5  ;;  %v18596_v0 = vld [vmem:[#allocation2 + $0xa0] sm:$0xf] }
 0x454   : > { %16932 = vmatmul.mubr.bf16.gmra.mrb[52].mxu1 %v15223_v59  ;;  %v7406_v24 = vrot.slane %v7404_v60, 5  ;;  %v7425_v59 = vor.u32 %v7424_v43, %v21548_v54  ;;  %v7472_v60 = vrot.slane %v7470_v6, 4  ;;  %v7452_v13 = vshll.u32 %v18595_v63, 16  ;;  %v18597_v35 = vld [vmem:[#allocation2 + $0x98] sm:$0x1] }
 0x455   : > { %16935 = vmatprep.mubr.bf16.mxu1 %v15224_v58  ;;  %16964 = vmatpush3.bf16.msra.mxu1 %v18440_v23  ;;  %v7392_v23 = vrot.slane %v7391_v38, 4  ;;  %v7435_v58 = vrot.slane %v7433_v50, 4  ;;  %v21561_v38 = vrot.slane %v7466_v52, 5  ;;  %v7449_v50 = vor.u32 %v7448_v10, %v21559_v61 }
 0x456   : > { %16965 = vmatprep.subr.bf16.mxu1 %v18441_v11  ;;  %v7407_v16 = vsel %vm19706_vm11, %v7402_v29, %v7406_v24  ;;  %v7426_v5 = vrot.slane %v7425_v59, 4  ;;  %v7463_v7 = vor.u32 %v7462_v8, %v7459_v17  ;;  %v7421_v6 = vsel %vm19706_vm11, %v7416_v36, %v21548_v54  ;;  %v7204_v24 = vld [vmem:[#allocation2 + $0xa8] sm:$0xf]  ;;  %v18598_v59 = vld [vmem:[#allocation2 + $0xac] sm:$0xf] }
 0x457   : > { %v7439_v43 = vor.u32 %v7438_v41, %v7435_v58  ;;  %v7476_v29 = vshll.u32 %v18597_v35, 16  ;;  %v7514_v37 = vshll.u32 %v18598_v59, 16  ;;  %v7518_v15 = vshrl.u32 %v18598_v59, 16  ;;  %v7210_v35 = vld [vmem:[#allocation2 + $0xc0] sm:$0xf] }
 0x458   : > { %v7431_v47 = vsel %vm19706_vm11, %v7426_v5, %v7430_v49  ;;  %v7450_v41 = vrot.slane %v7449_v50, 4  ;;  %v7483_v10 = vrot.slane %v7481_v21, 4  ;;  %v7486_v34 = vrot.slane %v7484_v45, 5  ;;  %v18601_v59 = vld [vmem:[#allocation2 + $0xc4] sm:$0xf] }
 0x459   : > { %16966 = vmatpush3.bf16.msra.mxu1 %v18441_v11  ;;  %v7397_v11 = vsel %vm19706_vm11, %v7392_v23, %v21536_v56  ;;  %v18444_v56 = vld [vmem:[%s23702_s4 + $0x230] sm:$0xff]   ;;  %v7494_v23 = vshrl.u32 %v18596_v0, 16  ;;  %v7440_v58 = vrot.slane %v7439_v43, 4  ;;  %v7464_v17 = vrot.slane %v7463_v7, 4  ;;  %v18599_v7 = vld [vmem:[#allocation2 + $0xa4] sm:$0x1] }
 0x45a   : > { %16967 = vmatprep.subr.bf16.mxu1 %v18442_v48  ;;  %v15227_v52 = vcombine.low %v7397_v11, %v7407_v16  ;;  %v7505_v54 = vshrl.u32 %v7204_v24, 16  ;;  %v15228_v36 = vcombine.low %v7421_v6, %v7431_v47  ;;  %v7454_v11 = vrot.slane %v7452_v13, 5 }
 0x45b   : > { %v7496_v5 = vrot.slane %v7494_v23, 4  ;;  %v7478_v43 = vrot.slane %v7476_v29, 5  ;;  %v21586_v50 = vrot.slane %v7514_v37, 5  ;;  %v7520_v21 = vrot.slane %v7518_v15, 4  ;;  %v18600_v23 = vld [vmem:[#allocation2 + $0xb8] sm:$0xf] }
 0x45c   : > { %16936 = vmatmul.mubr.bf16.gmra.mrb[56].mxu1 %v15225_v46  ;;  %v7473_v46 = vor.u32 %v7472_v60, %v21561_v38  ;;  %v7508_v60 = vshll.u32 %v7204_v24, 16  ;;  %v7445_v45 = vsel %vm19706_vm11, %v7440_v58, %v21559_v61  ;;  %v7455_v49 = vsel %vm19706_vm11, %v7450_v41, %v7454_v11 }
 0x45d   : > { %16939 = vmatprep.mubr.bf16.mxu1 %v15226_v26  ;;  %16968 = vmatpush3.bf16.msra.mxu1 %v18442_v48  ;;  %v7490_v48 = vshll.u32 %v18596_v0, 16  ;;  %v18445_v26 = vld [vmem:[%s23702_s4 + $0x238] sm:$0xff]   ;;  %v7487_v63 = vor.u32 %v7486_v34, %v7483_v10  ;;  %v7500_v13 = vshll.u32 %v18599_v7, 16  ;;  %v7507_v6 = vrot.slane %v7505_v54, 4 }
 0x45e   : > { %16969 = vmatprep.subr.bf16.mxu1 %v18443_v55  ;;  %v7474_v8 = vrot.slane %v7473_v46, 4  ;;  %v7469_v46 = vsel %vm19706_vm11, %v7464_v17, %v21561_v38  ;;  %v7510_v0 = vrot.slane %v7508_v60, 5  ;;  %v7538_v24 = vshll.u32 %v18600_v23, 16  ;;  %v18602_v17 = vld [vmem:[#allocation2 + $0xb0] sm:$0x1] }
 0x45f   : > { %v21584_v16 = vrot.slane %v7490_v48, 5  ;;  %v7542_v47 = vshrl.u32 %v18600_v23, 16  ;;  %v7521_v29 = vor.u32 %v7520_v21, %v21586_v50  ;;  %v7562_v37 = vshll.u32 %v18601_v59, 16 }
 0x460   : > { %v7566_v15 = vshrl.u32 %v18601_v59, 16  ;;  %v15229_v38 = vcombine.low %v7445_v45, %v7455_v49  ;;  %v7488_v41 = vrot.slane %v7487_v63, 4  ;;  %v7502_v10 = vrot.slane %v7500_v13, 5 }
 0x461   : > { %16970 = vmatpush3.bf16.msra.mxu1 %v18443_v55  ;;  %v7207_v55 = vld [vmem:[#allocation2 + $0xb4] sm:$0xf]  ;;  %v7497_v48 = vor.u32 %v7496_v5, %v21584_v16  ;;  %v7511_v34 = vor.u32 %v7510_v0, %v7507_v6  ;;  %v7553_v54 = vshrl.u32 %v7210_v35, 16  ;;  %v7556_v60 = vshll.u32 %v7210_v35, 16  ;;  %v18603_v35 = vld [vmem:[#allocation2 + $0xbc] sm:$0x1] }
 0x462   : > { %16971 = vmatprep.subr.bf16.mxu1 %v18444_v56  ;;  %v7529_v61 = vshrl.u32 %v7207_v55, 16  ;;  %v7544_v7 = vrot.slane %v7542_v47, 4  ;;  %v7522_v21 = vrot.slane %v7521_v29, 4  ;;  %v7564_v23 = vrot.slane %v7562_v37, 5 }
 0x463   : > { %v7498_v11 = vrot.slane %v7497_v48, 4  ;;  %v7568_v59 = vrot.slane %v7566_v15, 4  ;;  %v7590_v63 = vshrl.u32 %v21477_v9, 16  ;;  %v7512_v13 = vrot.slane %v7511_v34, 4  ;;  %v18604_v34 = vld [vmem:[#allocation2 + $0xc8] sm:$0x1] }
 0x464   : > { %16940 = vmatmul.mubr.bf16.gmra.mrb[60].mxu1 %v15227_v52  ;;  %v7479_v52 = vsel %vm19706_vm11, %v7474_v8, %v7478_v43  ;;  %v7524_v8 = vshll.u32 %v18602_v17, 16  ;;  %v7531_v5 = vrot.slane %v7529_v61, 4  ;;  %v7540_v43 = vrot.slane %v7538_v24, 5 }
 0x465   : > { %16943 = vmatprep.mubr.bf16.mxu1 %v15228_v36  ;;  %16972 = vmatpush3.bf16.msra.mxu1 %v18444_v56  ;;  %v7532_v56 = vshll.u32 %v7207_v55, 16  ;;  %v15230_v58 = vcombine.low %v7469_v46, %v7479_v52  ;;  %v7213_v36 = vld [vmem:[#allocation2 + $0xcc] sm:$0xf]  ;;  %v7555_v52 = vrot.slane %v7553_v54, 4  ;;  %v7558_v6 = vrot.slane %v7556_v60, 5 }
 0x466   : > { %16973 = vmatprep.subr.bf16.mxu1 %v18445_v26  ;;  %v7577_v45 = vshrl.u32 %v7213_v36, 16  ;;  %v7580_v49 = vshll.u32 %v7213_v36, 16  ;;  %v7526_v46 = vrot.slane %v7524_v8, 5  ;;  %v7493_v0 = vsel %vm19706_vm11, %v7488_v41, %v21584_v16 }
 0x467   : > { %v7534_v55 = vrot.slane %v7532_v56, 5  ;;  %v7503_v48 = vsel %vm19706_vm11, %v7498_v11, %v7502_v10  ;;  %v7545_v61 = vor.u32 %v7544_v7, %v7540_v43  ;;  %v7548_v29 = vshll.u32 %v18603_v35, 16 }
 0x468   : > { %v7527_v24 = vsel %vm19706_vm11, %v7522_v21, %v7526_v46  ;;  %v7569_v56 = vor.u32 %v7568_v59, %v7564_v23  ;;  %v7582_v37 = vrot.slane %v7580_v49, 5  ;;  %v7517_v16 = vsel %vm19706_vm11, %v7512_v13, %v21586_v50 }
 0x469   : > { %16974 = vmatpush3.bf16.msra.mxu1 %v18445_v26  ;;  %v7586_v26 = vshll.u32 %v21477_v9, 16  ;;  %v7535_v47 = vor.u32 %v7534_v55, %v7531_v5  ;;  %v7579_v9 = vrot.slane %v7577_v45, 4  ;;  %v7559_v41 = vor.u32 %v7558_v6, %v7555_v52 }
 0x46a   : > { %v7572_v10 = vshll.u32 %v18604_v34, 16  ;;  %v15232_v17 = vcombine.low %v7517_v16, %v7527_v24  ;;  %v7546_v8 = vrot.slane %v7545_v61, 4  ;;  %v7550_v54 = vrot.slane %v7548_v29, 5  ;;  %v24069_v24 = vld [vmem:[#allocation55_spill] sm:$0xff]  ;;  %v24073_v29 = vld [vmem:[#allocation60_spill] sm:$0xff] }
 0x46b   : > { %v7588_v15 = vrot.slane %v7586_v26, 5  ;;  %v7570_v60 = vrot.slane %v7569_v56, 4  ;;  %v7536_v36 = vrot.slane %v7535_v47, 4  ;;  %v7583_v11 = vor.u32 %v7582_v37, %v7579_v9  ;;  %v24070_v47 = vld [vmem:[#allocation57_spill] sm:$0xff]  ;;  %v24076_v37 = vld [vmem:[#allocation62_spill] sm:$0xff] }
 0x46c   : > { %16944 = vmatmul.mubr.bf16.gmra.mrb[64].mxu1 %v15229_v38  ;;  %v7592_v38 = vrot.slane %v7590_v63, 4  ;;  %v7596_v7 = vshll.u32 %v21479_v32, 16  ;;  %v7560_v21 = vrot.slane %v7559_v41, 4  ;;  %v7574_v55 = vrot.slane %v7572_v10, 5  ;;  %v24075_v9 = vld [vmem:[#allocation61_spill] sm:$0xff]  ;;  %v24083_v10 = vld [vmem:[#allocation66_spill] sm:$0xff] }
 0x46d   : > { %16947 = vmatprep.mubr.bf16.mxu1 %v15230_v58  ;;  %v15231_v58 = vcombine.low %v7493_v0, %v7503_v48  ;;  %v7551_v59 = vsel %vm19706_vm11, %v7546_v8, %v7550_v54  ;;  %v7541_v45 = vsel %vm19706_vm11, %v7536_v36, %v7540_v43  ;;  %v7584_v49 = vrot.slane %v7583_v11, 4  ;;  %v24066_v48 = vld [vmem:[#allocation52_spill] sm:$0xff]  ;;  %v24067_v43 = vld [vmem:[#allocation53_spill] sm:$0xff]  ;;  %v24086_v54 = vld [vmem:[#allocation67_spill] sm:$0xff] }
 0x46e   : > { %v7593_v5 = vor.u32 %v7592_v38, %v7588_v15  ;;  %v7575_v50 = vsel %vm19706_vm11, %v7570_v60, %v7574_v55  ;;  %v7598_v63 = vrot.slane %v7596_v7, 5  ;;  %v15233_v13 = vcombine.low %v7541_v45, %v7551_v59  ;;  %v24078_v38 = vld [vmem:[#allocation63_spill] sm:$0xff]  ;;  %v24081_v41 = vld [vmem:[#allocation65_spill] sm:$0xff]  ;;  %v24088_v36 = vld [vmem:[#allocation68_spill] sm:$0xff] }
 0x46f   : > { %v7565_v46 = vsel %vm19706_vm11, %v7560_v21, %v7564_v23  ;;  %v7589_v32 = vsel %vm19706_vm11, %v7584_v49, %v7588_v15  ;;  %v24068_v61 = vcombine.low %v24066_v48, %v24067_v43  ;;  %v24071_v35 = vcombine.low %v24069_v24, %v24070_v47  ;;  %v24072_v23 = vld [vmem:[#allocation58_spill] sm:$0xff]  ;;  %v610_v21 = vld [vmem:[#allocation3 + $0x3c] sm:$0x1]  ;;  %v18449_v55 = vld [vmem:[#allocation4 + $0x58] sm:$0xff]  }
 0x470   : > { %v7594_v26 = vrot.slane %v7593_v5, 4  ;;  %v15234_v52 = vcombine.low %v7565_v46, %v7575_v50  ;;  %v24074_v56 = vcombine.low %v24072_v23, %v24073_v29  ;;  %v24077_v15 = vcombine.low %v24075_v9, %v24076_v37  ;;  %v613_v7 = vld [vmem:[#allocation3 + $0x48] sm:$0x1]  ;;  %v667_v45 = vld [vmem:[#allocation3 + $0x50] sm:$0x1] }
 0x471   : > { %v24082_v34 = vcombine.low %v21116_v14, %v24081_v41  ;;  %v24085_v8 = vcombine.low %v21140_v42, %v21146_v53  ;;  %v24087_v60 = vcombine.low %v21150_v3, %v24086_v54  ;;  %v24089_v11 = vcombine.low %v21166_v62, %v24088_v36  ;;  %v598_v3 = vld [vmem:[#allocation3 + $0xc] sm:$0x1]  ;;  %v619_v46 = vld [vmem:[#allocation3 + $0x60] sm:$0x1]  ;;  %v673_v48 = vld [vmem:[#allocation3 + $0x68] sm:$0x1] }
 0x472   : > { %v7599_v6 = vsel %vm19706_vm11, %v7594_v26, %v7598_v63  ;;  %v24090_v14 = vcombine.low %v21174_v19, %v21180_v31  ;;  %v24091_v42 = vcombine.low %v21215_v12, %v21219_v27  ;;  %v24093_v53 = vcombine.low %v21492_v39, %v21496_v33  ;;  %v655_v31 = vld [vmem:[#allocation3 + $0x20] sm:$0x1]  ;;  %v652_v19 = vld [vmem:[#allocation3 + $0x14] sm:$0x1]  ;;  %v658_v39 = vld [vmem:[#allocation3 + $0x2c] sm:$0x1] }
 0x473   : > { %v15235_v0 = vcombine.low %v7589_v32, %v7599_v6  ;;  %v599_v62 = vsel %vm19575_vm6, 0, %v598_v3  ;;  %v656_v40 = vsel %vm19583_vm8, 0, %v655_v31  ;;  %v653_v20 = vsel %vm19583_vm8, 0, %v652_v19  ;;  %v18447_v27 = vld [vmem:[#allocation4 + $0x48] sm:$0xff]   ;;  %v18448_v33 = vld [vmem:[#allocation4 + $0x50] sm:$0xff]   ;;  %v18453_v9 = vld [vmem:[#allocation4 + $0x78] sm:$0xff]  }
 0x474   : > { %16948 = vmatmul.mubr.bf16.gmra.mrb[68].mxu1 %v15231_v58  ;;  %v24079_v58 = vld [vmem:[#allocation64_spill] sm:$0xff]  ;;  %600 = vst [vmem:[#allocation3 + $0xc] sm:$0x1] %v599_v62  ;;  %657 = vst [vmem:[#allocation3 + $0x20] sm:$0x1] %v656_v40  ;;  %17009 = vmatprep.subr.bf16.mxu0 %v18447_v27  ;;  %v659_v5 = vsel %vm19583_vm8, 0, %v658_v39 }
 0x475   : > { %16951 = vmatprep.mubr.bf16.mxu1 %v15232_v17  ;;  %v24080_v16 = vcombine.low %v24078_v38, %v24079_v58  ;;  %v24084_v17 = vcombine.low %v21124_v44, %v24083_v10  ;;  %v24092_v44 = vcombine.low %v21226_v4, %v21230_v30  ;;  %654 = vst [vmem:[#allocation3 + $0x14] sm:$0x1] %v653_v20  ;;  %v661_v4 = vld [vmem:[#allocation3 + $0x38] sm:$0x1]  ;;  %660 = vst [vmem:[#allocation3 + $0x2c] sm:$0x1] %v659_v5 }
 0x476   : > { %v662_v30 = vsel %vm19583_vm8, 0, %v661_v4  ;;  %17010 = vmatpush3.bf16.msra.mxu0 %v18447_v27  ;;  %v614_v59 = vsel %vm19575_vm6, 0, %v613_v7  ;;  %v611_v50 = vsel %vm19575_vm6, 0, %v610_v21  ;;  %v668_v49 = vsel %vm19583_vm8, 0, %v667_v45  ;;  %v664_v26 = vld [vmem:[#allocation3 + $0x44] sm:$0x1] }
 0x477   : > { %663 = vst [vmem:[#allocation3 + $0x38] sm:$0x1] %v662_v30  ;;  %17011 = vmatprep.subr.bf16.mxu0 %v18448_v33  ;;  %615 = vst [vmem:[#allocation3 + $0x48] sm:$0x1] %v614_v59  ;;  %v665_v63 = vsel %vm19583_vm8, 0, %v664_v26  ;;  %v674_v43 = vsel %vm19583_vm8, 0, %v673_v48 }
 0x478   : > { %612 = vst [vmem:[#allocation3 + $0x3c] sm:$0x1] %v611_v50  ;;  %669 = vst [vmem:[#allocation3 + $0x50] sm:$0x1] %v668_v49  ;;  %v616_v32 = vld [vmem:[#allocation3 + $0x54] sm:$0x1] }
 0x479   : > { %666 = vst [vmem:[#allocation3 + $0x44] sm:$0x1] %v665_v63  ;;  %v617_v6 = vsel %vm19575_vm6, 0, %v616_v32  ;;  %675 = vst [vmem:[#allocation3 + $0x68] sm:$0x1] %v674_v43  ;;  %v18452_v47 = vld [vmem:[#allocation4 + $0x70] sm:$0xff]  }
 0x47a   : > { %17012 = vmatpush3.bf16.msra.mxu0 %v18448_v33  ;;  %618 = vst [vmem:[#allocation3 + $0x54] sm:$0x1] %v617_v6  ;;  %v622_v29 = vld [vmem:[#allocation3 + $0x6c] sm:$0x1]  ;;  %v679_v37 = vld [vmem:[#allocation3 + $0x80] sm:$0x1] }
 0x47b   : > { %17013 = vmatprep.subr.bf16.mxu0 %v18449_v55  ;;  %v676_v38 = vld [vmem:[#allocation3 + $0x74] sm:$0x1]  ;;  %v649_v41 = vld [vmem:[#allocation3 + $0x8] sm:$0x1]  ;;  %v631_v31 = vld [vmem:[#allocation3 + $0x90] sm:$0x1] }
 0x47c   : > { %16952 = vmatmul.mubr.bf16.gmra.mrb[72].mxu1 %v15233_v13  ;;  %v18450_v13 = vld [vmem:[#allocation4 + $0x60] sm:$0xff]   ;;  %v677_v58 = vsel %vm19583_vm8, 0, %v676_v38  ;;  %v650_v10 = vsel %vm19583_vm8, 0, %v649_v41  ;;  %v632_v40 = vsel %vm19575_vm6, 0, %v631_v31  ;;  %v682_v33 = vld [vmem:[#allocation3 + $0x8c] sm:$0x1] }
 0x47d   : > { %16955 = vmatprep.mubr.bf16.mxu1 %v15234_v52  ;;  %v620_v52 = vsel %vm19575_vm6, 0, %v619_v46  ;;  %678 = vst [vmem:[#allocation3 + $0x74] sm:$0x1] %v677_v58  ;;  %651 = vst [vmem:[#allocation3 + $0x8] sm:$0x1] %v650_v10  ;;  %v683_v5 = vsel %vm19583_vm8, 0, %v682_v33 }
 0x47e   : > { %17014 = vmatpush3.bf16.msra.mxu0 %v18449_v55  ;;  %621 = vst [vmem:[#allocation3 + $0x60] sm:$0x1] %v620_v52  ;;  %633 = vst [vmem:[#allocation3 + $0x90] sm:$0x1] %v632_v40  ;;  %v637_v55 = vld [vmem:[#allocation3 + $0xa8] sm:$0x1] }
 0x47f   : > { %17015 = vmatprep.subr.bf16.mxu0 %v18450_v13  ;;  %684 = vst [vmem:[#allocation3 + $0x8c] sm:$0x1] %v683_v5  ;;  %v638_v59 = vsel %vm19575_vm6, 0, %v637_v55  ;;  %v634_v50 = vld [vmem:[#allocation3 + $0x9c] sm:$0x1] }
 0x480   : > { %639 = vst [vmem:[#allocation3 + $0xa8] sm:$0x1] %v638_v59  ;;  %v635_v45 = vsel %vm19575_vm6, 0, %v634_v50  ;;  %v691_v49 = vld [vmem:[#allocation3 + $0xb0] sm:$0x1] }
 0x481   : > { %v688_v26 = vld [vmem:[#allocation3 + $0xa4] sm:$0x1]  ;;  %636 = vst [vmem:[#allocation3 + $0x9c] sm:$0x1] %v635_v45  ;;  %v692_v63 = vsel %vm19583_vm8, 0, %v691_v49 }
 0x482   : > { %17016 = vmatpush3.bf16.msra.mxu0 %v18450_v13  ;;  %v689_v13 = vsel %vm19583_vm8, 0, %v688_v26  ;;  %693 = vst [vmem:[#allocation3 + $0xb0] sm:$0x1] %v692_v63  ;;  %v643_v46 = vld [vmem:[#allocation3 + $0xc0] sm:$0x1] }
 0x483   : > { %690 = vst [vmem:[#allocation3 + $0xa4] sm:$0x1] %v689_v13  ;;  %v644_v52 = vsel %vm19575_vm6, 0, %v643_v46  ;;  %v640_v32 = vld [vmem:[#allocation3 + $0xb4] sm:$0x1] }
 0x484   : > { %16956 = vmatmul.mubr.bf16.gmra.mrb[76].mxu1 %v15235_v0  ;;  %v18451_v0 = vld [vmem:[#allocation4 + $0x68] sm:$0xff]   ;;  %645 = vst [vmem:[#allocation3 + $0xc0] sm:$0x1] %v644_v52  ;;  %v697_v6 = vld [vmem:[#allocation3 + $0xc8] sm:$0x1] }
 0x485   : > { %16975 = vmatprep.mubr.bf16.mxu1 %v24068_v61  ;;  %17017 = vmatprep.subr.bf16.mxu0 %v18451_v0  ;;  %v670_v61 = vld [vmem:[#allocation3 + $0x5c] sm:$0x1]  ;;  %v698_v48 = vsel %vm19583_vm8, 0, %v697_v6  ;;  %v8945_v55 = vld [vmem:[#allocation3 + $0xc] sm:$0xf] }
 0x486   : > { %17018 = vmatpush3.bf16.msra.mxu0 %v18451_v0  ;;  %v671_v24 = vsel %vm19583_vm8, 0, %v670_v61  ;;  %v641_v0 = vsel %vm19575_vm6, 0, %v640_v32  ;;  %v694_v43 = vld [vmem:[#allocation3 + $0xbc] sm:$0x1]  ;;  %699 = vst [vmem:[#allocation3 + $0xc8] sm:$0x1] %v698_v48 }
 0x487   : > { %672 = vst [vmem:[#allocation3 + $0x5c] sm:$0x1] %v671_v24  ;;  %17019 = vmatprep.subr.bf16.mxu0 %v18452_v47  ;;  %642 = vst [vmem:[#allocation3 + $0xb4] sm:$0x1] %v641_v0  ;;  %v695_v61 = vsel %vm19583_vm8, 0, %v694_v43 }
 0x488   : > { %696 = vst [vmem:[#allocation3 + $0xbc] sm:$0x1] %v695_v61  ;;  %v21749_v24 = vld [vmem:[%s23703_s5] ss:$0 sm:$0xff]  ;;  %v8956_v26 = vld [vmem:[#allocation3 + $0x20] sm:$0x1] }
 0x489   : > { %v8949_v0 = vld [vmem:[#allocation3 + $0x14] sm:$0x1] }
 0x48a   : > { %17020 = vmatpush3.bf16.msra.mxu0 %v18452_v47  ;;  %v21754_v47 = vld [vmem:[%s23704_s6] ss:$0 sm:$0xff] }
 0x48b   : > { %17021 = vmatprep.subr.bf16.mxu0 %v18453_v9 }
 0x48c   : > { %16976 = vmatmul.mubr.bf16.vlgmr.msra.gmra.mrb[48].mxu1 %v24071_v35  ;;  %v625_v35 = vld [vmem:[#allocation3 + $0x78] sm:$0x1] }
 0x48d   : > { %16979 = vmatprep.mubr.bf16.mxu1 %v24074_v56  ;;  %v626_v23 = vsel %vm19575_vm6, 0, %v625_v35  ;;  %v623_v56 = vsel %vm19575_vm6, 0, %v622_v29 }
 0x48e   : > { %627 = vst [vmem:[#allocation3 + $0x78] sm:$0x1] %v626_v23  ;;  %624 = vst [vmem:[#allocation3 + $0x6c] sm:$0x1] %v623_v56  ;;  %17022 = vmatpush3.bf16.msra.mxu0 %v18453_v9 }
 0x494   : > { %16980 = vmatmul.mubr.bf16.gmra.mrb[52].mxu1 %v24077_v15  ;;  %v680_v15 = vsel %vm19583_vm8, 0, %v679_v37 }
 0x495   : > { %16983 = vmatprep.mubr.bf16.mxu1 %v24080_v16  ;;  %681 = vst [vmem:[#allocation3 + $0x80] sm:$0x1] %v680_v15  ;;  %v595_v16 = vld [vmem:[#allocation3] sm:$0x1] }
 0x49c   : > { %16984 = vmatmul.mubr.bf16.gmra.mrb[56].mxu1 %v24082_v34  ;;  %v596_v34 = vsel %vm19575_vm6, 0, %v595_v16 }
 0x49d   : > { %16987 = vmatprep.mubr.bf16.mxu1 %v24084_v17  ;;  %v9060_v17 = vld [vmem:[#allocation3 + $0x4] sm:$0xf]  ;;  %597 = vst [vmem:[#allocation3] sm:$0x1] %v596_v34 }
 0x49e   : > { %v9137_v54 = vshrl.u32 %v9060_v17, 16 }
 0x4a4   : > { %16988 = vmatmul.mubr.bf16.gmra.mrb[60].mxu1 %v24085_v8  ;;  %v9133_v8 = vshll.u32 %v9060_v17, 16 }
 0x4a5   : > { %16991 = vmatprep.mubr.bf16.mxu1 %v24087_v60  ;;  %v21715_v60 = vld [vmem:[#allocation4] sm:$0xff]  }
 0x4a6   : > { %v9135_v36 = vrot.slane %v9133_v8, 5  ;;  %17055 = vmatprep.subr.bf16.mxu0 %v21715_v60 }
 0x4ac   : > { %16992 = vmatmul.mubr.bf16.gmra.mrb[64].mxu1 %v24089_v11  ;;  %v9139_v11 = vrot.slane %v9137_v54, 4 }
 0x4ad   : > { %16995 = vmatprep.mubr.bf16.mxu1 %v24090_v14 }
 0x4ae   : > { %v9140_v14 = vor.u32 %v9139_v11, %v9135_v36 }
 0x4b0   : > { %v9141_v2 = vrot.slane %v9140_v14, 4 }
 0x4b4   : > { %16996 = vmatmul.mubr.bf16.gmra.mrb[68].mxu1 %v15287_v51  ;;  %v607_v51 = vld [vmem:[#allocation3 + $0x30] sm:$0x1] }
 0x4b5   : > { %16999 = vmatprep.mubr.bf16.mxu1 %v15288_v28  ;;  %v608_v1 = vsel %vm19575_vm6, 0, %v607_v51  ;;  %v604_v28 = vld [vmem:[#allocation3 + $0x24] sm:$0x1] }
 0x4b6   : > { %609 = vst [vmem:[#allocation3 + $0x30] sm:$0x1] %v608_v1  ;;  %v605_v12 = vsel %vm19575_vm6, 0, %v604_v28  ;;  %v628_v28 = vld [vmem:[#allocation3 + $0x84] sm:$0x1] }
 0x4b7   : > { %606 = vst [vmem:[#allocation3 + $0x24] sm:$0x1] %v605_v12  ;;  %v685_v12 = vld [vmem:[#allocation3 + $0x98] sm:$0x1]  ;;  %v629_v30 = vsel %vm19575_vm6, 0, %v628_v28 }
 0x4b8   : > { %v686_v39 = vsel %vm19583_vm8, 0, %v685_v12  ;;  %630 = vst [vmem:[#allocation3 + $0x84] sm:$0x1] %v629_v30 }
 0x4b9   : > { %687 = vst [vmem:[#allocation3 + $0x98] sm:$0x1] %v686_v39 }
 0x4bc   : > { %17000 = vmatmul.mubr.bf16.gmra.mrb[72].mxu1 %v24091_v42  ;;  %v9059_v42 = vld [vmem:[#allocation3] sm:$0xf] }
 0x4bd   : > { %17003 = vmatprep.mubr.bf16.mxu1 %v24092_v44  ;;  %v9107_v44 = vld [vmem:[#allocation3 + $0x8] sm:$0x1]  ;;  %v9127_v3 = vshll.u32 %v9059_v42, 16 }
 0x4be   : > { %v9143_v62 = vshll.u32 %v9107_v44, 16 }
 0x4bf   : > { %v9129_v20 = vrot.slane %v9127_v3, 5 }
 0x4c0   : > { %v9145_v51 = vrot.slane %v9143_v62, 5 }
 0x4c2   : > { %v9146_v4 = vsel %vm19706_vm11, %v9141_v2, %v9145_v51 }
 0x4c4   : > { %17004 = vmatmul.mubr.bf16.gmra.mrb[76].mxu1 %v24093_v53  ;;  %v9124_v53 = vshrl.u32 %v9059_v42, 16 }
 0x4c6   : > { %v9126_v19 = vrot.slane %v9124_v53, 4 }
 0x4c8   : > { %v9130_v1 = vor.u32 %v9129_v20, %v9126_v19 }
 0x4ca   : > { %v9131_v27 = vrot.slane %v9130_v1, 4 }
 0x4cc   : > { %v9136_v7 = vsel %vm19706_vm11, %v9131_v27, %v9135_v36 }
 0x4cd   : > { %v15334_v21 = vcombine.low %v9136_v7, %v9146_v4  ;;  %v8952_v4 = vld [vmem:[#allocation3 + $0x18] sm:$0xf] }
 0x4cf   : > { %17023 = vmatprep.mubr.bf16.mxu0 %v15334_v21 }
 0x55f   : > { %v16977_v35 = vpop.f32.mrb[48].mxu1 }
 0x560   : > { %v8428_v23 = vmul.f32 %v16977_v35, %v21749_v24  ;;  %v8261_v29 = vpop.f32.mrb[49].mxu1 }
 0x561   : > { %v8426_v56 = vmul.f32 %v21749_v24, %v8261_v29  ;;  %v16978_v9 = vpop.f32.mrb[50].mxu1 }
 0x562   : > { %v8466_v37 = vadd.f32 %v21754_v47, %v8428_v23  ;;  %v8429_v15 = vmul.f32 %v16978_v9, %v21749_v24  ;;  %v8264_v38 = vpop.f32.mrb[51].mxu1 }
 0x563   : > { %v8464_v58 = vadd.f32 %v21754_v47, %v8426_v56  ;;  %v8427_v16 = vmul.f32 %v21749_v24, %v8264_v38 }
 0x564   : > { %v8498_v41 = vmax.f32 %v8466_v37, 0.0  ;;  %v8467_v34 = vadd.f32 %v21754_v47, %v8429_v15 }
 0x565   : > { %v8496_v10 = vmax.f32 %v8464_v58, 0.0  ;;  %v8465_v17 = vadd.f32 %v21754_v47, %v8427_v16 }
 0x566   : > { %v15637_v8 = vpack.c.bf16 %v8498_v41, %v8498_v41  ;;  %v8499_v54 = vmax.f32 %v8467_v34, 0.0 }
 0x567   : > { %v15635_v36 = vpack.c.bf16 %v8496_v10, %v8496_v10  ;;  %v8497_v11 = vmax.f32 %v8465_v17, 0.0  ;;  %v16981_v14 = vpop.f32.mrb[52].mxu1 }
 0x568   : > { %v8642_v42 = vshrl.u32 %v15637_v8, 16  ;;  %v8645_v44 = vshll.u32 %v15637_v8, 16  ;;  %v15638_v53 = vpack.c.bf16 %v8499_v54, %v8499_v54  ;;  %v8432_v3 = vmul.f32 %v16981_v14, %v21749_v24  ;;  %v8277_v62 = vpop.f32.mrb[53].mxu1 }
 0x569   : > { %v8625_v31 = vshrl.u32 %v15635_v36, 16  ;;  %v8628_v40 = vshll.u32 %v15635_v36, 16  ;;  %v15636_v19 = vpack.c.bf16 %v8497_v11, %v8497_v11  ;;  %v8430_v20 = vmul.f32 %v21749_v24, %v8277_v62  ;;  %v16982_v2 = vpop.f32.mrb[54].mxu1 }
 0x56a   : > { %v8644_v51 = vrot.slane %v8642_v42, 7  ;;  %v8650_v1 = vshrl.u32 %v15638_v53, 16  ;;  %v8653_v28 = vshll.u32 %v15638_v53, 16  ;;  %v8470_v12 = vadd.f32 %v21754_v47, %v8432_v3  ;;  %v8280_v27 = vpop.f32.mrb[55].mxu1  ;;  %v8966_v42 = vld [vmem:[#allocation3 + $0x30] sm:$0xf] }
 0x56b   : > { %v8627_v30 = vrot.slane %v8625_v31, 7  ;;  %v8633_v39 = vshrl.u32 %v15636_v19, 16  ;;  %v8636_v33 = vshll.u32 %v15636_v19, 16  ;;  %v8468_v5 = vadd.f32 %v21754_v47, %v8430_v20  ;;  %v8959_v19 = vld [vmem:[#allocation3 + $0x24] sm:$0xf] }
 0x56c   : > { %v8647_v7 = vor.u32 %v8645_v44, %v8644_v51  ;;  %v8648_v21 = vrot.slane %v8644_v51, 4  ;;  %v8652_v59 = vrot.slane %v8650_v1, 7  ;;  %v8502_v50 = vmax.f32 %v8470_v12, 0.0 }
 0x56d   : > { %v8630_v45 = vor.u32 %v8628_v40, %v8627_v30  ;;  %v8631_v49 = vrot.slane %v8627_v30, 4  ;;  %v8635_v63 = vrot.slane %v8633_v39, 7  ;;  %v8500_v13 = vmax.f32 %v8468_v5, 0.0 }
 0x56e   : > { %v8953_v52 = vsel %vm19798_vm14, %v8647_v7, %v8952_v4  ;;  %v8655_v32 = vor.u32 %v8653_v28, %v8652_v59  ;;  %v8657_v6 = vrot.slane %v8652_v59, 4  ;;  %v15641_v48 = vpack.c.bf16 %v8502_v50, %v8502_v50 }
 0x56f   : > { %8954 = vst [vmem:[#allocation3 + $0x18] sm:$0xf] %v8953_v52  ;;  %v8946_v43 = vsel %vm19798_vm14, %v8630_v45, %v8945_v55  ;;  %v8638_v61 = vor.u32 %v8636_v33, %v8635_v63  ;;  %v8640_v35 = vrot.slane %v8635_v63, 4  ;;  %v15639_v23 = vpack.c.bf16 %v8500_v13, %v8500_v13  ;;  %v16985_v29 = vpop.f32.mrb[56].mxu1 }
 0x570   : > { %8947 = vst [vmem:[#allocation3 + $0xc] sm:$0xf] %v8946_v43  ;;  %v8656_v9 = vsel %vm19830_vm15, %v8648_v21, %v8655_v32  ;;  %v8957_v37 = vsel %vm19575_vm6, %v8657_v6, %v8956_v26  ;;  %v8676_v15 = vshrl.u32 %v15641_v48, 16  ;;  %v8679_v38 = vshll.u32 %v15641_v48, 16  ;;  %v8293_v58 = vpop.f32.mrb[57].mxu1 }
 0x571   : > { %8955 = vst [vmem:[#allocation3 + $0x1c] sm:$0xf] %v8656_v9  ;;  %8958 = vst [vmem:[#allocation3 + $0x20] sm:$0x1] %v8957_v37  ;;  %v8639_v16 = vsel %vm19830_vm15, %v8631_v49, %v8638_v61  ;;  %v8950_v41 = vsel %vm19575_vm6, %v8640_v35, %v8949_v0  ;;  %v8659_v34 = vshrl.u32 %v15639_v23, 16  ;;  %v8662_v10 = vshll.u32 %v15639_v23, 16 }
 0x572   : > { %v16986_v17 = vpop.f32.mrb[58].mxu1  ;;  %8948 = vst [vmem:[#allocation3 + $0x10] sm:$0xf] %v8639_v16  ;;  %8951 = vst [vmem:[#allocation3 + $0x14] sm:$0x1] %v8950_v41  ;;  %v21780_v8 = vrot.slane %v8676_v15, 7  ;;  %v8433_v54 = vmul.f32 %v16982_v2, %v21749_v24  ;;  %v8431_v36 = vmul.f32 %v21749_v24, %v8280_v27  ;;  %v8436_v11 = vmul.f32 %v16985_v29, %v21749_v24 }
 0x573   : > { %v8296_v14 = vpop.f32.mrb[59].mxu1  ;;  %v21785_v44 = vrot.slane %v8659_v34, 7  ;;  %v8434_v53 = vmul.f32 %v21749_v24, %v8293_v58  ;;  %v8437_v3 = vmul.f32 %v16986_v17, %v21749_v24  ;;  %v8970_v23 = vld [vmem:[#allocation3 + $0x38] sm:$0x1]  ;;  %v8963_v29 = vld [vmem:[#allocation3 + $0x2c] sm:$0x1] }
 0x574   : > { %v8435_v62 = vmul.f32 %v21749_v24, %v8296_v14  ;;  %v8681_v31 = vor.u32 %v8679_v38, %v21780_v8  ;;  %v8682_v40 = vrot.slane %v21780_v8, 4  ;;  %v8471_v20 = vadd.f32 %v21754_v47, %v8433_v54  ;;  %v8980_v41 = vld [vmem:[#allocation3 + $0x48] sm:$0xf] }
 0x575   : > { %v8469_v2 = vadd.f32 %v21754_v47, %v8431_v36  ;;  %v8664_v51 = vor.u32 %v8662_v10, %v21785_v44  ;;  %v8665_v1 = vrot.slane %v21785_v44, 4  ;;  %v8474_v28 = vadd.f32 %v21754_v47, %v8436_v11 }
 0x576   : > { %v8472_v12 = vadd.f32 %v21754_v47, %v8434_v53  ;;  %v8967_v27 = vsel %vm19798_vm14, %v8681_v31, %v8966_v42  ;;  %v8503_v4 = vmax.f32 %v8471_v20, 0.0  ;;  %v8475_v39 = vadd.f32 %v21754_v47, %v8437_v3  ;;  %v8973_v53 = vld [vmem:[#allocation3 + $0x3c] sm:$0xf] }
 0x577   : > { %v8501_v30 = vmax.f32 %v8469_v2, 0.0  ;;  %8968 = vst [vmem:[#allocation3 + $0x30] sm:$0xf] %v8967_v27  ;;  %v8960_v33 = vsel %vm19798_vm14, %v8664_v51, %v8959_v19  ;;  %v8506_v5 = vmax.f32 %v8474_v28, 0.0  ;;  %v8473_v21 = vadd.f32 %v21754_v47, %v8435_v62  ;;  %v16989_v55 = vpop.f32.mrb[60].mxu1 }
 0x578   : > { %v8504_v7 = vmax.f32 %v8472_v12, 0.0  ;;  %8961 = vst [vmem:[#allocation3 + $0x24] sm:$0xf] %v8960_v33  ;;  %v15642_v59 = vpack.c.bf16 %v8503_v4, %v8503_v4  ;;  %v8507_v45 = vmax.f32 %v8475_v39, 0.0  ;;  %v8440_v49 = vmul.f32 %v16989_v55, %v21749_v24  ;;  %v8309_v26 = vpop.f32.mrb[61].mxu1 }
 0x579   : > { %v15640_v50 = vpack.c.bf16 %v8501_v30, %v8501_v30  ;;  %v15645_v63 = vpack.c.bf16 %v8506_v5, %v8506_v5  ;;  %v8505_v52 = vmax.f32 %v8473_v21, 0.0  ;;  %v8438_v32 = vmul.f32 %v21749_v24, %v8309_v26  ;;  %v16990_v6 = vpop.f32.mrb[62].mxu1  ;;  %v8984_v26 = vld [vmem:[#allocation3 + $0x50] sm:$0x1] }
 0x57a   : > { %v15643_v13 = vpack.c.bf16 %v8504_v7, %v8504_v7  ;;  %v8684_v0 = vshrl.u32 %v15642_v59, 16  ;;  %v8687_v48 = vshll.u32 %v15642_v59, 16  ;;  %v8312_v35 = vpop.f32.mrb[63].mxu1  ;;  %v15646_v34 = vpack.c.bf16 %v8507_v45, %v8507_v45 }
 0x57b   : > { %v8667_v43 = vshrl.u32 %v15640_v50, 16  ;;  %v8670_v61 = vshll.u32 %v15640_v50, 16  ;;  %v8710_v9 = vshrl.u32 %v15645_v63, 16  ;;  %v8713_v37 = vshll.u32 %v15645_v63, 16 }
 0x57c   : > { %v8693_v15 = vshrl.u32 %v15643_v13, 16  ;;  %v8696_v38 = vshll.u32 %v15643_v13, 16  ;;  %v8686_v58 = vrot.slane %v8684_v0, 7  ;;  %v15644_v10 = vpack.c.bf16 %v8505_v52, %v8505_v52 }
 0x57d   : > { %v8669_v16 = vrot.slane %v8667_v43, 7  ;;  %v8712_v17 = vrot.slane %v8710_v9, 7  ;;  %v8478_v54 = vadd.f32 %v21754_v47, %v8440_v49  ;;  %v8476_v36 = vadd.f32 %v21754_v47, %v8438_v32  ;;  %v8977_v43 = vld [vmem:[#allocation3 + $0x44] sm:$0x1] }
 0x57e   : > { %v8695_v8 = vrot.slane %v8693_v15, 7  ;;  %v8689_v11 = vor.u32 %v8687_v48, %v8686_v58  ;;  %v8691_v14 = vrot.slane %v8686_v58, 4  ;;  %v8718_v30 = vshrl.u32 %v15646_v34, 16 }
 0x57f   : > { %v8672_v42 = vor.u32 %v8670_v61, %v8669_v16  ;;  %v8674_v44 = vrot.slane %v8669_v16, 4  ;;  %v8715_v3 = vor.u32 %v8713_v37, %v8712_v17  ;;  %v8716_v62 = vrot.slane %v8712_v17, 4  ;;  %v16993_v20 = vpop.f32.mrb[64].mxu1 }
 0x580   : > { %v8698_v31 = vor.u32 %v8696_v38, %v8695_v8  ;;  %v8699_v19 = vrot.slane %v8695_v8, 4  ;;  %v8690_v2 = vsel %vm19830_vm15, %v8682_v40, %v8689_v11  ;;  %v8971_v51 = vsel %vm19575_vm6, %v8691_v14, %v8970_v23  ;;  %v8325_v27 = vpop.f32.mrb[65].mxu1 }
 0x581   : > { %v8673_v28 = vsel %vm19830_vm15, %v8665_v1, %v8672_v42  ;;  %v8964_v12 = vsel %vm19575_vm6, %v8674_v44, %v8963_v29  ;;  %8969 = vst [vmem:[#allocation3 + $0x34] sm:$0xf] %v8690_v2  ;;  %8972 = vst [vmem:[#allocation3 + $0x38] sm:$0x1] %v8971_v51  ;;  %v8981_v4 = vsel %vm19798_vm14, %v8715_v3, %v8980_v41  ;;  %v8721_v39 = vshll.u32 %v15646_v34, 16  ;;  %v16994_v33 = vpop.f32.mrb[66].mxu1 }
 0x582   : > { %8962 = vst [vmem:[#allocation3 + $0x28] sm:$0xf] %v8673_v28  ;;  %8965 = vst [vmem:[#allocation3 + $0x2c] sm:$0x1] %v8964_v12  ;;  %v8974_v40 = vsel %vm19798_vm14, %v8698_v31, %v8973_v53  ;;  %v8701_v1 = vshrl.u32 %v15644_v10, 16  ;;  %v8704_v5 = vshll.u32 %v15644_v10, 16  ;;  %v8441_v50 = vmul.f32 %v16990_v6, %v21749_v24 }
 0x583   : > { %8982 = vst [vmem:[#allocation3 + $0x48] sm:$0xf] %v8981_v4  ;;  %8975 = vst [vmem:[#allocation3 + $0x3c] sm:$0xf] %v8974_v40  ;;  %v8510_v7 = vmax.f32 %v8478_v54, 0.0  ;;  %v8508_v21 = vmax.f32 %v8476_v36, 0.0  ;;  %v8439_v45 = vmul.f32 %v21749_v24, %v8312_v35  ;;  %v8444_v49 = vmul.f32 %v16993_v20, %v21749_v24 }
 0x584   : > { %v21820_v55 = vpop.f32.mrb[67].mxu1  ;;  %v8720_v59 = vrot.slane %v8718_v30, 7  ;;  %v8703_v63 = vrot.slane %v8701_v1, 7  ;;  %v8442_v32 = vmul.f32 %v21749_v24, %v8325_v27  ;;  %v8479_v61 = vadd.f32 %v21754_v47, %v8441_v50  ;;  %v8994_v54 = vld [vmem:[#allocation3 + $0x60] sm:$0xf] }
 0x585   : > { %v15649_v13 = vpack.c.bf16 %v8510_v7, %v8510_v7  ;;  %v15647_v52 = vpack.c.bf16 %v8508_v21, %v8508_v21  ;;  %v8477_v23 = vadd.f32 %v21754_v47, %v8439_v45  ;;  %v8482_v14 = vadd.f32 %v21754_v47, %v8444_v49  ;;  %v21847_v27 = vld [vmem:[#allocation3 + $0xc] sm:$0xf] }
 0x586   : > { %v8723_v0 = vor.u32 %v8721_v39, %v8720_v59  ;;  %v8725_v48 = vrot.slane %v8720_v59, 4  ;;  %v8706_v29 = vor.u32 %v8704_v5, %v8703_v63  ;;  %v8708_v9 = vrot.slane %v8703_v63, 4  ;;  %v8998_v5 = vld [vmem:[#allocation3 + $0x68] sm:$0x1] }
 0x587   : > { %v8744_v6 = vshrl.u32 %v15649_v13, 16  ;;  %v8747_v37 = vshll.u32 %v15649_v13, 16  ;;  %v8727_v38 = vshrl.u32 %v15647_v52, 16  ;;  %v8730_v58 = vshll.u32 %v15647_v52, 16  ;;  %v21832_v16 = vpop.f32.mrb[68].mxu1 }
 0x588   : > { %v8724_v35 = vsel %vm19830_vm15, %v8716_v62, %v8723_v0  ;;  %v8985_v15 = vsel %vm19575_vm6, %v8725_v48, %v8984_v26  ;;  %v8707_v41 = vsel %vm19830_vm15, %v8699_v19, %v8706_v29  ;;  %v8978_v34 = vsel %vm19575_vm6, %v8708_v9, %v8977_v43  ;;  %v21838_v8 = vpop.f32.mrb[69].mxu1  ;;  %v8987_v62 = vld [vmem:[#allocation3 + $0x54] sm:$0xf]  ;;  %v8991_v43 = vld [vmem:[#allocation3 + $0x5c] sm:$0x1] }
 0x589   : > { %8983 = vst [vmem:[#allocation3 + $0x4c] sm:$0xf] %v8724_v35  ;;  %8986 = vst [vmem:[#allocation3 + $0x50] sm:$0x1] %v8985_v15  ;;  %v8746_v10 = vrot.slane %v8744_v6, 7  ;;  %v8511_v17 = vmax.f32 %v8479_v61, 0.0  ;;  %v8480_v42 = vadd.f32 %v21754_v47, %v8442_v32  ;;  %v8445_v19 = vmul.f32 %v16994_v33, %v21749_v24 }
 0x58a   : > { %8976 = vst [vmem:[#allocation3 + $0x40] sm:$0xf] %v8707_v41  ;;  %8979 = vst [vmem:[#allocation3 + $0x44] sm:$0x1] %v8978_v34  ;;  %v8729_v36 = vrot.slane %v8727_v38, 7  ;;  %v8509_v11 = vmax.f32 %v8477_v23, 0.0  ;;  %v8443_v49 = vmul.f32 %v21749_v24, %v21820_v55 }
 0x58b   : > { %v21842_v44 = vpop.f32.mrb[70].mxu1  ;;  %v8749_v53 = vor.u32 %v8747_v37, %v8746_v10  ;;  %v8750_v3 = vrot.slane %v8746_v10, 4  ;;  %v15650_v31 = vpack.c.bf16 %v8511_v17, %v8511_v17  ;;  %v8514_v12 = vmax.f32 %v8482_v14, 0.0  ;;  %v9008_v35 = vld [vmem:[#allocation3 + $0x78] sm:$0xf] }
 0x58c   : > { %v21845_v20 = vpop.f32.mrb[71].mxu1  ;;  %v8732_v2 = vor.u32 %v8730_v58, %v8729_v36  ;;  %v8733_v51 = vrot.slane %v8729_v36, 4  ;;  %v15648_v28 = vpack.c.bf16 %v8509_v11, %v8509_v11  ;;  %v8512_v39 = vmax.f32 %v8480_v42, 0.0  ;;  %v9001_v34 = vld [vmem:[#allocation3 + $0x6c] sm:$0xf] }
 0x58d   : > { %v8995_v4 = vsel %vm19798_vm14, %v8749_v53, %v8994_v54  ;;  %v8752_v40 = vshrl.u32 %v15650_v31, 16  ;;  %v8755_v30 = vshll.u32 %v15650_v31, 16  ;;  %v15653_v21 = vpack.c.bf16 %v8514_v12, %v8514_v12  ;;  %v9062_v17 = vld [vmem:[#allocation3 + $0x10] sm:$0xf] }
 0x58e   : > { %8996 = vst [vmem:[#allocation3 + $0x60] sm:$0xf] %v8995_v4  ;;  %v8988_v1 = vsel %vm19798_vm14, %v8732_v2, %v8987_v62  ;;  %v8735_v33 = vshrl.u32 %v15648_v28, 16  ;;  %v8738_v7 = vshll.u32 %v15648_v28, 16  ;;  %v15651_v50 = vpack.c.bf16 %v8512_v39, %v8512_v39  ;;  %v9063_v4 = vld [vmem:[#allocation3 + $0x18] sm:$0xf] }
 0x58f   : > { %8989 = vst [vmem:[#allocation3 + $0x54] sm:$0xf] %v8988_v1  ;;  %v8754_v59 = vrot.slane %v8752_v40, 7  ;;  %v8483_v45 = vadd.f32 %v21754_v47, %v8445_v19  ;;  %v8778_v63 = vshrl.u32 %v15653_v21, 16  ;;  %v8781_v13 = vshll.u32 %v15653_v21, 16  ;;  %v21857_v32 = vpop.f32.mrb[72].mxu1 }
 0x590   : > { %v8737_v26 = vrot.slane %v8735_v33, 7  ;;  %v9148_v52 = vshrl.u32 %v21847_v27, 16  ;;  %v8761_v61 = vshrl.u32 %v15651_v50, 16  ;;  %v8764_v23 = vshll.u32 %v15651_v50, 16  ;;  %v21859_v29 = vpop.f32.mrb[73].mxu1 }
 0x591   : > { %v8757_v0 = vor.u32 %v8755_v30, %v8754_v59  ;;  %v8759_v48 = vrot.slane %v8754_v59, 4  ;;  %v21861_v37 = vrot.slane %v8778_v63, 7  ;;  %v8515_v55 = vmax.f32 %v8483_v45, 0.0  ;;  %v21863_v15 = vpop.f32.mrb[74].mxu1  ;;  %v9108_v19 = vld [vmem:[#allocation3 + $0x14] sm:$0x1] }
 0x592   : > { %v8740_v9 = vor.u32 %v8738_v7, %v8737_v26  ;;  %v8742_v6 = vrot.slane %v8737_v26, 4  ;;  %v21869_v41 = vrot.slane %v8761_v61, 7  ;;  %v8481_v10 = vadd.f32 %v21754_v47, %v8443_v49  ;;  %v21872_v54 = vpop.f32.mrb[75].mxu1  ;;  %v9012_v33 = vld [vmem:[#allocation3 + $0x80] sm:$0x1] }
 0x593   : > { %v8758_v38 = vsel %vm19830_vm15, %v8750_v3, %v8757_v0  ;;  %v8999_v58 = vsel %vm19575_vm6, %v8759_v48, %v8998_v5  ;;  %v8783_v14 = vor.u32 %v8781_v13, %v21861_v37  ;;  %v8784_v42 = vrot.slane %v21861_v37, 4  ;;  %v9064_v5 = vld [vmem:[#allocation3 + $0x1c] sm:$0xf]  ;;  %v9005_v37 = vld [vmem:[#allocation3 + $0x74] sm:$0x1] }
 0x594   : > { %8997 = vst [vmem:[#allocation3 + $0x64] sm:$0xf] %v8758_v38  ;;  %9000 = vst [vmem:[#allocation3 + $0x68] sm:$0x1] %v8999_v58  ;;  %v8741_v36 = vsel %vm19830_vm15, %v8733_v51, %v8740_v9  ;;  %v8992_v11 = vsel %vm19575_vm6, %v8742_v6, %v8991_v43  ;;  %v8766_v53 = vor.u32 %v8764_v23, %v21869_v41  ;;  %v8767_v3 = vrot.slane %v21869_v41, 4 }
 0x595   : > { %8990 = vst [vmem:[#allocation3 + $0x58] sm:$0xf] %v8741_v36  ;;  %8993 = vst [vmem:[#allocation3 + $0x5c] sm:$0x1] %v8992_v11  ;;  %v15654_v62 = vpack.c.bf16 %v8515_v55, %v8515_v55  ;;  %v8513_v31 = vmax.f32 %v8481_v10, 0.0  ;;  %v9009_v2 = vsel %vm19798_vm14, %v8783_v14, %v9008_v35  ;;  %v9150_v51 = vrot.slane %v9148_v52, 4 }
 0x596   : > { %v9151_v28 = vshll.u32 %v21847_v27, 16  ;;  %v9157_v12 = vshll.u32 %v9062_v17, 16  ;;  %9010 = vst [vmem:[#allocation3 + $0x78] sm:$0xf] %v9009_v2  ;;  %v9002_v40 = vsel %vm19798_vm14, %v8766_v53, %v9001_v34  ;;  %v9161_v59 = vshrl.u32 %v9062_v17, 16 }
 0x597   : > { %v8786_v30 = vshrl.u32 %v15654_v62, 16  ;;  %v8789_v39 = vshll.u32 %v15654_v62, 16  ;;  %v15652_v1 = vpack.c.bf16 %v8513_v31, %v8513_v31  ;;  %9003 = vst [vmem:[#allocation3 + $0x6c] sm:$0xf] %v9002_v40  ;;  %v9167_v50 = vshll.u32 %v9108_v19, 16  ;;  %v21887_v45 = vpop.f32.mrb[76].mxu1 }
 0x598   : > { %v9153_v7 = vrot.slane %v9151_v28, 5  ;;  %v9159_v21 = vrot.slane %v9157_v12, 5  ;;  %v9172_v63 = vshrl.u32 %v9063_v4, 16  ;;  %v21889_v13 = vpop.f32.mrb[77].mxu1  ;;  %v9163_v0 = vrot.slane %v9161_v59, 4 }
 0x599   : > { %v8788_v49 = vrot.slane %v8786_v30, 7  ;;  %v8769_v27 = vshrl.u32 %v15652_v1, 16  ;;  %v8772_v26 = vshll.u32 %v15652_v1, 16  ;;  %v9169_v48 = vrot.slane %v9167_v50, 5  ;;  %v21891_v61 = vpop.f32.mrb[78].mxu1  ;;  %v18455_v1 = vld [vmem:[#allocation4 + $0x8] sm:$0xff]  }
 0x59a   : > { %v9154_v52 = vor.u32 %v9153_v7, %v9150_v51  ;;  %v9175_v43 = vshll.u32 %v9063_v4, 16  ;;  %v9174_v35 = vrot.slane %v9172_v63, 4  ;;  %v21893_v55 = vpop.f32.mrb[79].mxu1  ;;  %v9164_v58 = vor.u32 %v9163_v0, %v9159_v21  ;;  %v9109_v41 = vld [vmem:[#allocation3 + $0x20] sm:$0x1] }
 0x59b   : > { %v8791_v23 = vor.u32 %v8789_v39, %v8788_v49  ;;  %v8793_v9 = vrot.slane %v8788_v49, 4  ;;  %v8771_v6 = vrot.slane %v8769_v27, 7  ;;  %v9181_v10 = vshll.u32 %v9064_v5, 16  ;;  %v9065_v12 = vld [vmem:[#allocation3 + $0x24] sm:$0xf] }
 0x59c   : > { %v9155_v38 = vrot.slane %v9154_v52, 4  ;;  %v9177_v34 = vrot.slane %v9175_v43, 5  ;;  %v9165_v62 = vrot.slane %v9164_v58, 4  ;;  %v9191_v28 = vshll.u32 %v9109_v41, 16  ;;  %v12627_v57 = vld [vmem:[#allocation3 + $0x60] sm:$0xf] }
 0x59d   : > { %v8792_v17 = vsel %vm19830_vm15, %v8784_v42, %v8791_v23  ;;  %v9013_v36 = vsel %vm19575_vm6, %v8793_v9, %v9012_v33  ;;  %v8774_v11 = vor.u32 %v8772_v26, %v8771_v6  ;;  %v8776_v14 = vrot.slane %v8771_v6, 4 }
 0x59e   : > { %9011 = vst [vmem:[#allocation3 + $0x7c] sm:$0xf] %v8792_v17  ;;  %9014 = vst [vmem:[#allocation3 + $0x80] sm:$0x1] %v9013_v36  ;;  %v9160_v53 = vsel %vm19706_vm11, %v9155_v38, %v9159_v21  ;;  %v9178_v31 = vor.u32 %v9177_v34, %v9174_v35  ;;  %v9183_v19 = vrot.slane %v9181_v10, 5  ;;  %v9185_v42 = vshrl.u32 %v9064_v5, 16 }
 0x59f   : > { %v8775_v2 = vsel %vm19830_vm15, %v8767_v3, %v8774_v11  ;;  %v9006_v51 = vsel %vm19575_vm6, %v8776_v14, %v9005_v37  ;;  %v9170_v4 = vsel %vm19706_vm11, %v9165_v62, %v9169_v48  ;;  %v8448_v30 = vmul.f32 %v21832_v16, %v21749_v24  ;;  %v9066_v21 = vld [vmem:[#allocation3 + $0x28] sm:$0xf]  ;;  %v9110_v34 = vld [vmem:[#allocation3 + $0x2c] sm:$0x1]  ;;  %v9022_v62 = vld [vmem:[#allocation3 + $0x90] sm:$0xf] }
 0x5a0   : > { %9004 = vst [vmem:[#allocation3 + $0x70] sm:$0xf] %v8775_v2  ;;  %9007 = vst [vmem:[#allocation3 + $0x74] sm:$0x1] %v9006_v51  ;;  %v9179_v40 = vrot.slane %v9178_v31, 4  ;;  %v8446_v39 = vmul.f32 %v21749_v24, %v21838_v8  ;;  %v15335_v3 = vcombine.low %v9160_v53, %v9170_v4  ;;  %v9187_v33 = vrot.slane %v9185_v42, 4 }
 0x5a1   : > { %v9193_v7 = vrot.slane %v9191_v28, 5  ;;  %v8449_v5 = vmul.f32 %v21842_v44, %v21749_v24  ;;  %v8486_v50 = vadd.f32 %v21754_v47, %v8448_v30  ;;  %v8447_v16 = vmul.f32 %v21749_v24, %v21845_v20  ;;  %v18456_v37 = vld [vmem:[#allocation4 + $0x10] sm:$0xff]   ;;  %v18457_v28 = vld [vmem:[#allocation4 + $0x18] sm:$0xff]  }
 0x5a2   : > { %v9184_v59 = vsel %vm19706_vm11, %v9179_v40, %v9183_v19  ;;  %v8484_v49 = vadd.f32 %v21754_v47, %v8446_v39  ;;  %17024 = vmatmul.mubr.bf16.vlgmr.msra.gmra.mrb[32].mxu0 %v15335_v3  ;;  %v9188_v8 = vor.u32 %v9187_v33, %v9183_v19  ;;  %v9196_v26 = vshrl.u32 %v9065_v12, 16  ;;  %v9015_v19 = vld [vmem:[#allocation3 + $0x84] sm:$0xf]  ;;  %v9026_v40 = vld [vmem:[#allocation3 + $0x98] sm:$0x1] }
 0x5a3   : > { %v8487_v27 = vadd.f32 %v21754_v47, %v8449_v5  ;;  %v9199_v63 = vshll.u32 %v9065_v12, 16  ;;  %17056 = vmatpush3.bf16.msra.mxu0 %v21715_v60  ;;  %v8518_v44 = vmax.f32 %v8486_v50, 0.0  ;;  %v8485_v0 = vadd.f32 %v21754_v47, %v8447_v16 }
 0x5a4   : > { %v8516_v52 = vmax.f32 %v8484_v49, 0.0  ;;  %v9205_v48 = vshll.u32 %v9066_v21, 16  ;;  %v9189_v43 = vrot.slane %v9188_v8, 4  ;;  %17057 = vmatprep.subr.bf16.mxu0 %v18455_v1  ;;  %v9198_v9 = vrot.slane %v9196_v26, 4  ;;  %v18458_v49 = vld [vmem:[#allocation4 + $0x20] sm:$0xff]  }
 0x5a5   : > { %v8519_v23 = vmax.f32 %v8487_v27, 0.0  ;;  %v9201_v6 = vrot.slane %v9199_v63, 5  ;;  %v15657_v20 = vpack.c.bf16 %v8518_v44, %v8518_v44  ;;  %v8517_v38 = vmax.f32 %v8485_v0, 0.0  ;;  %v21929_v63 = vld [vmem:[#allocation3 + $0x30] sm:$0xf] }
 0x5a6   : > { %v15655_v35 = vpack.c.bf16 %v8516_v52, %v8516_v52  ;;  %v21922_v58 = vrot.slane %v9205_v48, 5  ;;  %v9194_v41 = vsel %vm19706_vm11, %v9189_v43, %v9193_v7  ;;  %v9209_v17 = vshrl.u32 %v9066_v21, 16  ;;  %v21931_v44 = vld [vmem:[#allocation3 + $0x34] sm:$0xf]  ;;  %v9019_v48 = vld [vmem:[#allocation3 + $0x8c] sm:$0x1] }
 0x5a7   : > { %v15658_v60 = vpack.c.bf16 %v8519_v23, %v8519_v23  ;;  %v9202_v10 = vor.u32 %v9201_v6, %v9198_v9  ;;  %v15336_v36 = vcombine.low %v9184_v59, %v9194_v41  ;;  %v8812_v11 = vshrl.u32 %v15657_v20, 16  ;;  %17058 = vmatpush3.bf16.msra.mxu0 %v18455_v1  ;;  %v9111_v9 = vld [vmem:[#allocation3 + $0x38] sm:$0x1] }
 0x5a8   : > { %v8815_v14 = vshll.u32 %v15657_v20, 16  ;;  %v8795_v53 = vshrl.u32 %v15655_v35, 16  ;;  %v8798_v31 = vshll.u32 %v15655_v35, 16  ;;  %v15656_v42 = vpack.c.bf16 %v8517_v38, %v8517_v38  ;;  %17059 = vmatprep.subr.bf16.mxu0 %v18456_v37 }
 0x5a9   : > { %v8820_v2 = vshrl.u32 %v15658_v60, 16  ;;  %v8823_v51 = vshll.u32 %v15658_v60, 16  ;;  %17027 = vmatprep.mubr.bf16.mxu0 %v15336_v36  ;;  %v8814_v12 = vrot.slane %v8812_v11, 7  ;;  %v9203_v30 = vrot.slane %v9202_v10, 4  ;;  %v18459_v11 = vld [vmem:[#allocation4 + $0x28] sm:$0xff]  }
 0x5aa   : > { %v8797_v4 = vrot.slane %v8795_v53, 7  ;;  %v9211_v39 = vrot.slane %v9209_v17, 4  ;;  %v8803_v33 = vshrl.u32 %v15656_v42, 16  ;;  %v8806_v7 = vshll.u32 %v15656_v42, 16 }
 0x5ab   : > { %v8822_v3 = vrot.slane %v8820_v2, 7  ;;  %v9215_v5 = vshll.u32 %v9110_v34, 16  ;;  %v8817_v21 = vor.u32 %v8815_v14, %v8814_v12  ;;  %v8818_v1 = vrot.slane %v8814_v12, 4  ;;  %17060 = vmatpush3.bf16.msra.mxu0 %v18456_v37 }
 0x5ac   : > { %v8800_v59 = vor.u32 %v8798_v31, %v8797_v4  ;;  %v8801_v50 = vrot.slane %v8797_v4, 4  ;;  %v8805_v27 = vrot.slane %v8803_v33, 7  ;;  %v9208_v26 = vsel %vm19706_vm11, %v9203_v30, %v21922_v58  ;;  %17061 = vmatprep.subr.bf16.mxu0 %v18457_v28 }
 0x5ad   : > { %v8825_v16 = vor.u32 %v8823_v51, %v8822_v3  ;;  %v8827_v8 = vrot.slane %v8822_v3, 4  ;;  %v9023_v52 = vsel %vm19798_vm14, %v8817_v21, %v9022_v62  ;;  %v9212_v43 = vor.u32 %v9211_v39, %v21922_v58 }
 0x5ae   : > { %v9016_v0 = vsel %vm19798_vm14, %v8800_v59, %v9015_v19  ;;  %v9217_v23 = vrot.slane %v9215_v5, 5  ;;  %9024 = vst [vmem:[#allocation3 + $0x90] sm:$0xf] %v9023_v52  ;;  %v8808_v20 = vor.u32 %v8806_v7, %v8805_v27  ;;  %v8810_v35 = vrot.slane %v8805_v27, 4  ;;  %v21952_v19 = vld [vmem:[#allocation3 + $0x3c] sm:$0xf] }
 0x5af   : > { %9017 = vst [vmem:[#allocation3 + $0x84] sm:$0xf] %v9016_v0  ;;  %v8826_v6 = vsel %vm19830_vm15, %v8818_v1, %v8825_v16  ;;  %v9027_v37 = vsel %vm19575_vm6, %v8827_v8, %v9026_v40  ;;  %v9213_v38 = vrot.slane %v9212_v43, 4  ;;  %v9220_v41 = vshrl.u32 %v21929_v63, 16  ;;  %17062 = vmatpush3.bf16.msra.mxu0 %v18457_v28  ;;  %v21968_v1 = vld [vmem:[#allocation3 + $0x40] sm:$0xf] }
 0x5b0   : > { %9025 = vst [vmem:[#allocation3 + $0x94] sm:$0xf] %v8826_v6  ;;  %9028 = vst [vmem:[#allocation3 + $0x98] sm:$0x1] %v9027_v37  ;;  %v9223_v60 = vshll.u32 %v21929_v63, 16  ;;  %v9229_v58 = vshll.u32 %v21931_v44, 16  ;;  %v8809_v34 = vsel %vm19830_vm15, %v8801_v50, %v8808_v20  ;;  %v9020_v10 = vsel %vm19575_vm6, %v8810_v35, %v9019_v48  ;;  %17063 = vmatprep.subr.bf16.mxu0 %v18458_v49 }
 0x5b1   : > { %v9233_v17 = vshrl.u32 %v21931_v44, 16  ;;  %v9239_v36 = vshll.u32 %v9111_v9, 16  ;;  %9018 = vst [vmem:[#allocation3 + $0x88] sm:$0xf] %v8809_v34  ;;  %9021 = vst [vmem:[#allocation3 + $0x8c] sm:$0x1] %v9020_v10  ;;  %v9218_v14 = vsel %vm19706_vm11, %v9213_v38, %v9217_v23  ;;  %v8452_v28 = vmul.f32 %v21857_v32, %v21749_v24 }
 0x5b2   : > { %v9222_v53 = vrot.slane %v9220_v41, 4  ;;  %v9225_v62 = vrot.slane %v9223_v60, 5  ;;  %v9231_v31 = vrot.slane %v9229_v58, 5  ;;  %v15337_v2 = vcombine.low %v9208_v26, %v9218_v14  ;;  %v18460_v32 = vld [vmem:[#allocation4 + $0x30] sm:$0xff]   ;;  %v9112_v0 = vld [vmem:[#allocation3 + $0x44] sm:$0x1] }
 0x5b3   : > { %v9235_v51 = vrot.slane %v9233_v17, 4  ;;  %v9241_v42 = vrot.slane %v9239_v36, 5  ;;  %v8450_v4 = vmul.f32 %v21749_v24, %v21859_v29  ;;  %v8453_v40 = vmul.f32 %v21863_v15, %v21749_v24  ;;  %17064 = vmatpush3.bf16.msra.mxu0 %v18458_v49  ;;  %v18461_v43 = vld [vmem:[#allocation4 + $0x38] sm:$0xff]   ;;  %v21975_v20 = vld [vmem:[#allocation3 + $0x48] sm:$0xf] }
 0x5b4   : > { %v9226_v12 = vor.u32 %v9225_v62, %v9222_v53  ;;  %v8451_v30 = vmul.f32 %v21749_v24, %v21872_v54  ;;  %17028 = vmatmul.mubr.bf16.gmra.mrb[36].mxu0 %v15337_v2  ;;  %v8490_v3 = vadd.f32 %v21754_v47, %v8452_v28  ;;  %v9244_v33 = vshrl.u32 %v21952_v19, 16  ;;  %17065 = vmatprep.subr.bf16.mxu0 %v18459_v11  ;;  %v9036_v58 = vld [vmem:[#allocation3 + $0xa8] sm:$0xf]  ;;  %v9029_v14 = vld [vmem:[#allocation3 + $0x9c] sm:$0xf] }
 0x5b5   : > { %v9236_v39 = vor.u32 %v9235_v51, %v9231_v31  ;;  %v9247_v7 = vshll.u32 %v21952_v19, 16  ;;  %v8488_v29 = vadd.f32 %v21754_v47, %v8450_v4  ;;  %v8491_v21 = vadd.f32 %v21754_v47, %v8453_v40  ;;  %v9040_v53 = vld [vmem:[#allocation3 + $0xb0] sm:$0x1]  ;;  %v21985_v51 = vld [vmem:[#allocation4 + $0x80] sm:$0xff]  }
 0x5b6   : > { %v9227_v5 = vrot.slane %v9226_v12, 4  ;;  %v8489_v15 = vadd.f32 %v21754_v47, %v8451_v30  ;;  %v8522_v54 = vmax.f32 %v8490_v3, 0.0  ;;  %v9246_v59 = vrot.slane %v9244_v33, 4 }
 0x5b7   : > { %v9237_v24 = vrot.slane %v9236_v39, 4  ;;  %v9249_v50 = vrot.slane %v9247_v7, 5  ;;  %v8520_v16 = vmax.f32 %v8488_v29, 0.0  ;;  %v8523_v8 = vmax.f32 %v8491_v21, 0.0  ;;  %17066 = vmatpush3.bf16.msra.mxu0 %v18459_v11  ;;  %v9033_v29 = vld [vmem:[#allocation3 + $0xa4] sm:$0x1] }
 0x5b8   : > { %v9232_v49 = vsel %vm19706_vm11, %v9227_v5, %v9231_v31  ;;  %v8521_v27 = vmax.f32 %v8489_v15, 0.0  ;;  %v15661_v52 = vpack.c.bf16 %v8522_v54, %v8522_v54  ;;  %v9253_v47 = vshll.u32 %v21968_v1, 16  ;;  %17067 = vmatprep.subr.bf16.mxu0 %v18460_v32 }
 0x5b9   : > { %v9242_v26 = vsel %vm19706_vm11, %v9237_v24, %v9241_v42  ;;  %v9250_v48 = vor.u32 %v9249_v50, %v9246_v59  ;;  %v15659_v9 = vpack.c.bf16 %v8520_v16, %v8520_v16  ;;  %v15662_v6 = vpack.c.bf16 %v8523_v8, %v8523_v8  ;;  %v21991_v59 = vld [vmem:[#allocation3 + $0x4c] sm:$0xf]  ;;  %v21993_v50 = vld [vmem:[#allocation3 + $0x50] sm:$0x1] }
 0x5ba   : > { %v15338_v23 = vcombine.low %v9232_v49, %v9242_v26  ;;  %v15660_v37 = vpack.c.bf16 %v8521_v27, %v8521_v27  ;;  %v8846_v35 = vshrl.u32 %v15661_v52, 16  ;;  %v8849_v38 = vshll.u32 %v15661_v52, 16 }
 0x5bb   : > { %v21977_v41 = vrot.slane %v9250_v48, 4  ;;  %v21979_v60 = vrot.slane %v9253_v47, 5  ;;  %v8829_v34 = vshrl.u32 %v15659_v9, 16  ;;  %v8832_v10 = vshll.u32 %v15659_v9, 16  ;;  %17068 = vmatpush3.bf16.msra.mxu0 %v18460_v32 }
 0x5bc   : > { %17031 = vmatprep.mubr.bf16.mxu0 %v15338_v23  ;;  %v8854_v17 = vshrl.u32 %v15662_v6, 16  ;;  %v8857_v36 = vshll.u32 %v15662_v6, 16  ;;  %v8848_v11 = vrot.slane %v8846_v35, 7  ;;  %v8837_v62 = vshrl.u32 %v15660_v37, 16  ;;  %17069 = vmatprep.subr.bf16.mxu0 %v18461_v43 }
 0x5bd   : > { %v8840_v31 = vshll.u32 %v15660_v37, 16  ;;  %v9256_v2 = vsel %vm19706_vm11, %v21977_v41, %v21979_v60  ;;  %v8831_v42 = vrot.slane %v8829_v34, 7  ;;  %v9257_v12 = vshrl.u32 %v21968_v1, 16  ;;  %v18605_v37 = vld [vmem:[%s23703_s5] ss:$0 sm:$0xff] }
 0x5be   : > { %v8856_v28 = vrot.slane %v8854_v17, 7  ;;  %v9263_v4 = vshll.u32 %v9112_v0, 16  ;;  %v8851_v40 = vor.u32 %v8849_v38, %v8848_v11  ;;  %v8852_v30 = vrot.slane %v8848_v11, 4  ;;  %v22017_v17 = vld [vmem:[#allocation3 + $0x54] sm:$0xf] }
 0x5bf   : > { %v8839_v39 = vrot.slane %v8837_v62, 7  ;;  %v9268_v3 = vshrl.u32 %v21975_v20, 16  ;;  %v8834_v33 = vor.u32 %v8832_v10, %v8831_v42  ;;  %v8835_v7 = vrot.slane %v8831_v42, 4  ;;  %17070 = vmatpush3.bf16.msra.mxu0 %v18461_v43  ;;  %v18606_v11 = vld [vmem:[%s23704_s6] ss:$0 sm:$0xff] }
 0x5c0   : > { %v8859_v32 = vor.u32 %v8857_v36, %v8856_v28  ;;  %v8861_v5 = vrot.slane %v8856_v28, 4  ;;  %v9037_v21 = vsel %vm19798_vm14, %v8851_v40, %v9036_v58  ;;  %v9259_v54 = vrot.slane %v9257_v12, 4  ;;  %17103 = vmatprep.subr.bf16.mxu0 %v21985_v51 }
 0x5c1   : > { %v8842_v15 = vor.u32 %v8840_v31, %v8839_v39  ;;  %v8844_v24 = vrot.slane %v8839_v39, 4  ;;  %9038 = vst [vmem:[#allocation3 + $0xa8] sm:$0xf] %v9037_v21  ;;  %v9030_v49 = vsel %vm19798_vm14, %v8834_v33, %v9029_v14  ;;  %v9265_v27 = vrot.slane %v9263_v4, 5  ;;  %v22031_v21 = vld [vmem:[#allocation3 + $0x58] sm:$0xf] }
 0x5c2   : > { %v8860_v16 = vsel %vm19830_vm15, %v8852_v30, %v8859_v32  ;;  %v9041_v8 = vsel %vm19575_vm6, %v8861_v5, %v9040_v53  ;;  %9031 = vst [vmem:[#allocation3 + $0x9c] sm:$0xf] %v9030_v49  ;;  %v9260_v0 = vor.u32 %v9259_v54, %v21979_v60  ;;  %v9270_v48 = vrot.slane %v9268_v3, 4 }
 0x5c3   : > { %9039 = vst [vmem:[#allocation3 + $0xac] sm:$0xf] %v8860_v16  ;;  %9042 = vst [vmem:[#allocation3 + $0xb0] sm:$0x1] %v9041_v8  ;;  %v8843_v26 = vsel %vm19830_vm15, %v8835_v7, %v8842_v15  ;;  %v9034_v52 = vsel %vm19575_vm6, %v8844_v24, %v9033_v29  ;;  %v9271_v47 = vshll.u32 %v21975_v20, 16  ;;  %v9277_v43 = vshll.u32 %v21991_v59, 16 }
 0x5c4   : > { %9032 = vst [vmem:[#allocation3 + $0xa0] sm:$0xf] %v8843_v26  ;;  %9035 = vst [vmem:[#allocation3 + $0xa4] sm:$0x1] %v9034_v52  ;;  %v9281_v23 = vshrl.u32 %v21991_v59, 16  ;;  %v9287_v9 = vshll.u32 %v21993_v50, 16  ;;  %v8456_v35 = vmul.f32 %v18605_v37, %v21887_v45  ;;  %v8454_v38 = vmul.f32 %v18605_v37, %v21889_v13 }
 0x5c5   : > { %v9261_v6 = vrot.slane %v9260_v0, 4  ;;  %v8457_v41 = vmul.f32 %v18605_v37, %v21891_v61  ;;  %v9273_v60 = vrot.slane %v9271_v47, 5  ;;  %v9279_v58 = vrot.slane %v9277_v43, 5  ;;  %v9050_v8 = vld [vmem:[#allocation3 + $0xc0] sm:$0xf] }
 0x5c6   : > { %v9283_v34 = vrot.slane %v9281_v23, 4  ;;  %v9289_v10 = vrot.slane %v9287_v9, 5  ;;  %v8494_v14 = vadd.f32 %v18606_v11, %v8456_v35  ;;  %v8492_v53 = vadd.f32 %v18606_v11, %v8454_v38  ;;  %v9043_v26 = vld [vmem:[#allocation3 + $0xb4] sm:$0xf]  ;;  %v9054_v23 = vld [vmem:[#allocation3 + $0xc8] sm:$0x1] }
 0x5c7   : > { %v9266_v36 = vsel %vm19706_vm11, %v9261_v6, %v9265_v27  ;;  %v8495_v45 = vadd.f32 %v18606_v11, %v8457_v41  ;;  %v9274_v13 = vor.u32 %v9273_v60, %v9270_v48  ;;  %v8455_v61 = vmul.f32 %v18605_v37, %v21893_v55  ;;  %v22035_v60 = vld [vmem:[#allocation3 + $0x60] sm:$0xf] }
 0x5c8   : > { %v15339_v62 = vcombine.low %v9256_v2, %v9266_v36  ;;  %v9284_v31 = vor.u32 %v9283_v34, %v9279_v58  ;;  %v8526_v42 = vmax.f32 %v8494_v14, 0.0  ;;  %v8524_v28 = vmax.f32 %v8492_v53, 0.0  ;;  %v22037_v14 = vld [vmem:[#allocation3 + $0x5c] sm:$0x1]  ;;  %v22039_v53 = vld [vmem:[#allocation3 + $0x64] sm:$0xf] }
 0x5c9   : > { %v8527_v12 = vmax.f32 %v8495_v45, 0.0  ;;  %v9292_v4 = vshrl.u32 %v22017_v17, 16  ;;  %v9275_v40 = vrot.slane %v9274_v13, 4  ;;  %v8493_v39 = vadd.f32 %v18606_v11, %v8455_v61  ;;  %v9047_v11 = vld [vmem:[#allocation3 + $0xbc] sm:$0x1] }
 0x5ca   : > { %17032 = vmatmul.mubr.bf16.gmra.mrb[40].mxu0 %v15339_v62  ;;  %v9285_v30 = vrot.slane %v9284_v31, 4  ;;  %v9295_v3 = vshll.u32 %v22017_v17, 16  ;;  %v15665_v33 = vpack.c.bf16 %v8526_v42, %v8526_v42  ;;  %v15663_v7 = vpack.c.bf16 %v8524_v28, %v8524_v28 }
 0x5cb   : > { %v15666_v32 = vpack.c.bf16 %v8527_v12, %v8527_v12  ;;  %v9294_v5 = vrot.slane %v9292_v4, 4  ;;  %v9280_v2 = vsel %vm19706_vm11, %v9275_v40, %v9279_v58  ;;  %v8525_v29 = vmax.f32 %v8493_v39, 0.0  ;;  %v22045_v4 = vld [vmem:[#allocation3 + $0x68] sm:$0x1]  ;;  %v22047_v40 = vld [vmem:[#allocation3 + $0x6c] sm:$0xf] }
 0x5cc   : > { %v9290_v55 = vsel %vm19706_vm11, %v9285_v30, %v9289_v10  ;;  %v9297_v15 = vrot.slane %v9295_v3, 5  ;;  %v8880_v54 = vshrl.u32 %v15665_v33, 16  ;;  %v8883_v49 = vshll.u32 %v15665_v33, 16  ;;  %v22512_v18 = vld [vmem:[#allocation3 + $0xa0] sm:$0xf] }
 0x5cd   : > { %v15340_v24 = vcombine.low %v9280_v2, %v9290_v55  ;;  %v8863_v16 = vshrl.u32 %v15663_v7, 16  ;;  %v8866_v27 = vshll.u32 %v15663_v7, 16  ;;  %v8888_v52 = vshrl.u32 %v15666_v32, 16 }
 0x5ce   : > { %v8891_v0 = vshll.u32 %v15666_v32, 16  ;;  %v15664_v48 = vpack.c.bf16 %v8525_v29, %v8525_v29  ;;  %v8882_v47 = vrot.slane %v8880_v54, 7  ;;  %v9298_v9 = vor.u32 %v9297_v15, %v9294_v5 }
 0x5cf   : > { %17035 = vmatprep.mubr.bf16.mxu0 %v15340_v24  ;;  %v8865_v43 = vrot.slane %v8863_v16, 7  ;;  %v9301_v6 = vshll.u32 %v22031_v21, 16  ;;  %v8890_v37 = vrot.slane %v8888_v52, 7  ;;  %v9305_v41 = vshrl.u32 %v22031_v21, 16  ;;  %v22063_v24 = vld [vmem:[#allocation3 + $0x70] sm:$0xf] }
 0x5d0   : > { %v8871_v35 = vshrl.u32 %v15664_v48, 16  ;;  %v8874_v38 = vshll.u32 %v15664_v48, 16  ;;  %v8885_v58 = vor.u32 %v8883_v49, %v8882_v47  ;;  %v8886_v34 = vrot.slane %v8882_v47, 4 }
 0x5d1   : > { %v8868_v10 = vor.u32 %v8866_v27, %v8865_v43  ;;  %v8869_v36 = vrot.slane %v8865_v43, 4  ;;  %v8893_v45 = vor.u32 %v8891_v0, %v8890_v37  ;;  %v8895_v62 = vrot.slane %v8890_v37, 4  ;;  %v22068_v0 = vld [vmem:[#allocation3 + $0x78] sm:$0xf]  ;;  %v22072_v43 = vld [vmem:[#allocation3 + $0x74] sm:$0x1] }
 0x5d2   : > { %v8873_v13 = vrot.slane %v8871_v35, 7  ;;  %v9299_v31 = vrot.slane %v9298_v9, 4  ;;  %v9051_v61 = vsel %vm19798_vm14, %v8885_v58, %v9050_v8  ;;  %v9303_v28 = vrot.slane %v9301_v6, 5 }
 0x5d3   : > { %v9044_v42 = vsel %vm19798_vm14, %v8868_v10, %v9043_v26  ;;  %v9307_v12 = vrot.slane %v9305_v41, 4  ;;  %9052 = vst [vmem:[#allocation3 + $0xc0] sm:$0xf] %v9051_v61  ;;  %v8894_v30 = vsel %vm19830_vm15, %v8886_v34, %v8893_v45  ;;  %v9055_v39 = vsel %vm19575_vm6, %v8895_v62, %v9054_v23  ;;  %v22076_v41 = vld [vmem:[#allocation3 + $0x7c] sm:$0xf] }
 0x5d4   : > { %9045 = vst [vmem:[#allocation3 + $0xb4] sm:$0xf] %v9044_v42  ;;  %v8876_v3 = vor.u32 %v8874_v38, %v8873_v13  ;;  %v8878_v33 = vrot.slane %v8873_v13, 4  ;;  %9053 = vst [vmem:[#allocation3 + $0xc4] sm:$0xf] %v8894_v30  ;;  %v9304_v46 = vsel %vm19706_vm11, %v9299_v31, %v9303_v28  ;;  %v9311_v32 = vshll.u32 %v22037_v14, 16 }
 0x5d5   : > { %9056 = vst [vmem:[#allocation3 + $0xc8] sm:$0x1] %v9055_v39  ;;  %v9308_v7 = vor.u32 %v9307_v12, %v9303_v28  ;;  %v9316_v5 = vshrl.u32 %v22035_v60, 16  ;;  %v9319_v29 = vshll.u32 %v22035_v60, 16  ;;  %v9325_v15 = vshll.u32 %v22039_v53, 16 }
 0x5d6   : > { %v8877_v2 = vsel %vm19830_vm15, %v8869_v36, %v8876_v3  ;;  %v9048_v55 = vsel %vm19575_vm6, %v8878_v33, %v9047_v11  ;;  %v9313_v49 = vrot.slane %v9311_v32, 5  ;;  %v9329_v8 = vshrl.u32 %v22039_v53, 16  ;;  %v22079_v11 = vld [vmem:[#allocation3 + $0x80] sm:$0x1] }
 0x5d7   : > { %9046 = vst [vmem:[#allocation3 + $0xb8] sm:$0xf] %v8877_v2  ;;  %9049 = vst [vmem:[#allocation3 + $0xbc] sm:$0x1] %v9048_v55  ;;  %v9309_v54 = vrot.slane %v9308_v7, 4  ;;  %v9318_v16 = vrot.slane %v9316_v5, 4 }
 0x5d8   : > { %v9321_v27 = vrot.slane %v9319_v29, 5  ;;  %v9327_v26 = vrot.slane %v9325_v15, 5  ;;  %v9335_v56 = vshll.u32 %v22045_v4, 16  ;;  %v9340_v52 = vshrl.u32 %v22047_v40, 16  ;;  %v22091_v55 = vld [vmem:[#allocation3 + $0x88] sm:$0xf] }
 0x5d9   : > { %v9314_v48 = vsel %vm19706_vm11, %v9309_v54, %v9313_v49  ;;  %v9331_v47 = vrot.slane %v9329_v8, 4  ;;  %v9343_v23 = vshll.u32 %v22047_v40, 16  ;;  %v9349_v9 = vshll.u32 %v22063_v24, 16 }
 0x5da   : > { %v15341_v6 = vcombine.low %v9304_v46, %v9314_v48  ;;  %v9322_v37 = vor.u32 %v9321_v27, %v9318_v16  ;;  %v9337_v35 = vrot.slane %v9335_v56, 5  ;;  %v9342_v38 = vrot.slane %v9340_v52, 4  ;;  %v22087_v46 = vld [vmem:[#allocation3 + $0x84] sm:$0xf]  ;;  %v22095_v16 = vld [vmem:[#allocation3 + $0x90] sm:$0xf] }
 0x5db   : > { %v9332_v58 = vor.u32 %v9331_v47, %v9327_v26  ;;  %v9345_v34 = vrot.slane %v9343_v23, 5  ;;  %v9351_v10 = vrot.slane %v9349_v9, 5  ;;  %v9353_v36 = vshrl.u32 %v22063_v24, 16  ;;  %v22103_v48 = vld [vmem:[#allocation3 + $0x94] sm:$0xf] }
 0x5dc   : > { %17036 = vmatmul.mubr.bf16.gmra.mrb[44].mxu0 %v15341_v6  ;;  %v9323_v45 = vrot.slane %v9322_v37, 4  ;;  %v9359_v62 = vshll.u32 %v22072_v43, 16  ;;  %v9364_v13 = vshrl.u32 %v22068_v0, 16  ;;  %v9367_v31 = vshll.u32 %v22068_v0, 16 }
 0x5dd   : > { %v9333_v61 = vrot.slane %v9332_v58, 4  ;;  %v9346_v42 = vor.u32 %v9345_v34, %v9342_v38  ;;  %v9355_v28 = vrot.slane %v9353_v36, 4  ;;  %v9373_v12 = vshll.u32 %v22076_v41, 16 }
 0x5de   : > { %v9328_v30 = vsel %vm19706_vm11, %v9323_v45, %v9327_v26  ;;  %v9361_v39 = vrot.slane %v9359_v62, 5  ;;  %v9366_v3 = vrot.slane %v9364_v13, 4  ;;  %v9369_v33 = vrot.slane %v9367_v31, 5  ;;  %v22099_v26 = vld [vmem:[#allocation3 + $0x8c] sm:$0x1] }
 0x5df   : > { %v9338_v7 = vsel %vm19706_vm11, %v9333_v61, %v9337_v35  ;;  %v9347_v32 = vrot.slane %v9346_v42, 4  ;;  %v9356_v5 = vor.u32 %v9355_v28, %v9351_v10  ;;  %v9375_v2 = vrot.slane %v9373_v12, 5  ;;  %v22113_v28 = vld [vmem:[#allocation3 + $0x98] sm:$0x1] }
 0x5e0   : > { %v15342_v29 = vcombine.low %v9328_v30, %v9338_v7  ;;  %v9370_v15 = vor.u32 %v9369_v33, %v9366_v3  ;;  %v9377_v54 = vshrl.u32 %v22076_v41, 16  ;;  %v9383_v49 = vshll.u32 %v22079_v11, 16 }
 0x5e1   : > { %v9352_v8 = vsel %vm19706_vm11, %v9347_v32, %v9351_v10  ;;  %v9357_v27 = vrot.slane %v9356_v5, 4  ;;  %v9388_v56 = vshrl.u32 %v22087_v46, 16  ;;  %v9391_v52 = vshll.u32 %v22087_v46, 16  ;;  %v22118_v5 = vld [vmem:[#allocation3 + $0x9c] sm:$0xf] }
 0x5e2   : > { %17039 = vmatprep.mubr.bf16.mxu0 %v15342_v29  ;;  %v9371_v47 = vrot.slane %v9370_v15, 4  ;;  %v9379_v23 = vrot.slane %v9377_v54, 4  ;;  %v9385_v9 = vrot.slane %v9383_v49, 5  ;;  %v9397_v6 = vshll.u32 %v22091_v55, 16  ;;  %v22122_v49 = vld [vmem:[#allocation3 + $0xa0] sm:$0xf] }
 0x5e3   : > { %v9362_v37 = vsel %vm19706_vm11, %v9357_v27, %v9361_v39  ;;  %v9390_v35 = vrot.slane %v9388_v56, 4  ;;  %v9393_v38 = vrot.slane %v9391_v52, 5  ;;  %v9401_v58 = vshrl.u32 %v22091_v55, 16 }
 0x5e4   : > { %v15343_v34 = vcombine.low %v9352_v8, %v9362_v37  ;;  %v9376_v10 = vsel %vm19706_vm11, %v9371_v47, %v9375_v2  ;;  %v9380_v36 = vor.u32 %v9379_v23, %v9375_v2  ;;  %v9399_v45 = vrot.slane %v9397_v6, 5  ;;  %v22127_v6 = vld [vmem:[#allocation3 + $0xa4] sm:$0x1] }
 0x5e5   : > { %v9394_v62 = vor.u32 %v9393_v38, %v9390_v35  ;;  %v9403_v13 = vrot.slane %v9401_v58, 4  ;;  %v9407_v31 = vshll.u32 %v22099_v26, 16  ;;  %v9412_v61 = vshrl.u32 %v22095_v16, 16 }
 0x5e6   : > { %17040 = vmatmul.mubr.bf16.gmra.mrb[48].mxu0 %v15343_v34  ;;  %v9381_v42 = vrot.slane %v9380_v36, 4  ;;  %v9415_v12 = vshll.u32 %v22095_v16, 16  ;;  %v9421_v30 = vshll.u32 %v22103_v48, 16  ;;  %v9425_v39 = vshrl.u32 %v22103_v48, 16 }
 0x5e7   : > { %v9395_v3 = vrot.slane %v9394_v62, 4  ;;  %v9404_v33 = vor.u32 %v9403_v13, %v9399_v45  ;;  %v9409_v7 = vrot.slane %v9407_v31, 5  ;;  %v9414_v32 = vrot.slane %v9412_v61, 4 }
 0x5e8   : > { %v9386_v2 = vsel %vm19706_vm11, %v9381_v42, %v9385_v9  ;;  %v9417_v29 = vrot.slane %v9415_v12, 5  ;;  %v9423_v15 = vrot.slane %v9421_v30, 5  ;;  %v9427_v54 = vrot.slane %v9425_v39, 4  ;;  %v22138_v30 = vld [vmem:[#allocation3 + $0xac] sm:$0xf] }
 0x5e9   : > { %v15344_v8 = vcombine.low %v9376_v10, %v9386_v2  ;;  %v9400_v27 = vsel %vm19706_vm11, %v9395_v3, %v9399_v45  ;;  %v9405_v56 = vrot.slane %v9404_v33, 4  ;;  %v9431_v52 = vshll.u32 %v22113_v28, 16  ;;  %v22135_v10 = vld [vmem:[#allocation3 + $0xa8] sm:$0xf]  ;;  %v22144_v33 = vld [vmem:[#allocation3 + $0xb0] sm:$0x1] }
 0x5ea   : > { %v9418_v47 = vor.u32 %v9417_v29, %v9414_v32  ;;  %v9428_v23 = vor.u32 %v9427_v54, %v9423_v15  ;;  %v9436_v37 = vshrl.u32 %v22118_v5, 16  ;;  %v9439_v9 = vshll.u32 %v22118_v5, 16  ;;  %v22148_v2 = vld [vmem:[#allocation3 + $0xb4] sm:$0xf] }
 0x5eb   : > { %17043 = vmatprep.mubr.bf16.mxu0 %v15344_v8  ;;  %v9410_v35 = vsel %vm19706_vm11, %v9405_v56, %v9409_v7  ;;  %v9433_v38 = vrot.slane %v9431_v52, 5  ;;  %v9445_v58 = vshll.u32 %v22122_v49, 16  ;;  %v9449_v34 = vshrl.u32 %v22122_v49, 16 }
 0x5ec   : > { %v15345_v36 = vcombine.low %v9400_v27, %v9410_v35  ;;  %v9419_v45 = vrot.slane %v9418_v47, 4  ;;  %v9429_v62 = vrot.slane %v9428_v23, 4  ;;  %v9438_v13 = vrot.slane %v9436_v37, 4 }
 0x5ed   : > { %v9441_v31 = vrot.slane %v9439_v9, 5  ;;  %v9447_v61 = vrot.slane %v9445_v58, 5  ;;  %v9451_v42 = vrot.slane %v9449_v34, 4  ;;  %v9455_v12 = vshll.u32 %v22127_v6, 16 }
 0x5ee   : > { %17044 = vmatmul.mubr.bf16.gmra.mrb[52].mxu0 %v15345_v36  ;;  %v9424_v39 = vsel %vm19706_vm11, %v9419_v45, %v9423_v15  ;;  %v9434_v3 = vsel %vm19706_vm11, %v9429_v62, %v9433_v38  ;;  %v9460_v7 = vshrl.u32 %v22135_v10, 16  ;;  %v9463_v32 = vshll.u32 %v22135_v10, 16  ;;  %v22154_v36 = vld [vmem:[#allocation3 + $0xb8] sm:$0xf] }
 0x5ef   : > { %v15346_v29 = vcombine.low %v9424_v39, %v9434_v3  ;;  %v9442_v54 = vor.u32 %v9441_v31, %v9438_v13  ;;  %v9452_v8 = vor.u32 %v9451_v42, %v9447_v61  ;;  %v9457_v27 = vrot.slane %v9455_v12, 5  ;;  %v22161_v31 = vld [vmem:[#allocation3 + $0xbc] sm:$0x1] }
 0x5f0   : > { %v9462_v56 = vrot.slane %v9460_v7, 4  ;;  %v9465_v52 = vrot.slane %v9463_v32, 5  ;;  %v9469_v47 = vshll.u32 %v22138_v30, 16  ;;  %v9473_v15 = vshrl.u32 %v22138_v30, 16 }
 0x5f1   : > { %17047 = vmatprep.mubr.bf16.mxu0 %v15346_v29  ;;  %v9443_v23 = vrot.slane %v9442_v54, 4  ;;  %v9453_v37 = vrot.slane %v9452_v8, 4  ;;  %v9479_v9 = vshll.u32 %v22144_v33, 16  ;;  %v9484_v35 = vshrl.u32 %v22148_v2, 16 }
 0x5f2   : > { %v9466_v38 = vor.u32 %v9465_v52, %v9462_v56  ;;  %v9471_v58 = vrot.slane %v9469_v47, 5  ;;  %v9475_v34 = vrot.slane %v9473_v15, 4  ;;  %v9487_v45 = vshll.u32 %v22148_v2, 16 }
 0x5f3   : > { %v9448_v62 = vsel %vm19706_vm11, %v9443_v23, %v9447_v61  ;;  %v9458_v13 = vsel %vm19706_vm11, %v9453_v37, %v9457_v27  ;;  %v9486_v42 = vrot.slane %v9484_v35, 4  ;;  %v9493_v32 = vshll.u32 %v22154_v36, 16 }
 0x5f4   : > { %v15347_v12 = vcombine.low %v9448_v62, %v9458_v13  ;;  %v9467_v39 = vrot.slane %v9466_v38, 4  ;;  %v9476_v3 = vor.u32 %v9475_v34, %v9471_v58  ;;  %v9489_v7 = vrot.slane %v9487_v45, 5 }
 0x5f5   : > { %v9497_v29 = vshrl.u32 %v22154_v36, 16  ;;  %v9481_v8 = vrot.slane %v9479_v9, 5  ;;  %v9503_v61 = vshll.u32 %v22161_v31, 16  ;;  %v9495_v52 = vrot.slane %v9493_v32, 5 }
 0x5f6   : > { %17048 = vmatmul.mubr.bf16.gmra.mrb[56].mxu0 %v15347_v12  ;;  %v9477_v54 = vrot.slane %v9476_v3, 4  ;;  %v9490_v56 = vor.u32 %v9489_v7, %v9486_v42  ;;  %v9472_v27 = vsel %vm19706_vm11, %v9467_v39, %v9471_v58  ;;  %v15365_v34 = vcombine.low %v22017_v17, %v22031_v21  ;;  %v18469_v3 = vld [vmem:[#allocation4 + $0x90] sm:$0xff]   ;;  %v10112_v12 = vld [vmem:[#allocation3 + $0x78] sm:$0xe]  ;;  %v10115_v58 = vld [vmem:[#allocation3 + $0x9c] sm:$0xe] }
 0x5f7   : > { %v9499_v47 = vrot.slane %v9497_v29, 4  ;;  %v9505_v38 = vrot.slane %v9503_v61, 5  ;;  %v15366_v9 = vcombine.low %v22035_v60, %v22039_v53  ;;  %v22192_v29 = vld [vmem:[#allocation3 + $0x4] sm:$0xf]  ;;  %v18609_v61 = vld [vmem:[#allocation3 + $0xc] sm:$0xf]  ;;  %v24098_v17 = vcombine.low %v22087_v46, %v22091_v55 }
 0x5f8   : > { %v9482_v15 = vsel %vm19706_vm11, %v9477_v54, %v9481_v8  ;;  %v9491_v37 = vrot.slane %v9490_v56, 4  ;;  %v18608_v54 = vld [vmem:[#allocation3] sm:$0xf]  ;;  %v10211_v42 = vrot.slane %v22045_v4, 5  ;;  %v15392_v4 = vrot.slane %v10112_v12, 9 }
 0x5f9   : > { %v15348_v23 = vcombine.low %v9472_v27, %v9482_v15  ;;  %v9500_v35 = vor.u32 %v9499_v47, %v9495_v52  ;;  %v15358_v8 = vcombine.low %v18608_v54, %v22192_v29  ;;  %v22195_v47 = vld [vmem:[#allocation3 + $0x10] sm:$0xf]  ;;  %v18466_v15 = vld [vmem:[#allocation4 + $0x88] sm:$0xff]   ;;  %v10111_v54 = vld [vmem:[#allocation3 + $0x6c] sm:$0xe]  ;;  %v10152_v60 = vrot.slane %v22192_v29, 5 }
 0x5fa   : > { %v9496_v7 = vsel %vm19706_vm11, %v9491_v37, %v9495_v52  ;;  %v15359_v27 = vcombine.low %v18609_v61, %v22195_v47  ;;  %v22198_v52 = vld [vmem:[#allocation3 + $0x1c] sm:$0xf] }
 0x5fb   : > { %17051 = vmatprep.mubr.bf16.mxu0 %v15348_v23  ;;  %v9501_v62 = vrot.slane %v9500_v35, 4  ;;  %v10109_v23 = vld [vmem:[#allocation3 + $0x54] sm:$0xe]  ;;  %v18611_v35 = vld [vmem:[#allocation3 + $0x18] sm:$0xf] }
 0x5fc   : > { %v15360_v37 = vcombine.low %v18611_v35, %v22198_v52  ;;  %v10204_v35 = vrot.slane %v22037_v14, 5  ;;  %v15391_v14 = vrot.slane %v10111_v54, 9 }
 0x5fd   : > { %v9506_v32 = vsel %vm19706_vm11, %v9501_v62, %v9505_v38  ;;  %v10110_v38 = vld [vmem:[#allocation3 + $0x60] sm:$0xe]  ;;  %v10201_v62 = vrot.slane %v22031_v21, 5  ;;  %v24099_v21 = vcombine.low %v22095_v16, %v22103_v48  ;;  %v10166_v16 = vrot.slane %v22198_v52, 5 }
 0x5fe   : > { %v15349_v56 = vcombine.low %v9496_v7, %v9506_v32  ;;  %v15389_v7 = vrot.slane %v10109_v23, 9  ;;  %v10208_v32 = vrot.slane %v22039_v53, 5  ;;  %v10102_v53 = vld [vmem:[#allocation3] sm:$0xe] }
 0x5ff   : > { %v10203_v39 = vrot.slane %v10201_v62, 4 }
 0x600   : > { %17052 = vmatmul.mubr.bf16.gmra.mrb[60].mxu0 %v15349_v56  ;;  %v22204_v56 = vld [vmem:[#allocation3 + $0x28] sm:$0xf]  ;;  %v22212_v23 = vsel %vm20380_vm2, %v15389_v7, %v10201_v62  ;;  %v10222_v62 = vrot.slane %v22076_v41, 5  ;;  %v18472_v7 = vld [vmem:[#allocation4 + $0x98] sm:$0xff]  }
 0x601   : > { %17071 = vmatprep.mubr.bf16.mxu0 %v15358_v8  ;;  %v18613_v8 = vld [vmem:[#allocation3 + $0x24] sm:$0xf]  ;;  %v22217_v13 = vsel %vm20380_vm2, %v10203_v39, %v10204_v35  ;;  %v10218_v35 = vrot.slane %v22072_v43, 5  ;;  %v10236_v43 = vrot.slane %v22103_v48, 5  ;;  %v10173_v52 = vrot.slane %v22204_v56, 5 }
 0x602   : > { %v15361_v61 = vcombine.low %v18613_v8, %v22204_v56  ;;  %v10113_v39 = vld [vmem:[#allocation3 + $0x84] sm:$0xe]  ;;  %v10224_v12 = vrot.slane %v10222_v62, 4  ;;  %v18619_v56 = vld [vmem:[#allocation3 + $0x2c] sm:$0x1] }
 0x608   : > { %17072 = vmatmul.mubr.bf16.vlgmr.msra.gmra.mrb[32].mxu0 %v15359_v27  ;;  %v15390_v27 = vrot.slane %v10110_v38, 9  ;;  %v10215_v38 = vrot.slane %v22063_v24, 5 }
 0x609   : > { %17104 = vmatpush3.bf16.msra.mxu0 %v21985_v51  ;;  %17075 = vmatprep.mubr.bf16.mxu0 %v15360_v37  ;;  %v15362_v51 = vcombine.low %v21929_v63, %v21931_v44  ;;  %v10210_v37 = vrot.slane %v10208_v32, 4  ;;  %v10229_v63 = vrot.slane %v22091_v55, 5  ;;  %v10159_v55 = vrot.slane %v22195_v47, 5 }
 0x60a   : > { %17105 = vmatprep.subr.bf16.mxu0 %v18466_v15  ;;  %v22221_v8 = vsel %vm20380_vm2, %v15390_v27, %v10208_v32  ;;  %v22235_v54 = vsel %vm20380_vm2, %v15391_v14, %v10215_v38  ;;  %v10114_v27 = vld [vmem:[#allocation3 + $0x90] sm:$0xe]  ;;  %v15393_v14 = vrot.slane %v10113_v39, 9  ;;  %v18475_v39 = vld [vmem:[#allocation4 + $0xa0] sm:$0xff]  }
 0x60b   : > { %v22228_v44 = vsel %vm20380_vm2, %v10210_v37, %v10211_v42  ;;  %v22240_v42 = vsel %vm20380_vm2, %v15392_v4, %v10222_v62  ;;  %v10225_v37 = vrot.slane %v22079_v11, 5  ;;  %v10231_v62 = vrot.slane %v10229_v63, 4 }
 0x60c   : > { %v22263_v4 = vsel %vm20380_vm2, %v15393_v14, %v10229_v63  ;;  %v10250_v63 = vrot.slane %v22138_v30, 5  ;;  %v10117_v14 = vld [vmem:[#allocation3 + $0xb4] sm:$0xe]  ;;  %v10161_v29 = vrot.slane %v10159_v55, 4 }
 0x60d   : > { %17106 = vmatpush3.bf16.msra.mxu0 %v18466_v15  ;;  %v10217_v15 = vrot.slane %v10215_v38, 4  ;;  %v10232_v38 = vrot.slane %v22099_v26, 5  ;;  %v22254_v11 = vsel %vm20380_vm2, %v10224_v12, %v10225_v37  ;;  %v15395_v37 = vrot.slane %v10115_v58, 9  ;;  %v18478_v12 = vld [vmem:[#allocation4 + $0xa8] sm:$0xff]  }
 0x60e   : > { %17107 = vmatprep.subr.bf16.mxu0 %v18469_v3  ;;  %v15364_v26 = vcombine.low %v21975_v20, %v21991_v59  ;;  %v10252_v45 = vrot.slane %v10250_v63, 4  ;;  %v10257_v58 = vrot.slane %v22154_v36, 5  ;;  %v15397_v20 = vrot.slane %v10117_v14, 9 }
 0x60f   : > { %v22246_v32 = vsel %vm20380_vm2, %v10217_v15, %v10218_v35  ;;  %v15363_v15 = vcombine.low %v21952_v19, %v21968_v1  ;;  %v10116_v35 = vld [vmem:[#allocation3 + $0xa8] sm:$0xe]  ;;  %v10243_v1 = vrot.slane %v22122_v49, 5 }
 0x610   : > { %17076 = vmatmul.mubr.bf16.gmra.mrb[36].mxu0 %v15361_v61  ;;  %v15394_v61 = vrot.slane %v10114_v27, 9  ;;  %v22267_v27 = vsel %vm20380_vm2, %v10231_v62, %v10232_v38  ;;  %v10259_v38 = vrot.slane %v10257_v58, 4 }
 0x611   : > { %17079 = vmatprep.mubr.bf16.mxu0 %v15362_v51  ;;  %17108 = vmatpush3.bf16.msra.mxu0 %v18469_v3  ;;  %v10238_v51 = vrot.slane %v10236_v43, 4  ;;  %v10239_v3 = vrot.slane %v22113_v28, 5  ;;  %v10245_v62 = vrot.slane %v10243_v1, 4 }
 0x612   : > { %17109 = vmatprep.subr.bf16.mxu0 %v18472_v7  ;;  %v22271_v19 = vsel %vm20380_vm2, %v15394_v61, %v10236_v43  ;;  %v10246_v43 = vrot.slane %v22127_v6, 5  ;;  %v15396_v61 = vrot.slane %v10116_v35, 9  ;;  %v11735_v35 = vld [vmem:[#allocation3 + $0x90] sm:$0xe] }
 0x613   : > { %v22278_v28 = vsel %vm20380_vm2, %v10238_v51, %v10239_v3  ;;  %v10253_v51 = vrot.slane %v22144_v33, 5 }
 0x614   : > { %v22294_v3 = vsel %vm20380_vm2, %v10245_v62, %v10246_v43  ;;  %v22298_v6 = vsel %vm20380_vm2, %v15396_v61, %v10250_v63  ;;  %v18481_v63 = vld [vmem:[#allocation4 + $0xb0] sm:$0xff]   ;;  %v10168_v62 = vrot.slane %v10166_v16, 4  ;;  %v10104_v43 = vld [vmem:[#allocation3 + $0x18] sm:$0xe]  ;;  %v18617_v61 = vld [vmem:[#allocation3 + $0x20] sm:$0x1] }
 0x615   : > { %17110 = vmatpush3.bf16.msra.mxu0 %v18472_v7  ;;  %v22290_v7 = vsel %vm20380_vm2, %v15395_v37, %v10243_v1  ;;  %v22304_v33 = vsel %vm20380_vm2, %v10252_v45, %v10253_v51  ;;  %v10260_v1 = vrot.slane %v22161_v31, 5  ;;  %v18484_v31 = vld [vmem:[#allocation4 + $0xb8] sm:$0xff]   ;;  %v10169_v51 = vrot.slane %v18617_v61, 5 }
 0x616   : > { %17111 = vmatprep.subr.bf16.mxu0 %v18475_v39 }
 0x617   : > { %v22315_v14 = vsel %vm20380_vm2, %v10259_v38, %v10260_v1  ;;  %v18615_v38 = vld [vmem:[#allocation3 + $0x8] sm:$0x1]  ;;  %v10170_v1 = vsel %vm20380_vm2, %v10168_v62, %v10169_v51  ;;  %v18489_v62 = vld [vmem:[#allocation4 + $0xd8] sm:$0xff]   ;;  %v18622_v51 = vld [vmem:[#allocation3 + $0x44] sm:$0x1] }
 0x618   : > { %17080 = vmatmul.mubr.bf16.gmra.mrb[40].mxu0 %v15363_v15  ;;  %v22311_v15 = vsel %vm20380_vm2, %v15397_v20, %v10257_v58  ;;  %v15384_v20 = vrot.slane %v10104_v43, 9  ;;  %v10107_v43 = vld [vmem:[#allocation3 + $0x3c] sm:$0xe] }
 0x619   : > { %17083 = vmatprep.mubr.bf16.mxu0 %v15364_v26  ;;  %17112 = vmatpush3.bf16.msra.mxu0 %v18475_v39  ;;  %v18486_v39 = vld [vmem:[#allocation4 + $0xc0] sm:$0xff]   ;;  %v24096_v26 = vcombine.low %v22047_v40, %v22063_v24  ;;  %v10155_v40 = vrot.slane %v18615_v38, 5  ;;  %v24100_v24 = vcombine.low %v22118_v5, %v22122_v49  ;;  %v24102_v5 = vcombine.low %v22148_v2, %v22154_v36  ;;  %v10103_v49 = vld [vmem:[#allocation3 + $0xc] sm:$0xe]  ;;  %v18618_v2 = vld [vmem:[#allocation3 + $0x34] sm:$0xf] }
 0x61a   : > { %17113 = vmatprep.subr.bf16.mxu0 %v18478_v12  ;;  %v15383_v58 = vrot.slane %v10103_v49, 9  ;;  %v10180_v36 = vrot.slane %v18618_v2, 5  ;;  %v18620_v38 = vld [vmem:[#allocation3 + $0x38] sm:$0x1] }
 0x61d   : > { %17114 = vmatpush3.bf16.msra.mxu0 %v18478_v12  ;;  %v24097_v12 = vcombine.low %v22068_v0, %v22076_v41  ;;  %v24101_v0 = vcombine.low %v22135_v10, %v22138_v30  ;;  %v18616_v10 = vld [vmem:[#allocation3 + $0x14] sm:$0x1] }
 0x61e   : > { %17115 = vmatprep.subr.bf16.mxu0 %v18481_v63  ;;  %v10162_v30 = vrot.slane %v18616_v10, 5 }
 0x620   : > { %17084 = vmatmul.mubr.bf16.gmra.mrb[44].mxu0 %v15365_v34  ;;  %v15382_v34 = vrot.slane %v10102_v53, 9  ;;  %v10163_v47 = vsel %vm20380_vm2, %v10161_v29, %v10162_v30  ;;  %v10182_v53 = vrot.slane %v10180_v36, 4 }
 0x621   : > { %17087 = vmatprep.mubr.bf16.mxu0 %v15366_v9  ;;  %17116 = vmatpush3.bf16.msra.mxu0 %v18481_v63  ;;  %v10154_v9 = vrot.slane %v10152_v60, 4  ;;  %v10160_v63 = vsel %vm20380_vm2, %v15383_v58, %v10159_v55  ;;  %v10190_v58 = vrot.slane %v18622_v51, 5 }
 0x622   : > { %17117 = vmatprep.subr.bf16.mxu0 %v18484_v31  ;;  %v10153_v41 = vsel %vm20380_vm2, %v15382_v34, %v10152_v60  ;;  %v10105_v60 = vld [vmem:[#allocation3 + $0x24] sm:$0xe]  ;;  %v10176_v34 = vrot.slane %v18619_v56, 5  ;;  %v22382_v56 = vld [vmem:[#allocation3 + $0x2c] sm:$0x1] }
 0x623   : > { %v10156_v46 = vsel %vm20380_vm2, %v10154_v9, %v10155_v40  ;;  %v10106_v9 = vld [vmem:[#allocation3 + $0x30] sm:$0xe]  ;;  %v10183_v40 = vrot.slane %v18620_v38, 5  ;;  %v22386_v38 = vld [vmem:[#allocation3 + $0x38] sm:$0x1] }
 0x624   : > { %v15398_v48 = vcombine.low %v10153_v41, %v10156_v46  ;;  %v18621_v46 = vld [vmem:[#allocation3 + $0x40] sm:$0xf] }
 0x625   : > { %17118 = vmatpush3.bf16.msra.mxu0 %v18484_v31  ;;  %v15399_v31 = vcombine.low %v10160_v63, %v10163_v47  ;;  %v10187_v55 = vrot.slane %v18621_v46, 5  ;;  %v10197_v47 = vrot.slane %v21993_v50, 5  ;;  %v18491_v50 = vld [vmem:[#allocation4 + $0xe8] sm:$0xff]  }
 0x626   : > { %17151 = vmatprep.subr.bf16.mxu0 %v18486_v39 }
 0x627   : > { %v10189_v30 = vrot.slane %v10187_v55, 4 }
 0x628   : > { %17088 = vmatmul.mubr.bf16.gmra.mrb[48].mxu0 %v24096_v26  ;;  %v10167_v26 = vsel %vm20380_vm2, %v15384_v20, %v10166_v16  ;;  %v15386_v16 = vrot.slane %v10106_v9, 9  ;;  %v15387_v20 = vrot.slane %v10107_v43, 9  ;;  %v22384_v9 = vld [vmem:[#allocation3 + $0x34] sm:$0xf]  ;;  %v11814_v43 = vrot.slane %v22386_v38, 5 }
 0x629   : > { %17091 = vmatprep.mubr.bf16.mxu0 %v24097_v12  ;;  %v18487_v12 = vld [vmem:[#allocation4 + $0xc8] sm:$0xff]  }
 0x62a   : > { %v10181_v49 = vsel %vm20380_vm2, %v15386_v16, %v10180_v36  ;;  %v10188_v63 = vsel %vm20380_vm2, %v15387_v20, %v10187_v55  ;;  %v11728_v55 = vld [vmem:[#allocation3 + $0x3c] sm:$0xe]  ;;  %v11729_v16 = vld [vmem:[#allocation3 + $0x48] sm:$0xe] }
 0x630   : > { %17092 = vmatmul.mubr.bf16.gmra.mrb[52].mxu0 %v24098_v17  ;;  %v15400_v17 = vcombine.low %v10167_v26, %v10170_v1  ;;  %v10191_v1 = vsel %vm20380_vm2, %v10189_v30, %v10190_v58  ;;  %v22419_v58 = vld [vmem:[#allocation3 + $0x64] sm:$0xf] }
 0x631   : > { %17095 = vmatprep.mubr.bf16.mxu0 %v24099_v21  ;;  %v10175_v21 = vrot.slane %v10173_v52, 4 }
 0x633   : > { %v10177_v41 = vsel %vm20380_vm2, %v10175_v21, %v10176_v34  ;;  %v22380_v21 = vld [vmem:[#allocation3 + $0x28] sm:$0xf]  ;;  %v11727_v34 = vld [vmem:[#allocation3 + $0x30] sm:$0xe] }
 0x638   : > { %17096 = vmatmul.mubr.bf16.gmra.mrb[56].mxu0 %v24100_v24  ;;  %v18488_v24 = vld [vmem:[#allocation4 + $0xd0] sm:$0xff]  }
 0x639   : > { %17099 = vmatprep.mubr.bf16.mxu0 %v24101_v0  ;;  %v15385_v0 = vrot.slane %v10105_v60, 9  ;;  %v11726_v60 = vld [vmem:[#allocation3 + $0x24] sm:$0xe] }
 0x63a   : > { %v15472_v46 = vrot.slane %v11726_v60, 9 }
 0x63b   : > { %v10174_v29 = vsel %vm20380_vm2, %v15385_v0, %v10173_v52  ;;  %v18490_v52 = vld [vmem:[#allocation4 + $0xe0] sm:$0xff]  }
 0x63c   : > { %v22392_v0 = vld [vmem:[#allocation4 + $0x100] sm:$0xff]  }
 0x640   : > { %17100 = vmatmul.mubr.bf16.gmra.mrb[60].mxu0 %v24102_v5  ;;  %v15401_v5 = vcombine.low %v10174_v29, %v10177_v41  ;;  %v22394_v41 = vld [vmem:[#allocation3 + $0x40] sm:$0xf]  ;;  %v22401_v29 = vld [vmem:[#allocation3 + $0x4c] sm:$0xf] }
 0x641   : > { %17119 = vmatprep.mubr.bf16.mxu0 %v15398_v48  ;;  %v10184_v48 = vsel %vm20380_vm2, %v10182_v53, %v10183_v40  ;;  %v18493_v53 = vld [vmem:[#allocation4 + $0xf8] sm:$0xff]   ;;  %v11804_v40 = vrot.slane %v22380_v21, 5  ;;  %v11818_v51 = vrot.slane %v22394_v41, 5  ;;  %v11825_v20 = vrot.slane %v22401_v29, 5 }
 0x642   : > { %v15402_v10 = vcombine.low %v10181_v49, %v10184_v48  ;;  %v24104_v48 = vcombine.low %v22221_v8, %v22228_v44  ;;  %v11730_v8 = vld [vmem:[#allocation3 + $0x54] sm:$0xe]  ;;  %v22411_v44 = vld [vmem:[#allocation3 + $0x58] sm:$0xf] }
 0x643   : > { %v22408_v49 = vsel %vm20380_vm2, %v15472_v46, %v11804_v40  ;;  %v11832_v60 = vrot.slane %v22411_v44, 5 }
 0x644   : > { %24105 = vst [vmem:[#allocation15_spill] sm:$0xff] %v22408_v49  ;;  %v12631_v49 = vld [vmem:[#allocation3 + $0x70] sm:$0xf] }
 0x648   : > { %17120 = vmatmul.mubr.bf16.vlgmr.msra.gmra.mrb[32].mxu0 %v15399_v31  ;;  %v15403_v31 = vcombine.low %v10188_v63, %v10191_v1  ;;  %v22425_v1 = vld [vmem:[#allocation3 + $0x5c] sm:$0x1] }
 0x649   : > { %17152 = vmatpush3.bf16.msra.mxu0 %v18486_v39  ;;  %17123 = vmatprep.mubr.bf16.mxu0 %v15400_v17  ;;  %v10194_v39 = vrot.slane %v21991_v59, 5  ;;  %v10108_v59 = vld [vmem:[#allocation3 + $0x48] sm:$0xe] }
 0x64a   : > { %17153 = vmatprep.subr.bf16.mxu0 %v18487_v12  ;;  %v15388_v2 = vrot.slane %v10108_v59, 9  ;;  %v18492_v17 = vld [vmem:[#allocation4 + $0xf0] sm:$0xff]  }
 0x64b   : > { %v10196_v61 = vrot.slane %v10194_v39, 4 }
 0x64c   : > { %v10195_v26 = vsel %vm20380_vm2, %v15388_v2, %v10194_v39  ;;  %v22399_v39 = vld [vmem:[#allocation3 + $0x44] sm:$0x1]  ;;  %v22427_v2 = vld [vmem:[#allocation3 + $0x68] sm:$0x1] }
 0x64d   : > { %17154 = vmatpush3.bf16.msra.mxu0 %v18487_v12  ;;  %v10198_v36 = vsel %vm20380_vm2, %v10196_v61, %v10197_v47  ;;  %v15474_v61 = vrot.slane %v11728_v55, 9  ;;  %v15476_v55 = vrot.slane %v11730_v8, 9  ;;  %v24114_v8 = vcombine.low %v22240_v42, %v22254_v11 }
 0x64e   : > { %17155 = vmatprep.subr.bf16.mxu0 %v18488_v24  ;;  %v15404_v12 = vcombine.low %v10195_v26, %v10198_v36  ;;  %v15475_v26 = vrot.slane %v11729_v16, 9  ;;  %v11732_v16 = vld [vmem:[#allocation3 + $0x6c] sm:$0xe]  ;;  %v11842_v42 = vrot.slane %v22427_v2, 5 }
 0x64f   : > { %v22435_v63 = vsel %vm20380_vm2, %v15474_v61, %v11818_v51  ;;  %v11835_v61 = vrot.slane %v22425_v1, 5  ;;  %v15478_v11 = vrot.slane %v11732_v16, 9 }
 0x650   : > { %17124 = vmatmul.mubr.bf16.gmra.mrb[36].mxu0 %v15401_v5  ;;  %v11806_v5 = vrot.slane %v11804_v40, 4  ;;  %24108 = vst [vmem:[#allocation18_spill] sm:$0xff] %v22435_v63  ;;  %v22454_v46 = vsel %vm20380_vm2, %v15475_v26, %v11825_v20 }
 0x651   : > { %17127 = vmatprep.mubr.bf16.mxu0 %v15402_v10  ;;  %17156 = vmatpush3.bf16.msra.mxu0 %v18488_v24  ;;  %v24103_v24 = vcombine.low %v22212_v23, %v22217_v13  ;;  %v11807_v13 = vrot.slane %v22382_v56, 5  ;;  %v22404_v23 = vld [vmem:[#allocation3 + $0x50] sm:$0x1]  ;;  %v11811_v10 = vrot.slane %v22384_v9, 5  ;;  %24111 = vst [vmem:[#allocation23_spill] sm:$0xff] %v22454_v46 }
 0x652   : > { %17157 = vmatprep.subr.bf16.mxu0 %v18489_v62 }
 0x653   : > { %v22415_v30 = vsel %vm20380_vm2, %v11806_v5, %v11807_v13  ;;  %v11813_v47 = vrot.slane %v11811_v10, 4  ;;  %v22459_v5 = vld [vmem:[#allocation3 + $0x74] sm:$0x1]  ;;  %v22461_v13 = vld [vmem:[#allocation3 + $0x7c] sm:$0xf] }
 0x654   : > { %24106 = vst [vmem:[#allocation16_spill] sm:$0xff] %v22415_v30  ;;  %v13369_v30 = vld [vmem:[#allocation3 + $0x60] sm:$0xe] }
 0x655   : > { %17158 = vmatpush3.bf16.msra.mxu0 %v18489_v62  ;;  %v15473_v62 = vrot.slane %v11727_v34, 9  ;;  %v22444_v34 = vld [vmem:[#allocation3 + $0x70] sm:$0xf] }
 0x656   : > { %17159 = vmatprep.subr.bf16.mxu0 %v18490_v52 }
 0x657   : > { %v22431_v36 = vsel %vm20380_vm2, %v15473_v62, %v11811_v10 }
 0x658   : > { %17128 = vmatmul.mubr.bf16.gmra.mrb[40].mxu0 %v15403_v31  ;;  %24107 = vst [vmem:[#allocation17_spill] sm:$0xff] %v22431_v36  ;;  %v11820_v31 = vrot.slane %v11818_v51, 4  ;;  %v22479_v51 = vsel %vm20380_vm2, %v15476_v55, %v11832_v60  ;;  %v11849_v55 = vrot.slane %v22459_v5, 5 }
 0x659   : > { %17131 = vmatprep.mubr.bf16.mxu0 %v15404_v12  ;;  %17160 = vmatpush3.bf16.msra.mxu0 %v18490_v52  ;;  %v11821_v52 = vrot.slane %v22399_v39, 5  ;;  %v11827_v12 = vrot.slane %v11825_v20, 4  ;;  %24115 = vst [vmem:[#allocation25_spill] sm:$0xff] %v22479_v51  ;;  %v11733_v20 = vld [vmem:[#allocation3 + $0x78] sm:$0xe] }
 0x65a   : > { %17161 = vmatprep.subr.bf16.mxu0 %v18491_v50  ;;  %v15479_v40 = vrot.slane %v11733_v20, 9 }
 0x65d   : > { %17162 = vmatpush3.bf16.msra.mxu0 %v18491_v50  ;;  %v22440_v50 = vsel %vm20380_vm2, %v11813_v47, %v11814_v43  ;;  %v11834_v43 = vrot.slane %v11832_v60, 4 }
 0x65e   : > { %17163 = vmatprep.subr.bf16.mxu0 %v18492_v17  ;;  %24109 = vst [vmem:[#allocation19_spill] sm:$0xff] %v22440_v50  ;;  %v12626_v50 = vld [vmem:[#allocation3 + $0x5c] sm:$0x1] }
 0x65f   : > { %v22486_v26 = vsel %vm20380_vm2, %v11834_v43, %v11835_v61  ;;  %v11005_v43 = vld [vmem:[#allocation3 + $0x98] sm:$0x1] }
 0x660   : > { %17132 = vmatmul.mubr.bf16.gmra.mrb[44].mxu0 %v24103_v24  ;;  %v22450_v24 = vsel %vm20380_vm2, %v11820_v31, %v11821_v52  ;;  %v11839_v52 = vrot.slane %v22419_v58, 5  ;;  %v22482_v31 = vld [vmem:[#allocation3 + $0x88] sm:$0xf]  ;;  %24116 = vst [vmem:[#allocation26_spill] sm:$0xff] %v22486_v26 }
 0x661   : > { %17135 = vmatprep.mubr.bf16.mxu0 %v24104_v48  ;;  %17164 = vmatpush3.bf16.msra.mxu0 %v18492_v17  ;;  %v11828_v17 = vrot.slane %v22404_v23, 5  ;;  %24110 = vst [vmem:[#allocation22_spill] sm:$0xff] %v22450_v24  ;;  %v24112_v48 = vcombine.low %v22235_v54, %v22246_v32  ;;  %v22473_v32 = vld [vmem:[#allocation3 + $0x80] sm:$0x1]  ;;  %v22496_v54 = vld [vmem:[#allocation3 + $0x8c] sm:$0x1] }
 0x662   : > { %17165 = vmatprep.subr.bf16.mxu0 %v18493_v53  ;;  %v11856_v45 = vrot.slane %v22473_v32, 5  ;;  %v11860_v37 = vrot.slane %v22482_v31, 5 }
 0x663   : > { %v22467_v10 = vsel %vm20380_vm2, %v11827_v12, %v11828_v17  ;;  %v11846_v12 = vrot.slane %v22444_v34, 5  ;;  %v22490_v17 = vld [vmem:[#allocation3 + $0x94] sm:$0xf] }
 0x664   : > { %24113 = vst [vmem:[#allocation24_spill] sm:$0xff] %v22467_v10  ;;  %v11867_v26 = vrot.slane %v22490_v17, 5 }
 0x665   : > { %17166 = vmatpush3.bf16.msra.mxu0 %v18493_v53  ;;  %v11731_v53 = vld [vmem:[#allocation3 + $0x60] sm:$0xe]  ;;  %v22504_v16 = vsel %vm20380_vm2, %v15478_v11, %v11846_v12  ;;  %v11848_v62 = vrot.slane %v11846_v12, 4  ;;  %v11736_v11 = vld [vmem:[#allocation3 + $0x9c] sm:$0xe] }
 0x666   : > { %17199 = vmatprep.subr.bf16.mxu0 %v22392_v0  ;;  %v15477_v47 = vrot.slane %v11731_v53, 9  ;;  %v11841_v53 = vrot.slane %v11839_v52, 4  ;;  %24118 = vst [vmem:[#allocation27_spill] sm:$0xff] %v22504_v16  ;;  %v11008_v12 = vld [vmem:[#allocation3 + $0xa4] sm:$0x1] }
 0x667   : > { %v11014_v16 = vld [vmem:[#allocation3 + $0xbc] sm:$0x1] }
 0x668   : > { %17136 = vmatmul.mubr.bf16.gmra.mrb[48].mxu0 %v24112_v48  ;;  %v11853_v48 = vrot.slane %v22461_v13, 5  ;;  %v22500_v61 = vsel %vm20380_vm2, %v15477_v47, %v11839_v52  ;;  %v22508_v60 = vsel %vm20380_vm2, %v11841_v53, %v11842_v42  ;;  %v22518_v52 = vsel %vm20380_vm2, %v11848_v62, %v11849_v55  ;;  %v11010_v53 = vld [vmem:[#allocation3 + $0xac] sm:$0xf] }
 0x669   : > { %17139 = vmatprep.mubr.bf16.mxu0 %v24114_v8  ;;  %v11734_v8 = vld [vmem:[#allocation3 + $0x84] sm:$0xe]  ;;  %24117 = vst [vmem:[#allocation28_spill] sm:$0xff] %v22500_v61  ;;  %24119 = vst [vmem:[#allocation29_spill] sm:$0xff] %v22508_v60  ;;  %v11862_v47 = vrot.slane %v11860_v37, 4  ;;  %v11863_v60 = vrot.slane %v22496_v54, 5  ;;  %v24123_v62 = vcombine.low %v22263_v4, %v22267_v27 }
 0x66a   : > { %v11855_v59 = vrot.slane %v11853_v48, 4  ;;  %24120 = vst [vmem:[#allocation30_spill] sm:$0xff] %v22518_v52  ;;  %v22522_v20 = vsel %vm20380_vm2, %v15479_v40, %v11853_v48  ;;  %v15480_v42 = vrot.slane %v11734_v8, 9  ;;  %v11011_v40 = vld [vmem:[#allocation3 + $0xb0] sm:$0x1]  ;;  %v15481_v8 = vrot.slane %v11735_v35, 9 }
 0x66b   : > { %24121 = vst [vmem:[#allocation31_spill] sm:$0xff] %v22522_v20  ;;  %v22544_v52 = vld [vmem:[#allocation3 + $0xb8] sm:$0xf]  ;;  %v22548_v4 = vsel %vm20380_vm2, %v11862_v47, %v11863_v60  ;;  %v11870_v27 = vrot.slane %v11005_v43, 5  ;;  %v11874_v55 = vrot.slane %v22512_v18, 5 }
 0x66c   : > { %v22528_v51 = vsel %vm20380_vm2, %v11855_v59, %v11856_v45  ;;  %v22538_v48 = vsel %vm20380_vm2, %v15480_v42, %v11860_v37  ;;  %v11737_v45 = vld [vmem:[#allocation3 + $0xa8] sm:$0xe]  ;;  %v24125_v59 = vcombine.low %v22271_v19, %v22278_v28  ;;  %24126 = vst [vmem:[#allocation34_spill] sm:$0xff] %v22548_v4  ;;  %v11869_v37 = vrot.slane %v11867_v26, 4  ;;  %v11738_v20 = vld [vmem:[#allocation3 + $0xb4] sm:$0xe] }
 0x66d   : > { %24122 = vst [vmem:[#allocation32_spill] sm:$0xff] %v22528_v51  ;;  %24124 = vst [vmem:[#allocation33_spill] sm:$0xff] %v22538_v48  ;;  %v11877_v42 = vrot.slane %v11008_v12, 5  ;;  %v11881_v51 = vrot.slane %v11010_v53, 5  ;;  %v22555_v19 = vsel %vm20380_vm2, %v15481_v8, %v11867_v26  ;;  %v11876_v60 = vrot.slane %v11874_v55, 4  ;;  %v18516_v48 = vld [vmem:[#allocation4 + $0x138] sm:$0xff]  }
 0x66e   : > { %24127 = vst [vmem:[#allocation35_spill] sm:$0xff] %v22555_v19  ;;  %v15483_v43 = vrot.slane %v11737_v45, 9  ;;  %v11016_v47 = vld [vmem:[#allocation3 + $0xc4] sm:$0xf]  ;;  %v11884_v12 = vrot.slane %v11011_v40, 5  ;;  %v11888_v53 = vrot.slane %v22544_v52, 5 }
 0x66f   : > { %v22570_v26 = vsel %vm20380_vm2, %v11876_v60, %v11877_v42  ;;  %v15484_v8 = vrot.slane %v11738_v20, 9  ;;  %v11017_v45 = vld [vmem:[#allocation3 + $0xc8] sm:$0x1]  ;;  %v11739_v35 = vld [vmem:[#allocation3 + $0xc0] sm:$0xe]  ;;  %v11895_v60 = vrot.slane %v11016_v47, 5 }
 0x670   : > { %17140 = vmatmul.mubr.bf16.gmra.mrb[52].mxu0 %v24123_v62  ;;  %v15482_v62 = vrot.slane %v11736_v11, 9  ;;  %v22563_v11 = vsel %vm20380_vm2, %v11869_v37, %v11870_v27  ;;  %24130 = vst [vmem:[#allocation38_spill] sm:$0xff] %v22570_v26  ;;  %v11891_v37 = vrot.slane %v11014_v16, 5  ;;  %v24136_v16 = vcombine.low %v22298_v6, %v22304_v33  ;;  %v18496_v33 = vld [vmem:[#allocation3 + $0x18] sm:$0xff]   ;;  %v22618_v27 = vld [vmem:[#allocation3 + $0x14] sm:$0x1] }
 0x671   : > { %17143 = vmatprep.mubr.bf16.mxu0 %v24125_v59  ;;  %24129 = vst [vmem:[#allocation37_spill] sm:$0xff] %v22563_v11  ;;  %v11883_v59 = vrot.slane %v11881_v51, 4  ;;  %v22589_v20 = vsel %vm20380_vm2, %v15484_v8, %v11888_v53  ;;  %v15485_v47 = vrot.slane %v11739_v35, 9  ;;  %v11898_v42 = vrot.slane %v11017_v45, 5  ;;  %v18494_v8 = vld [vmem:[#allocation3 + $0xc] sm:$0xff]   ;;  %v18498_v35 = vld [vmem:[#allocation4 + $0x108] sm:$0xff]  }
 0x672   : > { %v22559_v28 = vsel %vm20380_vm2, %v15482_v62, %v11874_v55  ;;  %v22574_v55 = vsel %vm20380_vm2, %v15483_v43, %v11881_v51  ;;  %v11890_v62 = vrot.slane %v11888_v53, 4  ;;  %v24133_v51 = vcombine.low %v22290_v7, %v22294_v3  ;;  %24134 = vst [vmem:[#allocation41_spill] sm:$0xff] %v22589_v20  ;;  %v18497_v45 = vld [vmem:[#allocation3 + $0x24] sm:$0xff]  }
 0x673   : > { %24128 = vst [vmem:[#allocation36_spill] sm:$0xff] %v22559_v28  ;;  %24131 = vst [vmem:[#allocation39_spill] sm:$0xff] %v22574_v55  ;;  %v22580_v40 = vsel %vm20380_vm2, %v11883_v59, %v11884_v12  ;;  %v11897_v12 = vrot.slane %v11895_v60, 4  ;;  %v22602_v7 = vsel %vm20380_vm2, %v15485_v47, %v11895_v60  ;;  %v24139_v6 = vcombine.low %v22311_v15, %v22315_v14  ;;  %v18499_v60 = vld [vmem:[#allocation3 + $0x30] sm:$0xff]   ;;  %v18500_v15 = vld [vmem:[#allocation3 + $0x3c] sm:$0xff]  }
 0x674   : > { %24132 = vst [vmem:[#allocation40_spill] sm:$0xff] %v22580_v40  ;;  %v22593_v43 = vsel %vm20380_vm2, %v11890_v62, %v11891_v37  ;;  %24137 = vst [vmem:[#allocation43_spill] sm:$0xff] %v22602_v7  ;;  %v18501_v62 = vld [vmem:[#allocation4 + $0x110] sm:$0xff]   ;;  %v10975_v7 = vld [vmem:[#allocation3 + $0x20] sm:$0x1] }
 0x675   : > { %24135 = vst [vmem:[#allocation42_spill] sm:$0xff] %v22593_v43  ;;  %v22606_v3 = vsel %vm20380_vm2, %v11897_v12, %v11898_v42  ;;  %v10970_v37 = vld [vmem:[#allocation3 + $0xc] sm:$0xf]  ;;  %v22614_v42 = vld [vmem:[#allocation3 + $0x10] sm:$0xf]  ;;  %v18503_v40 = vld [vmem:[#allocation3 + $0x54] sm:$0xff]  }
 0x676   : > { %24138 = vst [vmem:[#allocation44_spill] sm:$0xff] %v22606_v3  ;;  %v11019_v14 = vshrl.u32 %v10970_v37, 16  ;;  %v11022_v47 = vshll.u32 %v10970_v37, 16  ;;  %v11028_v12 = vshll.u32 %v22614_v42, 16  ;;  %v18513_v28 = vld [vmem:[#allocation4 + $0x130] sm:$0xff]  }
 0x678   : > { %17144 = vmatmul.mubr.bf16.gmra.mrb[56].mxu0 %v24133_v51  ;;  %v18504_v51 = vld [vmem:[#allocation4 + $0x118] sm:$0xff]   ;;  %v11024_v53 = vrot.slane %v11022_v47, 5  ;;  %v22620_v3 = vrot.slane %v11028_v12, 5 }
 0x679   : > { %17147 = vmatprep.mubr.bf16.mxu0 %v24136_v16  ;;  %v10974_v16 = vld [vmem:[#allocation3 + $0x1c] sm:$0xf] }
 0x680   : > { %17148 = vmatmul.mubr.bf16.gmra.mrb[60].mxu0 %v24139_v6  ;;  %v11052_v6 = vshll.u32 %v10974_v16, 16 }
 0x681   : > { %17167 = vmatprep.mubr.bf16.mxu0 %v18494_v8  ;;  %v11032_v8 = vshrl.u32 %v22614_v42, 16 }
 0x682   : > { %v22622_v43 = vrot.slane %v11052_v6, 5 }
 0x683   : > { %v11034_v37 = vrot.slane %v11032_v8, 4  ;;  %v11062_v8 = vshll.u32 %v10975_v7, 16  ;;  %v10982_v7 = vld [vmem:[#allocation3 + $0x3c] sm:$0xf] }
 0x685   : > { %v11035_v12 = vor.u32 %v11034_v37, %v22620_v3  ;;  %v11064_v37 = vrot.slane %v11062_v8, 5 }
 0x688   : > { %17168 = vmatmul.mubr.bf16.vlgmr.msra.gmra.mrb[32].mxu0 %v18496_v33  ;;  %v11056_v33 = vshrl.u32 %v10974_v16, 16  ;;  %v18510_v16 = vld [vmem:[#allocation4 + $0x128] sm:$0xff]  }
 0x689   : > { %17200 = vmatpush3.bf16.msra.mxu0 %v22392_v0  ;;  %17171 = vmatprep.mubr.bf16.mxu0 %v18497_v45  ;;  %v10973_v0 = vld [vmem:[#allocation3 + $0x18] sm:$0xf]  ;;  %v11021_v45 = vrot.slane %v11019_v14, 4  ;;  %v11038_v14 = vshll.u32 %v22618_v27, 16 }
 0x68a   : > { %17201 = vmatprep.subr.bf16.mxu0 %v18498_v35  ;;  %v11043_v59 = vshrl.u32 %v10973_v0, 16  ;;  %v11058_v20 = vrot.slane %v11056_v33, 4  ;;  %v11076_v33 = vshll.u32 %v22380_v21, 16 }
 0x68b   : > { %v11025_v55 = vor.u32 %v11024_v53, %v11021_v45  ;;  %v11080_v53 = vshrl.u32 %v22380_v21, 16  ;;  %v10979_v45 = vld [vmem:[#allocation3 + $0x30] sm:$0xf]  ;;  %v11100_v21 = vshll.u32 %v22384_v9, 16 }
 0x68c   : > { %v11045_v47 = vrot.slane %v11043_v59, 4  ;;  %v11040_v59 = vrot.slane %v11038_v14, 5  ;;  %v22629_v4 = vrot.slane %v11076_v33, 5  ;;  %v11094_v10 = vshll.u32 %v10979_v45, 16  ;;  %v18506_v14 = vld [vmem:[#allocation3 + $0x6c] sm:$0xff]  }
 0x68d   : > { %17202 = vmatpush3.bf16.msra.mxu0 %v18498_v35  ;;  %v18507_v35 = vld [vmem:[#allocation4 + $0x120] sm:$0xff]   ;;  %v11026_v11 = vrot.slane %v11025_v55, 4  ;;  %v11082_v61 = vrot.slane %v11080_v53, 4  ;;  %v11104_v55 = vshrl.u32 %v22384_v9, 16 }
 0x68e   : > { %17203 = vmatprep.subr.bf16.mxu0 %v18501_v62 }
 0x68f   : > { %v11031_v8 = vsel %vm19706_vm11, %v11026_v11, %v22620_v3  ;;  %v11096_v11 = vrot.slane %v11094_v10, 5 }
 0x690   : > { %17172 = vmatmul.mubr.bf16.gmra.mrb[36].mxu0 %v18499_v60  ;;  %v11046_v60 = vshll.u32 %v10973_v0, 16 }
 0x691   : > { %17175 = vmatprep.mubr.bf16.mxu0 %v18500_v15  ;;  %17204 = vmatpush3.bf16.msra.mxu0 %v18501_v62  ;;  %v10976_v15 = vld [vmem:[#allocation3 + $0x24] sm:$0xf]  ;;  %v18502_v62 = vld [vmem:[#allocation3 + $0x48] sm:$0xff]  }
 0x692   : > { %17205 = vmatprep.subr.bf16.mxu0 %v18504_v51  ;;  %v11048_v26 = vrot.slane %v11046_v60, 5  ;;  %v11067_v0 = vshrl.u32 %v10976_v15, 16  ;;  %v11070_v6 = vshll.u32 %v10976_v15, 16  ;;  %v18505_v15 = vld [vmem:[#allocation3 + $0x60] sm:$0xff]  }
 0x694   : > { %v11049_v19 = vor.u32 %v11048_v26, %v11045_v47  ;;  %v11069_v60 = vrot.slane %v11067_v0, 4  ;;  %v11115_v26 = vshrl.u32 %v10982_v7, 16  ;;  %v11118_v47 = vshll.u32 %v10982_v7, 16 }
 0x695   : > { %17206 = vmatpush3.bf16.msra.mxu0 %v18504_v51  ;;  %v11059_v51 = vor.u32 %v11058_v20, %v22622_v43  ;;  %v11091_v20 = vshrl.u32 %v10979_v45, 16  ;;  %v10985_v45 = vld [vmem:[#allocation3 + $0x48] sm:$0xf]  ;;  %v11083_v7 = vor.u32 %v11082_v61, %v22629_v4 }
 0x696   : > { %17207 = vmatprep.subr.bf16.mxu0 %v18507_v35  ;;  %v11050_v0 = vrot.slane %v11049_v19, 4  ;;  %v22646_v19 = vrot.slane %v11100_v21, 5  ;;  %v11117_v3 = vrot.slane %v11115_v26, 4  ;;  %v10988_v21 = vld [vmem:[#allocation3 + $0x54] sm:$0xf] }
 0x697   : > { %v11093_v53 = vrot.slane %v11091_v20, 4  ;;  %v11152_v20 = vshrl.u32 %v22401_v29, 16  ;;  %v11084_v26 = vrot.slane %v11083_v7, 4  ;;  %v11176_v7 = vshrl.u32 %v22411_v44, 16 }
 0x698   : > { %17176 = vmatmul.mubr.bf16.gmra.mrb[40].mxu0 %v18502_v62  ;;  %v11036_v62 = vrot.slane %v11035_v12, 4  ;;  %v11124_v12 = vshll.u32 %v22394_v41, 16  ;;  %v11055_v61 = vsel %vm19706_vm11, %v11050_v0, %v22622_v43  ;;  %v11134_v0 = vshll.u32 %v22399_v39, 16 }
 0x699   : > { %17179 = vmatprep.mubr.bf16.mxu0 %v18503_v40  ;;  %17208 = vmatpush3.bf16.msra.mxu0 %v18507_v35  ;;  %v11060_v40 = vrot.slane %v11059_v51, 4  ;;  %v11072_v35 = vrot.slane %v11070_v6, 5  ;;  %v11086_v51 = vshll.u32 %v22382_v56, 16  ;;  %v11106_v56 = vrot.slane %v11104_v55, 4  ;;  %v18508_v55 = vld [vmem:[#allocation3 + $0x78] sm:$0xff]  }
 0x69a   : > { %17209 = vmatprep.subr.bf16.mxu0 %v18510_v16  ;;  %v11041_v9 = vsel %vm19706_vm11, %v11036_v62, %v11040_v59  ;;  %v11178_v46 = vrot.slane %v11176_v7, 4 }
 0x69b   : > { %v11065_v6 = vsel %vm19706_vm11, %v11060_v40, %v11064_v37  ;;  %v11073_v33 = vor.u32 %v11072_v35, %v11069_v60  ;;  %v22650_v62 = vcombine.low %v11031_v8, %v11041_v9  ;;  %v11139_v37 = vshrl.u32 %v10985_v45, 16 }
 0x69c   : > { %v11142_v60 = vshll.u32 %v10985_v45, 16  ;;  %v11148_v40 = vshll.u32 %v22401_v29, 16  ;;  %v11088_v35 = vrot.slane %v11086_v51, 5  ;;  %v10991_v51 = vld [vmem:[#allocation3 + $0x60] sm:$0xf]  ;;  %v11154_v45 = vrot.slane %v11152_v20, 4 }
 0x69d   : > { %17210 = vmatpush3.bf16.msra.mxu0 %v18510_v16  ;;  %v11128_v16 = vshrl.u32 %v22394_v41, 16  ;;  %v22643_v41 = vld [vmem:[#allocation4 + $0x140] sm:$0xff]   ;;  %v11074_v10 = vrot.slane %v11073_v33, 4  ;;  %v11141_v29 = vrot.slane %v11139_v37, 4  ;;  %v11187_v39 = vshrl.u32 %v10991_v51, 16 }
 0x69e   : > { %17211 = vmatprep.subr.bf16.mxu0 %v18513_v28  ;;  %v11144_v9 = vrot.slane %v11142_v60, 5  ;;  %v22664_v33 = vrot.slane %v11148_v40, 5  ;;  %v11136_v60 = vrot.slane %v11134_v0, 5  ;;  %v10994_v0 = vld [vmem:[#allocation3 + $0x6c] sm:$0xf] }
 0x69f   : > { %v11130_v59 = vrot.slane %v11128_v16, 4  ;;  %v18509_v16 = vld [vmem:[#allocation3 + $0x84] sm:$0xff]  }
 0x6a0   : > { %17180 = vmatmul.mubr.bf16.gmra.mrb[44].mxu0 %v18505_v15  ;;  %v22648_v15 = vrot.slane %v11124_v12, 5  ;;  %v11110_v12 = vshll.u32 %v22386_v38, 16  ;;  %v11172_v38 = vshll.u32 %v22411_v44, 16  ;;  %v11145_v20 = vor.u32 %v11144_v9, %v11141_v29 }
 0x6a1   : > { %17183 = vmatprep.mubr.bf16.mxu0 %v18506_v14  ;;  %17212 = vmatpush3.bf16.msra.mxu0 %v18513_v28  ;;  %v11120_v28 = vrot.slane %v11118_v47, 5  ;;  %v22658_v14 = vcombine.low %v11055_v61, %v11065_v6  ;;  %v11097_v47 = vor.u32 %v11096_v11, %v11093_v53  ;;  %v11163_v6 = vshrl.u32 %v10988_v21, 16 }
 0x6a2   : > { %17213 = vmatprep.subr.bf16.mxu0 %v18516_v48  ;;  %v11131_v43 = vor.u32 %v11130_v59, %v22648_v15  ;;  %v11166_v53 = vshll.u32 %v10988_v21, 16  ;;  %v11079_v11 = vsel %vm19706_vm11, %v11074_v10, %v22629_v4  ;;  %v18511_v4 = vld [vmem:[#allocation3 + $0x90] sm:$0xff]   ;;  %v11189_v10 = vrot.slane %v11187_v39, 4 }
 0x6a3   : > { %v11121_v8 = vor.u32 %v11120_v28, %v11117_v3  ;;  %v11190_v3 = vshll.u32 %v10991_v51, 16  ;;  %v11089_v28 = vsel %vm19706_vm11, %v11084_v26, %v11088_v35  ;;  %v11098_v59 = vrot.slane %v11097_v47, 4  ;;  %v18512_v26 = vld [vmem:[#allocation3 + $0x9c] sm:$0xff]  }
 0x6a4   : > { %v11132_v61 = vrot.slane %v11131_v43, 4  ;;  %v11165_v21 = vrot.slane %v11163_v6, 4  ;;  %v11168_v44 = vrot.slane %v11166_v53, 5  ;;  %v11196_v51 = vshll.u32 %v22419_v58, 16 }
 0x6a5   : > { %17214 = vmatpush3.bf16.msra.mxu0 %v18516_v48  ;;  %v11107_v48 = vor.u32 %v11106_v56, %v22646_v19  ;;  %v11112_v56 = vrot.slane %v11110_v12, 5  ;;  %v11122_v40 = vrot.slane %v11121_v8, 4  ;;  %v11192_v12 = vrot.slane %v11190_v3, 5 }
 0x6a6   : > { %17247 = vmatprep.subr.bf16.mxu0 %v22643_v41  ;;  %v11200_v35 = vshrl.u32 %v22419_v58, 16  ;;  %v22678_v47 = vcombine.low %v11079_v11, %v11089_v28  ;;  %v11158_v43 = vshll.u32 %v22404_v23, 16  ;;  %v11137_v58 = vsel %vm19706_vm11, %v11132_v61, %v11136_v60  ;;  %v22708_v28 = vld [vmem:[#allocation3 + $0x1c] sm:$0xf]  ;;  %v22720_v61 = vld [vmem:[#allocation3 + $0x20] sm:$0x1] }
 0x6a7   : > { %v11108_v37 = vrot.slane %v11107_v48, 4  ;;  %v11103_v48 = vsel %vm19706_vm11, %v11098_v59, %v22646_v19  ;;  %v11127_v29 = vsel %vm19706_vm11, %v11122_v40, %v22648_v15  ;;  %v22691_v9 = vrot.slane %v11145_v20, 4  ;;  %24140 = vst [vmem:[#allocation46_spill] sm:$0xff] %v22708_v28  ;;  %v13363_v59 = vld [vmem:[#allocation3 + $0x18] sm:$0xe]  ;;  %24141 = vst [vmem:[#allocation45_spill] sm:$0xff] %v22720_v61 }
 0x6a8   : > { %17184 = vmatmul.mubr.bf16.gmra.mrb[48].mxu0 %v18508_v55  ;;  %v11155_v55 = vor.u32 %v11154_v45, %v22664_v33  ;;  %v11182_v6 = vshll.u32 %v22425_v1, 16  ;;  %v11169_v45 = vor.u32 %v11168_v44, %v11165_v21  ;;  %v11206_v23 = vshll.u32 %v22427_v2, 16  ;;  %v22718_v40 = vld [vmem:[#allocation3 + $0x78] sm:$0xf]  ;;  %v22722_v20 = vld [vmem:[#allocation3 + $0x28] sm:$0xf] }
 0x6a9   : > { %17187 = vmatprep.mubr.bf16.mxu0 %v18509_v16  ;;  %v22674_v16 = vrot.slane %v11172_v38, 5  ;;  %v11113_v8 = vsel %vm19706_vm11, %v11108_v37, %v11112_v56  ;;  %v11193_v38 = vor.u32 %v11192_v12, %v11189_v10  ;;  %v22698_v7 = vrot.slane %v11196_v51, 5  ;;  %24142 = vst [vmem:[#allocation47_spill] sm:$0xff] %v22722_v20  ;;  %v22734_v10 = vld [vmem:[#allocation3 + $0x34] sm:$0xf] }
 0x6aa   : > { %v22694_v19 = vrot.slane %v11155_v55, 4  ;;  %v22700_v11 = vrot.slane %v11200_v35, 4  ;;  %v11211_v15 = vshrl.u32 %v10994_v0, 16  ;;  %v22702_v56 = vcombine.low %v11103_v48, %v11113_v8  ;;  %24143 = vst [vmem:[#allocation48_spill] sm:$0xff] %v22734_v10  ;;  %v18515_v12 = vld [vmem:[#allocation3 + $0xb4] sm:$0xff]  }
 0x6ab   : > { %v11179_v53 = vor.u32 %v11178_v46, %v22674_v16  ;;  %v22704_v39 = vcombine.low %v11127_v29, %v11137_v58  ;;  %v22706_v3 = vrot.slane %v11158_v43, 5  ;;  %v11214_v1 = vshll.u32 %v10994_v0, 16  ;;  %v22743_v8 = vld [vmem:[#allocation3 + $0x2c] sm:$0x1]  ;;  %v22749_v58 = vld [vmem:[#allocation3 + $0x38] sm:$0x1] }
 0x6ac   : > { %v22714_v46 = vrot.slane %v11182_v6, 5  ;;  %v11220_v37 = vshll.u32 %v22444_v34, 16  ;;  %v11224_v60 = vshrl.u32 %v22444_v34, 16  ;;  %v22728_v55 = vrot.slane %v11169_v45, 4  ;;  %v18514_v34 = vld [vmem:[#allocation3 + $0xa8] sm:$0xff]   ;;  %24144 = vst [vmem:[#allocation49_spill] sm:$0xff] %v22743_v8 }
 0x6ad   : > { %v22730_v44 = vrot.slane %v11179_v53, 4  ;;  %v22736_v51 = vrot.slane %v11193_v38, 4  ;;  %v11244_v48 = vshll.u32 %v22461_v13, 16  ;;  %v22745_v43 = vrot.slane %v11214_v1, 5  ;;  %24145 = vst [vmem:[#allocation51_spill] sm:$0xff] %v22749_v58 }
 0x6ae   : > { %v13429_v6 = vrot.slane %v22708_v28, 5  ;;  %v13364_v45 = vld [vmem:[#allocation3 + $0x24] sm:$0xe]  ;;  %v22752_v53 = vrot.slane %v11220_v37, 5  ;;  %v15558_v1 = vrot.slane %v13363_v59, 9  ;;  %v13432_v35 = vrot.slane %v22720_v61, 5 }
 0x6af   : > { %v13365_v2 = vld [vmem:[#allocation3 + $0x30] sm:$0xe]  ;;  %v12620_v21 = vld [vmem:[#allocation3 + $0x44] sm:$0x1]  ;;  %v13436_v28 = vrot.slane %v22722_v20, 5  ;;  %v15559_v38 = vrot.slane %v13364_v45, 9 }
 0x6b0   : > { %17188 = vmatmul.mubr.bf16.gmra.mrb[52].mxu0 %v18511_v4  ;;  %v22732_v4 = vrot.slane %v11206_v23, 5  ;;  %v22754_v23 = vrot.slane %v11224_v60, 4  ;;  %v13431_v29 = vrot.slane %v13429_v6, 4  ;;  %v22764_v37 = vld [vmem:[#allocation3 + $0x4c] sm:$0xf]  ;;  %v22768_v60 = vsel %vm20380_vm2, %v15558_v1, %v13429_v6 }
 0x6b1   : > { %17191 = vmatprep.mubr.bf16.mxu0 %v18512_v26  ;;  %v22740_v26 = vrot.slane %v11211_v15, 4  ;;  %v22757_v15 = vld [vmem:[#allocation3 + $0x40] sm:$0xf]  ;;  %24147 = vst [vmem:[#allocation56_spill] sm:$0xff] %v22768_v60  ;;  %v13443_v59 = vrot.slane %v22734_v10, 5  ;;  %v13438_v24 = vrot.slane %v13436_v28, 4 }
 0x6b2   : > { %24146 = vst [vmem:[#allocation50_spill] sm:$0xff] %v22757_v15  ;;  %v22773_v0 = vsel %vm20380_vm2, %v13431_v29, %v13432_v35  ;;  %v13439_v61 = vrot.slane %v22743_v8, 5  ;;  %v15560_v20 = vrot.slane %v13365_v2, 9  ;;  %v22780_v6 = vld [vmem:[#allocation3 + $0x58] sm:$0xf]  ;;  %v13446_v10 = vrot.slane %v22749_v58, 5 }
 0x6b3   : > { %24148 = vst [vmem:[#allocation54_spill] sm:$0xff] %v22773_v0  ;;  %v13445_v1 = vrot.slane %v13443_v59, 4  ;;  %v13367_v35 = vld [vmem:[#allocation3 + $0x48] sm:$0xe]  ;;  %v18517_v29 = vld [vmem:[#allocation3 + $0xc0] sm:$0xff]   ;;  %v22787_v2 = vsel %vm20380_vm2, %v15559_v38, %v13436_v28  ;;  %v13450_v45 = vrot.slane %v22757_v15, 5 }
 0x6b4   : > { %24149 = vst [vmem:[#allocation59_spill] sm:$0xff] %v22787_v2  ;;  %v22791_v8 = vsel %vm20380_vm2, %v13438_v24, %v13439_v61  ;;  %v22795_v63 = vsel %vm20380_vm2, %v15560_v20, %v13443_v59  ;;  %v13368_v0 = vld [vmem:[#allocation3 + $0x54] sm:$0xe]  ;;  %v22798_v60 = vld [vmem:[#allocation3 + $0x64] sm:$0xf]  ;;  %v13453_v24 = vrot.slane %v12620_v21, 5 }
 0x6b5   : > { %24150 = vst [vmem:[#allocation52_spill] sm:$0xff] %v22791_v8  ;;  %24151 = vst [vmem:[#allocation53_spill] sm:$0xff] %v22795_v63  ;;  %v12629_v58 = vld [vmem:[#allocation3 + $0x68] sm:$0x1]  ;;  %v22804_v28 = vsel %vm20380_vm2, %v13445_v1, %v13446_v10  ;;  %v13452_v20 = vrot.slane %v13450_v45, 4  ;;  %v15562_v59 = vrot.slane %v13367_v35, 9 }
 0x6b6   : > { %24152 = vst [vmem:[#allocation55_spill] sm:$0xff] %v22798_v60  ;;  %24153 = vst [vmem:[#allocation57_spill] sm:$0xff] %v22804_v28  ;;  %v13457_v15 = vrot.slane %v22764_v37, 5  ;;  %v15563_v8 = vrot.slane %v13368_v0, 9  ;;  %v13464_v10 = vrot.slane %v22780_v6, 5  ;;  %v13467_v35 = vrot.slane %v12626_v50, 5 }
 0x6b7   : > { %v22817_v21 = vsel %vm20380_vm2, %v13452_v20, %v13453_v24  ;;  %v12632_v61 = vld [vmem:[#allocation3 + $0x74] sm:$0x1]  ;;  %v13478_v50 = vrot.slane %v12631_v49, 5  ;;  %v18519_v28 = vld [vmem:[#allocation4 + $0x148] sm:$0xff]   ;;  %v12637_v63 = vld [vmem:[#allocation3 + $0x88] sm:$0xf] }
 0x6b8   : > { %17192 = vmatmul.mubr.bf16.gmra.mrb[56].mxu0 %v18514_v34  ;;  %v22762_v34 = vrot.slane %v11244_v48, 5  ;;  %v13366_v48 = vld [vmem:[#allocation3 + $0x3c] sm:$0xe]  ;;  %24155 = vst [vmem:[#allocation60_spill] sm:$0xff] %v22817_v21  ;;  %v13459_v1 = vrot.slane %v13457_v15, 4  ;;  %v13466_v0 = vrot.slane %v13464_v10, 4  ;;  %v22832_v20 = vsel %vm20380_vm2, %v15563_v8, %v13464_v10 }
 0x6b9   : > { %17195 = vmatprep.mubr.bf16.mxu0 %v18515_v12  ;;  %v12623_v12 = vld [vmem:[#allocation3 + $0x50] sm:$0x1]  ;;  %v15561_v38 = vrot.slane %v13366_v48, 9  ;;  %v22821_v48 = vsel %vm20380_vm2, %v15562_v59, %v13457_v15  ;;  %v13474_v15 = vrot.slane %v12629_v58, 5  ;;  %v13371_v59 = vld [vmem:[#allocation3 + $0x78] sm:$0xe] }
 0x6ba   : > { %v13460_v36 = vrot.slane %v12623_v12, 5  ;;  %24156 = vst [vmem:[#allocation61_spill] sm:$0xff] %v22821_v48  ;;  %v12638_v2 = vld [vmem:[#allocation3 + $0x8c] sm:$0x1]  ;;  %v13480_v58 = vrot.slane %v13478_v50, 4  ;;  %v13481_v10 = vrot.slane %v12632_v61, 5 }
 0x6bb   : > { %v22811_v25 = vsel %vm20380_vm2, %v15561_v38, %v13450_v45  ;;  %v15564_v45 = vrot.slane %v13369_v30, 9  ;;  %v13471_v38 = vrot.slane %v22798_v60, 5  ;;  %v22838_v30 = vsel %vm20380_vm2, %v13466_v0, %v13467_v35  ;;  %v12640_v60 = vld [vmem:[#allocation3 + $0x94] sm:$0xf]  ;;  %v12641_v12 = vld [vmem:[#allocation3 + $0x98] sm:$0x1] }
 0x6bc   : > { %24154 = vst [vmem:[#allocation58_spill] sm:$0xff] %v22811_v25  ;;  %v22828_v24 = vsel %vm20380_vm2, %v13459_v1, %v13460_v36  ;;  %24158 = vst [vmem:[#allocation63_spill] sm:$0xff] %v22838_v30  ;;  %v13372_v36 = vld [vmem:[#allocation3 + $0x84] sm:$0xe]  ;;  %v12635_v1 = vld [vmem:[#allocation3 + $0x80] sm:$0x1] }
 0x6bd   : > { %24157 = vst [vmem:[#allocation62_spill] sm:$0xff] %v22828_v24  ;;  %v13473_v21 = vrot.slane %v13471_v38, 4  ;;  %v22844_v49 = vsel %vm20380_vm2, %v15564_v45, %v13471_v38  ;;  %v15566_v0 = vrot.slane %v13371_v59, 9  ;;  %v12643_v48 = vld [vmem:[#allocation3 + $0xa0] sm:$0xf]  ;;  %v22858_v45 = vsel %vm20380_vm2, %v13480_v58, %v13481_v10  ;;  %v18520_v10 = vld [vmem:[#allocation4 + $0x150] sm:$0xff]  }
 0x6be   : > { %24160 = vst [vmem:[#allocation65_spill] sm:$0xff] %v22858_v45  ;;  %v15567_v61 = vrot.slane %v13372_v36, 9  ;;  %v13492_v38 = vrot.slane %v12637_v63, 5  ;;  %v13373_v30 = vld [vmem:[#allocation3 + $0x90] sm:$0xe]  ;;  %v13495_v36 = vrot.slane %v12638_v2, 5  ;;  %v11227_v45 = vor.u32 %v22754_v23, %v22752_v53 }
 0x6bf   : > { %v22848_v35 = vsel %vm20380_vm2, %v13473_v21, %v13474_v15  ;;  %v13488_v15 = vrot.slane %v12635_v1, 5  ;;  %v12644_v59 = vld [vmem:[#allocation3 + $0xa4] sm:$0x1]  ;;  %v13499_v58 = vrot.slane %v12640_v60, 5  ;;  %v12646_v21 = vld [vmem:[#allocation3 + $0xac] sm:$0xf] }
 0x6c0   : > { %17196 = vmatmul.mubr.bf16.gmra.mrb[60].mxu0 %v18517_v29  ;;  %v13370_v29 = vld [vmem:[#allocation3 + $0x6c] sm:$0xe]  ;;  %v22871_v63 = vsel %vm20380_vm2, %v15567_v61, %v13492_v38  ;;  %v15568_v1 = vrot.slane %v13373_v30, 9  ;;  %v12649_v8 = vld [vmem:[#allocation3 + $0xb8] sm:$0xf]  ;;  %v18521_v30 = vld [vmem:[#allocation4 + $0x158] sm:$0xff]  }
 0x6c1   : > { %17215 = vmatprep.mubr.bf16.mxu0 %v22650_v62  ;;  %v12634_v62 = vld [vmem:[#allocation3 + $0x7c] sm:$0xf]  ;;  %v15565_v25 = vrot.slane %v13370_v29, 9  ;;  %24161 = vst [vmem:[#allocation66_spill] sm:$0xff] %v22871_v63  ;;  %v13501_v2 = vrot.slane %v13499_v58, 4 }
 0x6c2   : > { %v13485_v24 = vrot.slane %v12634_v62, 5  ;;  %v12653_v63 = vld [vmem:[#allocation3 + $0xc8] sm:$0x1] }
 0x6c3   : > { %v22852_v29 = vsel %vm20380_vm2, %v15565_v25, %v13478_v50  ;;  %v13374_v50 = vld [vmem:[#allocation3 + $0x9c] sm:$0xe] }
 0x6c4   : > { %24159 = vst [vmem:[#allocation64_spill] sm:$0xff] %v22852_v29  ;;  %v22865_v25 = vsel %vm20380_vm2, %v15566_v0, %v13485_v24  ;;  %v13487_v62 = vrot.slane %v13485_v24, 4  ;;  %v13502_v0 = vrot.slane %v12641_v12, 5  ;;  %v15569_v60 = vrot.slane %v13374_v50, 9  ;;  %v12647_v29 = vld [vmem:[#allocation3 + $0xb0] sm:$0x1] }
 0x6c6   : > { %v22875_v24 = vsel %vm20380_vm2, %v13487_v62, %v13488_v15  ;;  %v13376_v62 = vld [vmem:[#allocation3 + $0xb4] sm:$0xe]  ;;  %v12650_v15 = vld [vmem:[#allocation3 + $0xbc] sm:$0x1]  ;;  %v22893_v50 = vsel %vm20380_vm2, %v13501_v2, %v13502_v0 }
 0x6c7   : > { %24162 = vst [vmem:[#allocation67_spill] sm:$0xff] %v22875_v24  ;;  %24165 = vst [vmem:[#allocation21_spill] sm:$0xff] %v22893_v50  ;;  %v13523_v50 = vrot.slane %v12650_v15, 5 }
 0x6c8   : > { %17216 = vmatmul.mubr.bf16.vlgmr.msra.gmra.mrb[32].mxu0 %v22658_v14  ;;  %v13494_v14 = vrot.slane %v13492_v38, 4  ;;  %v13375_v38 = vld [vmem:[#allocation3 + $0xa8] sm:$0xe] }
 0x6c9   : > { %17248 = vmatpush3.bf16.msra.mxu0 %v22643_v41  ;;  %17219 = vmatprep.mubr.bf16.mxu0 %v22678_v47  ;;  %v13506_v41 = vrot.slane %v12643_v48, 5  ;;  %v13509_v48 = vrot.slane %v12644_v59, 5  ;;  %v12652_v47 = vld [vmem:[#allocation3 + $0xc4] sm:$0xf] }
 0x6ca   : > { %17249 = vmatprep.subr.bf16.mxu0 %v18519_v28  ;;  %v22881_v61 = vsel %vm20380_vm2, %v13494_v14, %v13495_v36  ;;  %v22889_v14 = vsel %vm20380_vm2, %v15568_v1, %v13499_v58  ;;  %v13513_v36 = vrot.slane %v12646_v21, 5  ;;  %v15570_v58 = vrot.slane %v13375_v38, 9 }
 0x6cb   : > { %24163 = vst [vmem:[#allocation68_spill] sm:$0xff] %v22881_v61  ;;  %v13508_v12 = vrot.slane %v13506_v41, 4  ;;  %24164 = vst [vmem:[#allocation20_spill] sm:$0xff] %v22889_v14  ;;  %v22897_v23 = vsel %vm20380_vm2, %v15569_v60, %v13506_v41  ;;  %v13520_v1 = vrot.slane %v12649_v8, 5  ;;  %v13377_v61 = vld [vmem:[#allocation3 + $0xc0] sm:$0xe] }
 0x6cc   : > { %v13515_v2 = vrot.slane %v13513_v36, 4  ;;  %v13516_v41 = vrot.slane %v12647_v29, 5  ;;  %v15571_v60 = vrot.slane %v13376_v62, 9  ;;  %v24166_v21 = vshrl.u32 %v22461_v13, 16  ;;  %v18522_v29 = vld [vmem:[#allocation4 + $0x160] sm:$0xff]  }
 0x6cd   : > { %17250 = vmatpush3.bf16.msra.mxu0 %v18519_v28  ;;  %v22903_v59 = vsel %vm20380_vm2, %v13508_v12, %v13509_v48  ;;  %v13522_v28 = vrot.slane %v13520_v1, 4  ;;  %v13527_v14 = vrot.slane %v12652_v47, 5  ;;  %v22913_v8 = vsel %vm20380_vm2, %v15570_v58, %v13513_v36  ;;  %v11000_v12 = vld [vmem:[#allocation3 + $0x84] sm:$0xf] }
 0x6ce   : > { %17251 = vmatprep.subr.bf16.mxu0 %v18520_v10  ;;  %v15585_v0 = vcombine.low %v22897_v23, %v22903_v59  ;;  %v11250_v24 = vrot.slane %v24166_v21, 4  ;;  %v22917_v38 = vsel %vm20380_vm2, %v13515_v2, %v13516_v41  ;;  %v15572_v13 = vrot.slane %v13377_v61, 9  ;;  %v14540_v59 = vld [vmem:[%s23709_s11 + $0x10] sm:$0xff] }
 0x6cf   : > { %v13529_v47 = vrot.slane %v13527_v14, 4  ;;  %v13530_v48 = vrot.slane %v12653_v63, 5  ;;  %v24167_v62 = vor.u32 %v22700_v11, %v22698_v7  ;;  %v11217_v36 = vor.u32 %v22745_v43, %v22740_v26 }
 0x6d0   : > { %17220 = vmatmul.mubr.bf16.gmra.mrb[36].mxu0 %v22702_v56  ;;  %v22921_v56 = vsel %vm20380_vm2, %v15571_v60, %v13520_v1  ;;  %v24168_v61 = vshrl.u32 %v22718_v40, 16  ;;  %v11268_v2 = vshll.u32 %v22482_v31, 16  ;;  %v22942_v63 = vsel %vm20380_vm2, %v15572_v13, %v13527_v14 }
 0x6d1   : > { %17223 = vmatprep.mubr.bf16.mxu0 %v22704_v39  ;;  %17252 = vmatpush3.bf16.msra.mxu0 %v18520_v10  ;;  %v15586_v39 = vcombine.low %v22913_v8, %v22917_v38  ;;  %v22927_v10 = vsel %vm20380_vm2, %v13522_v28, %v13523_v50  ;;  %v11204_v15 = vrot.slane %v24167_v62, 4  ;;  %v11272_v50 = vshrl.u32 %v22482_v31, 16  ;;  %v14542_v38 = vld [vmem:[%s23709_s11 + $0x20] sm:$0xff] }
 0x6d2   : > { %17253 = vmatprep.subr.bf16.mxu0 %v18521_v30  ;;  %v11237_v58 = vrot.slane %v24168_v61, 4  ;;  %v15587_v1 = vcombine.low %v22921_v56, %v22927_v10  ;;  %v22946_v11 = vsel %vm20380_vm2, %v13529_v47, %v13530_v48  ;;  %v24169_v26 = vshll.u32 %v22718_v40, 16  ;;  %v14543_v56 = vld [vmem:[%s23709_s11 + $0x28] sm:$0xff]  ;;  %v14544_v10 = vld [vmem:[%s23709_s11 + $0x30] sm:$0xff] }
 0x6d3   : > { %v11259_v28 = vshrl.u32 %v11000_v12, 16  ;;  %v11262_v41 = vshll.u32 %v11000_v12, 16  ;;  %v15588_v60 = vcombine.low %v22942_v63, %v22946_v11  ;;  %v24170_v31 = vsel %vm19706_vm11, %v22694_v19, %v22706_v3  ;;  %v18523_v12 = vld [vmem:[#allocation4 + $0x168] sm:$0xff]   ;;  %v14546_v11 = vld [vmem:[%s23709_s11 + $0x40] sm:$0xff] }
 0x6d4   : > { %v11240_v43 = vrot.slane %v24169_v26, 5  ;;  %v24171_v14 = vsel %vm19706_vm11, %v22691_v9, %v22664_v33  ;;  %v11175_v40 = vsel %vm19706_vm11, %v22728_v55, %v22674_v16  ;;  %v11251_v13 = vor.u32 %v11250_v24, %v22762_v34 }
 0x6d5   : > { %17254 = vmatpush3.bf16.msra.mxu0 %v18521_v30  ;;  %v15451_v21 = vcombine.low %v24171_v14, %v24170_v31  ;;  %v11228_v30 = vrot.slane %v11227_v45, 4  ;;  %v24172_v19 = vsel %vm19706_vm11, %v22730_v44, %v22714_v46  ;;  %v11199_v33 = vsel %vm19706_vm11, %v22736_v51, %v22698_v7  ;;  %v11003_v46 = vld [vmem:[#allocation3 + $0x90] sm:$0xf] }
 0x6d6   : > { %17255 = vmatprep.subr.bf16.mxu0 %v18522_v29  ;;  %v15452_v3 = vcombine.low %v11175_v40, %v24172_v19  ;;  %v11209_v16 = vsel %vm19706_vm11, %v11204_v15, %v22732_v4  ;;  %v24173_v9 = vshll.u32 %v22459_v5, 16  ;;  %v11254_v45 = vshll.u32 %v22473_v32, 16  ;;  %v18524_v5 = vld [vmem:[#allocation4 + $0x170] sm:$0xff]  }
 0x6d7   : > { %v22982_v24 = vrot.slane %v11268_v2, 5  ;;  %v11274_v47 = vrot.slane %v11272_v50, 4  ;;  %v11218_v44 = vrot.slane %v11217_v36, 4  ;;  %v11241_v48 = vor.u32 %v11240_v43, %v11237_v58  ;;  %v11006_v50 = vld [vmem:[#allocation3 + $0x9c] sm:$0xf] }
 0x6d8   : > { %17224 = vmatmul.mubr.bf16.gmra.mrb[40].mxu0 %v15451_v21  ;;  %v11232_v55 = vrot.slane %v24173_v9, 5  ;;  %v11261_v62 = vrot.slane %v11259_v28, 4  ;;  %v11264_v7 = vrot.slane %v11262_v41, 5  ;;  %v15453_v51 = vcombine.low %v11199_v33, %v11209_v16 }
 0x6d9   : > { %17227 = vmatprep.mubr.bf16.mxu0 %v15452_v3  ;;  %17256 = vmatpush3.bf16.msra.mxu0 %v18522_v29  ;;  %v11252_v15 = vrot.slane %v11251_v13, 4  ;;  %v11283_v61 = vshrl.u32 %v11003_v46, 16  ;;  %v11286_v26 = vshll.u32 %v11003_v46, 16  ;;  %v11292_v32 = vshll.u32 %v22490_v17, 16  ;;  %v18525_v13 = vld [vmem:[#allocation4 + $0x178] sm:$0xff]  }
 0x6da   : > { %v11233_v4 = vsel %vm19706_vm11, %v11228_v30, %v11232_v55  ;;  %17257 = vmatprep.subr.bf16.mxu0 %v18523_v12  ;;  %v11296_v2 = vshrl.u32 %v22490_v17, 16  ;;  %v11256_v31 = vrot.slane %v11254_v45, 5  ;;  %v11275_v36 = vor.u32 %v11274_v47, %v22982_v24 }
 0x6db   : > { %v11316_v29 = vshll.u32 %v22512_v18, 16  ;;  %v11320_v58 = vshrl.u32 %v22512_v18, 16  ;;  %v11223_v43 = vsel %vm19706_vm11, %v11218_v44, %v22752_v53  ;;  %v11242_v28 = vrot.slane %v11241_v48, 4  ;;  %v11009_v44 = vld [vmem:[#allocation3 + $0xa8] sm:$0xf]  ;;  %v23004_v48 = vld [vmem:[#allocation4 + $0x180] sm:$0xff]  }
 0x6dc   : > { %v11265_v41 = vor.u32 %v11264_v7, %v11261_v62  ;;  %v11278_v14 = vshll.u32 %v22496_v54, 16  ;;  %v15454_v21 = vcombine.low %v11223_v43, %v11233_v4  ;;  %v11257_v17 = vsel %vm19706_vm11, %v11252_v15, %v11256_v31  ;;  %v18625_v43 = vld [vmem:[#allocation3 + $0xa4] sm:$0x1] }
 0x6dd   : > { %17258 = vmatpush3.bf16.msra.mxu0 %v18523_v12  ;;  %v11307_v40 = vshrl.u32 %v11006_v50, 16  ;;  %v11310_v30 = vshll.u32 %v11006_v50, 16  ;;  %v11285_v19 = vrot.slane %v11283_v61, 4  ;;  %v11288_v3 = vrot.slane %v11286_v26, 5  ;;  %v11012_v61 = vld [vmem:[#allocation3 + $0xb4] sm:$0xf] }
 0x6de   : > { %17259 = vmatprep.subr.bf16.mxu0 %v18524_v5  ;;  %v22997_v18 = vrot.slane %v11292_v32, 5  ;;  %v11298_v33 = vrot.slane %v11296_v2, 4  ;;  %v11276_v53 = vrot.slane %v11275_v36, 4  ;;  %v22999_v16 = vrot.slane %v11316_v29, 5  ;;  %v18624_v50 = vld [vmem:[#allocation3 + $0x98] sm:$0x1] }
 0x6df   : > { %v11322_v9 = vrot.slane %v11320_v58, 4  ;;  %v11247_v54 = vsel %vm19706_vm11, %v11242_v28, %v22762_v34  ;;  %v11266_v12 = vrot.slane %v11265_v41, 4  ;;  %v11280_v45 = vrot.slane %v11278_v14, 5 }
 0x6e0   : > { %17228 = vmatmul.mubr.bf16.gmra.mrb[44].mxu0 %v15453_v51  ;;  %v15455_v55 = vcombine.low %v11247_v54, %v11257_v17  ;;  %v11309_v47 = vrot.slane %v11307_v40, 4  ;;  %v11312_v46 = vrot.slane %v11310_v30, 5  ;;  %v11289_v62 = vor.u32 %v11288_v3, %v11285_v19  ;;  %v18623_v51 = vld [vmem:[#allocation3 + $0xac] sm:$0xf] }
 0x6e1   : > { %17231 = vmatprep.mubr.bf16.mxu0 %v15454_v21  ;;  %17260 = vmatpush3.bf16.msra.mxu0 %v18524_v5  ;;  %v11299_v7 = vor.u32 %v11298_v33, %v22997_v18  ;;  %v11340_v4 = vshll.u32 %v18623_v51, 16  ;;  %v11344_v15 = vshrl.u32 %v18623_v51, 16  ;;  %v11281_v34 = vsel %vm19706_vm11, %v11276_v53, %v11280_v45 }
 0x6e2   : > { %17261 = vmatprep.subr.bf16.mxu0 %v18525_v13  ;;  %v11323_v5 = vor.u32 %v11322_v9, %v22999_v16  ;;  %v11364_v26 = vshll.u32 %v22544_v52, 16  ;;  %v11368_v32 = vshrl.u32 %v22544_v52, 16  ;;  %v11271_v2 = vsel %vm19706_vm11, %v11266_v12, %v22982_v24 }
 0x6e3   : > { %v11302_v31 = vshll.u32 %v18624_v50, 16  ;;  %v11331_v36 = vshrl.u32 %v11009_v44, 16  ;;  %v11334_v29 = vshll.u32 %v11009_v44, 16  ;;  %v11313_v58 = vor.u32 %v11312_v46, %v11309_v47  ;;  %v11015_v47 = vld [vmem:[#allocation3 + $0xc0] sm:$0xf] }
 0x6e4   : > { %v11326_v28 = vshll.u32 %v18625_v43, 16  ;;  %v11355_v41 = vshrl.u32 %v11012_v61, 16  ;;  %v11358_v14 = vshll.u32 %v11012_v61, 16  ;;  %v15456_v21 = vcombine.low %v11271_v2, %v11281_v34  ;;  %v18627_v34 = vld [vmem:[#allocation3 + $0xb0] sm:$0x1] }
 0x6e5   : > { %17262 = vmatpush3.bf16.msra.mxu0 %v18525_v13  ;;  %v11300_v17 = vrot.slane %v11299_v7, 4  ;;  %v11342_v40 = vrot.slane %v11340_v4, 5  ;;  %v11346_v52 = vrot.slane %v11344_v15, 4  ;;  %v11290_v30 = vrot.slane %v11289_v62, 4  ;;  %v18626_v7 = vld [vmem:[#allocation3 + $0xc4] sm:$0xf] }
 0x6e6   : > { %17295 = vmatprep.subr.bf16.mxu0 %v23004_v48  ;;  %v11324_v19 = vrot.slane %v11323_v5, 4  ;;  %v11366_v24 = vrot.slane %v11364_v26, 5  ;;  %v11370_v3 = vrot.slane %v11368_v32, 4  ;;  %v11304_v33 = vrot.slane %v11302_v31, 5 }
 0x6e7   : > { %v11333_v53 = vrot.slane %v11331_v36, 4  ;;  %v11336_v13 = vrot.slane %v11334_v29, 5  ;;  %v11314_v9 = vrot.slane %v11313_v58, 4  ;;  %v11328_v54 = vrot.slane %v11326_v28, 5  ;;  %v18628_v36 = vld [vmem:[#allocation3 + $0xbc] sm:$0x1] }
 0x6e8   : > { %17232 = vmatmul.mubr.bf16.gmra.mrb[48].mxu0 %v15455_v55  ;;  %v11357_v12 = vrot.slane %v11355_v41, 4  ;;  %v11360_v45 = vrot.slane %v11358_v14, 5  ;;  %v11305_v46 = vsel %vm19706_vm11, %v11300_v17, %v11304_v33  ;;  %v11347_v44 = vor.u32 %v11346_v52, %v11342_v40 }
 0x6e9   : > { %17235 = vmatprep.mubr.bf16.mxu0 %v15456_v21  ;;  %v11388_v51 = vshll.u32 %v18626_v7, 16  ;;  %v11392_v55 = vshrl.u32 %v18626_v7, 16  ;;  %v11295_v62 = vsel %vm19706_vm11, %v11290_v30, %v22997_v18  ;;  %v11329_v4 = vsel %vm19706_vm11, %v11324_v19, %v11328_v54  ;;  %v18629_v54 = vld [vmem:[#allocation3 + $0xc8] sm:$0x1] }
 0x6ea   : > { %v11371_v15 = vor.u32 %v11370_v3, %v11366_v24  ;;  %v11337_v61 = vor.u32 %v11336_v13, %v11333_v53  ;;  %v11350_v5 = vshll.u32 %v18627_v34, 16  ;;  %v11379_v26 = vshrl.u32 %v11015_v47, 16  ;;  %v18630_v34 = vld [vmem:[#allocation3 + $0x1c] sm:$0xf] }
 0x6eb   : > { %v11382_v32 = vshll.u32 %v11015_v47, 16  ;;  %v15457_v2 = vcombine.low %v11295_v62, %v11305_v46  ;;  %v11319_v50 = vsel %vm19706_vm11, %v11314_v9, %v22999_v16  ;;  %v11361_v31 = vor.u32 %v11360_v45, %v11357_v12  ;;  %v11724_v62 = vld [vmem:[#allocation3 + $0xc] sm:$0xe] }
 0x6ec   : > { %v11374_v29 = vshll.u32 %v18628_v36, 16  ;;  %v15458_v58 = vcombine.low %v11319_v50, %v11329_v4  ;;  %v11348_v43 = vrot.slane %v11347_v44, 4  ;;  %v11390_v18 = vrot.slane %v11388_v51, 5  ;;  %v646_v4 = vld [vmem:[#allocation3 + $0xcc] sm:$0x1] }
 0x6ed   : > { %v11394_v28 = vrot.slane %v11392_v55, 4  ;;  %v11372_v41 = vrot.slane %v11371_v15, 4  ;;  %v11338_v14 = vrot.slane %v11337_v61, 4  ;;  %v11352_v21 = vrot.slane %v11350_v5, 5  ;;  %v11725_v36 = vld [vmem:[#allocation3 + $0x18] sm:$0xe] }
 0x6ee   : > { %v11381_v17 = vrot.slane %v11379_v26, 4  ;;  %v11384_v52 = vrot.slane %v11382_v32, 5  ;;  %v11362_v30 = vrot.slane %v11361_v31, 4  ;;  %v11376_v19 = vrot.slane %v11374_v29, 5  ;;  %v18631_v29 = vld [vmem:[#allocation3 + $0x20] sm:$0x1] }
 0x6ef   : > { %v11353_v3 = vsel %vm19706_vm11, %v11348_v43, %v11352_v21  ;;  %v11395_v16 = vor.u32 %v11394_v28, %v11390_v18  ;;  %v11790_v53 = vrot.slane %v22614_v42, 5  ;;  %v11343_v13 = vsel %vm19706_vm11, %v11338_v14, %v11342_v40  ;;  %v24175_v21 = vld [vmem:[#allocation15_spill] sm:$0xff] }
 0x6f0   : > { %17236 = vmatmul.mubr.bf16.gmra.mrb[52].mxu0 %v15457_v2  ;;  %v11377_v33 = vsel %vm19706_vm11, %v11372_v41, %v11376_v19  ;;  %v11385_v9 = vor.u32 %v11384_v52, %v11381_v17  ;;  %v11398_v12 = vshll.u32 %v18629_v54, 16  ;;  %v15459_v45 = vcombine.low %v11343_v13, %v11353_v3  ;;  %v24176_v17 = vld [vmem:[#allocation16_spill] sm:$0xff]  ;;  %v24178_v3 = vld [vmem:[#allocation17_spill] sm:$0xff]  ;;  %v24182_v13 = vld [vmem:[#allocation22_spill] sm:$0xff] }
 0x6f1   : > { %17239 = vmatprep.mubr.bf16.mxu0 %v15458_v58  ;;  %v11367_v47 = vsel %vm19706_vm11, %v11362_v30, %v11366_v24  ;;  %v11396_v44 = vrot.slane %v11395_v16, 4  ;;  %v11792_v7 = vrot.slane %v11790_v53, 4  ;;  %v11793_v42 = vrot.slane %v22618_v27, 5  ;;  %v18528_v30 = vld [vmem:[#allocation4 + $0x190] sm:$0xff]   ;;  %v18529_v19 = vld [vmem:[#allocation4 + $0x198] sm:$0xff]   ;;  %v18531_v54 = vld [vmem:[#allocation4 + $0x1a8] sm:$0xff]  }
 0x6f2   : > { %v15460_v46 = vcombine.low %v11367_v47, %v11377_v33  ;;  %v11386_v51 = vrot.slane %v11385_v9, 4  ;;  %v11400_v55 = vrot.slane %v11398_v12, 5  ;;  %v647_v40 = vsel %vm19575_vm6, 0, %v646_v4  ;;  %v24179_v16 = vld [vmem:[#allocation19_spill] sm:$0xff]  ;;  %v24191_v4 = vld [vmem:[#allocation29_spill] sm:$0xff] }
 0x6f3   : > { %v11797_v5 = vrot.slane %v18630_v34, 5  ;;  %648 = vst [vmem:[#allocation3 + $0xcc] sm:$0x1] %v647_v40  ;;  %v15470_v24 = vrot.slane %v11724_v62, 9  ;;  %v11794_v26 = vsel %vm20380_vm2, %v11792_v7, %v11793_v42  ;;  %v11800_v58 = vrot.slane %v18631_v29, 5  ;;  %v24184_v12 = vld [vmem:[#allocation23_spill] sm:$0xff] }
 0x6f4   : > { %v11401_v61 = vsel %vm19706_vm11, %v11396_v44, %v11400_v55  ;;  %v11391_v32 = vsel %vm19706_vm11, %v11386_v51, %v11390_v18  ;;  %v15471_v43 = vrot.slane %v11725_v36, 9  ;;  %v18527_v18 = vld [vmem:[#allocation4 + $0x188] sm:$0xff]   ;;  %v24177_v52 = vcombine.low %v24175_v21, %v24176_v17  ;;  %v18532_v51 = vld [vmem:[#allocation4 + $0x1b0] sm:$0xff]   ;;  %v18533_v55 = vld [vmem:[#allocation4 + $0x1b8] sm:$0xff]  }
 0x6f5   : > { %v15461_v2 = vcombine.low %v11391_v32, %v11401_v61  ;;  %v11791_v27 = vsel %vm20380_vm2, %v15470_v24, %v11790_v53  ;;  %v11799_v31 = vrot.slane %v11797_v5, 4  ;;  %v24180_v33 = vcombine.low %v24178_v3, %v24179_v16  ;;  %v24181_v53 = vld [vmem:[#allocation18_spill] sm:$0xff]  ;;  %v24190_v62 = vld [vmem:[#allocation28_spill] sm:$0xff]  ;;  %v24193_v15 = vld [vmem:[#allocation27_spill] sm:$0xff] }
 0x6f6   : > { %v15486_v50 = vcombine.low %v11791_v27, %v11794_v26  ;;  %v11798_v41 = vsel %vm20380_vm2, %v15471_v43, %v11797_v5  ;;  %v24183_v9 = vcombine.low %v24181_v53, %v24182_v13  ;;  %v24188_v44 = vld [vmem:[#allocation26_spill] sm:$0xff]  ;;  %v24192_v42 = vcombine.low %v24190_v62, %v24191_v4  ;;  %v18535_v34 = vld [vmem:[#allocation4 + $0x1c0] sm:$0xff]   ;;  %v24196_v5 = vld [vmem:[#allocation31_spill] sm:$0xff] }
 0x6f7   : > { %v11801_v28 = vsel %vm20380_vm2, %v11799_v31, %v11800_v58  ;;  %v24194_v40 = vld [vmem:[#allocation30_spill] sm:$0xff]  ;;  %v24197_v24 = vld [vmem:[#allocation32_spill] sm:$0xff]  ;;  %v24199_v32 = vld [vmem:[#allocation33_spill] sm:$0xff] }
 0x6f8   : > { %17240 = vmatmul.mubr.bf16.gmra.mrb[56].mxu0 %v15459_v45  ;;  %v15487_v14 = vcombine.low %v11798_v41, %v11801_v28  ;;  %v24185_v45 = vld [vmem:[#allocation24_spill] sm:$0xff]  ;;  %v24195_v61 = vcombine.low %v24193_v15, %v24194_v40  ;;  %v24198_v26 = vcombine.low %v24196_v5, %v24197_v24  ;;  %v24203_v31 = vld [vmem:[#allocation37_spill] sm:$0xff]  ;;  %v24206_v58 = vld [vmem:[#allocation38_spill] sm:$0xff] }
 0x6f9   : > { %17243 = vmatprep.mubr.bf16.mxu0 %v15460_v46  ;;  %v24186_v47 = vcombine.low %v24184_v12, %v24185_v45  ;;  %v24187_v46 = vld [vmem:[#allocation25_spill] sm:$0xff]  ;;  %v24205_v29 = vld [vmem:[#allocation36_spill] sm:$0xff]  ;;  %v24208_v28 = vld [vmem:[#allocation39_spill] sm:$0xff] }
 0x6fa   : > { %v24189_v7 = vcombine.low %v24187_v46, %v24188_v44  ;;  %v24207_v43 = vcombine.low %v24205_v29, %v24206_v58  ;;  %v24209_v41 = vld [vmem:[#allocation40_spill] sm:$0xff]  ;;  %v24212_v21 = vld [vmem:[#allocation42_spill] sm:$0xff]  ;;  %v24215_v16 = vld [vmem:[#allocation43_spill] sm:$0xff] }
 0x6fb   : > { %v18534_v3 = vld [vmem:[#allocation3 + $0x18] sm:$0xff]   ;;  %v18536_v13 = vld [vmem:[#allocation3 + $0x24] sm:$0xff]   ;;  %v18544_v45 = vld [vmem:[#allocation4 + $0x1d8] sm:$0xff]  }
 0x6fc   : > { %v18539_v12 = vld [vmem:[#allocation3 + $0x3c] sm:$0xff]   ;;  %v18542_v44 = vld [vmem:[#allocation3 + $0x54] sm:$0xff]   ;;  %v18545_v62 = vld [vmem:[#allocation3 + $0x6c] sm:$0xff]  }
 0x6fd   : > { %v18547_v46 = vld [vmem:[#allocation4 + $0x1e0] sm:$0xff]   ;;  %v18556_v4 = vld [vmem:[#allocation4 + $0x1f8] sm:$0xff]  }
 0x6fe   : > { %v12609_v15 = vld [vmem:[#allocation3 + $0x18] sm:$0xf] }
 0x6ff   : > { %v23095_v40 = vld [vmem:[#allocation4 + $0x200] sm:$0xff]   ;;  %v12658_v24 = vshrl.u32 %v12609_v15, 16 }
 0x700   : > { %17244 = vmatmul.mubr.bf16.gmra.mrb[60].mxu0 %v15461_v2  ;;  %v24200_v2 = vld [vmem:[#allocation34_spill] sm:$0xff] }
 0x701   : > { %17263 = vmatprep.mubr.bf16.mxu0 %v15486_v50  ;;  %v24201_v27 = vcombine.low %v24199_v32, %v24200_v2  ;;  %v24202_v50 = vld [vmem:[#allocation35_spill] sm:$0xff] }
 0x702   : > { %v24204_v36 = vcombine.low %v24202_v50, %v24203_v31  ;;  %v18548_v32 = vld [vmem:[#allocation3 + $0x84] sm:$0xff]   ;;  %v18549_v2 = vld [vmem:[#allocation3 + $0x90] sm:$0xff]  }
 0x703   : > { %v12612_v31 = vld [vmem:[#allocation3 + $0x24] sm:$0xf] }
 0x704   : > { %v12682_v58 = vshrl.u32 %v12612_v31, 16 }
 0x708   : > { %17264 = vmatmul.mubr.bf16.vlgmr.msra.gmra.mrb[32].mxu0 %v15487_v14  ;;  %v24210_v14 = vcombine.low %v24208_v28, %v24209_v41  ;;  %v12685_v28 = vshll.u32 %v12612_v31, 16  ;;  %v24219_v41 = vld [vmem:[#allocation47_spill] sm:$0xff] }
 0x709   : > { %17296 = vmatpush3.bf16.msra.mxu0 %v23004_v48  ;;  %17267 = vmatprep.mubr.bf16.mxu0 %v24177_v52  ;;  %v18530_v48 = vld [vmem:[#allocation4 + $0x1a0] sm:$0xff]   ;;  %v700_v52 = vld [vmem:[#allocation3 + $0xd4] sm:$0x1] }
 0x70a   : > { %17297 = vmatprep.subr.bf16.mxu0 %v18527_v18 }
 0x70d   : > { %17298 = vmatpush3.bf16.msra.mxu0 %v18527_v18  ;;  %v24211_v18 = vld [vmem:[#allocation41_spill] sm:$0xff] }
 0x70e   : > { %17299 = vmatprep.subr.bf16.mxu0 %v18528_v30  ;;  %v24213_v17 = vcombine.low %v24211_v18, %v24212_v21  ;;  %v12695_v18 = vshrl.u32 %v24219_v41, 16  ;;  %v12615_v21 = vld [vmem:[#allocation3 + $0x30] sm:$0xf] }
 0x710   : > { %17268 = vmatmul.mubr.bf16.gmra.mrb[36].mxu0 %v24180_v33  ;;  %v24216_v33 = vld [vmem:[#allocation44_spill] sm:$0xff] }
 0x711   : > { %17271 = vmatprep.mubr.bf16.mxu0 %v24183_v9  ;;  %17300 = vmatpush3.bf16.msra.mxu0 %v18528_v30  ;;  %v24217_v53 = vcombine.low %v24215_v16, %v24216_v33  ;;  %v18538_v9 = vld [vmem:[#allocation4 + $0x1c8] sm:$0xff]   ;;  %v18552_v16 = vld [vmem:[#allocation3 + $0xa8] sm:$0xff]  }
 0x712   : > { %17301 = vmatprep.subr.bf16.mxu0 %v18529_v19 }
 0x715   : > { %17302 = vmatpush3.bf16.msra.mxu0 %v18529_v19  ;;  %v701_v19 = vsel %vm19583_vm8, 0, %v700_v52  ;;  %v24220_v52 = vld [vmem:[#allocation45_spill] sm:$0xff] }
 0x716   : > { %17303 = vmatprep.subr.bf16.mxu0 %v18530_v48  ;;  %702 = vst [vmem:[#allocation3 + $0xd4] sm:$0x1] %v701_v19  ;;  %v12677_v30 = vshll.u32 %v24220_v52, 16  ;;  %v18551_v19 = vld [vmem:[#allocation3 + $0x9c] sm:$0xff]  }
 0x718   : > { %17272 = vmatmul.mubr.bf16.gmra.mrb[40].mxu0 %v24186_v47  ;;  %v18540_v47 = vld [vmem:[#allocation3 + $0x48] sm:$0xff]  }
 0x719   : > { %17275 = vmatprep.mubr.bf16.mxu0 %v24189_v7  ;;  %17304 = vmatpush3.bf16.msra.mxu0 %v18530_v48  ;;  %v18537_v48 = vld [vmem:[#allocation3 + $0x30] sm:$0xff]   ;;  %v18550_v7 = vld [vmem:[#allocation4 + $0x1e8] sm:$0xff]  }
 0x71a   : > { %17305 = vmatprep.subr.bf16.mxu0 %v18531_v54 }
 0x71d   : > { %17306 = vmatpush3.bf16.msra.mxu0 %v18531_v54  ;;  %v18541_v54 = vld [vmem:[#allocation4 + $0x1d0] sm:$0xff]  }
 0x71e   : > { %17307 = vmatprep.subr.bf16.mxu0 %v18532_v51 }
 0x720   : > { %17276 = vmatmul.mubr.bf16.gmra.mrb[44].mxu0 %v24192_v42  ;;  %v18546_v42 = vld [vmem:[#allocation3 + $0x78] sm:$0xff]  }
 0x721   : > { %17279 = vmatprep.mubr.bf16.mxu0 %v24195_v61  ;;  %17308 = vmatpush3.bf16.msra.mxu0 %v18532_v51  ;;  %v18543_v51 = vld [vmem:[#allocation3 + $0x60] sm:$0xff]  }
 0x722   : > { %17309 = vmatprep.subr.bf16.mxu0 %v18533_v55  ;;  %v24218_v61 = vld [vmem:[#allocation46_spill] sm:$0xff] }
 0x723   : > { %v12671_v5 = vshrl.u32 %v24218_v61, 16 }
 0x725   : > { %17310 = vmatpush3.bf16.msra.mxu0 %v18533_v55  ;;  %v18553_v55 = vld [vmem:[#allocation4 + $0x1f0] sm:$0xff]   ;;  %v12673_v50 = vrot.slane %v12671_v5, 4 }
 0x726   : > { %17343 = vmatprep.subr.bf16.mxu0 %v18535_v34 }
 0x728   : > { %17280 = vmatmul.mubr.bf16.gmra.mrb[48].mxu0 %v24198_v26  ;;  %v12661_v26 = vshll.u32 %v12609_v15, 16 }
 0x729   : > { %17283 = vmatprep.mubr.bf16.mxu0 %v24201_v27 }
 0x72a   : > { %v12663_v29 = vrot.slane %v12661_v26, 5 }
 0x730   : > { %17284 = vmatmul.mubr.bf16.gmra.mrb[52].mxu0 %v24204_v36  ;;  %v12660_v36 = vrot.slane %v12658_v24, 4 }
 0x731   : > { %17287 = vmatprep.mubr.bf16.mxu0 %v24207_v43 }
 0x738   : > { %17288 = vmatmul.mubr.bf16.gmra.mrb[56].mxu0 %v24210_v14  ;;  %v12691_v14 = vshll.u32 %v24219_v41, 16  ;;  %v24224_v41 = vld [vmem:[#allocation50_spill] sm:$0xff] }
 0x739   : > { %17291 = vmatprep.mubr.bf16.mxu0 %v24213_v17  ;;  %v12664_v17 = vor.u32 %v12663_v29, %v12660_v36  ;;  %v12621_v36 = vld [vmem:[#allocation3 + $0x48] sm:$0xf]  ;;  %v18555_v29 = vld [vmem:[#allocation3 + $0xc0] sm:$0xff]  }
 0x740   : > { %17292 = vmatmul.mubr.bf16.gmra.mrb[60].mxu0 %v24217_v53  ;;  %v12687_v53 = vrot.slane %v12685_v28, 5 }
 0x741   : > { %17311 = vmatprep.mubr.bf16.mxu0 %v18534_v3  ;;  %v12684_v3 = vrot.slane %v12682_v58, 4 }
 0x748   : > { %17312 = vmatmul.mubr.bf16.vlgmr.msra.gmra.mrb[32].mxu0 %v18536_v13  ;;  %v23103_v13 = vrot.slane %v12691_v14, 5  ;;  %v12739_v14 = vshll.u32 %v24224_v41, 16 }
 0x749   : > { %17344 = vmatpush3.bf16.msra.mxu0 %v18535_v34  ;;  %17315 = vmatprep.mubr.bf16.mxu0 %v18537_v48  ;;  %v12667_v34 = vshll.u32 %v24218_v61, 16  ;;  %v12697_v48 = vrot.slane %v12695_v18, 4  ;;  %v12743_v18 = vshrl.u32 %v24224_v41, 16  ;;  %v18632_v41 = vld [vmem:[#allocation3 + $0x44] sm:$0x1] }
 0x74a   : > { %17345 = vmatprep.subr.bf16.mxu0 %v18538_v9 }
 0x74b   : > { %v12669_v27 = vrot.slane %v12667_v34, 5  ;;  %v12698_v15 = vor.u32 %v12697_v48, %v23103_v13 }
 0x74d   : > { %17346 = vmatpush3.bf16.msra.mxu0 %v18538_v9  ;;  %v12674_v43 = vor.u32 %v12673_v50, %v12669_v27  ;;  %v12706_v9 = vshrl.u32 %v12615_v21, 16 }
 0x74e   : > { %17347 = vmatprep.subr.bf16.mxu0 %v18541_v54 }
 0x74f   : > { %v12675_v33 = vrot.slane %v12674_v43, 4  ;;  %v24223_v43 = vld [vmem:[#allocation51_spill] sm:$0xff] }
 0x750   : > { %17316 = vmatmul.mubr.bf16.gmra.mrb[36].mxu0 %v18539_v12  ;;  %v24221_v12 = vld [vmem:[#allocation48_spill] sm:$0xff]  ;;  %v12725_v28 = vshll.u32 %v24223_v43, 16 }
 0x751   : > { %17319 = vmatprep.mubr.bf16.mxu0 %v18540_v47  ;;  %17348 = vmatpush3.bf16.msra.mxu0 %v18541_v54  ;;  %v12709_v54 = vshll.u32 %v12615_v21, 16  ;;  %v12719_v47 = vshrl.u32 %v24221_v12, 16  ;;  %v12699_v21 = vrot.slane %v12698_v15, 4 }
 0x752   : > { %17349 = vmatprep.subr.bf16.mxu0 %v18544_v45 }
 0x753   : > { %v12711_v61 = vrot.slane %v12709_v54, 5  ;;  %v12721_v5 = vrot.slane %v12719_v47, 4  ;;  %v12624_v54 = vld [vmem:[#allocation3 + $0x54] sm:$0xf] }
 0x755   : > { %17350 = vmatpush3.bf16.msra.mxu0 %v18544_v45  ;;  %v12715_v45 = vshll.u32 %v24221_v12, 16  ;;  %v12787_v12 = vshll.u32 %v22780_v6, 16 }
 0x756   : > { %17351 = vmatprep.subr.bf16.mxu0 %v18547_v46 }
 0x757   : > { %v23111_v34 = vrot.slane %v12715_v45, 5  ;;  %v12791_v45 = vshrl.u32 %v22780_v6, 16 }
 0x758   : > { %17320 = vmatmul.mubr.bf16.gmra.mrb[40].mxu0 %v18542_v44  ;;  %v12679_v44 = vrot.slane %v12677_v30, 5  ;;  %v23120_v30 = vld [vmem:[#allocation3 + $0xd0] sm:$0xf] }
 0x759   : > { %17323 = vmatprep.mubr.bf16.mxu0 %v18543_v51  ;;  %17352 = vmatpush3.bf16.msra.mxu0 %v18547_v46  ;;  %v12665_v46 = vrot.slane %v12664_v17, 4  ;;  %v12722_v52 = vor.u32 %v12721_v5, %v23111_v34  ;;  %v12781_v5 = vshll.u32 %v12624_v54, 16 }
 0x75a   : > { %17353 = vmatprep.subr.bf16.mxu0 %v18550_v7 }
 0x75b   : > { %v12670_v24 = vsel %vm19706_vm11, %v12665_v46, %v12669_v27  ;;  %v12763_v27 = vshll.u32 %v22764_v37, 16  ;;  %v23129_v46 = vrot.slane %v12739_v14, 5  ;;  %v12749_v14 = vshll.u32 %v18632_v41, 16 }
 0x75d   : > { %17354 = vmatpush3.bf16.msra.mxu0 %v18550_v7  ;;  %v24222_v7 = vld [vmem:[#allocation49_spill] sm:$0xff] }
 0x75e   : > { %17355 = vmatprep.subr.bf16.mxu0 %v18553_v55  ;;  %v12701_v51 = vshll.u32 %v24222_v7, 16  ;;  %v12754_v7 = vshrl.u32 %v12621_v36, 16 }
 0x760   : > { %17324 = vmatmul.mubr.bf16.gmra.mrb[44].mxu0 %v18545_v62  ;;  %v12680_v62 = vsel %vm19706_vm11, %v12675_v33, %v12679_v44  ;;  %v12703_v50 = vrot.slane %v12701_v51, 5  ;;  %v13378_v33 = vld [vmem:[#allocation3 + $0xcc] sm:$0xe]  ;;  %v12745_v44 = vrot.slane %v12743_v18, 4 }
 0x761   : > { %17327 = vmatprep.mubr.bf16.mxu0 %v18546_v42  ;;  %17356 = vmatpush3.bf16.msra.mxu0 %v18553_v55  ;;  %v12618_v55 = vld [vmem:[#allocation3 + $0x3c] sm:$0xf]  ;;  %v12708_v42 = vrot.slane %v12706_v9, 4  ;;  %v15573_v47 = vrot.slane %v13378_v33, 9 }
 0x762   : > { %17357 = vmatprep.subr.bf16.mxu0 %v18556_v4  ;;  %v12730_v26 = vshrl.u32 %v12618_v55, 16  ;;  %v12733_v31 = vshll.u32 %v12618_v55, 16  ;;  %v18557_v55 = vld [vmem:[#allocation3 + $0xcc] sm:$0xff]  }
 0x763   : > { %v12712_v17 = vor.u32 %v12711_v61, %v12708_v42  ;;  %v12778_v61 = vshrl.u32 %v12624_v54, 16  ;;  %v18633_v54 = vld [vmem:[#allocation3 + $0x50] sm:$0x1] }
 0x764   : > { %v12735_v48 = vrot.slane %v12733_v31, 5 }
 0x765   : > { %17358 = vmatpush3.bf16.msra.mxu0 %v18556_v4  ;;  %v12688_v4 = vor.u32 %v12687_v53, %v12684_v3  ;;  %v12732_v3 = vrot.slane %v12730_v26, 4  ;;  %v13534_v53 = vrot.slane %v23120_v30, 5  ;;  %v23141_v26 = vrot.slane %v12787_v12, 5 }
 0x766   : > { %17391 = vmatprep.subr.bf16.mxu0 %v23095_v40  ;;  %v12713_v43 = vrot.slane %v12712_v17, 4  ;;  %v12805_v17 = vshll.u32 %v12627_v57, 16 }
 0x767   : > { %v12689_v58 = vrot.slane %v12688_v4, 4  ;;  %v13536_v51 = vrot.slane %v13534_v53, 4  ;;  %v23131_v4 = vrot.slane %v12763_v27, 5  ;;  %v23135_v42 = vsel %vm20380_vm2, %v15573_v47, %v13534_v53 }
 0x768   : > { %17328 = vmatmul.mubr.bf16.gmra.mrb[48].mxu0 %v18548_v32  ;;  %v18554_v32 = vld [vmem:[#allocation3 + $0xb4] sm:$0xff]   ;;  %v12736_v18 = vor.u32 %v12735_v48, %v12732_v3  ;;  %v12756_v27 = vrot.slane %v12754_v7, 4  ;;  %v12773_v3 = vshll.u32 %v18633_v54, 16  ;;  %v24225_v48 = vld [vmem:[#allocation55_spill] sm:$0xff]  ;;  %v12751_v7 = vrot.slane %v12749_v14, 5 }
 0x769   : > { %17331 = vmatprep.mubr.bf16.mxu0 %v18549_v2  ;;  %v15534_v2 = vcombine.low %v12670_v24, %v12680_v62  ;;  %v12723_v62 = vrot.slane %v12722_v52, 4  ;;  %v12727_v24 = vrot.slane %v12725_v28, 5  ;;  %v12746_v52 = vor.u32 %v12745_v44, %v23129_v46 }
 0x76a   : > { %v12811_v12 = vshll.u32 %v24225_v48, 16  ;;  %v12737_v44 = vrot.slane %v12736_v18, 4  ;;  %v18635_v18 = vld [vmem:[#allocation3 + $0x70] sm:$0xf] }
 0x76b   : > { %v12728_v28 = vsel %vm19706_vm11, %v12723_v62, %v12727_v24  ;;  %v12747_v62 = vrot.slane %v12746_v52, 4  ;;  %v12835_v52 = vshll.u32 %v18635_v18, 16 }
 0x76c   : > { %v12742_v14 = vsel %vm19706_vm11, %v12737_v44, %v23129_v46 }
 0x770   : > { %17332 = vmatmul.mubr.bf16.gmra.mrb[52].mxu0 %v18551_v19  ;;  %v23122_v19 = vld [vmem:[#allocation3 + $0xd4] sm:$0x1] }
 0x771   : > { %17335 = vmatprep.mubr.bf16.mxu0 %v18552_v16  ;;  %v12767_v16 = vshrl.u32 %v22764_v37, 16  ;;  %v13537_v9 = vrot.slane %v23122_v19, 5  ;;  %v12757_v37 = vshll.u32 %v12621_v36, 16  ;;  %v12694_v36 = vsel %vm19706_vm11, %v12689_v58, %v23103_v13 }
 0x772   : > { %v12780_v13 = vrot.slane %v12778_v61, 4  ;;  %v12783_v58 = vrot.slane %v12781_v5, 5  ;;  %v18559_v5 = vld [vmem:[#allocation4 + $0x208] sm:$0xff]  }
 0x773   : > { %v12769_v15 = vrot.slane %v12767_v16, 4  ;;  %v23139_v6 = vsel %vm20380_vm2, %v13536_v51, %v13537_v9  ;;  %v12759_v16 = vrot.slane %v12757_v37, 5  ;;  %v12718_v9 = vsel %vm19706_vm11, %v12713_v43, %v23111_v34  ;;  %v18634_v51 = vld [vmem:[#allocation3 + $0x5c] sm:$0x1] }
 0x774   : > { %v15589_v31 = vcombine.low %v23135_v42, %v23139_v6  ;;  %v15536_v47 = vcombine.low %v12718_v9, %v12728_v28  ;;  %v12784_v61 = vor.u32 %v12783_v58, %v12780_v13  ;;  %v12807_v34 = vrot.slane %v12805_v17, 5  ;;  %v18636_v17 = vld [vmem:[#allocation3 + $0x68] sm:$0x1]  ;;  %v13864_v6 = vld [vmem:[#allocation2 + $0x18] sm:$0xf] }
 0x775   : > { %v12770_v33 = vor.u32 %v12769_v15, %v23131_v4  ;;  %v12760_v37 = vor.u32 %v12759_v16, %v12756_v27  ;;  %v23160_v43 = vrot.slane %v12811_v12, 5  ;;  %v12839_v27 = vshrl.u32 %v18635_v18, 16  ;;  %v12633_v16 = vld [vmem:[#allocation3 + $0x78] sm:$0xf] }
 0x776   : > { %v12821_v9 = vshll.u32 %v18636_v17, 16  ;;  %v12853_v12 = vshll.u32 %v12633_v16, 16 }
 0x777   : > { %v12771_v15 = vrot.slane %v12770_v33, 4  ;;  %v12752_v33 = vsel %vm19706_vm11, %v12747_v62, %v12751_v7  ;;  %v12761_v13 = vrot.slane %v12760_v37, 4 }
 0x778   : > { %17336 = vmatmul.mubr.bf16.gmra.mrb[56].mxu0 %v18554_v32  ;;  %v12793_v32 = vrot.slane %v12791_v45, 4  ;;  %v12630_v45 = vld [vmem:[#allocation3 + $0x6c] sm:$0xf] }
 0x779   : > { %17339 = vmatprep.mubr.bf16.mxu0 %v18555_v29  ;;  %v12704_v29 = vsel %vm19706_vm11, %v12699_v21, %v12703_v50  ;;  %v12802_v21 = vshrl.u32 %v12627_v57, 16  ;;  %v12829_v57 = vshll.u32 %v12630_v45, 16 }
 0x77a   : > { %v15535_v53 = vcombine.low %v12694_v36, %v12704_v29  ;;  %v12794_v50 = vor.u32 %v12793_v32, %v23141_v26  ;;  %v12826_v36 = vshrl.u32 %v12630_v45, 16  ;;  %v12775_v29 = vrot.slane %v12773_v3, 5 }
 0x77b   : > { %v12804_v32 = vrot.slane %v12802_v21, 4  ;;  %v12831_v3 = vrot.slane %v12829_v57, 5  ;;  %v12841_v45 = vrot.slane %v12839_v27, 4 }
 0x77c   : > { %v12795_v24 = vrot.slane %v12794_v50, 4  ;;  %v12776_v58 = vsel %vm19706_vm11, %v12771_v15, %v12775_v29  ;;  %v18560_v50 = vld [vmem:[#allocation4 + $0x210] sm:$0xff]   ;;  %v12828_v54 = vrot.slane %v12826_v36, 4  ;;  %v18638_v29 = vld [vmem:[#allocation3 + $0x74] sm:$0x1] }
 0x77d   : > { %v12808_v21 = vor.u32 %v12807_v34, %v12804_v32  ;;  %v18561_v32 = vld [vmem:[#allocation4 + $0x218] sm:$0xff]   ;;  %v12636_v34 = vld [vmem:[#allocation3 + $0x84] sm:$0xf] }
 0x77e   : > { %v12832_v36 = vor.u32 %v12831_v3, %v12828_v54  ;;  %v12877_v27 = vshll.u32 %v12636_v34, 16 }
 0x780   : > { %17340 = vmatmul.mubr.bf16.gmra.mrb[60].mxu0 %v18557_v55  ;;  %v12797_v55 = vshll.u32 %v18634_v51, 16  ;;  %v15537_v51 = vcombine.low %v12742_v14, %v12752_v33  ;;  %v12639_v14 = vld [vmem:[#allocation3 + $0x90] sm:$0xf] }
 0x781   : > { %17359 = vmatprep.mubr.bf16.mxu0 %v15534_v2  ;;  %v12815_v2 = vshrl.u32 %v24225_v48, 16  ;;  %v12850_v48 = vshrl.u32 %v12633_v16, 16  ;;  %v18639_v16 = vld [vmem:[#allocation3 + $0x88] sm:$0xf] }
 0x782   : > { %v12799_v28 = vrot.slane %v12797_v55, 5  ;;  %v12766_v55 = vsel %vm19706_vm11, %v12761_v13, %v23131_v4  ;;  %v12883_v33 = vshll.u32 %v18639_v16, 16  ;;  %v12887_v13 = vshrl.u32 %v18639_v16, 16 }
 0x783   : > { %v12817_v41 = vrot.slane %v12815_v2, 4  ;;  %v23173_v2 = vrot.slane %v12835_v52, 5  ;;  %v15538_v37 = vcombine.low %v12766_v55, %v12776_v58  ;;  %v12852_v57 = vrot.slane %v12850_v48, 4  ;;  %v18562_v58 = vld [vmem:[#allocation4 + $0x220] sm:$0xff]  }
 0x784   : > { %v12800_v46 = vsel %vm19706_vm11, %v12795_v24, %v12799_v28  ;;  %v12823_v24 = vrot.slane %v12821_v9, 5  ;;  %v12874_v52 = vshrl.u32 %v12636_v34, 16  ;;  %v23190_v55 = vrot.slane %v12883_v33, 5 }
 0x785   : > { %v12842_v4 = vor.u32 %v12841_v45, %v23173_v2 }
 0x788   : > { %17360 = vmatmul.mubr.bf16.vlgmr.msra.gmra.mrb[32].mxu0 %v15535_v53  ;;  %v12785_v53 = vrot.slane %v12784_v61, 4  ;;  %v12809_v61 = vrot.slane %v12808_v21, 4  ;;  %v18640_v21 = vld [vmem:[#allocation3 + $0x94] sm:$0xf] }
 0x789   : > { %17392 = vmatpush3.bf16.msra.mxu0 %v23095_v40  ;;  %17363 = vmatprep.mubr.bf16.mxu0 %v15536_v47  ;;  %v12818_v40 = vor.u32 %v12817_v41, %v23160_v43  ;;  %v18637_v47 = vld [vmem:[#allocation3 + $0x7c] sm:$0xf]  ;;  %v12845_v41 = vshll.u32 %v18638_v29, 16  ;;  %v12907_v17 = vshll.u32 %v18640_v21, 16  ;;  %v12911_v9 = vshrl.u32 %v18640_v21, 16  ;;  %v18563_v29 = vld [vmem:[#allocation4 + $0x228] sm:$0xff]  }
 0x78a   : > { %17393 = vmatprep.subr.bf16.mxu0 %v18559_v5  ;;  %v12859_v44 = vshll.u32 %v18637_v47, 16  ;;  %v12863_v7 = vshrl.u32 %v18637_v47, 16  ;;  %v12790_v62 = vsel %vm19706_vm11, %v12785_v53, %v23141_v26  ;;  %v12898_v53 = vshrl.u32 %v12639_v14, 16  ;;  %v18641_v47 = vld [vmem:[#allocation3 + $0x80] sm:$0x1] }
 0x78b   : > { %v15539_v15 = vcombine.low %v12790_v62, %v12800_v46  ;;  %v12819_v28 = vrot.slane %v12818_v40, 4  ;;  %v12901_v46 = vshll.u32 %v12639_v14, 16  ;;  %v12814_v54 = vsel %vm19706_vm11, %v12809_v61, %v23160_v43 }
 0x78c   : > { %v23182_v18 = vrot.slane %v12859_v44, 5  ;;  %v12865_v26 = vrot.slane %v12863_v7, 4  ;;  %v12833_v40 = vrot.slane %v12832_v36, 4  ;;  %v12847_v3 = vrot.slane %v12845_v41, 5 }
 0x78d   : > { %17394 = vmatpush3.bf16.msra.mxu0 %v18559_v5  ;;  %v12855_v5 = vrot.slane %v12853_v12, 5  ;;  %v12843_v12 = vrot.slane %v12842_v4, 4  ;;  %v12869_v44 = vshll.u32 %v18641_v47, 16  ;;  %v12876_v7 = vrot.slane %v12874_v52, 4 }
 0x78e   : > { %17395 = vmatprep.subr.bf16.mxu0 %v18560_v50  ;;  %v12866_v45 = vor.u32 %v12865_v26, %v23182_v18  ;;  %v12889_v62 = vrot.slane %v12887_v13, 4  ;;  %v12900_v43 = vrot.slane %v12898_v53, 4  ;;  %v12903_v61 = vrot.slane %v12901_v46, 5  ;;  %v18564_v13 = vld [vmem:[#allocation4 + $0x230] sm:$0xff]   ;;  %v18643_v46 = vld [vmem:[#allocation3 + $0xa0] sm:$0xf] }
 0x78f   : > { %v12856_v48 = vor.u32 %v12855_v5, %v12852_v57  ;;  %v23192_v34 = vrot.slane %v12907_v17, 5  ;;  %v12913_v36 = vrot.slane %v12911_v9, 4  ;;  %v12848_v57 = vsel %vm19706_vm11, %v12843_v12, %v12847_v3  ;;  %v12645_v9 = vld [vmem:[#allocation3 + $0xa8] sm:$0xf]  ;;  %v18645_v3 = vld [vmem:[#allocation3 + $0xac] sm:$0xf] }
 0x790   : > { %17364 = vmatmul.mubr.bf16.gmra.mrb[36].mxu0 %v15537_v51  ;;  %v12879_v51 = vrot.slane %v12877_v27, 5  ;;  %v12867_v5 = vrot.slane %v12866_v45, 4  ;;  %v12871_v52 = vrot.slane %v12869_v44, 5  ;;  %v18642_v27 = vld [vmem:[#allocation3 + $0x8c] sm:$0x1]  ;;  %v12904_v33 = vor.u32 %v12903_v61, %v12900_v43 }
 0x791   : > { %17367 = vmatprep.mubr.bf16.mxu0 %v15538_v37  ;;  %17396 = vmatpush3.bf16.msra.mxu0 %v18560_v50  ;;  %v12824_v50 = vsel %vm19706_vm11, %v12819_v28, %v12823_v24  ;;  %v12642_v37 = vld [vmem:[#allocation3 + $0x9c] sm:$0xf]  ;;  %v12857_v41 = vrot.slane %v12856_v48, 4  ;;  %v12890_v28 = vor.u32 %v12889_v62, %v23190_v55  ;;  %v12893_v16 = vshll.u32 %v18642_v27, 16 }
 0x792   : > { %17397 = vmatprep.subr.bf16.mxu0 %v18561_v32  ;;  %v15540_v24 = vcombine.low %v12814_v54, %v12824_v50  ;;  %v12880_v14 = vor.u32 %v12879_v51, %v12876_v7  ;;  %v12922_v4 = vshrl.u32 %v12642_v37, 16  ;;  %v12925_v26 = vshll.u32 %v12642_v37, 16  ;;  %v18644_v54 = vld [vmem:[#allocation3 + $0x98] sm:$0x1]  ;;  %v18565_v37 = vld [vmem:[#allocation4 + $0x238] sm:$0xff]  }
 0x793   : > { %v12862_v53 = vsel %vm19706_vm11, %v12857_v41, %v23182_v18  ;;  %v12931_v21 = vshll.u32 %v18643_v46, 16  ;;  %v12935_v17 = vshrl.u32 %v18643_v46, 16  ;;  %v12955_v48 = vshll.u32 %v18645_v3, 16 }
 0x794   : > { %v12959_v50 = vshrl.u32 %v18645_v3, 16  ;;  %v12881_v12 = vrot.slane %v12880_v14, 4  ;;  %v12891_v45 = vrot.slane %v12890_v28, 4  ;;  %v12924_v47 = vrot.slane %v12922_v4, 4  ;;  %v18646_v4 = vld [vmem:[#allocation3 + $0xa4] sm:$0x1] }
 0x795   : > { %17398 = vmatpush3.bf16.msra.mxu0 %v18561_v32  ;;  %v12838_v32 = vsel %vm19706_vm11, %v12833_v40, %v23173_v2  ;;  %v12917_v40 = vshll.u32 %v18644_v54, 16  ;;  %v12927_v44 = vrot.slane %v12925_v26, 5  ;;  %v12905_v7 = vrot.slane %v12904_v33, 4 }
 0x796   : > { %17399 = vmatprep.subr.bf16.mxu0 %v18562_v58  ;;  %v15541_v2 = vcombine.low %v12838_v32, %v12848_v57  ;;  %v12946_v18 = vshrl.u32 %v12645_v9, 16  ;;  %v12949_v62 = vshll.u32 %v12645_v9, 16  ;;  %v12895_v61 = vrot.slane %v12893_v16, 5  ;;  %v18648_v9 = vld [vmem:[#allocation3 + $0xc4] sm:$0xf] }
 0x797   : > { %v12919_v41 = vrot.slane %v12917_v40, 5  ;;  %v23208_v32 = vrot.slane %v12955_v48, 5  ;;  %v12961_v57 = vrot.slane %v12959_v50, 4  ;;  %v12928_v28 = vor.u32 %v12927_v44, %v12924_v47 }
 0x798   : > { %17368 = vmatmul.mubr.bf16.gmra.mrb[40].mxu0 %v15539_v15  ;;  %v12914_v15 = vor.u32 %v12913_v36, %v23192_v34  ;;  %v23206_v36 = vrot.slane %v12931_v21, 5  ;;  %v12896_v14 = vsel %vm19706_vm11, %v12891_v45, %v12895_v61  ;;  %v12941_v26 = vshll.u32 %v18646_v4, 16  ;;  %v12651_v21 = vld [vmem:[#allocation3 + $0xc0] sm:$0xf] }
 0x799   : > { %17371 = vmatprep.mubr.bf16.mxu0 %v15540_v24  ;;  %17400 = vmatpush3.bf16.msra.mxu0 %v18562_v58  ;;  %v12872_v58 = vsel %vm19706_vm11, %v12867_v5, %v12871_v52  ;;  %v12937_v24 = vrot.slane %v12935_v17, 4  ;;  %v12648_v5 = vld [vmem:[#allocation3 + $0xb4] sm:$0xf]  ;;  %v12910_v52 = vsel %vm19706_vm11, %v12905_v7, %v23192_v34  ;;  %v12948_v16 = vrot.slane %v12946_v18, 4  ;;  %v12654_v7 = vld [vmem:[#allocation3 + $0xcc] sm:$0xf] }
 0x79a   : > { %17401 = vmatprep.subr.bf16.mxu0 %v18563_v29  ;;  %v12915_v51 = vrot.slane %v12914_v15, 4  ;;  %v15542_v43 = vcombine.low %v12862_v53, %v12872_v58  ;;  %v12951_v33 = vrot.slane %v12949_v62, 5  ;;  %v12962_v17 = vor.u32 %v12961_v57, %v23208_v32 }
 0x79b   : > { %v12938_v15 = vor.u32 %v12937_v24, %v23206_v36  ;;  %v13003_v58 = vshll.u32 %v18648_v9, 16  ;;  %v13007_v54 = vshrl.u32 %v18648_v9, 16  ;;  %v12929_v3 = vrot.slane %v12928_v28, 4 }
 0x79c   : > { %v12920_v27 = vsel %vm19706_vm11, %v12915_v51, %v12919_v41  ;;  %v12943_v48 = vrot.slane %v12941_v26, 5  ;;  %v12952_v50 = vor.u32 %v12951_v33, %v12948_v16  ;;  %v12994_v47 = vshrl.u32 %v12651_v21, 16 }
 0x79d   : > { %17402 = vmatpush3.bf16.msra.mxu0 %v18563_v29  ;;  %v12886_v29 = vsel %vm19706_vm11, %v12881_v12, %v23190_v55  ;;  %v12970_v55 = vshrl.u32 %v12648_v5, 16  ;;  %v15544_v40 = vcombine.low %v12910_v52, %v12920_v27  ;;  %v18649_v12 = vld [vmem:[#allocation3 + $0xb0] sm:$0x1]  ;;  %v12997_v44 = vshll.u32 %v12651_v21, 16 }
 0x79e   : > { %17403 = vmatprep.subr.bf16.mxu0 %v18564_v13  ;;  %v15543_v34 = vcombine.low %v12886_v29, %v12896_v14  ;;  %v12965_v45 = vshll.u32 %v18649_v12, 16  ;;  %v12939_v51 = vrot.slane %v12938_v15, 4  ;;  %v12963_v61 = vrot.slane %v12962_v17, 4 }
 0x79f   : > { %v12972_v18 = vrot.slane %v12970_v55, 4  ;;  %v13005_v41 = vrot.slane %v13003_v58, 5  ;;  %v13009_v57 = vrot.slane %v13007_v54, 4  ;;  %v13021_v29 = vshll.u32 %v12654_v7, 16  ;;  %v18651_v54 = vld [vmem:[#allocation3 + $0xc8] sm:$0x1] }
 0x7a0   : > { %17372 = vmatmul.mubr.bf16.gmra.mrb[44].mxu0 %v15541_v2  ;;  %v18647_v2 = vld [vmem:[#allocation3 + $0xb8] sm:$0xf]  ;;  %v13031_v14 = vshrl.u32 %v23120_v30, 16  ;;  %v12953_v28 = vrot.slane %v12952_v50, 4  ;;  %v12967_v4 = vrot.slane %v12965_v45, 5  ;;  %v12996_v26 = vrot.slane %v12994_v47, 4 }
 0x7a1   : > { %17375 = vmatprep.mubr.bf16.mxu0 %v15542_v43  ;;  %17404 = vmatpush3.bf16.msra.mxu0 %v18564_v13  ;;  %v12979_v53 = vshll.u32 %v18647_v2, 16  ;;  %v12983_v46 = vshrl.u32 %v18647_v2, 16  ;;  %v12973_v13 = vshll.u32 %v12648_v5, 16  ;;  %v13018_v5 = vshrl.u32 %v12654_v7, 16  ;;  %v18650_v2 = vld [vmem:[#allocation3 + $0xbc] sm:$0x1] }
 0x7a2   : > { %17405 = vmatprep.subr.bf16.mxu0 %v18565_v37  ;;  %v12999_v52 = vrot.slane %v12997_v44, 5  ;;  %v12934_v27 = vsel %vm19706_vm11, %v12929_v3, %v23206_v36  ;;  %v12944_v16 = vsel %vm19706_vm11, %v12939_v51, %v12943_v48  ;;  %v12968_v15 = vsel %vm19706_vm11, %v12963_v61, %v12967_v4  ;;  %v24226_v4 = vld [vmem:[#allocation56_spill] sm:$0xff] }
 0x7a3   : > { %v12981_v62 = vrot.slane %v12979_v53, 5  ;;  %v12985_v43 = vrot.slane %v12983_v46, 4  ;;  %v12975_v24 = vrot.slane %v12973_v13, 5  ;;  %v12989_v53 = vshll.u32 %v18650_v2, 16  ;;  %v24236_v2 = vld [vmem:[#allocation60_spill] sm:$0xff] }
 0x7a4   : > { %v13010_v46 = vor.u32 %v13009_v57, %v13005_v41  ;;  %v13023_v21 = vrot.slane %v13021_v29, 5  ;;  %v13033_v13 = vrot.slane %v13031_v14, 4  ;;  %v15545_v9 = vcombine.low %v12934_v27, %v12944_v16  ;;  %v24230_v27 = vld [vmem:[#allocation52_spill] sm:$0xff] }
 0x7a5   : > { %17406 = vmatpush3.bf16.msra.mxu0 %v18565_v37  ;;  %v13027_v37 = vshll.u32 %v23120_v30, 16  ;;  %v12986_v33 = vor.u32 %v12985_v43, %v12981_v62  ;;  %v12976_v55 = vor.u32 %v12975_v24, %v12972_v18  ;;  %v13020_v30 = vrot.slane %v13018_v5, 4 }
 0x7a6   : > { %v12958_v36 = vsel %vm19706_vm11, %v12953_v28, %v23208_v32  ;;  %v13000_v58 = vor.u32 %v12999_v52, %v12996_v26  ;;  %v12991_v48 = vrot.slane %v12989_v53, 5  ;;  %v13011_v50 = vrot.slane %v13010_v46, 4  ;;  %v24229_v52 = vld [vmem:[#allocation59_spill] sm:$0xff]  ;;  %v24238_v46 = vld [vmem:[#allocation61_spill] sm:$0xff] }
 0x7a7   : > { %v13029_v17 = vrot.slane %v13027_v37, 5  ;;  %v12987_v3 = vrot.slane %v12986_v33, 4  ;;  %v12977_v12 = vrot.slane %v12976_v55, 4  ;;  %v13024_v45 = vor.u32 %v13023_v21, %v13020_v30  ;;  %v24233_v33 = vld [vmem:[#allocation57_spill] sm:$0xff]  ;;  %v24235_v55 = vld [vmem:[#allocation58_spill] sm:$0xff] }
 0x7a8   : > { %17376 = vmatmul.mubr.bf16.gmra.mrb[48].mxu0 %v15543_v34  ;;  %v13013_v34 = vshll.u32 %v18651_v54, 16  ;;  %v13037_v44 = vshll.u32 %v23122_v19, 16  ;;  %v13001_v7 = vrot.slane %v13000_v58, 4  ;;  %v24231_v16 = vcombine.low %v24229_v52, %v24230_v27  ;;  %v24239_v30 = vld [vmem:[#allocation62_spill] sm:$0xff]  ;;  %v24245_v58 = vld [vmem:[#allocation65_spill] sm:$0xff] }
 0x7a9   : > { %17379 = vmatprep.mubr.bf16.mxu0 %v15544_v40  ;;  %v15546_v40 = vcombine.low %v12958_v36, %v12968_v15  ;;  %v13034_v47 = vor.u32 %v13033_v13, %v13029_v17  ;;  %v12992_v18 = vsel %vm19706_vm11, %v12987_v3, %v12991_v48  ;;  %v12982_v43 = vsel %vm19706_vm11, %v12977_v12, %v12981_v62  ;;  %v24227_v62 = vld [vmem:[#allocation54_spill] sm:$0xff]  ;;  %v24244_v36 = vld [vmem:[#allocation64_spill] sm:$0xff] }
 0x7aa   : > { %v13015_v51 = vrot.slane %v13013_v34, 5  ;;  %v13025_v61 = vrot.slane %v13024_v45, 4  ;;  %v13039_v57 = vrot.slane %v13037_v44, 5  ;;  %v15547_v5 = vcombine.low %v12982_v43, %v12992_v18  ;;  %v24247_v34 = vld [vmem:[#allocation67_spill] sm:$0xff]  ;;  %v24249_v3 = vld [vmem:[#allocation66_spill] sm:$0xff]  ;;  %v24250_v48 = vld [vmem:[#allocation68_spill] sm:$0xff] }
 0x7ab   : > { %v13035_v24 = vrot.slane %v13034_v47, 4  ;;  %v13006_v29 = vsel %vm19706_vm11, %v13001_v7, %v13005_v41  ;;  %v24228_v26 = vcombine.low %v24226_v4, %v24227_v62  ;;  %v24232_v41 = vld [vmem:[#allocation53_spill] sm:$0xff]  ;;  %v24237_v53 = vcombine.low %v24235_v55, %v24236_v2  ;;  %v24252_v12 = vld [vmem:[#allocation20_spill] sm:$0xff] }
 0x7ac   : > { %v13016_v32 = vsel %vm19706_vm11, %v13011_v50, %v13015_v51  ;;  %v13030_v19 = vsel %vm19706_vm11, %v13025_v61, %v13029_v17  ;;  %v24234_v15 = vcombine.low %v24232_v41, %v24233_v33  ;;  %v24240_v21 = vcombine.low %v24238_v46, %v24239_v30  ;;  %v24241_v17 = vld [vmem:[#allocation63_spill] sm:$0xff]  ;;  %v24253_v45 = vld [vmem:[#allocation21_spill] sm:$0xff]  ;;  %v13861_v7 = vld [vmem:[#allocation2 + $0xc] sm:$0xf] }
 0x7ad   : > { %v15548_v37 = vcombine.low %v13006_v29, %v13016_v32  ;;  %v13040_v14 = vsel %vm19706_vm11, %v13035_v24, %v13039_v57  ;;  %v24242_v13 = vcombine.low %v22832_v20, %v24241_v17  ;;  %v24246_v54 = vcombine.low %v24244_v36, %v24245_v58  ;;  %v13862_v51 = vld [vmem:[#allocation2 + $0x10] sm:$0xf]  ;;  %v14551_v62 = vld [vmem:[%s23709_s11 + $0x68] sm:$0xff]  ;;  %v13867_v33 = vld [vmem:[#allocation2 + $0x24] sm:$0xf] }
 0x7ae   : > { %v15549_v28 = vcombine.low %v13030_v19, %v13040_v14  ;;  %v24251_v50 = vcombine.low %v24249_v3, %v24250_v48  ;;  %v24254_v20 = vcombine.low %v24252_v12, %v24253_v45  ;;  %v13934_v47 = vshrl.u32 %v13864_v6, 16  ;;  %v14549_v19 = vld [vmem:[%s23709_s11 + $0x58] sm:$0xff]  ;;  %v14550_v14 = vld [vmem:[%s23709_s11 + $0x60] sm:$0xff]  ;;  %v14552_v17 = vld [vmem:[%s23709_s11 + $0x70] sm:$0xff] }
 0x7af   : > { %v13937_v44 = vshll.u32 %v13864_v6, 16  ;;  %v13910_v24 = vshrl.u32 %v13861_v7, 16  ;;  %v13913_v57 = vshll.u32 %v13861_v7, 16  ;;  %v13923_v29 = vshrl.u32 %v13862_v51, 16 }
 0x7b0   : > { %17380 = vmatmul.mubr.bf16.gmra.mrb[52].mxu0 %v15545_v9  ;;  %v24243_v9 = vcombine.low %v22844_v49, %v22848_v35  ;;  %v14538_v49 = vld [vmem:[%s23709_s11] sm:$0xff]  ;;  %v14539_v35 = vld [vmem:[%s23709_s11 + $0x8] sm:$0xff]  ;;  %v13936_v32 = vrot.slane %v13934_v47, 4  ;;  %v17493_v46 = vpack.c.bf16 %v14551_v62, %v14550_v14  ;;  %v13958_v36 = vshrl.u32 %v13867_v33, 16 }
 0x7b1   : > { %17383 = vmatprep.mubr.bf16.mxu0 %v15546_v40  ;;  %v24248_v40 = vcombine.low %v22865_v25, %v24247_v34  ;;  %v18753_v25 = vmov 0.0|0.0   ;;  %v17475_v23 = vpack.c.bf16 %v14539_v35, %v14538_v49  ;;  %v13939_v43 = vrot.slane %v13937_v44, 5  ;;  %v13869_v62 = vld [vmem:[#allocation2 + $0x2c] sm:$0x1] }
 0x7b2   : > { %17474 = vmatprep.subr.bf16.mxu1 %v18753_v25  ;;  %v13925_v2 = vrot.slane %v13923_v29, 4  ;;  %v13961_v58 = vshll.u32 %v13867_v33, 16 }
 0x7b3   : > { %17476 = vmatpush3.bf16.msra.mxu1 %v17475_v23  ;;  %v13940_v52 = vor.u32 %v13939_v43, %v13936_v32 }
 0x7b4   : > { %17477 = vmatprep.subr.bf16.mxu1 %v18753_v25 }
 0x7b8   : > { %17384 = vmatmul.mubr.bf16.gmra.mrb[56].mxu0 %v15547_v5  ;;  %v13919_v5 = vshll.u32 %v13862_v51, 16 }
 0x7b9   : > { %17387 = vmatprep.mubr.bf16.mxu0 %v15548_v37  ;;  %v14548_v37 = vld [vmem:[%s23709_s11 + $0x50] sm:$0xff] }
 0x7ba   : > { %v17490_v4 = vpack.c.bf16 %v14549_v19, %v14548_v37  ;;  %v23343_v55 = vrot.slane %v13919_v5, 5 }
 0x7bc   : > { %v13926_v45 = vor.u32 %v13925_v2, %v23343_v55 }
 0x7be   : > { %v13927_v6 = vrot.slane %v13926_v45, 4 }
 0x7c0   : > { %17388 = vmatmul.mubr.bf16.gmra.mrb[60].mxu0 %v15549_v28  ;;  %v13870_v28 = vld [vmem:[#allocation2 + $0x30] sm:$0xf] }
 0x7c1   : > { %17407 = vmatprep.mubr.bf16.mxu0 %v24228_v26  ;;  %v18755_v26 = vmov 0.0   ;;  %v13982_v30 = vshrl.u32 %v13870_v28, 16 }
 0x7c2   : > { %17471 = vmatprep.mubr.msk.f32.mxu1 %vm18754_vm3, %v18755_v26 }
 0x7c3   : > { %v13984_v49 = vrot.slane %v13982_v30, 4  ;;  %v13977_v30 = vshll.u32 %v13869_v62, 16 }
 0x7c8   : > { %17408 = vmatmul.mubr.bf16.vlgmr.msra.gmra.mrb[32].mxu0 %v24231_v16  ;;  %v13912_v16 = vrot.slane %v13910_v24, 4 }
 0x7c9   : > { %17411 = vmatprep.mubr.bf16.mxu0 %v24234_v15  ;;  %v13915_v15 = vrot.slane %v13913_v57, 5 }
 0x7cb   : > { %v13916_v12 = vor.u32 %v13915_v15, %v13912_v16 }
 0x7d0   : > { %17412 = vmatmul.mubr.bf16.gmra.mrb[36].mxu0 %v24237_v53  ;;  %v13871_v53 = vld [vmem:[#allocation2 + $0x34] sm:$0xf] }
 0x7d1   : > { %17415 = vmatprep.mubr.bf16.mxu0 %v24240_v21  ;;  %v13985_v21 = vshll.u32 %v13870_v28, 16  ;;  %v13991_v3 = vshll.u32 %v13871_v53, 16  ;;  %v13995_v48 = vshrl.u32 %v13871_v53, 16 }
 0x7d3   : > { %v13987_v35 = vrot.slane %v13985_v21, 5 }
 0x7d8   : > { %17416 = vmatmul.mubr.bf16.gmra.mrb[40].mxu0 %v24242_v13  ;;  %v14553_v13 = vld [vmem:[%s23709_s11 + $0x78] sm:$0xff] }
 0x7d9   : > { %17419 = vmatprep.mubr.bf16.mxu0 %v24243_v9  ;;  %v13868_v9 = vld [vmem:[#allocation2 + $0x28] sm:$0xf] }
 0x7da   : > { %v13967_v23 = vshll.u32 %v13868_v9, 16 }
 0x7dc   : > { %v13969_v47 = vrot.slane %v13967_v23, 5  ;;  %v13979_v23 = vrot.slane %v13977_v30, 5 }
 0x7e0   : > { %17420 = vmatmul.mubr.bf16.gmra.mrb[44].mxu0 %v24246_v54  ;;  %v13866_v54 = vld [vmem:[#allocation2 + $0x20] sm:$0x1] }
 0x7e1   : > { %17423 = vmatprep.mubr.bf16.mxu0 %v24248_v40  ;;  %v13863_v40 = vld [vmem:[#allocation2 + $0x14] sm:$0x1] }
 0x7e8   : > { %17424 = vmatmul.mubr.bf16.gmra.mrb[48].mxu0 %v24251_v50  ;;  %v13941_v50 = vrot.slane %v13940_v52, 4  ;;  %v13874_v52 = vld [vmem:[#allocation2 + $0x40] sm:$0xf] }
 0x7e9   : > { %17427 = vmatprep.mubr.bf16.mxu0 %v24254_v20  ;;  %v17496_v20 = vpack.c.bf16 %v14553_v13, %v14552_v17  ;;  %v14015_v21 = vshll.u32 %v13874_v52, 16  ;;  %v14019_v17 = vshrl.u32 %v13874_v52, 16  ;;  %v13882_v13 = vld [vmem:[#allocation2 + $0x60] sm:$0xf] }
 0x7f0   : > { %17428 = vmatmul.mubr.bf16.gmra.mrb[52].mxu0 %v15585_v0  ;;  %v14541_v0 = vld [vmem:[%s23709_s11 + $0x18] sm:$0xff] }
 0x7f1   : > { %17431 = vmatprep.mubr.bf16.mxu0 %v15586_v39  ;;  %v17478_v8 = vpack.c.bf16 %v14541_v0, %v14540_v59  ;;  %v17481_v39 = vpack.c.bf16 %v14543_v56, %v14542_v38  ;;  %v13971_v59 = vshrl.u32 %v13868_v9, 16  ;;  %v13953_v0 = vshll.u32 %v13866_v54, 16 }
 0x7f2   : > { %v13960_v38 = vrot.slane %v13958_v36, 4  ;;  %v13963_v56 = vrot.slane %v13961_v58, 5 }
 0x7f3   : > { %17479 = vmatpush3.bf16.msra.mxu1 %v17478_v8  ;;  %v13929_v8 = vshll.u32 %v13863_v40, 16  ;;  %v13973_v44 = vrot.slane %v13971_v59, 4  ;;  %v23383_v59 = vrot.slane %v14015_v21, 5  ;;  %v13884_v21 = vld [vmem:[#allocation2 + $0x68] sm:$0x1] }
 0x7f4   : > { %17480 = vmatprep.subr.bf16.mxu1 %v18753_v25  ;;  %v13964_v51 = vor.u32 %v13963_v56, %v13960_v38  ;;  %v14081_v38 = vshll.u32 %v13882_v13, 16 }
 0x7f5   : > { %v13931_v7 = vrot.slane %v13929_v8, 5  ;;  %v13974_v26 = vor.u32 %v13973_v44, %v13969_v47  ;;  %v14021_v8 = vrot.slane %v14019_v17, 4 }
 0x7f7   : > { %17482 = vmatpush3.bf16.msra.mxu1 %v17481_v39  ;;  %v23354_v39 = vrot.slane %v13991_v3, 5  ;;  %v13932_v14 = vsel %vm19706_vm11, %v13927_v6, %v13931_v7  ;;  %v13975_v40 = vrot.slane %v13974_v26, 4 }
 0x7f8   : > { %17432 = vmatmul.mubr.bf16.gmra.mrb[56].mxu0 %v15587_v1  ;;  %17483 = vmatprep.subr.bf16.mxu1 %v18753_v25  ;;  %v14545_v1 = vld [vmem:[%s23709_s11 + $0x38] sm:$0xff]  ;;  %v23372_v36 = vunpack.c.l.bf16 %v13932_v14 }
 0x7f9   : > { %17435 = vmatprep.mubr.bf16.mxu0 %v15588_v60  ;;  %v17484_v63 = vpack.c.bf16 %v14545_v1, %v14544_v10  ;;  %v14547_v60 = vld [vmem:[%s23709_s11 + $0x48] sm:$0xff]  ;;  %v13997_v10 = vrot.slane %v13995_v48, 4 }
 0x7fa   : > { %v17487_v42 = vpack.c.bf16 %v14547_v60, %v14546_v11  ;;  %v13876_v1 = vld [vmem:[#allocation2 + $0x48] sm:$0xf]  ;;  %v13917_v11 = vrot.slane %v13916_v12, 4 }
 0x7fb   : > { %17485 = vmatpush3.bf16.msra.mxu1 %v17484_v63  ;;  %v14030_v32 = vshrl.u32 %v13876_v1, 16  ;;  %v13998_v43 = vor.u32 %v13997_v10, %v23354_v39  ;;  %v14033_v24 = vshll.u32 %v13876_v1, 16 }
 0x7fc   : > { %17486 = vmatprep.subr.bf16.mxu1 %v18753_v25  ;;  %v13922_v37 = vsel %vm19706_vm11, %v13917_v11, %v23343_v55 }
 0x7fd   : > { %v14032_v16 = vrot.slane %v14030_v32, 4  ;;  %v13999_v15 = vrot.slane %v13998_v43, 4  ;;  %v14035_v2 = vrot.slane %v14033_v24, 5  ;;  %v23370_v9 = vunpack.c.l.bf16 %v13922_v37 }
 0x7fe   : > { %v14083_v32 = vrot.slane %v14081_v38, 5 }
 0x7ff   : > { %17488 = vmatpush3.bf16.msra.mxu1 %v17487_v42  ;;  %v13873_v42 = vld [vmem:[#allocation2 + $0x3c] sm:$0xf]  ;;  %v14036_v45 = vor.u32 %v14035_v2, %v14032_v16 }
 0x800   : > { %17436 = vmatmul.mubr.bf16.gmra.mrb[60].mxu0 %v15589_v31  ;;  %17489 = vmatprep.subr.bf16.mxu1 %v18753_v25  ;;  %v13865_v31 = vld [vmem:[#allocation2 + $0x1c] sm:$0xf]  ;;  %v14006_v57 = vshrl.u32 %v13873_v42, 16  ;;  %v14009_v5 = vshll.u32 %v13873_v42, 16 }
 0x801   : > { %v13943_v18 = vshll.u32 %v13865_v31, 16  ;;  %v13947_v61 = vshrl.u32 %v13865_v31, 16  ;;  %v13988_v31 = vor.u32 %v13987_v35, %v13984_v49  ;;  %v13878_v49 = vld [vmem:[#allocation2 + $0x50] sm:$0x1]  ;;  %v14078_v35 = vshrl.u32 %v13882_v13, 16 }
 0x802   : > { %v14008_v53 = vrot.slane %v14006_v57, 4  ;;  %v14049_v6 = vshll.u32 %v13878_v49, 16  ;;  %v13894_v49 = vld [vmem:[#allocation2 + $0x90] sm:$0xf] }
 0x803   : > { %v13945_v27 = vrot.slane %v13943_v18, 5  ;;  %v13949_v41 = vrot.slane %v13947_v61, 4  ;;  %17491 = vmatpush3.bf16.msra.mxu1 %v17490_v4  ;;  %v13872_v18 = vld [vmem:[#allocation2 + $0x38] sm:$0x1]  ;;  %v13877_v61 = vld [vmem:[#allocation2 + $0x4c] sm:$0xf] }
 0x804   : > { %17492 = vmatprep.subr.bf16.mxu1 %v18753_v25  ;;  %v13989_v28 = vrot.slane %v13988_v31, 4  ;;  %v14001_v4 = vshll.u32 %v13872_v18, 16  ;;  %v14043_v33 = vshrl.u32 %v13877_v61, 16  ;;  %v13880_v31 = vld [vmem:[#allocation2 + $0x58] sm:$0xf]  ;;  %v14080_v7 = vrot.slane %v14078_v35, 4 }
 0x805   : > { %v13950_v34 = vor.u32 %v13949_v41, %v13945_v27  ;;  %v13946_v63 = vsel %vm19706_vm11, %v13941_v50, %v13945_v27  ;;  %v13965_v27 = vrot.slane %v13964_v51, 4  ;;  %v14039_v41 = vshll.u32 %v13877_v61, 16  ;;  %v13883_v50 = vld [vmem:[#allocation2 + $0x64] sm:$0xf]  ;;  %v13888_v51 = vld [vmem:[#allocation2 + $0x78] sm:$0xf] }
 0x806   : > { %v23359_v29 = vunpack.c.l.bf16 %v13946_v63  ;;  %v13994_v58 = vsel %vm19706_vm11, %v13989_v28, %v23354_v39  ;;  %v14003_v54 = vrot.slane %v14001_v4, 5  ;;  %v14045_v48 = vrot.slane %v14043_v33, 4  ;;  %v13879_v63 = vld [vmem:[#allocation2 + $0x54] sm:$0xf]  ;;  %v13889_v28 = vld [vmem:[#allocation2 + $0x7c] sm:$0xf] }
 0x807   : > { %17494 = vmatpush3.bf16.msra.mxu1 %v17493_v46  ;;  %v13951_v60 = vrot.slane %v13950_v34, 4  ;;  %v14011_v46 = vrot.slane %v14009_v5, 5  ;;  %v13970_v34 = vsel %vm19706_vm11, %v13965_v27, %v13969_v47  ;;  %v23379_v3 = vrot.slane %v14039_v41, 5  ;;  %v13885_v41 = vld [vmem:[#allocation2 + $0x6c] sm:$0xf] }
 0x808   : > { %17495 = vmatprep.subr.bf16.mxu1 %v18753_v25  ;;  %v13955_v25 = vrot.slane %v13953_v0, 5  ;;  %v14004_v12 = vsel %vm19706_vm11, %v13999_v15, %v14003_v54  ;;  %v13875_v0 = vld [vmem:[#allocation2 + $0x44] sm:$0x1]  ;;  %v23385_v56 = vunpack.c.l.bf16 %v13994_v58  ;;  %v23387_v39 = vunpack.c.l.bf16 %v13970_v34  ;;  %v13881_v34 = vld [vmem:[#allocation2 + $0x5c] sm:$0x1] }
 0x809   : > { %v14087_v10 = vshll.u32 %v13883_v50, 16  ;;  %v14091_v1 = vshrl.u32 %v13883_v50, 16  ;;  %v23389_v11 = vunpack.c.l.bf16 %v14004_v12  ;;  %v14046_v42 = vor.u32 %v14045_v48, %v23379_v3 }
 0x80a   : > { %v13956_v19 = vsel %vm19706_vm11, %v13951_v60, %v13955_v25  ;;  %v13980_v60 = vsel %vm19706_vm11, %v13975_v40, %v13979_v23  ;;  %v14037_v47 = vrot.slane %v14036_v45, 4  ;;  %v14025_v25 = vshll.u32 %v13875_v0, 16 }
 0x80b   : > { %17497 = vmatpush3.bf16.msra.mxu1 %v17496_v20  ;;  %v23368_v55 = vunpack.c.l.bf16 %v13956_v19  ;;  %v14012_v20 = vor.u32 %v14011_v46, %v14008_v53  ;;  %v14022_v18 = vor.u32 %v14021_v8, %v23383_v59  ;;  %v14054_v43 = vshrl.u32 %v13879_v63, 16  ;;  %v13886_v46 = vld [vmem:[#allocation2 + $0x70] sm:$0xf] }
 0x80c   : > { %v14057_v61 = vshll.u32 %v13879_v63, 16  ;;  %v23395_v24 = vrot.slane %v14087_v10, 5  ;;  %v14063_v57 = vshll.u32 %v13880_v31, 16  ;;  %v14067_v5 = vshrl.u32 %v13880_v31, 16 }
 0x80d   : > { %v14013_v44 = vrot.slane %v14012_v20, 4  ;;  %v14093_v37 = vrot.slane %v14091_v1, 4  ;;  %v23397_v19 = vunpack.c.l.bf16 %v13980_v60  ;;  %v14047_v14 = vrot.slane %v14046_v42, 4 }
 0x80e   : > { %v14126_v4 = vshrl.u32 %v13888_v51, 16  ;;  %v14129_v62 = vshll.u32 %v13888_v51, 16  ;;  %v14042_v26 = vsel %vm19706_vm11, %v14037_v47, %v23379_v3  ;;  %v14051_v27 = vrot.slane %v14049_v6, 5 }
 0x80f   : > { %v14018_v52 = vsel %vm19706_vm11, %v14013_v44, %v23383_v59  ;;  %v14027_v16 = vrot.slane %v14025_v25, 5  ;;  %v14023_v33 = vrot.slane %v14022_v18, 4  ;;  %v14084_v15 = vor.u32 %v14083_v32, %v14080_v7 }
 0x810   : > { %v14056_v2 = vrot.slane %v14054_v43, 4  ;;  %v14059_v53 = vrot.slane %v14057_v61, 5  ;;  %v23405_v30 = vrot.slane %v14063_v57, 5  ;;  %v14094_v17 = vor.u32 %v14093_v37, %v23395_v24  ;;  %v13890_v43 = vld [vmem:[#allocation2 + $0x80] sm:$0x1] }
 0x811   : > { %v14069_v13 = vrot.slane %v14067_v5, 4  ;;  %v14135_v58 = vshll.u32 %v13889_v28, 16  ;;  %v14052_v54 = vsel %vm19706_vm11, %v14047_v14, %v14051_v27  ;;  %v14128_v40 = vrot.slane %v14126_v4, 4  ;;  %v13887_v14 = vld [vmem:[#allocation2 + $0x74] sm:$0x1] }
 0x812   : > { %v14131_v3 = vrot.slane %v14129_v62, 5  ;;  %v14102_v48 = vshrl.u32 %v13885_v41, 16  ;;  %v14139_v50 = vshrl.u32 %v13889_v28, 16  ;;  %v14105_v12 = vshll.u32 %v13885_v41, 16  ;;  %v13891_v28 = vld [vmem:[#allocation2 + $0x84] sm:$0xf] }
 0x813   : > { %v14111_v45 = vshll.u32 %v13886_v46, 16  ;;  %v14115_v20 = vshrl.u32 %v13886_v46, 16  ;;  %v14028_v35 = vsel %vm19706_vm11, %v14023_v33, %v14027_v16  ;;  %v14085_v23 = vrot.slane %v14084_v15, 4 }
 0x814   : > { %v14060_v59 = vor.u32 %v14059_v53, %v14056_v2  ;;  %v14097_v0 = vshll.u32 %v13884_v21, 16  ;;  %v14095_v8 = vrot.slane %v14094_v17, 4  ;;  %v14070_v38 = vor.u32 %v14069_v13, %v23405_v30 }
 0x815   : > { %v14073_v10 = vshll.u32 %v13881_v34, 16  ;;  %v14137_v1 = vrot.slane %v14135_v58, 5  ;;  %v14132_v63 = vor.u32 %v14131_v3, %v14128_v40  ;;  %v14104_v60 = vrot.slane %v14102_v48, 4 }
 0x816   : > { %v14174_v42 = vshrl.u32 %v13894_v49, 16  ;;  %v14177_v6 = vshll.u32 %v13894_v49, 16  ;;  %v14107_v31 = vrot.slane %v14105_v12, 5  ;;  %v23413_v47 = vrot.slane %v14111_v45, 5 }
 0x817   : > { %v14141_v44 = vrot.slane %v14139_v50, 4  ;;  %v14117_v25 = vrot.slane %v14115_v20, 4  ;;  %v23415_v7 = vunpack.c.l.bf16 %v14042_v26  ;;  %v23417_v51 = vunpack.c.l.bf16 %v14018_v52  ;;  %v13895_v26 = vld [vmem:[#allocation2 + $0x94] sm:$0xf] }
 0x818   : > { %v23419_v18 = vunpack.c.l.bf16 %v14052_v54  ;;  %v14061_v32 = vrot.slane %v14060_v59, 4  ;;  %v23421_v61 = vunpack.c.l.bf16 %v14028_v35  ;;  %v14090_v57 = vsel %vm19706_vm11, %v14085_v23, %v23395_v24  ;;  %v13892_v54 = vld [vmem:[#allocation2 + $0x88] sm:$0xf] }
 0x819   : > { %v14099_v5 = vrot.slane %v14097_v0, 5  ;;  %v14071_v37 = vrot.slane %v14070_v38, 4  ;;  %v14075_v4 = vrot.slane %v14073_v10, 5  ;;  %v14133_v62 = vrot.slane %v14132_v63, 4  ;;  %v13896_v0 = vld [vmem:[#allocation2 + $0x98] sm:$0x1] }
 0x81a   : > { %v14176_v27 = vrot.slane %v14174_v42, 4  ;;  %v14179_v52 = vrot.slane %v14177_v6, 5  ;;  %v14108_v41 = vor.u32 %v14107_v31, %v14104_v60  ;;  %v14142_v33 = vor.u32 %v14141_v44, %v14137_v1 }
 0x81b   : > { %v14100_v16 = vsel %vm19706_vm11, %v14095_v8, %v14099_v5  ;;  %v14118_v15 = vor.u32 %v14117_v25, %v23413_v47  ;;  %v23429_v2 = vunpack.c.l.bf16 %v14090_v57  ;;  %v14066_v24 = vsel %vm19706_vm11, %v14061_v32, %v23405_v30  ;;  %v23443_v30 = vld [vmem:[%s23706_s8] ss:$0 sm:$0xff]  ;;  %v13893_v32 = vld [vmem:[#allocation2 + $0x8c] sm:$0x1] }
 0x81c   : > { %v14150_v53 = vshrl.u32 %v13891_v28, 16  ;;  %v14153_v46 = vshll.u32 %v13891_v28, 16  ;;  %v14076_v21 = vsel %vm19706_vm11, %v14071_v37, %v14075_v4  ;;  %v14145_v17 = vshll.u32 %v13890_v43, 16  ;;  %v23452_v8 = vld [vmem:[%s23707_s9] ss:$0 sm:$0xff] }
 0x81d   : > { %v14121_v13 = vshll.u32 %v13887_v14, 16  ;;  %v14183_v58 = vshll.u32 %v13895_v26, 16  ;;  %v23436_v34 = vunpack.c.l.bf16 %v14100_v16  ;;  %v14138_v40 = vsel %vm19706_vm11, %v14133_v62, %v14137_v1 }
 0x81e   : > { %v14180_v3 = vor.u32 %v14179_v52, %v14176_v27  ;;  %v14187_v48 = vshrl.u32 %v13895_v26, 16  ;;  %v23445_v50 = vunpack.c.l.bf16 %v14066_v24  ;;  %v14109_v12 = vrot.slane %v14108_v41, 4  ;;  %v13900_v52 = vld [vmem:[#allocation2 + $0xa8] sm:$0xf] }
 0x81f   : > { %v14143_v45 = vrot.slane %v14142_v33, 4  ;;  %v14119_v20 = vrot.slane %v14118_v15, 4  ;;  %v23447_v49 = vunpack.c.l.bf16 %v14076_v21  ;;  %v14152_v35 = vrot.slane %v14150_v53, 4 }
 0x820   : > { %v14155_v23 = vrot.slane %v14153_v46, 5  ;;  %v14159_v59 = vshll.u32 %v13892_v54, 16  ;;  %v23454_v10 = vunpack.c.l.bf16 %v14138_v40  ;;  %v14147_v1 = vrot.slane %v14145_v17, 5 }
 0x821   : > { %v14123_v63 = vrot.slane %v14121_v13, 5  ;;  %v14185_v60 = vrot.slane %v14183_v58, 5  ;;  %v14181_v31 = vrot.slane %v14180_v3, 4  ;;  %v14163_v44 = vshrl.u32 %v13892_v54, 16 }
 0x822   : > { %v14189_v25 = vrot.slane %v14187_v48, 4  ;;  %v14114_v5 = vsel %vm19706_vm11, %v14109_v12, %v23413_v47  ;;  %v14148_v37 = vsel %vm19706_vm11, %v14143_v45, %v14147_v1  ;;  %v14156_v26 = vor.u32 %v14155_v23, %v14152_v35  ;;  %v23488_v1 = vld [vmem:[#allocation2 + $0xac] sm:$0xf] }
 0x823   : > { %v14124_v14 = vsel %vm19706_vm11, %v14119_v20, %v14123_v63  ;;  %v14161_v27 = vrot.slane %v14159_v59, 5  ;;  %v14193_v33 = vshll.u32 %v13896_v0, 16  ;;  %v14169_v47 = vshll.u32 %v13893_v32, 16 }
 0x824   : > { %v14186_v24 = vsel %vm19706_vm11, %v14181_v31, %v14185_v60  ;;  %v14190_v53 = vor.u32 %v14189_v25, %v14185_v60  ;;  %v14165_v46 = vrot.slane %v14163_v44, 4  ;;  %v23474_v13 = vunpack.c.l.bf16 %v14114_v5  ;;  %v13897_v31 = vld [vmem:[#allocation2 + $0x9c] sm:$0xf] }
 0x825   : > { %v14222_v58 = vshrl.u32 %v13900_v52, 16  ;;  %v23477_v40 = vunpack.c.l.bf16 %v14148_v37  ;;  %v23479_v3 = vunpack.c.l.bf16 %v14124_v14  ;;  %v14157_v48 = vrot.slane %v14156_v26, 4 }
 0x826   : > { %v23482_v20 = vunpack.c.l.bf16 %v14186_v24  ;;  %v14195_v35 = vrot.slane %v14193_v33, 5  ;;  %v23484_v23 = vrot.slane %v14169_v47, 5  ;;  %v14198_v26 = vshrl.u32 %v13897_v31, 16 }
 0x827   : > { %v14235_v24 = vshrl.u32 %v23488_v1, 16 }
 0x89b   : > { %v17409_v38 = vpop.f32.mrb[32].mxu0 }
 0x89c   : > { %v14365_v42 = vmul.f32 %v17409_v38, %v23443_v30  ;;  %v13702_v6 = vpop.f32.mrb[33].mxu0  ;;  %v14191_v38 = vrot.slane %v14190_v53, 4 }
 0x89d   : > { %v14363_v43 = vmul.f32 %v23443_v30, %v13702_v6  ;;  %v17410_v57 = vpop.f32.mrb[34].mxu0  ;;  %v23491_v6 = vrot.slane %v14222_v58, 4 }
 0x89e   : > { %v14403_v28 = vadd.f32 %v23452_v8, %v14365_v42  ;;  %v14366_v4 = vmul.f32 %v17410_v57, %v23443_v30  ;;  %v13705_v62 = vpop.f32.mrb[35].mxu0 }
 0x89f   : > { %v14401_v16 = vadd.f32 %v23452_v8, %v14363_v43  ;;  %v14364_v41 = vmul.f32 %v23443_v30, %v13705_v62  ;;  %v14225_v43 = vshll.u32 %v13900_v52, 16  ;;  %v14231_v62 = vshll.u32 %v23488_v1, 16 }
 0x8a0   : > { %v14404_v15 = vadd.f32 %v23452_v8, %v14366_v4  ;;  %v14435_v54 = vadd.f32 %v14403_v28, %v23359_v29  ;;  %v14166_v29 = vor.u32 %v14165_v46, %v14161_v27  ;;  %v14196_v4 = vsel %vm19706_vm11, %v14191_v38, %v14195_v35  ;;  %v13898_v38 = vld [vmem:[#allocation2 + $0xa0] sm:$0xf] }
 0x8a1   : > { %v14433_v21 = vadd.f32 %v14401_v16, %v23370_v9  ;;  %v14402_v17 = vadd.f32 %v23452_v8, %v14364_v41 }
 0x8a2   : > { %v14436_v9 = vadd.f32 %v14404_v15, %v23368_v55  ;;  %v14467_v44 = vmax.f32 %v14435_v54, 0.0  ;;  %v14162_v55 = vsel %vm19706_vm11, %v14157_v48, %v14161_v27  ;;  %v14167_v47 = vrot.slane %v14166_v29, 4 }
 0x8a3   : > { %v14434_v12 = vadd.f32 %v14402_v17, %v23372_v36  ;;  %v17413_v45 = vpop.f32.mrb[36].mxu0  ;;  %v14465_v63 = vmax.f32 %v14433_v21, 0.0  ;;  %v23505_v33 = vunpack.c.l.bf16 %v14162_v55  ;;  %v14227_v15 = vrot.slane %v14225_v43, 5 }
 0x8a4   : > { %v14369_v59 = vmul.f32 %v17413_v45, %v23443_v30  ;;  %v13718_v0 = vpop.f32.mrb[37].mxu0  ;;  %v14468_v28 = vmax.f32 %v14436_v9, 0.0  ;;  %v23511_v48 = vunpack.c.l.bf16 %v14196_v4  ;;  %v23515_v45 = vrot.slane %v14198_v26, 4 }
 0x8a5   : > { %v14466_v60 = vmax.f32 %v14434_v12, 0.0  ;;  %v14367_v42 = vmul.f32 %v23443_v30, %v13718_v0  ;;  %v17414_v36 = vpop.f32.mrb[38].mxu0  ;;  %v23513_v12 = vrot.slane %v14231_v62, 5  ;;  %v14207_v55 = vshll.u32 %v13898_v38, 16 }
 0x8a6   : > { %v14370_v25 = vmul.f32 %v17414_v36, %v23443_v30  ;;  %v13721_v32 = vpop.f32.mrb[39].mxu0  ;;  %v14407_v5 = vadd.f32 %v23452_v8, %v14369_v59  ;;  %v14211_v43 = vshrl.u32 %v13898_v38, 16  ;;  %v14237_v62 = vrot.slane %v14235_v24, 4  ;;  %v13906_v38 = vld [vmem:[#allocation2 + $0xc0] sm:$0xf] }
 0x8a7   : > { %v14497_v57 = vadd.f32 %v14466_v60, %v14465_v63  ;;  %v14405_v37 = vadd.f32 %v23452_v8, %v14367_v42  ;;  %v14368_v14 = vmul.f32 %v23443_v30, %v13721_v32  ;;  %v14172_v63 = vsel %vm19706_vm11, %v14167_v47, %v23484_v23 }
 0x8a8   : > { %v14408_v27 = vadd.f32 %v23452_v8, %v14370_v25  ;;  %v14439_v53 = vadd.f32 %v14407_v5, %v23385_v56  ;;  %v14201_v60 = vshll.u32 %v13897_v31, 16  ;;  %v14228_v32 = vor.u32 %v14227_v15, %v23491_v6 }
 0x8a9   : > { %v14498_v16 = vadd.f32 %v14497_v57, %v14467_v44  ;;  %v14437_v41 = vadd.f32 %v14405_v37, %v23387_v39  ;;  %v14406_v52 = vadd.f32 %v23452_v8, %v14368_v14  ;;  %v13902_v57 = vld [vmem:[#allocation2 + $0xb0] sm:$0x1] }
 0x8aa   : > { %v14440_v9 = vadd.f32 %v14408_v27, %v23389_v11  ;;  %v14471_v42 = vmax.f32 %v14439_v53, 0.0  ;;  %v14203_v4 = vrot.slane %v14201_v60, 5  ;;  %v14241_v27 = vshll.u32 %v13902_v57, 16 }
 0x8ab   : > { %v14469_v46 = vmax.f32 %v14437_v41, 0.0  ;;  %v14499_v21 = vadd.f32 %v14498_v16, %v14468_v28  ;;  %v14438_v17 = vadd.f32 %v14406_v52, %v23397_v19  ;;  %v17417_v58 = vpop.f32.mrb[40].mxu0  ;;  %v23531_v28 = vunpack.c.l.bf16 %v14172_v63  ;;  %v13899_v52 = vld [vmem:[#allocation2 + $0xa4] sm:$0x1] }
 0x8ac   : > { %v14373_v54 = vmul.f32 %v17417_v58, %v23443_v30  ;;  %v13734_v39 = vpop.f32.mrb[41].mxu0  ;;  %v14472_v5 = vmax.f32 %v14440_v9, 0.0  ;;  %v14229_v53 = vrot.slane %v14228_v32, 4  ;;  %v14213_v58 = vrot.slane %v14211_v43, 4 }
 0x8ad   : > { %v14500_v35 = vadd.f32 %v14499_v21, %v14469_v46  ;;  %v14470_v59 = vmax.f32 %v14438_v17, 0.0  ;;  %v14371_v56 = vmul.f32 %v23443_v30, %v13734_v39  ;;  %v17418_v0 = vpop.f32.mrb[42].mxu0  ;;  %v23536_v46 = vrot.slane %v14207_v55, 5 }
 0x8ae   : > { %v14411_v19 = vadd.f32 %v23452_v8, %v14373_v54  ;;  %v14374_v29 = vmul.f32 %v17418_v0, %v23443_v30  ;;  %v13737_v1 = vpop.f32.mrb[43].mxu0  ;;  %v14217_v9 = vshll.u32 %v13899_v52, 16  ;;  %v23548_v63 = vrot.slane %v14241_v27, 5 }
 0x8af   : > { %v14501_v36 = vadd.f32 %v14500_v35, %v14470_v59  ;;  %v14409_v44 = vadd.f32 %v23452_v8, %v14371_v56  ;;  %v14372_v11 = vmul.f32 %v23443_v30, %v13737_v1  ;;  %v14204_v35 = vor.u32 %v14203_v4, %v23515_v45 }
 0x8b0   : > { %v14412_v25 = vadd.f32 %v23452_v8, %v14374_v29  ;;  %v14443_v31 = vadd.f32 %v14411_v19, %v23415_v7  ;;  %v14234_v29 = vsel %vm19706_vm11, %v14229_v53, %v23513_v12  ;;  %v14238_v1 = vor.u32 %v14237_v62, %v23513_v12 }
 0x8b1   : > { %v14502_v37 = vadd.f32 %v14501_v36, %v14471_v42  ;;  %v14441_v14 = vadd.f32 %v14409_v44, %v23417_v51  ;;  %v14410_v23 = vadd.f32 %v23452_v8, %v14372_v11  ;;  %v14214_v44 = vor.u32 %v14213_v58, %v23536_v46 }
 0x8b2   : > { %v14444_v47 = vadd.f32 %v14412_v25, %v23419_v18  ;;  %v14475_v54 = vmax.f32 %v14443_v31, 0.0  ;;  %v23554_v11 = vrot.slane %v14217_v9, 5  ;;  %v14270_v25 = vshrl.u32 %v13906_v38, 16  ;;  %v13904_v9 = vld [vmem:[#allocation2 + $0xb8] sm:$0xf] }
 0x8b3   : > { %v14473_v26 = vmax.f32 %v14441_v14, 0.0  ;;  %v14503_v16 = vadd.f32 %v14502_v37, %v14472_v5  ;;  %v14442_v41 = vadd.f32 %v14410_v23, %v23421_v61  ;;  %v17421_v6 = vpop.f32.mrb[44].mxu0  ;;  %v14273_v32 = vshll.u32 %v13906_v38, 16 }
 0x8b4   : > { %v14377_v15 = vmul.f32 %v17421_v6, %v23443_v30  ;;  %v13750_v51 = vpop.f32.mrb[45].mxu0  ;;  %v14476_v19 = vmax.f32 %v14444_v47, 0.0  ;;  %v23559_v14 = vunpack.c.l.bf16 %v14234_v29  ;;  %v14205_v23 = vrot.slane %v14204_v35, 4 }
 0x8b5   : > { %v14504_v7 = vadd.f32 %v14503_v16, %v14473_v26  ;;  %v14474_v21 = vmax.f32 %v14442_v41, 0.0  ;;  %v14375_v17 = vmul.f32 %v23443_v30, %v13750_v51  ;;  %v17422_v24 = vpop.f32.mrb[46].mxu0  ;;  %v23561_v31 = vrot.slane %v14238_v1, 4  ;;  %v13907_v41 = vld [vmem:[#allocation2 + $0xc4] sm:$0xf] }
 0x8b6   : > { %v14378_v61 = vmul.f32 %v17422_v24, %v23443_v30  ;;  %v13753_v39 = vpop.f32.mrb[47].mxu0  ;;  %v14415_v59 = vadd.f32 %v23452_v8, %v14377_v15  ;;  %v23567_v52 = vrot.slane %v14214_v44, 4  ;;  %v23569_v47 = vrot.slane %v14270_v25, 4 }
 0x8b7   : > { %v14505_v18 = vadd.f32 %v14504_v7, %v14474_v21  ;;  %v14413_v56 = vadd.f32 %v23452_v8, %v14375_v17  ;;  %v14376_v0 = vmul.f32 %v23443_v30, %v13753_v39  ;;  %v13903_v7 = vld [vmem:[#allocation2 + $0xb4] sm:$0xf]  ;;  %v23574_v17 = vrot.slane %v14273_v32, 5 }
 0x8b8   : > { %v14416_v42 = vadd.f32 %v23452_v8, %v14378_v61  ;;  %v14447_v55 = vadd.f32 %v14415_v59, %v23429_v2  ;;  %v14279_v24 = vshll.u32 %v13907_v41, 16  ;;  %v14283_v58 = vshrl.u32 %v13907_v41, 16 }
 0x8b9   : > { %v14506_v60 = vadd.f32 %v14505_v18, %v14475_v54  ;;  %v14445_v45 = vadd.f32 %v14413_v56, %v23445_v50  ;;  %v14414_v36 = vadd.f32 %v23452_v8, %v14376_v0  ;;  %v14210_v59 = vsel %vm19706_vm11, %v14205_v23, %v23536_v46 }
 0x8ba   : > { %v14448_v62 = vadd.f32 %v14416_v42, %v23436_v34  ;;  %v14479_v15 = vmax.f32 %v14447_v55, 0.0  ;;  %v14246_v56 = vshrl.u32 %v13903_v7, 16  ;;  %v14249_v0 = vshll.u32 %v13903_v7, 16 }
 0x8bb   : > { %v14477_v43 = vmax.f32 %v14445_v45, 0.0  ;;  %v14507_v57 = vadd.f32 %v14506_v60, %v14476_v19  ;;  %v14446_v12 = vadd.f32 %v14414_v36, %v23447_v49  ;;  %v17425_v5 = vpop.f32.mrb[48].mxu0  ;;  %v14255_v42 = vshll.u32 %v13904_v9, 16 }
 0x8bc   : > { %v14381_v37 = vmul.f32 %v17425_v5, %v23443_v30  ;;  %v13766_v50 = vpop.f32.mrb[49].mxu0  ;;  %v14480_v54 = vmax.f32 %v14448_v62, 0.0  ;;  %v14259_v36 = vshrl.u32 %v13904_v9, 16  ;;  %v14349_v55 = vunpack.c.l.bf16 %v14210_v59 }
 0x8bd   : > { %v14508_v4 = vadd.f32 %v14507_v57, %v14477_v43  ;;  %v14478_v26 = vmax.f32 %v14446_v12, 0.0  ;;  %v14379_v16 = vmul.f32 %v23443_v30, %v13766_v50  ;;  %v17426_v2 = vpop.f32.mrb[50].mxu0  ;;  %v14248_v12 = vrot.slane %v14246_v56, 4 }
 0x8be   : > { %v14419_v6 = vadd.f32 %v23452_v8, %v14381_v37  ;;  %v14382_v49 = vmul.f32 %v17426_v2, %v23443_v30  ;;  %v13769_v27 = vpop.f32.mrb[51].mxu0  ;;  %v14251_v5 = vrot.slane %v14249_v0, 5  ;;  %v14220_v62 = vsel %vm19706_vm11, %v23567_v52, %v23554_v11 }
 0x8bf   : > { %v14509_v51 = vadd.f32 %v14508_v4, %v14478_v26  ;;  %v14417_v53 = vadd.f32 %v23452_v8, %v14379_v16  ;;  %v14380_v34 = vmul.f32 %v23443_v30, %v13769_v27  ;;  %v23598_v26 = vrot.slane %v14255_v42, 5  ;;  %v13905_v27 = vld [vmem:[#allocation2 + $0xbc] sm:$0x1] }
 0x8c0   : > { %v14420_v21 = vadd.f32 %v23452_v8, %v14382_v49  ;;  %v14451_v18 = vadd.f32 %v14419_v6, %v23454_v10  ;;  %v14261_v16 = vrot.slane %v14259_v36, 4  ;;  %v14265_v9 = vshll.u32 %v13905_v27, 16 }
 0x8c1   : > { %v14510_v61 = vadd.f32 %v14509_v51, %v14479_v15  ;;  %v14449_v39 = vadd.f32 %v14417_v53, %v23474_v13  ;;  %v14418_v35 = vadd.f32 %v23452_v8, %v14380_v34  ;;  %v14244_v13 = vsel %vm19706_vm11, %v23561_v31, %v23548_v63 }
 0x8c2   : > { %v14452_v60 = vadd.f32 %v14420_v21, %v23477_v40  ;;  %v14276_v15 = vor.u32 %v23574_v17, %v23569_v47  ;;  %v23605_v51 = vrot.slane %v14279_v24, 5  ;;  %v14252_v53 = vor.u32 %v14251_v5, %v14248_v12 }
 0x8c3   : > { %v14481_v38 = vmax.f32 %v14449_v39, 0.0  ;;  %v14511_v19 = vadd.f32 %v14510_v61, %v14480_v54  ;;  %v14450_v29 = vadd.f32 %v14418_v35, %v23479_v3  ;;  %v17429_v1 = vpop.f32.mrb[52].mxu0  ;;  %v14483_v3 = vmax.f32 %v14451_v18, 0.0 }
 0x8c4   : > { %v14385_v10 = vmul.f32 %v17429_v1, %v23443_v30  ;;  %v13782_v45 = vpop.f32.mrb[53].mxu0  ;;  %v14484_v4 = vmax.f32 %v14452_v60, 0.0  ;;  %v14285_v34 = vrot.slane %v14283_v58, 4  ;;  %v14350_v39 = vunpack.c.l.bf16 %v14220_v62 }
 0x8c5   : > { %v14512_v46 = vadd.f32 %v14511_v19, %v14481_v38  ;;  %v14482_v44 = vmax.f32 %v14450_v29, 0.0  ;;  %v14383_v25 = vmul.f32 %v23443_v30, %v13782_v45  ;;  %v17430_v32 = vpop.f32.mrb[54].mxu0  ;;  %v14262_v35 = vor.u32 %v14261_v16, %v23598_v26 }
 0x8c6   : > { %v14386_v43 = vmul.f32 %v17430_v32, %v23443_v30  ;;  %v13785_v57 = vpop.f32.mrb[55].mxu0  ;;  %v14423_v40 = vadd.f32 %v23452_v8, %v14385_v10  ;;  %v14253_v0 = vrot.slane %v14252_v53, 4  ;;  %v14286_v38 = vor.u32 %v14285_v34, %v23605_v51 }
 0x8c7   : > { %v14513_v37 = vadd.f32 %v14512_v46, %v14482_v44  ;;  %v14421_v50 = vadd.f32 %v23452_v8, %v14383_v25  ;;  %v14384_v23 = vmul.f32 %v23443_v30, %v13785_v57  ;;  %v14277_v10 = vrot.slane %v14276_v15, 4 }
 0x8c8   : > { %v14424_v6 = vadd.f32 %v23452_v8, %v14386_v43  ;;  %v14455_v11 = vadd.f32 %v14423_v40, %v23482_v20  ;;  %v13908_v20 = vld [vmem:[#allocation2 + $0xc8] sm:$0x1]  ;;  %v14263_v42 = vrot.slane %v14262_v35, 4  ;;  %v14287_v43 = vrot.slane %v14286_v38, 4 }
 0x8c9   : > { %v14514_v2 = vadd.f32 %v14513_v37, %v14483_v3  ;;  %v14453_v41 = vadd.f32 %v14421_v50, %v23505_v33  ;;  %v14422_v49 = vadd.f32 %v23452_v8, %v14384_v23  ;;  %v14289_v45 = vshll.u32 %v13908_v20, 16 }
 0x8ca   : > { %v14456_v47 = vadd.f32 %v14424_v6, %v23511_v48  ;;  %v14487_v19 = vmax.f32 %v14455_v11, 0.0  ;;  %v14352_v3 = vunpack.c.l.bf16 %v14244_v13  ;;  %v14267_v57 = vrot.slane %v14265_v9, 5 }
 0x8cb   : > { %v14485_v52 = vmax.f32 %v14453_v41, 0.0  ;;  %v14515_v7 = vadd.f32 %v14514_v2, %v14484_v4  ;;  %v14454_v21 = vadd.f32 %v14422_v49, %v23531_v28  ;;  %v17433_v54 = vpop.f32.mrb[56].mxu0  ;;  %v14291_v63 = vrot.slane %v14289_v45, 5 }
 0x8cc   : > { %v14389_v33 = vmul.f32 %v17433_v54, %v23443_v30  ;;  %v13798_v61 = vpop.f32.mrb[57].mxu0  ;;  %v14488_v36 = vmax.f32 %v14456_v47, 0.0  ;;  %v14268_v2 = vsel %vm19706_vm11, %v14263_v42, %v14267_v57 }
 0x8cd   : > { %v14516_v18 = vadd.f32 %v14515_v7, %v14485_v52  ;;  %v14486_v17 = vmax.f32 %v14454_v21, 0.0  ;;  %v14387_v24 = vmul.f32 %v23443_v30, %v13798_v61  ;;  %v17434_v58 = vpop.f32.mrb[58].mxu0  ;;  %v14354_v7 = vunpack.c.l.bf16 %v14268_v2 }
 0x8ce   : > { %v14427_v59 = vadd.f32 %v23452_v8, %v14389_v33  ;;  %v14390_v28 = vmul.f32 %v17434_v58, %v23443_v30  ;;  %v13801_v56 = vpop.f32.mrb[59].mxu0 }
 0x8cf   : > { %v14517_v29 = vadd.f32 %v14516_v18, %v14486_v17  ;;  %v14425_v1 = vadd.f32 %v23452_v8, %v14387_v24  ;;  %v14388_v60 = vmul.f32 %v23443_v30, %v13801_v56 }
 0x8d0   : > { %v14428_v48 = vadd.f32 %v23452_v8, %v14390_v28  ;;  %v14459_v32 = vadd.f32 %v14427_v59, %v23559_v14  ;;  %v14282_v14 = vsel %vm19706_vm11, %v14277_v10, %v23605_v51  ;;  %v14554_v10 = vld [vmem:[%s23710_s12] sm:$0x1] }
 0x8d1   : > { %v14518_v46 = vadd.f32 %v14517_v29, %v14487_v19  ;;  %v14457_v44 = vadd.f32 %v14425_v1, %v14349_v55  ;;  %v14426_v25 = vadd.f32 %v23452_v8, %v14388_v60  ;;  %v14258_v55 = vsel %vm19706_vm11, %v14253_v0, %v23598_v26  ;;  %v14536_v1 = vld [vmem:[%s466_s16] sm:$0x1]  ;;  %s18680_s16 = scalar_lea.vmem %s23658_s15, 16 }
 0x8d2   : > { %v14460_v50 = vadd.f32 %v14428_v48, %v14352_v3  ;;  %v14491_v41 = vmax.f32 %v14459_v32, 0.0  ;;  %v14353_v6 = vunpack.c.l.bf16 %v14258_v55  ;;  %v14292_v26 = vsel %vm19706_vm11, %v14287_v43, %v14291_v63  ;;  %p18681_p6 = scmp.ne.s32.totalorder %s23658_s15, %s18680_s16  ;;  %p18688_p3 = scmp.lt.s32.totalorder %s18686_s22, %s18680_s16 }
 0x8d3   : > { %v14489_v12 = vmax.f32 %v14457_v44, 0.0  ;;  %v14519_v5 = vadd.f32 %v14518_v46, %v14488_v36  ;;  %v14458_v37 = vadd.f32 %v14426_v25, %v14350_v39  ;;  %v17437_v40 = vpop.f32.mrb[60].mxu0  ;;  %v14355_v52 = vunpack.c.l.bf16 %v14282_v14 }
 0x8d4   : > { %v14393_v23 = vmul.f32 %v17437_v40, %v23443_v30  ;;  %v13814_v4 = vpop.f32.mrb[61].mxu0  ;;  %v14492_v11 = vmax.f32 %v14460_v50, 0.0  ;;  %v14356_v61 = vunpack.c.l.bf16 %v14292_v26  ;;  %p18682_p10 = pnand %p18681_p6, %p24255_p9  ;;  %p18689_p4 = por %p18688_p3, %p18687_p2 }
 0x8d5   : > { %v14520_v31 = vadd.f32 %v14519_v5, %v14489_v12  ;;  %v14490_v13 = vmax.f32 %v14458_v37, 0.0  ;;  %v14391_v62 = vmul.f32 %v23443_v30, %v13814_v4  ;;  %v17438_v16 = vpop.f32.mrb[62].mxu0 }
 0x8d6   : > { %v14394_v49 = vmul.f32 %v17438_v16, %v23443_v30  ;;  %v13817_v27 = vpop.f32.mrb[63].mxu0  ;;  %v14431_v51 = vadd.f32 %v23452_v8, %v14393_v23  ;;  %p18683_p12 = pneg %p18682_p10 }
 0x8d7   : > { %v14521_v15 = vadd.f32 %v14520_v31, %v14490_v13  ;;  %v14429_v53 = vadd.f32 %v23452_v8, %v14391_v62  ;;  %v14392_v34 = vmul.f32 %v23443_v30, %v13817_v27 }
 0x8d8   : > { %v14432_v33 = vadd.f32 %v23452_v8, %v14394_v49  ;;  %v14463_v39 = vadd.f32 %v14431_v51, %v14355_v52  ;;  %p18690_p7 = pnand %p18689_p4, %p18683_p12 }
 0x8d9   : > { %v14522_v21 = vadd.f32 %v14521_v15, %v14491_v41  ;;  %v14461_v54 = vadd.f32 %v14429_v53, %v14353_v6  ;;  %v14430_v22 = vadd.f32 %v23452_v8, %v14392_v34 }
 0x8da   : > { %v14464_v17 = vadd.f32 %v14432_v33, %v14356_v61  ;;  %v14495_v58 = vmax.f32 %v14463_v39, 0.0 }
 0x8db   : > { %v14493_v35 = vmax.f32 %v14461_v54, 0.0  ;;  %v14523_v9 = vadd.f32 %v14522_v21, %v14492_v11  ;;  %v14462_v18 = vadd.f32 %v14430_v22, %v14354_v7 }
 0x8dc   : > { %v14496_v20 = vmax.f32 %v14464_v17, 0.0 }
 0x8dd   : > { %v14524_v47 = vadd.f32 %v14523_v9, %v14493_v35  ;;  %v14494_v24 = vmax.f32 %v14462_v18, 0.0 }
 0x8df   : > { %v14525_v30 = vadd.f32 %v14524_v47, %v14494_v24 }
 0x8e1   : > { %v14526_v59 = vadd.f32 %v14525_v30, %v14495_v58 }
 0x8e3   : > { %v14527_v28 = vadd.f32 %v14526_v59, %v14496_v20 }
 0x8e5   : > { %v14528_v56 = vrot.slane %v14527_v28, 4 }
 0x8e7   : > { %v14529_v0 = vadd.f32 %v14528_v56, %v14527_v28 }
 0x8e9   : > { %v14530_v38 = vrot.slane %v14529_v0, 2 }
 0x8eb   : > { %v14531_v8 = vadd.f32 %v14530_v38, %v14529_v0 }
 0x8ed   : > { %v14532_v19 = vrot.slane %v14531_v8, 1 }
 0x8ef   : > { %v14533_v29 = vadd.f32 %v14532_v19, %v14531_v8 }
 0x8f1   : > { %v14535_v60 = vmul.f32 0.00390625, %v14533_v29 }
 0x8f3   : > { %v14537_v48 = vmul.f32 %v14536_v1, %v14535_v60 }
 0x8f5   : > { %17472 = vmatmul.mubr.f32.vlgmr.msra.gmra.mrb[80].mxu1 %v14537_v48 }
 0x9c8   : > { %v14621_v45 = vpop.f32.mrb[80].mxu1 }
 0x9c9   : > { %v14622_v42 = vadd.f32 %v14621_v45, %v14554_v10  ;;  %v17473_v36 = vpop.f32.mrb[81].mxu1 }
 0x9cb   : > { %14625 = vst [vmem:[%s458_s23] sm:$0x1] %v14622_v42 }
 0x9cc   : > { %18693 = shalt.err (!%p18690_p7)
}
 0x9cd   : > { %s18694_s14 = scalar_lea.hbm %s23656_s17, 16  ;;  %s18698_s21 = scalar_lea.hbm %s23711_s13, 32 }
 0x9ce   : > { %p18695_p8 = scmp.ne.s32.totalorder %s23656_s17, %s18694_s14  ;;  %p18699_p1 = scmp.lt.u32.totalorder %s23656_s17, %s23711_s13 }
 0x9cf   : > { %p18700_p0 = scmp.lt.u32.totalorder %s18698_s21, %s18694_s14  ;;  %p18702_p6 = scmp.lt.u32.totalorder %s18694_s14, %s23656_s17 }
 0x9d0   : > { %p18696_p11 = pnand %p18695_p8, %p24255_p9 }
 0x9d1   : > { %p18701_p5 = por %p18700_p0, %p18699_p1 }
 0x9d2   : > { %p18697_p13 = pneg %p18696_p11 }
 0x9d3   : > { %p18703_p10 = por %p18702_p6, %p18701_p5 }
 0x9d5   : > { %p18704_p12 = pnand %p18703_p10, %p18697_p13 }
 0x9d7   : > { %18707 = shalt.err (!%p18704_p12)
}
 0x9d8   : > { %18273 = dma.vmem_to_hbm [thread:$0]  (%p24255_p9), %s23658_s15, 16, %s23656_s17, %s14627_s30  }
 0x9d9 PF: > { %p18285_p2 = scmp.ge.s32.totalorder %s18746_s28, 2  ;;  %s14651_s16 = sand.u32 1, %s18734_s25  }
 0x9da   : > { %p24256_p3 = scmp.ne.s32.totalorder %s23865_s19, 0  ;;  %s14652_s20 = scalar_lea.sflag [#allocation6], %s14651_s16 }
 0x9dc   : > { %p18280_p4 = pnand %p18285_p2, %p24256_p3 }
 0x9de   : > { %18729 = dma.done.wait (!%p18280_p4), %s14652_s20, 16  }
 0x9df   : > { %18731 = vsyncadd (!%p18280_p4), %s14652_s20, 4294967280  ;;  %s24257_s28 = sld [smem:[#allocation11_spill]]  ;;  %s24258_s22 = sld [smem:[#allocation10_spill]] }
 0x9e0   : > { %s24259_s27 = sld [smem:[#allocation12_spill]]  ;;  %s24260_s25 = smov %s18738_s26 }
 0x9e5   : > { %p24_p7 = scmp.ge.s32.totalorder %s24257_s28, 4   ;;  %s24261_s26 = smov %s24258_s22 }
 0x9e7   :  { %26 = sbr.rel (!%p24_p7) target bundleno = 4 (0x4), region = 145 }
 0x9ee   :  { %14656 = vsyncpa [#allocation5], 1 }
 0x9ef   :  { %14658 = vsyncpa [#allocation5 + $0x1], 1 }
 0x9f0   :  { %14659 = vsyncpa [#allocation6], 1 }
 0x9f1   :  { %14661 = vsyncpa [#allocation6 + $0x1], 1 }

</bundles_post_ra>
